<compile_context>
chip_gen: v5e
topology: v5e:2x2
jax: 0.10.0
libtpu: 0.0.40
codegen_flags: <defaults>
</compile_context>

<pallas_src>
import jax
import jax.numpy as jnp
from jax.experimental import pallas as pl
from jax.experimental.pallas import tpu as pltpu


# ----------------------------------------------------------------------------
# Pallas kernel factory (one sample / grid step, everything in VMEM)
# ----------------------------------------------------------------------------
def _make_kernel(H, W, Cin, Midc, Cout, has_expand):
    M = H * W
    TAPS = tuple((ky, kx) for ky in range(3) for kx in range(3))

    def kernel(*refs):
        if has_expand:
            (x_ref, wexp_ref, w1_ref, w2_ref, s1_ref, b1_ref, s2_ref, b2_ref,
             out_ref, xpad_ref, midpad_ref, col1_ref, col2_ref) = refs
        else:
            (x_ref, w1_ref, w2_ref, s1_ref, b1_ref, s2_ref, b2_ref,
             out_ref, xpad_ref, midpad_ref, col1_ref, col2_ref) = refs
            wexp_ref = None

        x = x_ref[...].reshape(H, W, Cin)                    # bf16 (H, W, Cin)

        # ---- identity branch (1x1 conv, or passthrough when inc == outc) ----
        x_flat = x.reshape(M, Cin)
        if has_expand:
            identity = jnp.dot(x_flat, wexp_ref[...],
                               preferred_element_type=jnp.float32)
        else:
            identity = x_flat.astype(jnp.float32)

        # ---- fused padding: zero only the 1-px halo ring, copy interior -----
        zrow = jnp.zeros((1, W + 2, Cin), jnp.bfloat16)
        zcol = jnp.zeros((H, 1, Cin), jnp.bfloat16)
        xpad_ref[0:1, :, :] = zrow
        xpad_ref[H + 1:H + 2, :, :] = zrow
        xpad_ref[1:H + 1, 0:1, :] = zcol
        xpad_ref[1:H + 1, W + 1:W + 2, :] = zcol
        xpad_ref[1:H + 1, 1:W + 1, :] = x

        # ---- conv1: build 9-tap im2col once, single MXU matmul --------------
        for t, (ky, kx) in enumerate(TAPS):
            col1_ref[:, t * Cin:(t + 1) * Cin] = (
                xpad_ref[ky:ky + H, kx:kx + W, :].reshape(M, Cin))
        h1 = jnp.dot(col1_ref[...], w1_ref[...],
                     preferred_element_type=jnp.float32)     # (M, Midc) f32

        # ---- bn1 (folded) + LeakyReLU(0.2) -----------------------------------
        h1 = h1 * s1_ref[...] + b1_ref[...]
        h1 = jnp.maximum(h1, 0.2 * h1)

        # ---- padded intermediate (halo-only zeroing again) -------------------
        zrow2 = jnp.zeros((1, W + 2, Midc), jnp.bfloat16)
        zcol2 = jnp.zeros((H, 1, Midc), jnp.bfloat16)
        midpad_ref[0:1, :, :] = zrow2
        midpad_ref[H + 1:H + 2, :, :] = zrow2
        midpad_ref[1:H + 1, 0:1, :] = zcol2
        midpad_ref[1:H + 1, W + 1:W + 2, :] = zcol2
        midpad_ref[1:H + 1, 1:W + 1, :] = (
            h1.astype(jnp.bfloat16).reshape(H, W, Midc))

        # ---- conv2: im2col once, single MXU matmul ---------------------------
        for t, (ky, kx) in enumerate(TAPS):
            col2_ref[:, t * Midc:(t + 1) * Midc] = (
                midpad_ref[ky:ky + H, kx:kx + W, :].reshape(M, Midc))
        h2 = jnp.dot(col2_ref[...], w2_ref[...],
                     preferred_element_type=jnp.float32)     # (M, Cout) f32

        # ---- bn2 + residual add + LeakyReLU(0.2) ------------------------------
        h2 = h2 * s2_ref[...] + b2_ref[...] + identity
        out = jnp.maximum(h2, 0.2 * h2)
        out_ref[...] = out.reshape(1, H, W, Cout).astype(out_ref.dtype)

    return kernel


# ----------------------------------------------------------------------------
# Wrapper: layout transposes, BN folding, weight reshape, pallas_call
# ----------------------------------------------------------------------------
def _fold_bn(gamma, beta, mean, var, eps=1e-5):
    scale = gamma / jnp.sqrt(var + eps)
    bias = beta - mean * scale
    return scale.astype(jnp.float32), bias.astype(jnp.float32)


@jax.jit
def residual_block_forward(x_nchw, params):
    N, Cin, H, W = x_nchw.shape
    Midc = params["w1"].shape[-1]
    Cout = params["w2"].shape[-1]
    has_expand = params["wexp"] is not None

    # NCHW -> NHWC (channels on lanes); bf16 activations for MXU + half the DMA.
    x = jnp.transpose(x_nchw, (0, 2, 3, 1)).astype(jnp.bfloat16)

    # Weights pre-reshaped for the fused im2col matmul: HWIO -> (9*I, O).
    w1_mat = params["w1"].reshape(9 * Cin, Midc).astype(jnp.bfloat16)
    w2_mat = params["w2"].reshape(9 * Midc, Cout).astype(jnp.bfloat16)

    s1, b1 = _fold_bn(params["g1"], params["be1"], params["m1"], params["v1"])
    s2, b2 = _fold_bn(params["g2"], params["be2"], params["m2"], params["v2"])
    s1, b1 = s1.reshape(1, Midc), b1.reshape(1, Midc)
    s2, b2 = s2.reshape(1, Cout), b2.reshape(1, Cout)

    def full_spec(shape):
        return pl.BlockSpec(shape, lambda b, _s=shape: (0,) * len(_s))

    in_specs = [pl.BlockSpec((1, H, W, Cin), lambda b: (b, 0, 0, 0))]
    inputs = [x]
    if has_expand:
        in_specs.append(full_spec((Cin, Cout)))
        inputs.append(params["wexp"].astype(jnp.bfloat16))
    in_specs += [full_spec((9 * Cin, Midc)), full_spec((9 * Midc, Cout)),
                 full_spec((1, Midc)), full_spec((1, Midc)),
                 full_spec((1, Cout)), full_spec((1, Cout))]
    inputs += [w1_mat, w2_mat, s1, b1, s2, b2]

    kernel = _make_kernel(H, W, Cin, Midc, Cout, has_expand)

    out_nhwc = pl.pallas_call(
        kernel,
        out_shape=jax.ShapeDtypeStruct((N, H, W, Cout), jnp.float32),
        grid=(N,),
        in_specs=in_specs,
        out_specs=pl.BlockSpec((1, H, W, Cout), lambda b: (b, 0, 0, 0)),
        scratch_shapes=[
            pltpu.VMEM((H + 2, W + 2, Cin), jnp.bfloat16),   # padded input
            pltpu.VMEM((H + 2, W + 2, Midc), jnp.bfloat16),  # padded mid act
            pltpu.VMEM((H * W, 9 * Cin), jnp.bfloat16),      # im2col conv1
            pltpu.VMEM((H * W, 9 * Midc), jnp.bfloat16),     # im2col conv2
        ],
        compiler_params=pltpu.CompilerParams(
            dimension_semantics=("parallel",),
            vmem_limit_bytes=32 * 1024 * 1024),
    )(*inputs)

    return jnp.transpose(out_nhwc, (0, 3, 1, 2)).astype(x_nchw.dtype)


# ----------------------------------------------------------------------------
# Pure-JAX f32 reference (eval-mode BatchNorm) for correctness checking
# ----------------------------------------------------------------------------
def residual_block_reference(x_nchw, params):
    x = jnp.transpose(x_nchw, (0, 2, 3, 1)).astype(jnp.float32)
    dn = ("NHWC", "HWIO", "NHWC")

    if params["wexp"] is None:
        identity = x
    else:
        Cin, Cout = params["wexp"].shape
        identity = jax.lax.conv_general_dilated(
            x, params["wexp"].reshape(1, 1, Cin, Cout), (1, 1), "VALID",
            dimension_numbers=dn)

    def bn(h, g, be, m, v, eps=1e-5):
        return (h - m) / jnp.sqrt(v + eps) * g + be

    def lrelu(h):
        return jnp.where(h > 0, h, 0.2 * h)

    h = jax.lax.conv_general_dilated(x, params["w1"], (1, 1), "SAME",
                                     dimension_numbers=dn)
    h = lrelu(bn(h, params["g1"], params["be1"], params["m1"], params["v1"]))
    h = jax.lax.conv_general_dilated(h, params["w2"], (1, 1), "SAME",
                                     dimension_numbers=dn)
    h = bn(h, params["g2"], params["be2"], params["m2"], params["v2"])
    out = lrelu(h + identity)
    return jnp.transpose(out, (0, 3, 1, 2))


# ----------------------------------------------------------------------------
# Deterministic synthetic parameters (shapes match the nn.Module init)
# ----------------------------------------------------------------------------
def make_params(key, inc, outc, scale=1.0):
    midc = int(outc * scale)
    keys = jax.random.split(key, 11)
    return {
        "wexp": (None if inc == outc else
                 0.1 * jax.random.normal(keys[0], (inc, outc), jnp.float32)),
        "w1": 0.1 * jax.random.normal(keys[1], (3, 3, inc, midc), jnp.float32),
        "w2": 0.1 * jax.random.normal(keys[2], (3, 3, midc, outc), jnp.float32),
        # BatchNorm2d(midc)
        "g1": 1.0 + 0.1 * jax.random.normal(keys[3], (midc,), jnp.float32),
        "be1": 0.1 * jax.random.normal(keys[4], (midc,), jnp.float32),
        "m1": 0.1 * jax.random.normal(keys[5], (midc,), jnp.float32),
        "v1": jax.random.uniform(keys[6], (midc,), jnp.float32, 0.5, 1.5),
        # BatchNorm2d(outc)
        "g2": 1.0 + 0.1 * jax.random.normal(keys[7], (outc,), jnp.float32),
        "be2": 0.1 * jax.random.normal(keys[8], (outc,), jnp.float32),
        "m2": 0.1 * jax.random.normal(keys[9], (outc,), jnp.float32),
        "v2": jax.random.uniform(keys[10], (outc,), jnp.float32, 0.5, 1.5),
    }


if __name__ == "__main__":
    key = jax.random.PRNGKey(0)
    k_x, k_p, k_x2, k_p2 = jax.random.split(key, 4)

    # Case 1: inc != outc  ->  conv_expand (1x1) identity path.
    N, INC, OUTC, H, W = 2, 4, 8, 16, 16
    x = jax.random.normal(k_x, (N, INC, H, W), jnp.float32)
    params = make_params(k_p, INC, OUTC, scale=1.0)

    out = jax.block_until_ready(residual_block_forward(x, params))
    ref = jax.block_until_ready(residual_block_reference(x, params))
    assert out.shape == (N, OUTC, H, W), out.shape
    # bf16 matmuls (f32 accumulation) vs f32 reference -> relaxed tolerance.
    assert jnp.allclose(out, ref, rtol=5e-2, atol=5e-2), (
        float(jnp.max(jnp.abs(out - ref))))

    # Case 2: inc == outc  ->  specialized kernel, identity passthrough.
    x2 = jax.random.normal(k_x2, (N, OUTC, H, W), jnp.float32)
    params2 = make_params(k_p2, OUTC, OUTC, scale=1.0)
    out2 = jax.block_until_ready(residual_block_forward(x2, params2))
    ref2 = jax.block_until_ready(residual_block_reference(x2, params2))
    assert jnp.allclose(out2, ref2, rtol=5e-2, atol=5e-2), (
        float(jnp.max(jnp.abs(out2 - ref2))))

    print("KERNEL_OK")
</pallas_src>

<mosaic_0001>
module attributes {stable_mosaic.version = 11 : i64} {
  func.func @kernel(%arg0: i32, %arg1: memref<1x16x16x4xbf16, #tpu.memory_space<vmem>>, %arg2: memref<4x8xbf16, #tpu.memory_space<vmem>>, %arg3: memref<36x8xbf16, #tpu.memory_space<vmem>>, %arg4: memref<72x8xbf16, #tpu.memory_space<vmem>>, %arg5: memref<1x8xf32, #tpu.memory_space<vmem>>, %arg6: memref<1x8xf32, #tpu.memory_space<vmem>>, %arg7: memref<1x8xf32, #tpu.memory_space<vmem>>, %arg8: memref<1x8xf32, #tpu.memory_space<vmem>>, %arg9: memref<1x16x16x8xf32, #tpu.memory_space<vmem>>, %arg10: memref<18x18x4xbf16, #tpu.memory_space<vmem>>, %arg11: memref<18x18x8xbf16, #tpu.memory_space<vmem>>, %arg12: memref<256x36xbf16, #tpu.memory_space<vmem>>, %arg13: memref<256x72xbf16, #tpu.memory_space<vmem>>) attributes {dimension_semantics = [#tpu.dimension_semantics<parallel>], iteration_bounds = array<i64: 2>, scalar_prefetch = 0 : i64, scratch_operands = 4 : i64, tpu.core_type = #tpu.core_type<tc>, window_params = [{transform_indices = @transform_0, window_bounds = array<i64: 1, 16, 16, 4>}, {pipeline_mode = #tpu.pipeline_mode<synchronous>, transform_indices = @transform_1, window_bounds = array<i64: 4, 8>}, {pipeline_mode = #tpu.pipeline_mode<synchronous>, transform_indices = @transform_2, window_bounds = array<i64: 36, 8>}, {pipeline_mode = #tpu.pipeline_mode<synchronous>, transform_indices = @transform_3, window_bounds = array<i64: 72, 8>}, {pipeline_mode = #tpu.pipeline_mode<synchronous>, transform_indices = @transform_4, window_bounds = array<i64: 1, 8>}, {pipeline_mode = #tpu.pipeline_mode<synchronous>, transform_indices = @transform_5, window_bounds = array<i64: 1, 8>}, {pipeline_mode = #tpu.pipeline_mode<synchronous>, transform_indices = @transform_6, window_bounds = array<i64: 1, 8>}, {pipeline_mode = #tpu.pipeline_mode<synchronous>, transform_indices = @transform_7, window_bounds = array<i64: 1, 8>}, {transform_indices = @transform_8, window_bounds = array<i64: 1, 16, 16, 8>}]} {
    %c0 = arith.constant 0 : index
    %c0_0 = arith.constant 0 : index
    %c0_1 = arith.constant 0 : index
    %c0_2 = arith.constant 0 : index
    %0 = vector.load %arg1[%c0, %c0_0, %c0_1, %c0_2] : memref<1x16x16x4xbf16, #tpu.memory_space<vmem>>, vector<1x16x16x4xbf16>
    %1 = vector.shape_cast %0 : vector<1x16x16x4xbf16> to vector<16x16x4xbf16>
    %2 = vector.shape_cast %1 : vector<16x16x4xbf16> to vector<256x4xbf16>
    %c0_3 = arith.constant 0 : index
    %c0_4 = arith.constant 0 : index
    %3 = vector.load %arg2[%c0_3, %c0_4] : memref<4x8xbf16, #tpu.memory_space<vmem>>, vector<4x8xbf16>
    %cst = arith.constant dense<0.000000e+00> : vector<256x8xf32>
    %4 = tpu.matmul %2, %3, %cst {dimension_numbers = #tpu.dot_dimension_numbers<[1], [0], [0], [1], [0, 0, 1, 1], [], []>} : vector<256x4xbf16>, vector<4x8xbf16>, vector<256x8xf32> -> vector<256x8xf32>
    %cst_5 = arith.constant 0.000000e+00 : bf16
    %5 = vector.broadcast %cst_5 : bf16 to vector<1x18x4xbf16>
    %cst_6 = arith.constant 0.000000e+00 : bf16
    %6 = vector.broadcast %cst_6 : bf16 to vector<16x1x4xbf16>
    %c0_7 = arith.constant 0 : index
    %c0_8 = arith.constant 0 : index
    %c0_9 = arith.constant 0 : index
    %7 = vector.load %arg10[%c0_7, %c0_8, %c0_9] : memref<18x18x4xbf16, #tpu.memory_space<vmem>>, vector<1x18x4xbf16>
    tpu.vector_store %arg10[%c0_7, %c0_8, %c0_9], %5 {strides = array<i32>} : memref<18x18x4xbf16, #tpu.memory_space<vmem>>, vector<1x18x4xbf16>,
    %c17 = arith.constant 17 : index
    %c0_10 = arith.constant 0 : index
    %c0_11 = arith.constant 0 : index
    %8 = vector.load %arg10[%c17, %c0_10, %c0_11] : memref<18x18x4xbf16, #tpu.memory_space<vmem>>, vector<1x18x4xbf16>
    tpu.vector_store %arg10[%c17, %c0_10, %c0_11], %5 {strides = array<i32>} : memref<18x18x4xbf16, #tpu.memory_space<vmem>>, vector<1x18x4xbf16>,
    %c1 = arith.constant 1 : index
    %c0_12 = arith.constant 0 : index
    %c0_13 = arith.constant 0 : index
    %9 = vector.load %arg10[%c1, %c0_12, %c0_13] : memref<18x18x4xbf16, #tpu.memory_space<vmem>>, vector<16x1x4xbf16>
    tpu.vector_store %arg10[%c1, %c0_12, %c0_13], %6 {strides = array<i32>} : memref<18x18x4xbf16, #tpu.memory_space<vmem>>, vector<16x1x4xbf16>,
    %c1_14 = arith.constant 1 : index
    %c17_15 = arith.constant 17 : index
    %c0_16 = arith.constant 0 : index
    %10 = vector.load %arg10[%c1_14, %c17_15, %c0_16] : memref<18x18x4xbf16, #tpu.memory_space<vmem>>, vector<16x1x4xbf16>
    tpu.vector_store %arg10[%c1_14, %c17_15, %c0_16], %6 {strides = array<i32>} : memref<18x18x4xbf16, #tpu.memory_space<vmem>>, vector<16x1x4xbf16>,
    %c1_17 = arith.constant 1 : index
    %c1_18 = arith.constant 1 : index
    %c0_19 = arith.constant 0 : index
    %11 = vector.load %arg10[%c1_17, %c1_18, %c0_19] : memref<18x18x4xbf16, #tpu.memory_space<vmem>>, vector<16x16x4xbf16>
    tpu.vector_store %arg10[%c1_17, %c1_18, %c0_19], %1 {strides = array<i32>} : memref<18x18x4xbf16, #tpu.memory_space<vmem>>, vector<16x16x4xbf16>,
    %c0_20 = arith.constant 0 : index
    %c0_21 = arith.constant 0 : index
    %c0_22 = arith.constant 0 : index
    %12 = vector.load %arg10[%c0_20, %c0_21, %c0_22] : memref<18x18x4xbf16, #tpu.memory_space<vmem>>, vector<16x16x4xbf16>
    %13 = vector.shape_cast %12 : vector<16x16x4xbf16> to vector<256x4xbf16>
    %c0_23 = arith.constant 0 : index
    %c0_24 = arith.constant 0 : index
    %14 = vector.load %arg12[%c0_23, %c0_24] : memref<256x36xbf16, #tpu.memory_space<vmem>>, vector<256x4xbf16>
    tpu.vector_store %arg12[%c0_23, %c0_24], %13 {strides = array<i32>} : memref<256x36xbf16, #tpu.memory_space<vmem>>, vector<256x4xbf16>,
    %c0_25 = arith.constant 0 : index
    %c1_26 = arith.constant 1 : index
    %c0_27 = arith.constant 0 : index
    %15 = vector.load %arg10[%c0_25, %c1_26, %c0_27] : memref<18x18x4xbf16, #tpu.memory_space<vmem>>, vector<16x16x4xbf16>
    %16 = vector.shape_cast %15 : vector<16x16x4xbf16> to vector<256x4xbf16>
    %c0_28 = arith.constant 0 : index
    %c4 = arith.constant 4 : index
    %17 = vector.load %arg12[%c0_28, %c4] : memref<256x36xbf16, #tpu.memory_space<vmem>>, vector<256x4xbf16>
    tpu.vector_store %arg12[%c0_28, %c4], %16 {strides = array<i32>} : memref<256x36xbf16, #tpu.memory_space<vmem>>, vector<256x4xbf16>,
    %c0_29 = arith.constant 0 : index
    %c2 = arith.constant 2 : index
    %c0_30 = arith.constant 0 : index
    %18 = vector.load %arg10[%c0_29, %c2, %c0_30] : memref<18x18x4xbf16, #tpu.memory_space<vmem>>, vector<16x16x4xbf16>
    %19 = vector.shape_cast %18 : vector<16x16x4xbf16> to vector<256x4xbf16>
    %c0_31 = arith.constant 0 : index
    %c8 = arith.constant 8 : index
    %20 = vector.load %arg12[%c0_31, %c8] : memref<256x36xbf16, #tpu.memory_space<vmem>>, vector<256x4xbf16>
    tpu.vector_store %arg12[%c0_31, %c8], %19 {strides = array<i32>} : memref<256x36xbf16, #tpu.memory_space<vmem>>, vector<256x4xbf16>,
    %c1_32 = arith.constant 1 : index
    %c0_33 = arith.constant 0 : index
    %c0_34 = arith.constant 0 : index
    %21 = vector.load %arg10[%c1_32, %c0_33, %c0_34] : memref<18x18x4xbf16, #tpu.memory_space<vmem>>, vector<16x16x4xbf16>
    %22 = vector.shape_cast %21 : vector<16x16x4xbf16> to vector<256x4xbf16>
    %c0_35 = arith.constant 0 : index
    %c12 = arith.constant 12 : index
    %23 = vector.load %arg12[%c0_35, %c12] : memref<256x36xbf16, #tpu.memory_space<vmem>>, vector<256x4xbf16>
    tpu.vector_store %arg12[%c0_35, %c12], %22 {strides = array<i32>} : memref<256x36xbf16, #tpu.memory_space<vmem>>, vector<256x4xbf16>,
    %c1_36 = arith.constant 1 : index
    %c1_37 = arith.constant 1 : index
    %c0_38 = arith.constant 0 : index
    %24 = vector.load %arg10[%c1_36, %c1_37, %c0_38] : memref<18x18x4xbf16, #tpu.memory_space<vmem>>, vector<16x16x4xbf16>
    %25 = vector.shape_cast %24 : vector<16x16x4xbf16> to vector<256x4xbf16>
    %c0_39 = arith.constant 0 : index
    %c16 = arith.constant 16 : index
    %26 = vector.load %arg12[%c0_39, %c16] : memref<256x36xbf16, #tpu.memory_space<vmem>>, vector<256x4xbf16>
    tpu.vector_store %arg12[%c0_39, %c16], %25 {strides = array<i32>} : memref<256x36xbf16, #tpu.memory_space<vmem>>, vector<256x4xbf16>,
    %c1_40 = arith.constant 1 : index
    %c2_41 = arith.constant 2 : index
    %c0_42 = arith.constant 0 : index
    %27 = vector.load %arg10[%c1_40, %c2_41, %c0_42] : memref<18x18x4xbf16, #tpu.memory_space<vmem>>, vector<16x16x4xbf16>
    %28 = vector.shape_cast %27 : vector<16x16x4xbf16> to vector<256x4xbf16>
    %c0_43 = arith.constant 0 : index
    %c20 = arith.constant 20 : index
    %29 = vector.load %arg12[%c0_43, %c20] : memref<256x36xbf16, #tpu.memory_space<vmem>>, vector<256x4xbf16>
    tpu.vector_store %arg12[%c0_43, %c20], %28 {strides = array<i32>} : memref<256x36xbf16, #tpu.memory_space<vmem>>, vector<256x4xbf16>,
    %c2_44 = arith.constant 2 : index
    %c0_45 = arith.constant 0 : index
    %c0_46 = arith.constant 0 : index
    %30 = vector.load %arg10[%c2_44, %c0_45, %c0_46] : memref<18x18x4xbf16, #tpu.memory_space<vmem>>, vector<16x16x4xbf16>
    %31 = vector.shape_cast %30 : vector<16x16x4xbf16> to vector<256x4xbf16>
    %c0_47 = arith.constant 0 : index
    %c24 = arith.constant 24 : index
    %32 = vector.load %arg12[%c0_47, %c24] : memref<256x36xbf16, #tpu.memory_space<vmem>>, vector<256x4xbf16>
    tpu.vector_store %arg12[%c0_47, %c24], %31 {strides = array<i32>} : memref<256x36xbf16, #tpu.memory_space<vmem>>, vector<256x4xbf16>,
    %c2_48 = arith.constant 2 : index
    %c1_49 = arith.constant 1 : index
    %c0_50 = arith.constant 0 : index
    %33 = vector.load %arg10[%c2_48, %c1_49, %c0_50] : memref<18x18x4xbf16, #tpu.memory_space<vmem>>, vector<16x16x4xbf16>
    %34 = vector.shape_cast %33 : vector<16x16x4xbf16> to vector<256x4xbf16>
    %c0_51 = arith.constant 0 : index
    %c28 = arith.constant 28 : index
    %35 = vector.load %arg12[%c0_51, %c28] : memref<256x36xbf16, #tpu.memory_space<vmem>>, vector<256x4xbf16>
    tpu.vector_store %arg12[%c0_51, %c28], %34 {strides = array<i32>} : memref<256x36xbf16, #tpu.memory_space<vmem>>, vector<256x4xbf16>,
    %c2_52 = arith.constant 2 : index
    %c2_53 = arith.constant 2 : index
    %c0_54 = arith.constant 0 : index
    %36 = vector.load %arg10[%c2_52, %c2_53, %c0_54] : memref<18x18x4xbf16, #tpu.memory_space<vmem>>, vector<16x16x4xbf16>
    %37 = vector.shape_cast %36 : vector<16x16x4xbf16> to vector<256x4xbf16>
    %c0_55 = arith.constant 0 : index
    %c32 = arith.constant 32 : index
    %38 = vector.load %arg12[%c0_55, %c32] : memref<256x36xbf16, #tpu.memory_space<vmem>>, vector<256x4xbf16>
    tpu.vector_store %arg12[%c0_55, %c32], %37 {strides = array<i32>} : memref<256x36xbf16, #tpu.memory_space<vmem>>, vector<256x4xbf16>,
    %c0_56 = arith.constant 0 : index
    %c0_57 = arith.constant 0 : index
    %39 = vector.load %arg12[%c0_56, %c0_57] : memref<256x36xbf16, #tpu.memory_space<vmem>>, vector<256x36xbf16>
    %c0_58 = arith.constant 0 : index
    %c0_59 = arith.constant 0 : index
    %40 = vector.load %arg3[%c0_58, %c0_59] : memref<36x8xbf16, #tpu.memory_space<vmem>>, vector<36x8xbf16>
    %cst_60 = arith.constant dense<0.000000e+00> : vector<256x8xf32>
    %41 = tpu.matmul %39, %40, %cst_60 {dimension_numbers = #tpu.dot_dimension_numbers<[1], [0], [0], [1], [0, 0, 1, 1], [], []>} : vector<256x36xbf16>, vector<36x8xbf16>, vector<256x8xf32> -> vector<256x8xf32>
    %c0_61 = arith.constant 0 : index
    %c0_62 = arith.constant 0 : index
    %42 = vector.load %arg5[%c0_61, %c0_62] : memref<1x8xf32, #tpu.memory_space<vmem>>, vector<1x8xf32>
    %43 = vector.broadcast %42 : vector<1x8xf32> to vector<256x8xf32>
    %44 = arith.mulf %41, %43 : vector<256x8xf32>
    %c0_63 = arith.constant 0 : index
    %c0_64 = arith.constant 0 : index
    %45 = vector.load %arg6[%c0_63, %c0_64] : memref<1x8xf32, #tpu.memory_space<vmem>>, vector<1x8xf32>
    %46 = vector.broadcast %45 : vector<1x8xf32> to vector<256x8xf32>
    %47 = arith.addf %44, %46 : vector<256x8xf32>
    %cst_65 = arith.constant 2.000000e-01 : f32
    %48 = vector.broadcast %cst_65 : f32 to vector<256x8xf32>
    %49 = arith.mulf %48, %47 : vector<256x8xf32>
    %50 = arith.maximumf %47, %49 : vector<256x8xf32>
    %cst_66 = arith.constant 0.000000e+00 : bf16
    %51 = vector.broadcast %cst_66 : bf16 to vector<1x18x8xbf16>
    %cst_67 = arith.constant 0.000000e+00 : bf16
    %52 = vector.broadcast %cst_67 : bf16 to vector<16x1x8xbf16>
    %c0_68 = arith.constant 0 : index
    %c0_69 = arith.constant 0 : index
    %c0_70 = arith.constant 0 : index
    %53 = vector.load %arg11[%c0_68, %c0_69, %c0_70] : memref<18x18x8xbf16, #tpu.memory_space<vmem>>, vector<1x18x8xbf16>
    tpu.vector_store %arg11[%c0_68, %c0_69, %c0_70], %51 {strides = array<i32>} : memref<18x18x8xbf16, #tpu.memory_space<vmem>>, vector<1x18x8xbf16>,
    %c17_71 = arith.constant 17 : index
    %c0_72 = arith.constant 0 : index
    %c0_73 = arith.constant 0 : index
    %54 = vector.load %arg11[%c17_71, %c0_72, %c0_73] : memref<18x18x8xbf16, #tpu.memory_space<vmem>>, vector<1x18x8xbf16>
    tpu.vector_store %arg11[%c17_71, %c0_72, %c0_73], %51 {strides = array<i32>} : memref<18x18x8xbf16, #tpu.memory_space<vmem>>, vector<1x18x8xbf16>,
    %c1_74 = arith.constant 1 : index
    %c0_75 = arith.constant 0 : index
    %c0_76 = arith.constant 0 : index
    %55 = vector.load %arg11[%c1_74, %c0_75, %c0_76] : memref<18x18x8xbf16, #tpu.memory_space<vmem>>, vector<16x1x8xbf16>
    tpu.vector_store %arg11[%c1_74, %c0_75, %c0_76], %52 {strides = array<i32>} : memref<18x18x8xbf16, #tpu.memory_space<vmem>>, vector<16x1x8xbf16>,
    %c1_77 = arith.constant 1 : index
    %c17_78 = arith.constant 17 : index
    %c0_79 = arith.constant 0 : index
    %56 = vector.load %arg11[%c1_77, %c17_78, %c0_79] : memref<18x18x8xbf16, #tpu.memory_space<vmem>>, vector<16x1x8xbf16>
    tpu.vector_store %arg11[%c1_77, %c17_78, %c0_79], %52 {strides = array<i32>} : memref<18x18x8xbf16, #tpu.memory_space<vmem>>, vector<16x1x8xbf16>,
    %57 = arith.truncf %50 : vector<256x8xf32> to vector<256x8xbf16>
    %58 = vector.shape_cast %57 : vector<256x8xbf16> to vector<16x16x8xbf16>
    %c1_80 = arith.constant 1 : index
    %c1_81 = arith.constant 1 : index
    %c0_82 = arith.constant 0 : index
    %59 = vector.load %arg11[%c1_80, %c1_81, %c0_82] : memref<18x18x8xbf16, #tpu.memory_space<vmem>>, vector<16x16x8xbf16>
    tpu.vector_store %arg11[%c1_80, %c1_81, %c0_82], %58 {strides = array<i32>} : memref<18x18x8xbf16, #tpu.memory_space<vmem>>, vector<16x16x8xbf16>,
    %c0_83 = arith.constant 0 : index
    %c0_84 = arith.constant 0 : index
    %c0_85 = arith.constant 0 : index
    %60 = vector.load %arg11[%c0_83, %c0_84, %c0_85] : memref<18x18x8xbf16, #tpu.memory_space<vmem>>, vector<16x16x8xbf16>
    %61 = vector.shape_cast %60 : vector<16x16x8xbf16> to vector<256x8xbf16>
    %c0_86 = arith.constant 0 : index
    %c0_87 = arith.constant 0 : index
    %62 = vector.load %arg13[%c0_86, %c0_87] : memref<256x72xbf16, #tpu.memory_space<vmem>>, vector<256x8xbf16>
    tpu.vector_store %arg13[%c0_86, %c0_87], %61 {strides = array<i32>} : memref<256x72xbf16, #tpu.memory_space<vmem>>, vector<256x8xbf16>,
    %c0_88 = arith.constant 0 : index
    %c1_89 = arith.constant 1 : index
    %c0_90 = arith.constant 0 : index
    %63 = vector.load %arg11[%c0_88, %c1_89, %c0_90] : memref<18x18x8xbf16, #tpu.memory_space<vmem>>, vector<16x16x8xbf16>
    %64 = vector.shape_cast %63 : vector<16x16x8xbf16> to vector<256x8xbf16>
    %c0_91 = arith.constant 0 : index
    %c8_92 = arith.constant 8 : index
    %65 = vector.load %arg13[%c0_91, %c8_92] : memref<256x72xbf16, #tpu.memory_space<vmem>>, vector<256x8xbf16>
    tpu.vector_store %arg13[%c0_91, %c8_92], %64 {strides = array<i32>} : memref<256x72xbf16, #tpu.memory_space<vmem>>, vector<256x8xbf16>,
    %c0_93 = arith.constant 0 : index
    %c2_94 = arith.constant 2 : index
    %c0_95 = arith.constant 0 : index
    %66 = vector.load %arg11[%c0_93, %c2_94, %c0_95] : memref<18x18x8xbf16, #tpu.memory_space<vmem>>, vector<16x16x8xbf16>
    %67 = vector.shape_cast %66 : vector<16x16x8xbf16> to vector<256x8xbf16>
    %c0_96 = arith.constant 0 : index
    %c16_97 = arith.constant 16 : index
    %68 = vector.load %arg13[%c0_96, %c16_97] : memref<256x72xbf16, #tpu.memory_space<vmem>>, vector<256x8xbf16>
    tpu.vector_store %arg13[%c0_96, %c16_97], %67 {strides = array<i32>} : memref<256x72xbf16, #tpu.memory_space<vmem>>, vector<256x8xbf16>,
    %c1_98 = arith.constant 1 : index
    %c0_99 = arith.constant 0 : index
    %c0_100 = arith.constant 0 : index
    %69 = vector.load %arg11[%c1_98, %c0_99, %c0_100] : memref<18x18x8xbf16, #tpu.memory_space<vmem>>, vector<16x16x8xbf16>
    %70 = vector.shape_cast %69 : vector<16x16x8xbf16> to vector<256x8xbf16>
    %c0_101 = arith.constant 0 : index
    %c24_102 = arith.constant 24 : index
    %71 = vector.load %arg13[%c0_101, %c24_102] : memref<256x72xbf16, #tpu.memory_space<vmem>>, vector<256x8xbf16>
    tpu.vector_store %arg13[%c0_101, %c24_102], %70 {strides = array<i32>} : memref<256x72xbf16, #tpu.memory_space<vmem>>, vector<256x8xbf16>,
    %c1_103 = arith.constant 1 : index
    %c1_104 = arith.constant 1 : index
    %c0_105 = arith.constant 0 : index
    %72 = vector.load %arg11[%c1_103, %c1_104, %c0_105] : memref<18x18x8xbf16, #tpu.memory_space<vmem>>, vector<16x16x8xbf16>
    %73 = vector.shape_cast %72 : vector<16x16x8xbf16> to vector<256x8xbf16>
    %c0_106 = arith.constant 0 : index
    %c32_107 = arith.constant 32 : index
    %74 = vector.load %arg13[%c0_106, %c32_107] : memref<256x72xbf16, #tpu.memory_space<vmem>>, vector<256x8xbf16>
    tpu.vector_store %arg13[%c0_106, %c32_107], %73 {strides = array<i32>} : memref<256x72xbf16, #tpu.memory_space<vmem>>, vector<256x8xbf16>,
    %c1_108 = arith.constant 1 : index
    %c2_109 = arith.constant 2 : index
    %c0_110 = arith.constant 0 : index
    %75 = vector.load %arg11[%c1_108, %c2_109, %c0_110] : memref<18x18x8xbf16, #tpu.memory_space<vmem>>, vector<16x16x8xbf16>
    %76 = vector.shape_cast %75 : vector<16x16x8xbf16> to vector<256x8xbf16>
    %c0_111 = arith.constant 0 : index
    %c40 = arith.constant 40 : index
    %77 = vector.load %arg13[%c0_111, %c40] : memref<256x72xbf16, #tpu.memory_space<vmem>>, vector<256x8xbf16>
    tpu.vector_store %arg13[%c0_111, %c40], %76 {strides = array<i32>} : memref<256x72xbf16, #tpu.memory_space<vmem>>, vector<256x8xbf16>,
    %c2_112 = arith.constant 2 : index
    %c0_113 = arith.constant 0 : index
    %c0_114 = arith.constant 0 : index
    %78 = vector.load %arg11[%c2_112, %c0_113, %c0_114] : memref<18x18x8xbf16, #tpu.memory_space<vmem>>, vector<16x16x8xbf16>
    %79 = vector.shape_cast %78 : vector<16x16x8xbf16> to vector<256x8xbf16>
    %c0_115 = arith.constant 0 : index
    %c48 = arith.constant 48 : index
    %80 = vector.load %arg13[%c0_115, %c48] : memref<256x72xbf16, #tpu.memory_space<vmem>>, vector<256x8xbf16>
    tpu.vector_store %arg13[%c0_115, %c48], %79 {strides = array<i32>} : memref<256x72xbf16, #tpu.memory_space<vmem>>, vector<256x8xbf16>,
    %c2_116 = arith.constant 2 : index
    %c1_117 = arith.constant 1 : index
    %c0_118 = arith.constant 0 : index
    %81 = vector.load %arg11[%c2_116, %c1_117, %c0_118] : memref<18x18x8xbf16, #tpu.memory_space<vmem>>, vector<16x16x8xbf16>
    %82 = vector.shape_cast %81 : vector<16x16x8xbf16> to vector<256x8xbf16>
    %c0_119 = arith.constant 0 : index
    %c56 = arith.constant 56 : index
    %83 = vector.load %arg13[%c0_119, %c56] : memref<256x72xbf16, #tpu.memory_space<vmem>>, vector<256x8xbf16>
    tpu.vector_store %arg13[%c0_119, %c56], %82 {strides = array<i32>} : memref<256x72xbf16, #tpu.memory_space<vmem>>, vector<256x8xbf16>,
    %c2_120 = arith.constant 2 : index
    %c2_121 = arith.constant 2 : index
    %c0_122 = arith.constant 0 : index
    %84 = vector.load %arg11[%c2_120, %c2_121, %c0_122] : memref<18x18x8xbf16, #tpu.memory_space<vmem>>, vector<16x16x8xbf16>
    %85 = vector.shape_cast %84 : vector<16x16x8xbf16> to vector<256x8xbf16>
    %c0_123 = arith.constant 0 : index
    %c64 = arith.constant 64 : index
    %86 = vector.load %arg13[%c0_123, %c64] : memref<256x72xbf16, #tpu.memory_space<vmem>>, vector<256x8xbf16>
    tpu.vector_store %arg13[%c0_123, %c64], %85 {strides = array<i32>} : memref<256x72xbf16, #tpu.memory_space<vmem>>, vector<256x8xbf16>,
    %c0_124 = arith.constant 0 : index
    %c0_125 = arith.constant 0 : index
    %87 = vector.load %arg13[%c0_124, %c0_125] : memref<256x72xbf16, #tpu.memory_space<vmem>>, vector<256x72xbf16>
    %c0_126 = arith.constant 0 : index
    %c0_127 = arith.constant 0 : index
    %88 = vector.load %arg4[%c0_126, %c0_127] : memref<72x8xbf16, #tpu.memory_space<vmem>>, vector<72x8xbf16>
    %cst_128 = arith.constant dense<0.000000e+00> : vector<256x8xf32>
    %89 = tpu.matmul %87, %88, %cst_128 {dimension_numbers = #tpu.dot_dimension_numbers<[1], [0], [0], [1], [0, 0, 1, 1], [], []>} : vector<256x72xbf16>, vector<72x8xbf16>, vector<256x8xf32> -> vector<256x8xf32>
    %c0_129 = arith.constant 0 : index
    %c0_130 = arith.constant 0 : index
    %90 = vector.load %arg7[%c0_129, %c0_130] : memref<1x8xf32, #tpu.memory_space<vmem>>, vector<1x8xf32>
    %91 = vector.broadcast %90 : vector<1x8xf32> to vector<256x8xf32>
    %92 = arith.mulf %89, %91 : vector<256x8xf32>
    %c0_131 = arith.constant 0 : index
    %c0_132 = arith.constant 0 : index
    %93 = vector.load %arg8[%c0_131, %c0_132] : memref<1x8xf32, #tpu.memory_space<vmem>>, vector<1x8xf32>
    %94 = vector.broadcast %93 : vector<1x8xf32> to vector<256x8xf32>
    %95 = arith.addf %92, %94 : vector<256x8xf32>
    %96 = arith.addf %95, %4 : vector<256x8xf32>
    %cst_133 = arith.constant 2.000000e-01 : f32
    %97 = vector.broadcast %cst_133 : f32 to vector<256x8xf32>
    %98 = arith.mulf %97, %96 : vector<256x8xf32>
    %99 = arith.maximumf %96, %98 : vector<256x8xf32>
    %100 = vector.shape_cast %99 : vector<256x8xf32> to vector<1x16x16x8xf32>
    %c0_134 = arith.constant 0 : index
    %c0_135 = arith.constant 0 : index
    %c0_136 = arith.constant 0 : index
    %c0_137 = arith.constant 0 : index
    %101 = vector.load %arg9[%c0_134, %c0_135, %c0_136, %c0_137] : memref<1x16x16x8xf32, #tpu.memory_space<vmem>>, vector<1x16x16x8xf32>
    tpu.vector_store %arg9[%c0_134, %c0_135, %c0_136, %c0_137], %100 {strides = array<i32>} : memref<1x16x16x8xf32, #tpu.memory_space<vmem>>, vector<1x16x16x8xf32>,
    return
  }
  func.func @transform_0(%arg0: i32) -> (i32, i32, i32, i32) {
    %c0_i32 = arith.constant 0 : i32
    %c0_i32_0 = arith.constant 0 : i32
    %c0_i32_1 = arith.constant 0 : i32
    %c0_i32_2 = arith.constant 0 : i32
    return %arg0, %c0_i32, %c0_i32_0, %c0_i32_1 : i32, i32, i32, i32
  }
  func.func @transform_1(%arg0: i32) -> (i32, i32) {
    %c0_i32 = arith.constant 0 : i32
    %c0_i32_0 = arith.constant 0 : i32
    %c0_i32_1 = arith.constant 0 : i32
    return %c0_i32, %c0_i32_0 : i32, i32
  }
  func.func @transform_2(%arg0: i32) -> (i32, i32) {
    %c0_i32 = arith.constant 0 : i32
    %c0_i32_0 = arith.constant 0 : i32
    %c0_i32_1 = arith.constant 0 : i32
    return %c0_i32, %c0_i32_0 : i32, i32
  }
  func.func @transform_3(%arg0: i32) -> (i32, i32) {
    %c0_i32 = arith.constant 0 : i32
    %c0_i32_0 = arith.constant 0 : i32
    %c0_i32_1 = arith.constant 0 : i32
    return %c0_i32, %c0_i32_0 : i32, i32
  }
  func.func @transform_4(%arg0: i32) -> (i32, i32) {
    %c0_i32 = arith.constant 0 : i32
    %c0_i32_0 = arith.constant 0 : i32
    %c0_i32_1 = arith.constant 0 : i32
    return %c0_i32, %c0_i32_0 : i32, i32
  }
  func.func @transform_5(%arg0: i32) -> (i32, i32) {
    %c0_i32 = arith.constant 0 : i32
    %c0_i32_0 = arith.constant 0 : i32
    %c0_i32_1 = arith.constant 0 : i32
    return %c0_i32, %c0_i32_0 : i32, i32
  }
  func.func @transform_6(%arg0: i32) -> (i32, i32) {
    %c0_i32 = arith.constant 0 : i32
    %c0_i32_0 = arith.constant 0 : i32
    %c0_i32_1 = arith.constant 0 : i32
    return %c0_i32, %c0_i32_0 : i32, i32
  }
  func.func @transform_7(%arg0: i32) -> (i32, i32) {
    %c0_i32 = arith.constant 0 : i32
    %c0_i32_0 = arith.constant 0 : i32
    %c0_i32_1 = arith.constant 0 : i32
    return %c0_i32, %c0_i32_0 : i32, i32
  }
  func.func @transform_8(%arg0: i32) -> (i32, i32, i32, i32) {
    %c0_i32 = arith.constant 0 : i32
    %c0_i32_0 = arith.constant 0 : i32
    %c0_i32_1 = arith.constant 0 : i32
    %c0_i32_2 = arith.constant 0 : i32
    return %arg0, %c0_i32, %c0_i32_0, %c0_i32_1 : i32, i32, i32, i32
  }
}

</mosaic_0001>

<bundles_post_ra>
// kernel: residual_block_forward.1
= control target key start
LH: loop header
LB: loop body
LE: loop exit
PB: predicated region body
PF: predicated region fallthrough
CT: control target
= control target key end

     0   :  { %s9468_s27 = smov 0   ;;  %s12797_s0 = inlined_call_operand.vmem [shape: bf16[2,16,16,4], index: 0, kind: input, shape index: {}]   ;;  %s12798_s1 = inlined_call_operand.vmem [shape: bf16[4,8], index: 1, kind: input, shape index: {}]   ;;  %s12799_s2 = inlined_call_operand.vmem [shape: bf16[36,8], index: 2, kind: input, shape index: {}]   ;;  %s12800_s3 = inlined_call_operand.vmem [shape: bf16[72,8], index: 3, kind: input, shape index: {}]   ;;  %s12801_s4 = inlined_call_operand.vmem [shape: f32[1,8], index: 4, kind: input, shape index: {}]   ;;  %s12802_s5 = inlined_call_operand.vmem [shape: f32[1,8], index: 5, kind: input, shape index: {}]   ;;  %s12803_s6 = inlined_call_operand.vmem [shape: f32[1,8], index: 6, kind: input, shape index: {}]   ;;  %s12804_s7 = inlined_call_operand.vmem [shape: f32[1,8], index: 7, kind: input, shape index: {}]   ;;  %s12805_s8 = inlined_call_operand.vmem [shape: f32[2,16,16,8], index: 8, kind: output, shape index: {}]  }
   0x1 LB: > { %s8935_s28 = sadd.s32 4294967295, %s9408_s27   ;;  %p8939_p0 = scmp.ge.s32.totalorder %s9408_s27, 1  ;;  %s9408_s27 = sphi %s9468_s27, %s18_s27  }
   0x2   : > { %p262_p1 = scmp.lt.s32.totalorder %s9408_s27, 3 }
   0x4   : > { %p263_p2 = pnand %p8939_p0, %p262_p1 }
   0x5   : > { %p296_p3 = scmp.lt.s32.totalorder (!%p263_p2), %s8935_s28, 1  ;;  %s9411_s11 = smov (!%p263_p2), 4  }
   0x6   : > { %266 = sbr.rel (%p263_p2) target bundleno = 2024 (0x7e8), region = 52  ;;  %s9412_s12 = smov (!%p263_p2), 8  }
   0x7   : > { %s9413_s13 = smov (!%p263_p2), 12   ;;  %s9414_s14 = smov (!%p263_p2), 16  }
   0x8   : > { %s9415_s15 = smov (!%p263_p2), 20   ;;  %s9416_s16 = smov (!%p263_p2), 24  }
   0x9   : > { %s9417_s17 = smov (!%p263_p2), 28   ;;  %s9418_s18 = smov (!%p263_p2), 32  }
   0xa   : > { %s9420_s22 = smov (!%p263_p2), 48   ;;  %s9422_s23 = smov (!%p263_p2), 64  }
   0xb   : > { %vm562_vm0 = vcmask 27648   ;;  %v9410_v0 = vmov 0   ;;  %vm565_vm1 = vcmask 24576   ;;  %vm573_vm2 = vsmask.f32 256  ;;  %s12825_s28 = smov (!%p296_p3, %s8935_s28), 1 }
   0xc   : > { %563 = vst.msk [vmem:[#allocation2] sm:$0xf] %vm562_vm0, %v9410_v0  ;;  %vm1221_vm3 = vsmask.f32 3328  ;;  %vm1222_vm4 = vsmask.f32 7440  ;;  %vm9482_vm5 = vmand %vm565_vm1, %vm573_vm2 }
   0xd   : > { %564 = vst.msk [vmem:[#allocation2 + $0x4] sm:$0xf] %vm562_vm0, %v9410_v0  ;;  %vm623_vm6 = vsmask.f32 7938  ;;  %v581_v2 = vld [vmem:[#allocation2 + $0x24] sm:$0x1]  ;;  %vm9518_vm11 = vmor %vm1221_vm3, %vm1222_vm4 }
   0xe   : > { %568 = vst.msk [vmem:[#allocation2 + $0xcc] sm:$0xf] %vm562_vm0, %v9410_v0  ;;  %vm9489_vm7 = vmand %vm565_vm1, %vm623_vm6  ;;  %v575_v4 = vld [vmem:[#allocation2 + $0xc] sm:$0x1]  ;;  %vm4669_vm8 = vcmask 60416   ;;  %vm4672_vm9 = vcmask 57344  }
   0xf   : > { %569 = vst.msk [vmem:[#allocation2 + $0xd0] sm:$0xf] %vm562_vm0, %v9410_v0  ;;  %v634_v5 = vld [vmem:[#allocation2 + $0x38] sm:$0x1]  ;;  %s9306_s29 = sshll.u32 %s12825_s28, 7  ;;  %v582_v6 = vsel %vm9482_vm5, 0, %v581_v2  ;;  %vm9543_vm13 = vmand %vm562_vm0, %vm623_vm6 }
  0x10   : > { %566 = vst.msk [vmem:[#allocation2 + $0x8] sm:$0x1] %vm565_vm1, %v9410_v0  ;;  %vm673_vm10 = vsmask.f32 4368  ;;  %s9504_s10 = scalar_lea.vmem %s12797_s0, %s9306_s29  ;;  %v576_v8 = vsel %vm9482_vm5, 0, %v575_v4  ;;  %v635_v9 = vsel %vm9489_vm7, 0, %v634_v5 }
  0x11   : > { %570 = vst.msk [vmem:[#allocation2 + $0xd4] sm:$0x1] %vm565_vm1, %v9410_v0  ;;  %v311_v15 = vld [vmem:[%s9504_s10 + $0x10] sm:$0xf]  ;;  %v625_v16 = vld [vmem:[#allocation2 + $0x14] sm:$0x1]  ;;  %vm9535_vm12 = vmor %vm573_vm2, %vm673_vm10 }
  0x12   : > { %4670 = vst.msk [vmem:[#allocation3] sm:$0xf] %vm4669_vm8, %v9410_v0  ;;  %v312_v19 = vld [vmem:[%s9504_s10 + $0x14] sm:$0xf]  ;;  %v710_v25 = vshrl.u32 %v311_v15, 16  ;;  %v713_v26 = vshll.u32 %v311_v15, 16 }
  0x13   : > { %v1173_v7 = vld [vmem:[#allocation2] sm:$0xf]  ;;  %4671 = vst.msk [vmem:[#allocation3 + $0x4] sm:$0xf] %vm4669_vm8, %v9410_v0  ;;  %v718_v29 = vshrl.u32 %v312_v19, 16  ;;  %v721_v30 = vshll.u32 %v312_v19, 16 }
  0x14   : > { %v1174_v10 = vld [vmem:[#allocation2 + $0x4] sm:$0xf]  ;;  %v1225_v11 = vshrl.u32 %v1173_v7, 16  ;;  %v1228_v12 = vshll.u32 %v1173_v7, 16  ;;  %4673 = vst.msk [vmem:[#allocation3 + $0x8] sm:$0x1] %vm4672_vm9, %v9410_v0 }
  0x15   : > { %v1234_v13 = vshll.u32 %v1174_v10, 16  ;;  %v1238_v14 = vshrl.u32 %v1174_v10, 16  ;;  %4675 = vst.msk [vmem:[#allocation3 + $0xcc] sm:$0xf] %vm4669_vm8, %v9410_v0  ;;  %v307_v31 = vld [vmem:[%s9504_s10] sm:$0xf] }
  0x16   : > { %v1227_v17 = vrot.slane %v1225_v11, 4  ;;  %v1230_v18 = vrot.slane %v1228_v12, 5  ;;  %4676 = vst.msk [vmem:[#allocation3 + $0xd0] sm:$0xf] %vm4669_vm8, %v9410_v0  ;;  %v308_v32 = vld [vmem:[%s9504_s10 + $0x4] sm:$0xf] }
  0x17   : > { %v1236_v20 = vrot.slane %v1234_v13, 5  ;;  %v1240_v21 = vrot.slane %v1238_v14, 4  ;;  %v1175_v22 = vld [vmem:[#allocation2 + $0x8] sm:$0x1]  ;;  %4677 = vst.msk [vmem:[#allocation3 + $0xd4] sm:$0x1] %vm4672_vm9, %v9410_v0 }
  0x18   : > { %v1231_v23 = vor.u32 %v1230_v18, %v1227_v17  ;;  %v1244_v24 = vshll.u32 %v1175_v22, 16  ;;  %583 = vst [vmem:[#allocation2 + $0x24] sm:$0x1] %v582_v6  ;;  %v712_v34 = vrot.slane %v710_v25, 7  ;;  %v676_v35 = vshrl.u32 %v307_v31, 16  ;;  %s9307_s21 = sshll.u32 %s12825_s28, 8 }
  0x19   : > { %v1241_v28 = vor.u32 %v1240_v21, %v1236_v20  ;;  %577 = vst [vmem:[#allocation2 + $0xc] sm:$0x1] %v576_v8  ;;  %v626_v36 = vsel %vm9489_vm7, 0, %v625_v16  ;;  %v9526_v38 = vrot.slane %v718_v29, 7  ;;  %v679_v39 = vshll.u32 %v307_v31, 16  ;;  %s12459_s28 = scalar_lea.vmem %s12805_s8, %s9307_s21 }
  0x1a   : > { %v1232_v33 = vrot.slane %v1231_v23, 4  ;;  %v1246_v37 = vrot.slane %v1244_v24, 5  ;;  %v684_v40 = vshrl.u32 %v308_v32, 16  ;;  %v9529_v41 = vld [vmem:[%s9504_s10 + $0x18] sm:$0xf]  ;;  %v715_v44 = vor.u32 %v713_v26, %v712_v34 }
  0x1b   : > { %v716_v45 = vrot.slane %v712_v34, 4  ;;  %v678_v46 = vrot.slane %v676_v35, 7  ;;  %v314_v47 = vld [vmem:[%s9504_s10 + $0x1c] sm:$0xf]  ;;  %636 = vst [vmem:[#allocation2 + $0x38] sm:$0x1] %v635_v9  ;;  %v723_v50 = vor.u32 %v721_v30, %v9526_v38 }
  0x1c   : > { %v1237_v42 = vsel %vm9518_vm11, %v1232_v33, %v1236_v20  ;;  %v1242_v49 = vrot.slane %v1241_v28, 4  ;;  %v686_v51 = vrot.slane %v684_v40, 7  ;;  %v687_v52 = vshll.u32 %v308_v32, 16  ;;  %627 = vst [vmem:[#allocation2 + $0x14] sm:$0x1] %v626_v36 }
  0x1d   : > { %1608 = vrot.lane.b32.xlu0 %v1237_v42, %s9411_s11  ;;  %v681_v53 = vor.u32 %v679_v39, %v678_v46  ;;  %v682_v54 = vrot.slane %v678_v46, 4  ;;  %v727_v55 = vshrl.u32 %v9529_v41, 16  ;;  %v317_v56 = vld [vmem:[%s9504_s10 + $0x28] sm:$0xf]  ;;  %v318_v57 = vld [vmem:[%s9504_s10 + $0x2c] sm:$0xf]  ;;  %v724_v58 = vsel %vm9535_vm12, %v716_v45, %v723_v50 }
  0x1e   : > { %v689_v60 = vor.u32 %v687_v52, %v686_v51  ;;  %v735_v61 = vshrl.u32 %v314_v47, 16  ;;  %v738_v62 = vshll.u32 %v314_v47, 16  ;;  %v590_v63 = vld [vmem:[#allocation2 + $0x48] sm:$0x1]  ;;  %1014 = vst.msk [vmem:[#allocation2 + $0x28] sm:$0xf] %vm562_vm0, %v724_v58  ;;  %v1247_v6 = vsel %vm9518_vm11, %v1242_v49, %v1246_v37 }
  0x1f   : > { %v1011_v59 = vld [vmem:[#allocation2 + $0x24] sm:$0xf]  ;;  %v9556_v2 = vrot.slane %v727_v55, 7  ;;  %v691_v4 = vrot.slane %v686_v51, 4  ;;  %v591_v5 = vsel %vm9482_vm5, 0, %v590_v63  ;;  %v761_v10 = vshrl.u32 %v317_v56, 16 }
  0x20   : > { %v1012_v0 = vsel %vm9543_vm13, %v715_v44, %v1011_v59  ;;  %v690_v7 = vsel %vm9535_vm12, %v682_v54, %v689_v60  ;;  %v997_v8 = vld [vmem:[#allocation2 + $0xc] sm:$0xf]  ;;  %v737_v9 = vrot.slane %v735_v61, 7  ;;  %v764_v13 = vshll.u32 %v317_v56, 16  ;;  %592 = vst [vmem:[#allocation2 + $0x48] sm:$0x1] %v591_v5 }
  0x21   : > { %1013 = vst [vmem:[#allocation2 + $0x24] sm:$0xf] %v1012_v0  ;;  %v998_v11 = vsel %vm9543_vm13, %v681_v53, %v997_v8  ;;  %v733_v12 = vrot.slane %v9556_v2, 4  ;;  %v769_v14 = vshrl.u32 %v318_v57, 16  ;;  %v763_v18 = vrot.slane %v761_v10, 7 }
  0x22   : > { %1000 = vst.msk [vmem:[#allocation2 + $0x10] sm:$0xf] %vm562_vm0, %v690_v7  ;;  %v740_v15 = vor.u32 %v738_v62, %v737_v9  ;;  %v742_v16 = vrot.slane %v737_v9, 4  ;;  %v1022_v17 = vld [vmem:[#allocation2 + $0x38] sm:$0x1]  ;;  %v772_v21 = vshll.u32 %v318_v57, 16 }
  0x23   : > { %999 = vst [vmem:[#allocation2 + $0xc] sm:$0xf] %v998_v11  ;;  %v1001_v19 = vld [vmem:[#allocation2 + $0x14] sm:$0x1]  ;;  %v9568_v20 = vrot.slane %v769_v14, 7  ;;  %v767_v28 = vrot.slane %v763_v18, 4  ;;  %v766_v36 = vor.u32 %v764_v13, %v763_v18 }
  0x24   : > { %v741_v22 = vsel %vm9535_vm12, %v733_v12, %v740_v15  ;;  %v1023_v23 = vsel %vm9482_vm5, %v742_v16, %v1022_v17  ;;  %v1002_v24 = vsel %vm9482_vm5, %v691_v4, %v1001_v19  ;;  %v309_v25 = vld [vmem:[%s9504_s10 + $0x8] sm:$0xf]  ;;  %v578_v26 = vld [vmem:[#allocation2 + $0x18] sm:$0x1]  ;;  %v9581_v30 = vld [vmem:[%s9504_s10 + $0xc] sm:$0xf] }
  0x25   : > { %1610 = vrot.lane.b32.xlu0 %v1247_v6, %s9411_s11  ;;  %1021 = vst.msk [vmem:[#allocation2 + $0x34] sm:$0xf] %vm562_vm0, %v741_v22  ;;  %v774_v29 = vor.u32 %v772_v21, %v9568_v20  ;;  %v9583_v31 = vld [vmem:[#allocation2 + $0x28] sm:$0xf]  ;;  %v579_v32 = vsel %vm9482_vm5, 0, %v578_v26  ;;  %v693_v33 = vshrl.u32 %v309_v25, 16 }
  0x26   : > { %1024 = vst [vmem:[#allocation2 + $0x38] sm:$0x1] %v1023_v23  ;;  %v1306_v35 = vshll.u32 %v9583_v31, 16  ;;  %v696_v39 = vshll.u32 %v309_v25, 16  ;;  %v701_v50 = vshrl.u32 %v9581_v30, 16  ;;  %v730_v9 = vshll.u32 %v9529_v41, 16 }
  0x27   : > { %1003 = vst [vmem:[#allocation2 + $0x14] sm:$0x1] %v1002_v24  ;;  %v775_v37 = vsel %vm9535_vm12, %v767_v28, %v774_v29  ;;  %v1032_v55 = vld [vmem:[#allocation2 + $0x48] sm:$0xf]  ;;  %v695_v59 = vrot.slane %v693_v33, 7  ;;  %v1310_v18 = vshrl.u32 %v9583_v31, 16 }
  0x28   : > { %v1182_v34 = vld [vmem:[#allocation2 + $0x24] sm:$0xf]  ;;  %1035 = vst.msk [vmem:[#allocation2 + $0x4c] sm:$0xf] %vm562_vm0, %v775_v37  ;;  %v9591_v45 = vrot.slane %v1306_v35, 5  ;;  %v1033_v58 = vsel %vm9543_vm13, %v766_v36, %v1032_v55  ;;  %v9599_v15 = vrot.slane %v701_v50, 7 }
  0x29   : > { %v1297_v40 = vshrl.u32 %v1182_v34, 16  ;;  %v1300_v42 = vshll.u32 %v1182_v34, 16  ;;  %v1177_v44 = vld [vmem:[#allocation2 + $0x10] sm:$0xf]  ;;  %580 = vst [vmem:[#allocation2 + $0x18] sm:$0x1] %v579_v32  ;;  %v698_v14 = vor.u32 %v696_v39, %v695_v59 }
  0x2a   : > { %v1176_v46 = vld [vmem:[#allocation2 + $0xc] sm:$0xf]  ;;  %v1258_v47 = vshll.u32 %v1177_v44, 16  ;;  %v1262_v49 = vshrl.u32 %v1177_v44, 16  ;;  %1034 = vst [vmem:[#allocation2 + $0x48] sm:$0xf] %v1033_v58 }
  0x2b   : > { %v1299_v51 = vrot.slane %v1297_v40, 4  ;;  %v1302_v52 = vrot.slane %v1300_v42, 5  ;;  %v1249_v53 = vshrl.u32 %v1176_v46, 16  ;;  %v1252_v54 = vshll.u32 %v1176_v46, 16  ;;  %v631_v16 = vld [vmem:[#allocation2 + $0x2c] sm:$0x1] }
  0x2c   : > { %v1260_v56 = vrot.slane %v1258_v47, 5  ;;  %v1264_v57 = vrot.slane %v1262_v49, 4  ;;  %v1186_v63 = vld [vmem:[#allocation2 + $0x34] sm:$0xf]  ;;  %v699_v25 = vrot.slane %v695_v59, 4  ;;  %v704_v26 = vshll.u32 %v9581_v30, 16 }
  0x2d   : > { %v1303_v60 = vor.u32 %v1302_v52, %v1299_v51  ;;  %v1251_v61 = vrot.slane %v1249_v53, 4  ;;  %v1254_v62 = vrot.slane %v1252_v54, 5  ;;  %v1187_v0 = vld [vmem:[#allocation2 + $0x38] sm:$0x1]  ;;  %v1330_v4 = vshll.u32 %v1186_v63, 16 }
  0x2e   : > { %v1334_v5 = vshrl.u32 %v1186_v63, 16  ;;  %v1265_v6 = vor.u32 %v1264_v57, %v1260_v56  ;;  %v1340_v10 = vshll.u32 %v1187_v0, 16  ;;  %v1178_v11 = vld [vmem:[#allocation2 + $0x14] sm:$0x1]  ;;  %v9611_v28 = vld [vmem:[%s9504_s10 + $0x30] sm:$0xf]  ;;  %v706_v39 = vor.u32 %v704_v26, %v9599_v15 }
  0x2f   : > { %v1304_v7 = vrot.slane %v1303_v60, 4  ;;  %v1255_v8 = vor.u32 %v1254_v62, %v1251_v61  ;;  %v9597_v12 = vrot.slane %v1330_v4, 5  ;;  %v1268_v21 = vshll.u32 %v1178_v11, 16  ;;  %v9605_v22 = vld [vmem:[#allocation2 + $0x4c] sm:$0xf] }
  0x30   : > { %v1336_v13 = vrot.slane %v1334_v5, 4  ;;  %v1266_v24 = vrot.slane %v1265_v6, 4  ;;  %v1342_v32 = vrot.slane %v1340_v10, 5  ;;  %v1004_v33 = vld [vmem:[#allocation2 + $0x18] sm:$0xf]  ;;  %v632_v31 = vsel %vm9489_vm7, 0, %v631_v16 }
  0x31   : > { %v1309_v17 = vsel %vm9518_vm11, %v1304_v7, %v9591_v45  ;;  %v1256_v19 = vrot.slane %v1255_v8, 4  ;;  %v320_v34 = vld [vmem:[%s9504_s10 + $0x34] sm:$0xf]  ;;  %v1191_v36 = vld [vmem:[#allocation2 + $0x48] sm:$0xf]  ;;  %v1378_v37 = vshll.u32 %v9605_v22, 16  ;;  %v1005_v30 = vsel %vm9543_vm13, %v698_v14, %v1004_v33 }
  0x32   : > { %1620 = vrot.lane.b32.xlu0 %v1309_v17, %s9411_s11  ;;  %v1337_v23 = vor.u32 %v1336_v13, %v9597_v12  ;;  %633 = vst [vmem:[#allocation2 + $0x2c] sm:$0x1] %v632_v31  ;;  %v1270_v40 = vrot.slane %v1268_v21, 5  ;;  %v1369_v42 = vshrl.u32 %v1191_v36, 16  ;;  %v1372_v44 = vshll.u32 %v1191_v36, 16 }
  0x33   : > { %v1261_v29 = vsel %vm9518_vm11, %v1256_v19, %v1260_v56  ;;  %1006 = vst [vmem:[#allocation2 + $0x18] sm:$0xf] %v1005_v30  ;;  %v778_v46 = vshrl.u32 %v9611_v28, 16  ;;  %v707_v47 = vsel %vm9535_vm12, %v699_v25, %v706_v39  ;;  %v725_v49 = vrot.slane %v9526_v38, 4  ;;  %v643_v50 = vld [vmem:[#allocation2 + $0x5c] sm:$0x1] }
  0x34   : > { %1612 = vrot.lane.b32.xlu1 %v1261_v29, %s9411_s11  ;;  %v1338_v35 = vrot.slane %v1337_v23, 4  ;;  %v786_v51 = vshrl.u32 %v320_v34, 16  ;;  %v628_v52 = vld [vmem:[#allocation2 + $0x20] sm:$0x1]  ;;  %v1371_v54 = vrot.slane %v1369_v42, 4  ;;  %v1374_v55 = vrot.slane %v1372_v44, 5 }
  0x35   : > { %1007 = vst.msk [vmem:[#allocation2 + $0x1c] sm:$0xf] %vm562_vm0, %v707_v47  ;;  %v644_v56 = vsel %vm9489_vm7, 0, %v643_v50  ;;  %v9632_v57 = vrot.slane %v778_v46, 7  ;;  %v789_v38 = vshll.u32 %v320_v34, 16  ;;  %v629_v59 = vsel %vm9489_vm7, 0, %v628_v52 }
  0x36   : > { %v1343_v53 = vsel %vm9518_vm11, %v1338_v35, %v1342_v32  ;;  %645 = vst [vmem:[#allocation2 + $0x5c] sm:$0x1] %v644_v56  ;;  %v788_v58 = vrot.slane %v786_v51, 7  ;;  %v1271_v60 = vsel %vm9518_vm11, %v1266_v24, %v1270_v40  ;;  %v1375_v61 = vor.u32 %v1374_v55, %v1371_v54  ;;  %v315_v0 = vld [vmem:[%s9504_s10 + $0x20] sm:$0xf] }
  0x37   : > { %v9638_v62 = vrot.slane %v1378_v37, 5  ;;  %v9640_v63 = vrot.slane %v1310_v18, 4  ;;  %630 = vst [vmem:[#allocation2 + $0x20] sm:$0x1] %v629_v59  ;;  %v784_v4 = vrot.slane %v9632_v57, 4  ;;  %v744_v14 = vshrl.u32 %v315_v0, 16 }
  0x38   : > { %v791_v5 = vor.u32 %v789_v38, %v788_v58  ;;  %v793_v6 = vrot.slane %v788_v58, 4  ;;  %v316_v7 = vld [vmem:[%s9504_s10 + $0x24] sm:$0xf]  ;;  %v587_v8 = vld [vmem:[#allocation2 + $0x3c] sm:$0x1]  ;;  %v1376_v10 = vrot.slane %v1375_v61, 4 }
  0x39   : > { %v1015_v11 = vld [vmem:[#allocation2 + $0x2c] sm:$0x1]  ;;  %v588_v13 = vsel %vm9482_vm5, 0, %v587_v8  ;;  %v747_v16 = vshll.u32 %v315_v0, 16  ;;  %v752_v21 = vshrl.u32 %v316_v7, 16  ;;  %v755_v23 = vshll.u32 %v316_v7, 16 }
  0x3a   : > { %1626 = vrot.lane.b32.xlu0 %v1343_v53, %s9411_s11  ;;  %v1179_v17 = vld [vmem:[#allocation2 + $0x18] sm:$0xf]  ;;  %v1016_v18 = vsel %vm9482_vm5, %v725_v49, %v1015_v11  ;;  %v792_v19 = vsel %vm9535_vm12, %v784_v4, %v791_v5  ;;  %589 = vst [vmem:[#allocation2 + $0x3c] sm:$0x1] %v588_v13  ;;  %v708_v26 = vrot.slane %v9599_v15, 4  ;;  %v746_v29 = vrot.slane %v744_v14, 7 }
  0x3b   : > { %v1273_v24 = vshrl.u32 %v1179_v17, 16  ;;  %v1276_v25 = vshll.u32 %v1179_v17, 16  ;;  %1017 = vst [vmem:[#allocation2 + $0x2c] sm:$0x1] %v1016_v18  ;;  %v1381_v32 = vsel %vm9518_vm11, %v1376_v10, %v9638_v62  ;;  %v1382_v33 = vshrl.u32 %v9605_v22, 16 }
  0x3c   : > { %1614 = vrot.lane.b32.xlu1 %v1271_v60, %s9411_s11  ;;  %v1180_v31 = vld [vmem:[#allocation2 + $0x1c] sm:$0xf]  ;;  %v1313_v34 = vor.u32 %v9640_v63, %v9591_v45  ;;  %1042 = vst.msk [vmem:[#allocation2 + $0x58] sm:$0xf] %vm562_vm0, %v792_v19  ;;  %v9661_v35 = vrot.slane %v752_v21, 7  ;;  %v749_v44 = vor.u32 %v747_v16, %v746_v29  ;;  %v750_v46 = vrot.slane %v746_v29, 4 }
  0x3d   : > { %v1275_v36 = vrot.slane %v1273_v24, 4  ;;  %v1278_v37 = vrot.slane %v1276_v25, 5  ;;  %v1282_v15 = vshll.u32 %v1180_v31, 16  ;;  %v1286_v39 = vshrl.u32 %v1180_v31, 16  ;;  %v1043_v30 = vld [vmem:[#allocation2 + $0x5c] sm:$0x1] }
  0x3e   : > { %v1044_v40 = vsel %vm9482_vm5, %v793_v6, %v1043_v30  ;;  %v1008_v42 = vld [vmem:[#allocation2 + $0x20] sm:$0x1]  ;;  %v757_v47 = vor.u32 %v755_v23, %v9661_v35  ;;  %v324_v53 = vld [vmem:[%s9504_s10 + $0x44] sm:$0xf]  ;;  %v599_v55 = vld [vmem:[#allocation2 + $0x6c] sm:$0x1]  ;;  %v732_v22 = vor.u32 %v730_v9, %v9556_v2 }
  0x3f   : > { %v323_v49 = vld [vmem:[%s9504_s10 + $0x40] sm:$0xf]  ;;  %v1279_v45 = vor.u32 %v1278_v37, %v1275_v36  ;;  %v1284_v50 = vrot.slane %v1282_v15, 5  ;;  %v1288_v51 = vrot.slane %v1286_v39, 4  ;;  %1045 = vst [vmem:[#allocation2 + $0x5c] sm:$0x1] %v1044_v40  ;;  %v1009_v52 = vsel %vm9482_vm5, %v708_v26, %v1008_v42 }
  0x40   : > { %1010 = vst [vmem:[#allocation2 + $0x20] sm:$0x1] %v1009_v52  ;;  %v758_v54 = vsel %vm9535_vm12, %v750_v46, %v757_v47  ;;  %v812_v56 = vshrl.u32 %v323_v49, 16  ;;  %v815_v58 = vshll.u32 %v323_v49, 16  ;;  %v600_v61 = vsel %vm9482_vm5, 0, %v599_v55 }
  0x41   : > { %v1280_v38 = vrot.slane %v1279_v45, 4  ;;  %v1289_v59 = vor.u32 %v1288_v51, %v1284_v50  ;;  %v1025_v60 = vld [vmem:[#allocation2 + $0x3c] sm:$0xf]  ;;  %1028 = vst.msk [vmem:[#allocation2 + $0x40] sm:$0xf] %vm562_vm0, %v758_v54  ;;  %v820_v5 = vshrl.u32 %v324_v53, 16 }
  0x42   : > { %1632 = vrot.lane.b32.xlu0 %v1381_v32, %s9411_s11  ;;  %v1184_v63 = vld [vmem:[#allocation2 + $0x2c] sm:$0x1]  ;;  %v1026_v0 = vsel %vm9543_vm13, %v749_v44, %v1025_v60  ;;  %601 = vst [vmem:[#allocation2 + $0x6c] sm:$0x1] %v600_v61  ;;  %v814_v4 = vrot.slane %v812_v56, 7  ;;  %v1314_v7 = vrot.slane %v1313_v34, 4 }
  0x43   : > { %v1285_v6 = vsel %vm9518_vm11, %v1280_v38, %v1284_v50  ;;  %v1316_v8 = vshll.u32 %v1184_v63, 16  ;;  %v1195_v10 = vld [vmem:[#allocation2 + $0x58] sm:$0xf]  ;;  %1027 = vst [vmem:[#allocation2 + $0x3c] sm:$0xf] %v1026_v0  ;;  %v1290_v14 = vrot.slane %v1289_v59, 4 }
  0x44   : > { %1616 = vrot.lane.b32.xlu2 %v1285_v6, %s9411_s11  ;;  %v1402_v11 = vshll.u32 %v1195_v10, 16  ;;  %v1406_v13 = vshrl.u32 %v1195_v10, 16  ;;  %v818_v16 = vrot.slane %v814_v4, 4  ;;  %v584_v17 = vld [vmem:[#allocation2 + $0x30] sm:$0x1]  ;;  %v9681_v19 = vrot.slane %v820_v5, 7 }
  0x45   : > { %v1318_v18 = vrot.slane %v1316_v8, 5  ;;  %v823_v21 = vshll.u32 %v324_v53, 16  ;;  %v585_v23 = vsel %vm9482_vm5, 0, %v584_v17  ;;  %v640_v24 = vld [vmem:[#allocation2 + $0x50] sm:$0x1]  ;;  %v817_v32 = vor.u32 %v815_v58, %v814_v4 }
  0x46   : > { %v1196_v25 = vld [vmem:[#allocation2 + $0x5c] sm:$0x1]  ;;  %v9685_v26 = vrot.slane %v1402_v11, 5  ;;  %v1408_v29 = vrot.slane %v1406_v13, 4  ;;  %586 = vst [vmem:[#allocation2 + $0x30] sm:$0x1] %v585_v23 }
  0x47   : > { %v1319_v31 = vsel %vm9518_vm11, %v1314_v7, %v1318_v18  ;;  %v1412_v34 = vshll.u32 %v1196_v25, 16  ;;  %v1181_v36 = vld [vmem:[#allocation2 + $0x20] sm:$0x1]  ;;  %v825_v37 = vor.u32 %v823_v21, %v9681_v19  ;;  %v641_v15 = vsel %vm9489_vm7, 0, %v640_v24  ;;  %v9693_v39 = vld [vmem:[%s9504_s10 + $0x48] sm:$0xf] }
  0x48   : > { %1622 = vrot.lane.b32.xlu1 %v1319_v31, %s9411_s11  ;;  %v1409_v30 = vor.u32 %v1408_v29, %v9685_v26  ;;  %v1292_v40 = vshll.u32 %v1181_v36, 16  ;;  %v1189_v42 = vld [vmem:[#allocation2 + $0x40] sm:$0xf]  ;;  %642 = vst [vmem:[#allocation2 + $0x50] sm:$0x1] %v641_v15  ;;  %v1384_v44 = vrot.slane %v1382_v33, 4 }
  0x49   : > { %v1414_v46 = vrot.slane %v1412_v34, 5  ;;  %v1354_v47 = vshll.u32 %v1189_v42, 16  ;;  %v826_v49 = vsel %vm9535_vm12, %v818_v16, %v825_v37  ;;  %v1053_v45 = vld [vmem:[#allocation2 + $0x6c] sm:$0xf]  ;;  %v776_v50 = vrot.slane %v9568_v20, 4 }
  0x4a   : > { %v1410_v51 = vrot.slane %v1409_v30, 4  ;;  %v1294_v52 = vrot.slane %v1292_v40, 5  ;;  %v1188_v53 = vld [vmem:[#allocation2 + $0x3c] sm:$0xf]  ;;  %v1054_v54 = vsel %vm9543_vm13, %v817_v32, %v1053_v45  ;;  %1056 = vst.msk [vmem:[#allocation2 + $0x70] sm:$0xf] %vm562_vm0, %v826_v49  ;;  %v1385_v56 = vor.u32 %v1384_v44, %v9638_v62 }
  0x4b   : > { %v1345_v33 = vshrl.u32 %v1188_v53, 16  ;;  %v1348_v55 = vshll.u32 %v1188_v53, 16  ;;  %1055 = vst [vmem:[#allocation2 + $0x6c] sm:$0xf] %v1054_v54  ;;  %v829_v20 = vshrl.u32 %v9693_v39, 16  ;;  %v1356_v59 = vrot.slane %v1354_v47, 5 }
  0x4c   : > { %v1415_v58 = vsel %vm9518_vm11, %v1410_v51, %v1414_v46  ;;  %v1295_v38 = vsel %vm9518_vm11, %v1290_v14, %v1294_v52  ;;  %v1358_v60 = vshrl.u32 %v1189_v42, 16  ;;  %v326_v61 = vld [vmem:[%s9504_s10 + $0x4c] sm:$0xf]  ;;  %v652_v63 = vld [vmem:[#allocation2 + $0x80] sm:$0x1]  ;;  %v9723_v11 = vrot.slane %v1385_v56, 4 }
  0x4d   : > { %1638 = vrot.lane.b32.xlu0 %v1415_v58, %s9411_s11  ;;  %1618 = vrot.lane.b32.xlu2 %v1295_v38, %s9411_s11  ;;  %v1347_v41 = vrot.slane %v1345_v33, 4  ;;  %v1350_v2 = vrot.slane %v1348_v55, 5  ;;  %v1018_v9 = vld [vmem:[#allocation2 + $0x30] sm:$0xf]  ;;  %v653_v62 = vsel %vm9489_vm7, 0, %v652_v63  ;;  %v9719_v0 = vrot.slane %v829_v20, 7 }
  0x4e   : > { %v1019_v4 = vsel %vm9543_vm13, %v732_v22, %v1018_v9  ;;  %654 = vst [vmem:[#allocation2 + $0x80] sm:$0x1] %v653_v62  ;;  %v837_v5 = vshrl.u32 %v326_v61, 16  ;;  %v840_v6 = vshll.u32 %v326_v61, 16  ;;  %v637_v7 = vld [vmem:[#allocation2 + $0x44] sm:$0x1] }
  0x4f   : > { %v1351_v8 = vor.u32 %v1350_v2, %v1347_v41  ;;  %1020 = vst [vmem:[#allocation2 + $0x30] sm:$0xf] %v1019_v4  ;;  %v1036_v10 = vld [vmem:[#allocation2 + $0x50] sm:$0x1]  ;;  %v638_v13 = vsel %vm9489_vm7, 0, %v637_v7  ;;  %v835_v16 = vrot.slane %v9719_v0, 4 }
  0x50   : > { %v1037_v14 = vsel %vm9482_vm5, %v776_v50, %v1036_v10  ;;  %v839_v17 = vrot.slane %v837_v5, 7  ;;  %639 = vst [vmem:[#allocation2 + $0x44] sm:$0x1] %v638_v13  ;;  %v1360_v18 = vrot.slane %v1358_v60, 4  ;;  %v759_v24 = vrot.slane %v9661_v35, 4 }
  0x51   : > { %v1352_v21 = vrot.slane %v1351_v8, 4  ;;  %v9730_v23 = vld [vmem:[#allocation2 + $0x70] sm:$0xf]  ;;  %1038 = vst [vmem:[#allocation2 + $0x50] sm:$0x1] %v1037_v14  ;;  %vm1833_vm14 = vcmask 1042432  }
  0x52   : > { %v1200_v25 = vld [vmem:[#allocation2 + $0x6c] sm:$0xf]  ;;  %v1450_v29 = vshll.u32 %v9730_v23, 16  ;;  %v1454_v32 = vshrl.u32 %v9730_v23, 16  ;;  %v842_v31 = vor.u32 %v840_v6, %v839_v17  ;;  %v844_v34 = vrot.slane %v839_v17, 4 }
  0x53   : > { %v1357_v36 = vsel %vm9518_vm11, %v1352_v21, %v1356_v59  ;;  %v1441_v37 = vshrl.u32 %v1200_v25, 16  ;;  %v1444_v15 = vshll.u32 %v1200_v25, 16  ;;  %v1361_v30 = vor.u32 %v1360_v18, %v1356_v59  ;;  %v321_v40 = vld [vmem:[%s9504_s10 + $0x38] sm:$0xf]  ;;  %v322_v42 = vld [vmem:[%s9504_s10 + $0x3c] sm:$0xf] }
  0x54   : > { %1628 = vrot.lane.b32.xlu1 %v1357_v36, %s9411_s11  ;;  %v9740_v44 = vrot.slane %v1450_v29, 5  ;;  %v843_v35 = vsel %vm9535_vm12, %v835_v16, %v842_v31  ;;  %v596_v46 = vld [vmem:[#allocation2 + $0x60] sm:$0x1]  ;;  %v795_v47 = vshrl.u32 %v321_v40, 16  ;;  %v798_v49 = vshll.u32 %v321_v40, 16 }
  0x55   : > { %v1443_v45 = vrot.slane %v1441_v37, 4  ;;  %v1446_v50 = vrot.slane %v1444_v15, 5  ;;  %1063 = vst.msk [vmem:[#allocation2 + $0x7c] sm:$0xf] %vm562_vm0, %v843_v35  ;;  %v1064_v51 = vld [vmem:[#allocation2 + $0x80] sm:$0x1] }
  0x56   : > { %v1185_v52 = vld [vmem:[#allocation2 + $0x30] sm:$0xf]  ;;  %v1065_v53 = vsel %vm9482_vm5, %v844_v34, %v1064_v51  ;;  %v9747_v54 = vrot.slane %v1361_v30, 4  ;;  %v597_v22 = vsel %vm9482_vm5, 0, %v596_v46  ;;  %v797_v33 = vrot.slane %v795_v47, 7 }
  0x57   : > { %v1447_v55 = vor.u32 %v1446_v50, %v1443_v45  ;;  %v1321_v56 = vshrl.u32 %v1185_v52, 16  ;;  %v1324_v20 = vshll.u32 %v1185_v52, 16  ;;  %1066 = vst [vmem:[#allocation2 + $0x80] sm:$0x1] %v1065_v53  ;;  %v1029_v58 = vld [vmem:[#allocation2 + $0x44] sm:$0x1] }
  0x58   : > { %v1193_v38 = vld [vmem:[#allocation2 + $0x50] sm:$0x1]  ;;  %v1030_v59 = vsel %vm9482_vm5, %v759_v24, %v1029_v58  ;;  %598 = vst [vmem:[#allocation2 + $0x60] sm:$0x1] %v597_v22  ;;  %v801_v60 = vrot.slane %v797_v33, 4  ;;  %v803_v61 = vshrl.u32 %v322_v42, 16  ;;  %v800_v62 = vor.u32 %v798_v49, %v797_v33 }
  0x59   : > { %v1448_v63 = vrot.slane %v1447_v55, 4  ;;  %v1323_v41 = vrot.slane %v1321_v56, 4  ;;  %v1326_v2 = vrot.slane %v1324_v20, 5  ;;  %v1388_v9 = vshll.u32 %v1193_v38, 16  ;;  %1031 = vst [vmem:[#allocation2 + $0x44] sm:$0x1] %v1030_v59 }
  0x5a   : > { %v9753_v4 = vrot.slane %v803_v61, 7  ;;  %v806_v5 = vshll.u32 %v322_v42, 16  ;;  %v329_v6 = vld [vmem:[%s9504_s10 + $0x58] sm:$0xf]  ;;  %v330_v7 = vld [vmem:[%s9504_s10 + $0x5c] sm:$0xf] }
  0x5b   : > { %v1453_v8 = vsel %vm9518_vm11, %v1448_v63, %v9740_v44  ;;  %v1327_v10 = vor.u32 %v1326_v2, %v1323_v41  ;;  %v1390_v13 = vrot.slane %v1388_v9, 5  ;;  %v608_v14 = vld [vmem:[#allocation2 + $0x90] sm:$0x1]  ;;  %v863_v16 = vshrl.u32 %v329_v6, 16  ;;  %v593_v29 = vld [vmem:[#allocation2 + $0x54] sm:$0x1] }
  0x5c   : > { %1644 = vrot.lane.b32.xlu0 %v1453_v8, %s9411_s11  ;;  %v1204_v17 = vld [vmem:[#allocation2 + $0x7c] sm:$0xf]  ;;  %v808_v18 = vor.u32 %v806_v5, %v9753_v4  ;;  %v609_v21 = vsel %vm9482_vm5, 0, %v608_v14  ;;  %v866_v24 = vshll.u32 %v329_v6, 16  ;;  %v871_v25 = vshrl.u32 %v330_v7, 16 }
  0x5d   : > { %v1328_v31 = vrot.slane %v1327_v10, 4  ;;  %v1391_v34 = vsel %vm9518_vm11, %v9723_v11, %v1390_v13  ;;  %v1474_v36 = vshll.u32 %v1204_v17, 16  ;;  %v1478_v37 = vshrl.u32 %v1204_v17, 16  ;;  %610 = vst [vmem:[#allocation2 + $0x90] sm:$0x1] %v609_v21 }
  0x5e   : > { %1634 = vrot.lane.b32.xlu1 %v1391_v34, %s9411_s11  ;;  %v1205_v15 = vld [vmem:[#allocation2 + $0x80] sm:$0x1]  ;;  %v809_v30 = vsel %vm9535_vm12, %v801_v60, %v808_v18  ;;  %v865_v40 = vrot.slane %v863_v16, 7  ;;  %v9770_v42 = vrot.slane %v871_v25, 7  ;;  %v874_v35 = vshll.u32 %v330_v7, 16 }
  0x5f   : > { %v1333_v46 = vsel %vm9518_vm11, %v1328_v31, %v9597_v12  ;;  %v9775_v47 = vrot.slane %v1474_v36, 5  ;;  %v1480_v11 = vrot.slane %v1478_v37, 4  ;;  %v1484_v49 = vshll.u32 %v1205_v15, 16  ;;  %v1046_v45 = vld [vmem:[#allocation2 + $0x60] sm:$0xf] }
  0x60   : > { %1624 = vrot.lane.b32.xlu2 %v1333_v46, %s9411_s11  ;;  %v1190_v50 = vld [vmem:[#allocation2 + $0x44] sm:$0x1]  ;;  %v1047_v51 = vsel %vm9543_vm13, %v800_v62, %v1046_v45  ;;  %1049 = vst.msk [vmem:[#allocation2 + $0x64] sm:$0xf] %vm562_vm0, %v809_v30  ;;  %v868_v52 = vor.u32 %v866_v24, %v865_v40  ;;  %v869_v53 = vrot.slane %v865_v40, 4  ;;  %v876_v22 = vor.u32 %v874_v35, %v9770_v42 }
  0x61   : > { %v1481_v33 = vor.u32 %v1480_v11, %v9775_v47  ;;  %v1486_v12 = vrot.slane %v1484_v49, 5  ;;  %v1364_v55 = vshll.u32 %v1190_v50, 16  ;;  %1048 = vst [vmem:[#allocation2 + $0x60] sm:$0xf] %v1047_v51  ;;  %v594_v56 = vsel %vm9482_vm5, 0, %v593_v29 }
  0x62   : > { %v781_v20 = vshll.u32 %v9611_v28, 16  ;;  %v877_v58 = vsel %vm9535_vm12, %v869_v53, %v876_v22  ;;  %595 = vst [vmem:[#allocation2 + $0x54] sm:$0x1] %v594_v56  ;;  %v649_v38 = vld [vmem:[#allocation2 + $0x74] sm:$0x1]  ;;  %v1456_v63 = vrot.slane %v1454_v32, 4 }
  0x63   : > { %v1482_v59 = vrot.slane %v1481_v33, 4  ;;  %v1366_v60 = vrot.slane %v1364_v55, 5  ;;  %1077 = vst.msk [vmem:[#allocation2 + $0x94] sm:$0xf] %vm562_vm0, %v877_v58  ;;  %v650_v61 = vsel %vm9489_vm7, 0, %v649_v38  ;;  %v810_v37 = vrot.slane %v9753_v4, 4 }
  0x64   : > { %v1074_v41 = vld [vmem:[#allocation2 + $0x90] sm:$0xf]  ;;  %651 = vst [vmem:[#allocation2 + $0x74] sm:$0x1] %v650_v61  ;;  %v9794_v2 = vld [vmem:[%s9504_s10 + $0x60] sm:$0xf]  ;;  %v783_v23 = vor.u32 %v781_v20, %v9632_v57  ;;  %v1457_v13 = vor.u32 %v1456_v63, %v9740_v44 }
  0x65   : > { %v1487_v28 = vsel %vm9518_vm11, %v1482_v59, %v1486_v12  ;;  %v1367_v9 = vsel %vm9518_vm11, %v9747_v54, %v1366_v60  ;;  %v1075_v62 = vsel %vm9543_vm13, %v868_v52, %v1074_v41  ;;  %v332_v5 = vld [vmem:[%s9504_s10 + $0x64] sm:$0xf]  ;;  %v880_v7 = vshrl.u32 %v9794_v2, 16  ;;  %v646_v36 = vld [vmem:[#allocation2 + $0x68] sm:$0x1] }
  0x66   : > { %v661_v6 = vld [vmem:[#allocation2 + $0xa4] sm:$0x1]  ;;  %1650 = vrot.lane.b32.xlu0 %v1487_v28, %s9411_s11  ;;  %1076 = vst [vmem:[#allocation2 + $0x90] sm:$0xf] %v1075_v62  ;;  %v888_v8 = vshrl.u32 %v332_v5, 16  ;;  %v891_v14 = vshll.u32 %v332_v5, 16 }
  0x67   : > { %v662_v32 = vsel %vm9489_vm7, 0, %v661_v6  ;;  %v1198_v10 = vld [vmem:[#allocation2 + $0x64] sm:$0xf]  ;;  %v9810_v54 = vrot.slane %v880_v7, 7  ;;  %v827_v57 = vrot.slane %v9681_v19, 4  ;;  %v9820_v40 = vrot.slane %v1457_v13, 4 }
  0x68   : > { %663 = vst [vmem:[#allocation2 + $0xa4] sm:$0x1] %v662_v32  ;;  %1630 = vrot.lane.b32.xlu2 %v1367_v9, %s9411_s11  ;;  %v1197_v16 = vld [vmem:[#allocation2 + $0x60] sm:$0xf]  ;;  %v1426_v17 = vshll.u32 %v1198_v10, 16  ;;  %v890_v18 = vrot.slane %v888_v8, 7 }
  0x69   : > { %v1417_v21 = vshrl.u32 %v1197_v16, 16  ;;  %v1420_v24 = vshll.u32 %v1197_v16, 16  ;;  %v1039_v25 = vld [vmem:[#allocation2 + $0x54] sm:$0xf]  ;;  %v886_v29 = vrot.slane %v9810_v54, 4  ;;  %v647_v49 = vsel %vm9489_vm7, 0, %v646_v36 }
  0x6a   : > { %v9815_v31 = vld [vmem:[#allocation2 + $0x94] sm:$0xf]  ;;  %v1040_v44 = vsel %vm9543_vm13, %v783_v23, %v1039_v25  ;;  %v893_v34 = vor.u32 %v891_v14, %v890_v18  ;;  %v895_v35 = vrot.slane %v890_v18, 4  ;;  %v9822_v46 = vrot.slane %v1426_v17, 5  ;;  %v327_v45 = vld [vmem:[%s9504_s10 + $0x50] sm:$0xf] }
  0x6b   : > { %v1419_v15 = vrot.slane %v1417_v21, 4  ;;  %v1422_v30 = vrot.slane %v1420_v24, 5  ;;  %1041 = vst [vmem:[#allocation2 + $0x54] sm:$0xf] %v1040_v44  ;;  %v1057_v19 = vld [vmem:[#allocation2 + $0x74] sm:$0x1] }
  0x6c   : > { %v894_v11 = vsel %vm9535_vm12, %v886_v29, %v893_v34  ;;  %v1522_v52 = vshll.u32 %v9815_v31, 16  ;;  %v1058_v53 = vsel %vm9482_vm5, %v827_v57, %v1057_v19  ;;  %v846_v22 = vshrl.u32 %v327_v45, 16  ;;  %648 = vst [vmem:[#allocation2 + $0x68] sm:$0x1] %v647_v49  ;;  %v328_v38 = vld [vmem:[%s9504_s10 + $0x54] sm:$0xf] }
  0x6d   : > { %v1423_v50 = vor.u32 %v1422_v30, %v1419_v15  ;;  %v1209_v51 = vld [vmem:[#allocation2 + $0x90] sm:$0xf]  ;;  %1084 = vst.msk [vmem:[#allocation2 + $0xa0] sm:$0xf] %vm562_vm0, %v894_v11  ;;  %v1430_v20 = vshrl.u32 %v1198_v10, 16  ;;  %v849_v63 = vshll.u32 %v327_v45, 16 }
  0x6e   : > { %v1513_v33 = vshrl.u32 %v1209_v51, 16  ;;  %v1516_v12 = vshll.u32 %v1209_v51, 16  ;;  %1059 = vst [vmem:[#allocation2 + $0x74] sm:$0x1] %v1058_v53  ;;  %v848_v61 = vrot.slane %v846_v22, 7  ;;  %v9839_v28 = vrot.slane %v1522_v52, 5 }
  0x6f   : > { %v1085_v55 = vld [vmem:[#allocation2 + $0xa4] sm:$0x1]  ;;  %v1424_v56 = vrot.slane %v1423_v50, 4  ;;  %v1526_v9 = vshrl.u32 %v9815_v31, 16  ;;  %v854_v5 = vshrl.u32 %v328_v38, 16  ;;  %v857_v32 = vshll.u32 %v328_v38, 16 }
  0x70   : > { %v1086_v58 = vsel %vm9482_vm5, %v895_v35, %v1085_v55  ;;  %v1515_v59 = vrot.slane %v1513_v33, 4  ;;  %v1518_v60 = vrot.slane %v1516_v12, 5  ;;  %v605_v62 = vld [vmem:[#allocation2 + $0x84] sm:$0x1]  ;;  %v335_v8 = vld [vmem:[%s9504_s10 + $0x70] sm:$0xf]  ;;  %v851_v21 = vor.u32 %v849_v63, %v848_v61 }
  0x71   : > { %1087 = vst [vmem:[#allocation2 + $0xa4] sm:$0x1] %v1086_v58  ;;  %v1429_v41 = vsel %vm9518_vm11, %v1424_v56, %v9822_v46  ;;  %v606_v23 = vsel %vm9482_vm5, 0, %v605_v62  ;;  %v9846_v14 = vrot.slane %v1430_v20, 4  ;;  %v9848_v16 = vrot.slane %v854_v5, 7 }
  0x72   : > { %1640 = vrot.lane.b32.xlu1 %v1429_v41, %s9411_s11  ;;  %v1519_v6 = vor.u32 %v1518_v60, %v1515_v59  ;;  %v1194_v7 = vld [vmem:[#allocation2 + $0x54] sm:$0xf]  ;;  %607 = vst [vmem:[#allocation2 + $0x84] sm:$0x1] %v606_v23  ;;  %v852_v24 = vrot.slane %v848_v61, 4  ;;  %v914_v25 = vshrl.u32 %v335_v8, 16 }
  0x73   : > { %v1393_v10 = vshrl.u32 %v1194_v7, 16  ;;  %v1396_v13 = vshll.u32 %v1194_v7, 16  ;;  %v336_v15 = vld [vmem:[%s9504_s10 + $0x74] sm:$0xf]  ;;  %v1050_v19 = vld [vmem:[#allocation2 + $0x68] sm:$0x1]  ;;  %v859_v11 = vor.u32 %v857_v32, %v9848_v16  ;;  %v1433_v61 = vor.u32 %v9846_v14, %v9822_v46 }
  0x74   : > { %v1520_v17 = vrot.slane %v1519_v6, 4  ;;  %v1213_v18 = vld [vmem:[#allocation2 + $0xa0] sm:$0xf]  ;;  %v617_v49 = vld [vmem:[#allocation2 + $0xb4] sm:$0x1]  ;;  %v917_v45 = vshll.u32 %v335_v8, 16  ;;  %v1051_v22 = vsel %vm9482_vm5, %v810_v37, %v1050_v19 }
  0x75   : > { %v1395_v57 = vrot.slane %v1393_v10, 4  ;;  %v1398_v29 = vrot.slane %v1396_v13, 5  ;;  %v1202_v44 = vld [vmem:[#allocation2 + $0x74] sm:$0x1]  ;;  %v1546_v34 = vshll.u32 %v1213_v18, 16  ;;  %v1550_v36 = vshrl.u32 %v1213_v18, 16 }
  0x76   : > { %v1525_v30 = vsel %vm9518_vm11, %v1520_v17, %v9839_v28  ;;  %v1460_v35 = vshll.u32 %v1202_v44, 16  ;;  %v602_v33 = vld [vmem:[#allocation2 + $0x78] sm:$0x1]  ;;  %1052 = vst [vmem:[#allocation2 + $0x68] sm:$0x1] %v1051_v22  ;;  %v860_v56 = vsel %vm9535_vm12, %v852_v24, %v859_v11  ;;  %v618_v20 = vsel %vm9482_vm5, 0, %v617_v49 }
  0x77   : > { %1656 = vrot.lane.b32.xlu0 %v1525_v30, %s9411_s11  ;;  %v1399_v50 = vor.u32 %v1398_v29, %v1395_v57  ;;  %v9856_v52 = vrot.slane %v1546_v34, 5  ;;  %v1552_v53 = vrot.slane %v1550_v36, 4  ;;  %1070 = vst.msk [vmem:[#allocation2 + $0x88] sm:$0xf] %vm562_vm0, %v860_v56  ;;  %v916_v59 = vrot.slane %v914_v25, 7 }
  0x78   : > { %v1214_v51 = vld [vmem:[#allocation2 + $0xa4] sm:$0x1]  ;;  %v1462_v12 = vrot.slane %v1460_v35, 5  ;;  %v658_v4 = vld [vmem:[#allocation2 + $0x98] sm:$0x1]  ;;  %v922_v41 = vshrl.u32 %v336_v15, 16 }
  0x79   : > { %v1556_v55 = vshll.u32 %v1214_v51, 16  ;;  %v1400_v58 = vrot.slane %v1399_v50, 4  ;;  %v1553_v38 = vor.u32 %v1552_v53, %v9856_v52  ;;  %v1067_v63 = vld [vmem:[#allocation2 + $0x84] sm:$0xf]  ;;  %619 = vst [vmem:[#allocation2 + $0xb4] sm:$0x1] %v618_v20  ;;  %v919_v10 = vor.u32 %v917_v45, %v916_v59 }
  0x7a   : > { %v1463_v37 = vsel %vm9518_vm11, %v9820_v40, %v1462_v12  ;;  %v1068_v6 = vsel %vm9543_vm13, %v851_v21, %v1067_v63  ;;  %v925_v7 = vshll.u32 %v336_v15, 16  ;;  %v920_v40 = vrot.slane %v916_v59, 4  ;;  %v655_v17 = vld [vmem:[#allocation2 + $0x8c] sm:$0x1]  ;;  %v333_v25 = vld [vmem:[%s9504_s10 + $0x68] sm:$0xf] }
  0x7b   : > { %v1558_v60 = vrot.slane %v1556_v55, 5  ;;  %v1405_v62 = vsel %vm9518_vm11, %v1400_v58, %v9685_v26  ;;  %1646 = vrot.lane.b32.xlu1 %v1463_v37, %s9411_s11  ;;  %v1554_v5 = vrot.slane %v1553_v38, 4  ;;  %1069 = vst [vmem:[#allocation2 + $0x84] sm:$0xf] %v1068_v6  ;;  %v9880_v46 = vrot.slane %v922_v41, 7 }
  0x7c   : > { %1636 = vrot.lane.b32.xlu2 %v1405_v62, %s9411_s11  ;;  %v603_v23 = vsel %vm9482_vm5, 0, %v602_v33  ;;  %v659_v26 = vsel %vm9489_vm7, 0, %v658_v4  ;;  %v832_v32 = vshll.u32 %v9693_v39, 16  ;;  %v878_v14 = vrot.slane %v9770_v42, 4  ;;  %v614_v49 = vld [vmem:[#allocation2 + $0xa8] sm:$0x1] }
  0x7d   : > { %v1559_v8 = vsel %vm9518_vm11, %v1554_v5, %v1558_v60  ;;  %604 = vst [vmem:[#allocation2 + $0x78] sm:$0x1] %v603_v23  ;;  %v927_v13 = vor.u32 %v925_v7, %v9880_v46  ;;  %v1199_v18 = vld [vmem:[#allocation2 + $0x68] sm:$0x1]  ;;  %v1434_v21 = vrot.slane %v1433_v61, 4  ;;  %v656_v24 = vsel %vm9489_vm7, 0, %v655_v17 }
  0x7e   : > { %660 = vst [vmem:[#allocation2 + $0x98] sm:$0x1] %v659_v26  ;;  %v1436_v39 = vshll.u32 %v1199_v18, 16  ;;  %v1207_v57 = vld [vmem:[#allocation2 + $0x88] sm:$0xf]  ;;  %v1528_v44 = vrot.slane %v1526_v9, 4  ;;  %v834_v34 = vor.u32 %v832_v32, %v9719_v0 }
  0x7f   : > { %1662 = vrot.lane.b32.xlu0 %v1559_v8, %s9411_s11  ;;  %v928_v29 = vsel %vm9535_vm12, %v920_v40, %v927_v13  ;;  %657 = vst [vmem:[#allocation2 + $0x8c] sm:$0x1] %v656_v24  ;;  %v861_v36 = vrot.slane %v9848_v16, 4  ;;  %v897_v15 = vshrl.u32 %v333_v25, 16  ;;  %v1498_v35 = vshll.u32 %v1207_v57, 16 }
  0x80   : > { %v1095_v42 = vld [vmem:[#allocation2 + $0xb4] sm:$0xf]  ;;  %1098 = vst.msk [vmem:[#allocation2 + $0xb8] sm:$0xf] %vm562_vm0, %v928_v29  ;;  %v1438_v30 = vrot.slane %v1436_v39, 5  ;;  %v1502_v19 = vshrl.u32 %v1207_v57, 16  ;;  %v1529_v59 = vor.u32 %v1528_v44, %v9839_v28 }
  0x81   : > { %v1096_v11 = vsel %vm9543_vm13, %v919_v10, %v1095_v42  ;;  %v334_v31 = vld [vmem:[%s9504_s10 + $0x6c] sm:$0xf]  ;;  %v615_v0 = vsel %vm9482_vm5, 0, %v614_v49  ;;  %v899_v33 = vrot.slane %v897_v15, 7  ;;  %v900_v12 = vshll.u32 %v333_v25, 16 }
  0x82   : > { %v1206_v45 = vld [vmem:[#allocation2 + $0x84] sm:$0xf]  ;;  %1097 = vst [vmem:[#allocation2 + $0xb4] sm:$0xf] %v1096_v11  ;;  %v1439_v9 = vsel %vm9518_vm11, %v1434_v21, %v1438_v30  ;;  %v905_v58 = vshrl.u32 %v334_v31, 16  ;;  %v9914_v38 = vrot.slane %v1498_v35, 5 }
  0x83   : > { %v1489_v50 = vshrl.u32 %v1206_v45, 16  ;;  %v1492_v51 = vshll.u32 %v1206_v45, 16  ;;  %616 = vst [vmem:[#allocation2 + $0xa8] sm:$0x1] %v615_v0  ;;  %v908_v37 = vshll.u32 %v334_v31, 16  ;;  %v903_v41 = vrot.slane %v899_v33, 4 }
  0x84   : > { %v1060_v53 = vld [vmem:[#allocation2 + $0x78] sm:$0xf]  ;;  %1642 = vrot.lane.b32.xlu2 %v1439_v9, %s9411_s11  ;;  %v9921_v62 = vrot.slane %v905_v58, 7  ;;  %v902_v5 = vor.u32 %v900_v12, %v899_v33  ;;  %v883_v6 = vshll.u32 %v9794_v2, 16  ;;  %v1530_v8 = vrot.slane %v1529_v59, 4 }
  0x85   : > { %v1061_v16 = vsel %vm9543_vm13, %v834_v34, %v1060_v53  ;;  %v1078_v22 = vld [vmem:[#allocation2 + $0x98] sm:$0x1]  ;;  %v1491_v55 = vrot.slane %v1489_v50, 4  ;;  %v1494_v56 = vrot.slane %v1492_v51, 5  ;;  %v611_v10 = vld [vmem:[#allocation2 + $0x9c] sm:$0x1] }
  0x86   : > { %1062 = vst [vmem:[#allocation2 + $0x78] sm:$0xf] %v1061_v16  ;;  %v1079_v20 = vsel %vm9482_vm5, %v878_v14, %v1078_v22  ;;  %v1071_v4 = vld [vmem:[#allocation2 + $0x8c] sm:$0x1]  ;;  %v910_v23 = vor.u32 %v908_v37, %v9921_v62  ;;  %v9929_v14 = vld [vmem:[#allocation2 + $0x4] sm:$0xf]  ;;  %v885_v53 = vor.u32 %v883_v6, %v9810_v54 }
  0x87   : > { %1080 = vst [vmem:[#allocation2 + $0x98] sm:$0x1] %v1079_v20  ;;  %v1495_v60 = vor.u32 %v1494_v56, %v1491_v55  ;;  %v9917_v61 = vld [vmem:[#allocation2 + $0xb8] sm:$0xf]  ;;  %v1072_v63 = vsel %vm9482_vm5, %v861_v36, %v1071_v4  ;;  %v1504_v17 = vrot.slane %v1502_v19, 4  ;;  %v612_v21 = vsel %vm9482_vm5, 0, %v611_v10 }
  0x88   : > { %1073 = vst [vmem:[#allocation2 + $0x8c] sm:$0x1] %v1072_v63  ;;  %v1594_v32 = vshll.u32 %v9917_v61, 16  ;;  %v911_v2 = vsel %vm9535_vm12, %v903_v41, %v910_v23  ;;  %v667_v24 = vld [vmem:[#allocation2 + $0xbc] sm:$0x1]  ;;  %v1838_v9 = vrot.slane %v9929_v14, 5 }
  0x89   : > { %v1496_v7 = vrot.slane %v1495_v60, 4  ;;  %v1218_v40 = vld [vmem:[#allocation2 + $0xb4] sm:$0xf]  ;;  %1091 = vst.msk [vmem:[#allocation2 + $0xac] sm:$0xf] %vm562_vm0, %v911_v2  ;;  %v668_v35 = vsel %vm9489_vm7, 0, %v667_v24  ;;  %v1505_v12 = vor.u32 %v1504_v17, %v9914_v38 }
  0x8a   : > { %v1585_v28 = vshrl.u32 %v1218_v40, 16  ;;  %v1588_v26 = vshll.u32 %v1218_v40, 16  ;;  %v1088_v18 = vld [vmem:[#allocation2 + $0xa8] sm:$0xf]  ;;  %v9939_v15 = vrot.slane %v1594_v32, 5  ;;  %vm1834_vm15 = vcmask 1046532  }
  0x8b   : > { %v1501_v13 = vsel %vm9518_vm11, %v1496_v7, %v9914_v38  ;;  %v1089_v29 = vsel %vm9543_vm13, %v902_v5, %v1088_v18  ;;  %613 = vst [vmem:[#allocation2 + $0x9c] sm:$0x1] %v612_v21  ;;  %v1739_v49 = vld [vmem:[#allocation2 + $0x8] sm:$0x1]  ;;  %v664_v0 = vld [vmem:[#allocation2 + $0xb0] sm:$0x1]  ;;  %vm9964_vm1 = vmor %vm1833_vm14, %vm1834_vm15 }
  0x8c   : > { %1652 = vrot.lane.b32.xlu1 %v1501_v13, %s9411_s11  ;;  %v1587_v25 = vrot.slane %v1585_v28, 4  ;;  %v1590_v39 = vrot.slane %v1588_v26, 5  ;;  %1090 = vst [vmem:[#allocation2 + $0xa8] sm:$0xf] %v1089_v29  ;;  %v1841_v33 = vrot.slane %v1739_v49, 5  ;;  %v929_v58 = vrot.slane %v9880_v46, 4 }
  0x8d   : > { %v1203_v57 = vld [vmem:[#allocation2 + $0x78] sm:$0xf]  ;;  %669 = vst [vmem:[#allocation2 + $0xbc] sm:$0x1] %v668_v35  ;;  %v665_v54 = vsel %vm9489_vm7, 0, %v664_v0  ;;  %v1598_v59 = vshrl.u32 %v9917_v61, 16 }
  0x8e   : > { %v1465_v44 = vshrl.u32 %v1203_v57, 16  ;;  %v1468_v42 = vshll.u32 %v1203_v57, 16  ;;  %v1211_v34 = vld [vmem:[#allocation2 + $0x98] sm:$0x1]  ;;  %v1591_v36 = vor.u32 %v1590_v39, %v1587_v25  ;;  %v1840_v4 = vrot.slane %v1838_v9, 4 }
  0x8f   : > { %v1532_v30 = vshll.u32 %v1211_v34, 16  ;;  %v1208_v50 = vld [vmem:[#allocation2 + $0x8c] sm:$0x1]  ;;  %666 = vst [vmem:[#allocation2 + $0xb0] sm:$0x1] %v665_v54  ;;  %v1506_v5 = vrot.slane %v1505_v12, 4  ;;  %v1609_v17 = vpop.permute.xlu0 %1608 }
  0x90   : > { %v1467_v19 = vrot.slane %v1465_v44, 4  ;;  %v1470_v11 = vrot.slane %v1468_v42, 5  ;;  %v1592_v45 = vrot.slane %v1591_v36, 4  ;;  %v1508_v56 = vshll.u32 %v1208_v50, 16  ;;  %v1216_v20 = vld [vmem:[#allocation2 + $0xac] sm:$0xf] }
  0x91   : > { %v1534_v31 = vrot.slane %v1532_v30, 5  ;;  %v1570_v61 = vshll.u32 %v1216_v20, 16  ;;  %v1743_v6 = vld [vmem:[#allocation2 + $0x18] sm:$0xe]  ;;  %v1842_v32 = vsel %vm9964_vm1, %v1840_v4, %v1841_v33  ;;  %v1600_v10 = vrot.slane %v1598_v59, 4 }
  0x92   : > { %v1471_v51 = vor.u32 %v1470_v11, %v1467_v19  ;;  %v1597_v16 = vsel %vm9518_vm11, %v1592_v45, %v9939_v15  ;;  %v1081_v41 = vld [vmem:[#allocation2 + $0x9c] sm:$0xf]  ;;  %v1510_v23 = vrot.slane %v1508_v56, 5  ;;  %v912_v13 = vrot.slane %v9921_v62, 4  ;;  %v1109_v24 = vld [vmem:[#allocation2] sm:$0xf] }
  0x93   : > { %v1535_v22 = vsel %vm9518_vm11, %v1530_v8, %v1534_v31  ;;  %1668 = vrot.lane.b32.xlu0 %v1597_v16, %s9411_s11  ;;  %v1215_v37 = vld [vmem:[#allocation2 + $0xa8] sm:$0xf]  ;;  %v1082_v7 = vsel %vm9543_vm13, %v885_v53, %v1081_v41  ;;  %v9975_v8 = vld [vmem:[#allocation2 + $0x1c] sm:$0xf]  ;;  %v9978_v18 = vrot.slane %v1570_v61, 5  ;;  %vm1704_vm3 = vcmask 60448  }
  0x94   : > { %v1472_v55 = vrot.slane %v1471_v51, 4  ;;  %1658 = vrot.lane.b32.xlu1 %v1535_v22, %s9411_s11  ;;  %v1561_v60 = vshrl.u32 %v1215_v37, 16  ;;  %v1564_v63 = vshll.u32 %v1215_v37, 16  ;;  %v1099_v40 = vld [vmem:[#allocation2 + $0xbc] sm:$0x1]  ;;  %v9026_v21 = vrot.slane %v1743_v6, 9 }
  0x95   : > { %1083 = vst [vmem:[#allocation2 + $0x9c] sm:$0xf] %v1082_v7  ;;  %v1100_v26 = vsel %vm9482_vm5, %v929_v58, %v1099_v40  ;;  %v1511_v25 = vsel %vm9518_vm11, %v1506_v5, %v1510_v23  ;;  %v1852_v57 = vrot.slane %v9975_v8, 5  ;;  %v1574_v62 = vshrl.u32 %v1216_v20, 16  ;;  %v9992_v36 = vld [vmem:[#allocation2 + $0x28] sm:$0xf] }
  0x96   : > { %v1477_v38 = vsel %vm9518_vm11, %v1472_v55, %v9775_v47  ;;  %v1563_v47 = vrot.slane %v1561_v60, 4  ;;  %v1566_v28 = vrot.slane %v1564_v63, 5  ;;  %1101 = vst [vmem:[#allocation2 + $0xbc] sm:$0x1] %v1100_v26  ;;  %v1092_v29 = vld [vmem:[#allocation2 + $0xb0] sm:$0x1]  ;;  %v1601_v44 = vor.u32 %v1600_v10, %v9939_v15 }
  0x97   : > { %1648 = vrot.lane.b32.xlu2 %v1477_v38, %s9411_s11  ;;  %1141 = vst.msk [vmem:[#allocation4] sm:$0xf] %vm562_vm0, %v1109_v24  ;;  %v1093_v42 = vsel %vm9482_vm5, %v912_v13, %v1092_v29  ;;  %v1853_v15 = vsel %vm9964_vm1, %v9026_v21, %v1852_v57  ;;  %v1748_v49 = vld [vmem:[#allocation2 + $0x2c] sm:$0x1]  ;;  %v1859_v50 = vrot.slane %v9992_v36, 5  ;;  %v1576_v51 = vrot.slane %v1574_v62, 4  ;;  %v1611_v0 = vpop.permute.xlu0 %1610 }
  0x98   : > { %v1567_v2 = vor.u32 %v1566_v28, %v1563_v47  ;;  %1705 = vst.msk [vmem:[#allocation4] sm:$0xf] %vm1704_vm3, %v1609_v17  ;;  %v1602_v45 = vrot.slane %v1601_v44, 4  ;;  %v1110_v53 = vld [vmem:[#allocation2 + $0x4] sm:$0xf]  ;;  %v1862_v4 = vrot.slane %v1748_v49, 5 }
  0x99   : > { %1094 = vst [vmem:[#allocation2 + $0xb0] sm:$0x1] %v1093_v42  ;;  %v1113_v12 = vld [vmem:[#allocation2 + $0x18] sm:$0xf]  ;;  %v1740_v20 = vld [vmem:[#allocation2 + $0xc] sm:$0xe]  ;;  %v1577_v60 = vor.u32 %v1576_v51, %v9978_v18 }
  0x9a   : > { %v1568_v39 = vrot.slane %v1567_v2, 4  ;;  %1142 = vst.msk [vmem:[#allocation4 + $0x4] sm:$0xf] %vm562_vm0, %v1110_v53  ;;  %v10004_v58 = vld [vmem:[#allocation2 + $0x10] sm:$0xf]  ;;  %v1861_v59 = vrot.slane %v1859_v50, 4 }
  0x9b   : > { %1950 = vrot.lane.b32.xlu0 %v1842_v32, %s9412_s12  ;;  %1706 = vst.msk [vmem:[#allocation4 + $0x4] sm:$0xf] %vm1704_vm3, %v1611_v0  ;;  %v1752_v61 = vld [vmem:[#allocation2 + $0x3c] sm:$0xe]  ;;  %v9025_v5 = vrot.slane %v1740_v20, 9  ;;  %v1845_v6 = vrot.slane %v10004_v58, 5 }
  0x9c   : > { %v1573_v34 = vsel %vm9518_vm11, %v1568_v39, %v9978_v18  ;;  %v1212_v30 = vld [vmem:[#allocation2 + $0x9c] sm:$0xf]  ;;  %1145 = vst.msk [vmem:[#allocation4 + $0x10] sm:$0xf] %vm562_vm0, %v1113_v12  ;;  %v1863_v7 = vsel %vm9964_vm1, %v1861_v59, %v1862_v4  ;;  %v10021_v40 = vld [vmem:[#allocation2 + $0x40] sm:$0xf] }
  0x9d   : > { %1664 = vrot.lane.b32.xlu1 %v1573_v34, %s9411_s11  ;;  %v1537_v35 = vshrl.u32 %v1212_v30, 16  ;;  %v1540_v19 = vshll.u32 %v1212_v30, 16  ;;  %v1220_v11 = vld [vmem:[#allocation2 + $0xbc] sm:$0x1]  ;;  %v1115_v47 = vld [vmem:[#allocation2 + $0x24] sm:$0xf]  ;;  %v1846_v17 = vsel %vm9964_vm1, %v9025_v5, %v1845_v6 }
  0x9e   : > { %v1604_v31 = vshll.u32 %v1220_v11, 16  ;;  %v1617_v16 = vpop.permute.xlu2 %1616  ;;  %v1114_v28 = vld [vmem:[#allocation2 + $0x1c] sm:$0xf]  ;;  %v1578_v26 = vrot.slane %v1577_v60, 4  ;;  %1147 = vst.msk [vmem:[#allocation4 + $0x18] sm:$0xf] %vm562_vm0, %v1115_v47 }
  0x9f   : > { %1654 = vrot.lane.b32.xlu2 %v1511_v25, %s9411_s11  ;;  %v1539_v22 = vrot.slane %v1537_v35, 4  ;;  %v1542_v33 = vrot.slane %v1540_v19, 5  ;;  %1709 = vst.msk [vmem:[#allocation4 + $0x10] sm:$0xf] %vm1704_vm3, %v1617_v16  ;;  %v9029_v2 = vrot.slane %v1752_v61, 9  ;;  %v1873_v18 = vrot.slane %v10021_v40, 5 }
  0xa0   : > { %v1606_v55 = vrot.slane %v1604_v31, 5  ;;  %v1217_v37 = vld [vmem:[#allocation2 + $0xb0] sm:$0x1]  ;;  %1146 = vst.msk [vmem:[#allocation4 + $0x14] sm:$0xf] %vm562_vm0, %v1114_v28  ;;  %v1854_v29 = vrot.slane %v1852_v57, 4 }
  0xa1   : > { %v1543_v56 = vor.u32 %v1542_v33, %v1539_v22  ;;  %v1580_v63 = vshll.u32 %v1217_v37, 16  ;;  %v1745_v21 = vld [vmem:[#allocation2 + $0x20] sm:$0x1]  ;;  %v10030_v24 = vld [vmem:[#allocation2 + $0x4c] sm:$0xf]  ;;  %v1874_v42 = vsel %vm9964_vm1, %v9029_v2, %v1873_v18  ;;  %v1847_v20 = vrot.slane %v1845_v6, 4 }
  0xa2   : > { %v1607_v54 = vsel %vm9518_vm11, %v1602_v45, %v1606_v55  ;;  %v1737_v39 = vld [vmem:[#allocation2] sm:$0xe]  ;;  %v1855_v62 = vrot.slane %v1745_v21, 5  ;;  %v1880_v44 = vrot.slane %v10030_v24, 5  ;;  %v1757_v34 = vld [vmem:[#allocation2 + $0x50] sm:$0x1] }
  0xa3   : > { %1956 = vrot.lane.b32.xlu0 %v1853_v15, %s9412_s12  ;;  %v1544_v38 = vrot.slane %v1543_v56, 4  ;;  %v1582_v32 = vrot.slane %v1580_v63, 5  ;;  %v1118_v30 = vld [vmem:[#allocation2 + $0x34] sm:$0xf]  ;;  %v1117_v35 = vld [vmem:[#allocation2 + $0x30] sm:$0xf] }
  0xa4   : > { %v1621_v23 = vpop.permute.xlu0 %1620  ;;  %v9024_v19 = vrot.slane %v1737_v39, 9  ;;  %1150 = vst.msk [vmem:[#allocation4 + $0x24] sm:$0xf] %vm562_vm0, %v1118_v30  ;;  %v1112_v11 = vld [vmem:[#allocation2 + $0x10] sm:$0xf]  ;;  %v1856_v57 = vsel %vm9964_vm1, %v1854_v29, %v1855_v62  ;;  %v1882_v49 = vrot.slane %v1880_v44, 4 }
  0xa5   : > { %1670 = vrot.lane.b32.xlu1 %v1607_v54, %s9411_s11  ;;  %v1549_v41 = vsel %vm9518_vm11, %v1544_v38, %v9856_v52  ;;  %1711 = vst.msk [vmem:[#allocation4 + $0x18] sm:$0xf] %vm1704_vm3, %v1621_v23  ;;  %v1111_v52 = vld [vmem:[#allocation2 + $0xc] sm:$0xf]  ;;  %v1583_v25 = vsel %vm9518_vm11, %v1578_v26, %v1582_v32  ;;  %v1883_v45 = vrot.slane %v1757_v34, 5  ;;  %v1875_v6 = vrot.slane %v1873_v18, 4 }
  0xa6   : > { %v1613_v13 = vpop.permute.xlu1 %1612  ;;  %1143 = vst.msk [vmem:[#allocation4 + $0x8] sm:$0xf] %vm562_vm0, %v1111_v52  ;;  %v1749_v31 = vld [vmem:[#allocation2 + $0x30] sm:$0xe]  ;;  %v10054_v51 = vld [vmem:[#allocation2 + $0x34] sm:$0xf]  ;;  %v1839_v53 = vsel %vm9964_vm1, %v9024_v19, %v1838_v9 }
  0xa7   : > { %1660 = vrot.lane.b32.xlu2 %v1549_v41, %s9411_s11  ;;  %v1619_v10 = vpop.permute.xlu2 %1618  ;;  %1707 = vst.msk [vmem:[#allocation4 + $0x8] sm:$0xf] %vm1704_vm3, %v1613_v13  ;;  %v1742_v0 = vld [vmem:[#allocation2 + $0x14] sm:$0x1]  ;;  %v9028_v16 = vrot.slane %v1749_v31, 9  ;;  %v1866_v22 = vrot.slane %v10054_v51, 5  ;;  %v1884_v33 = vsel %vm9964_vm1, %v1882_v49, %v1883_v45 }
  0xa8   : > { %1710 = vst.msk [vmem:[#allocation4 + $0x14] sm:$0xf] %vm1704_vm3, %v1619_v10  ;;  %v1761_v12 = vld [vmem:[#allocation2 + $0x60] sm:$0xe]  ;;  %v10067_v55 = vld [vmem:[#allocation2 + $0x64] sm:$0xf] }
  0xa9   : > { %1149 = vst.msk [vmem:[#allocation4 + $0x20] sm:$0xf] %vm562_vm0, %v1117_v35  ;;  %v1121_v14 = vld [vmem:[#allocation2 + $0x48] sm:$0xf]  ;;  %v1848_v9 = vrot.slane %v1742_v0, 5  ;;  %v1867_v4 = vsel %vm9964_vm1, %v9028_v16, %v1866_v22  ;;  %v9032_v37 = vrot.slane %v1761_v12, 9 }
  0xaa   : > { %1144 = vst.msk [vmem:[#allocation4 + $0xc] sm:$0xf] %vm562_vm0, %v1112_v11  ;;  %v1120_v54 = vld [vmem:[#allocation2 + $0x40] sm:$0xf]  ;;  %v1116_v59 = vld [vmem:[#allocation2 + $0x28] sm:$0xf] }
  0xab   : > { %1962 = vrot.lane.b32.xlu0 %v1863_v7, %s9412_s12  ;;  %1153 = vst.msk [vmem:[#allocation4 + $0x30] sm:$0xf] %vm562_vm0, %v1121_v14  ;;  %v1894_v38 = vrot.slane %v10067_v55, 5  ;;  %v1754_v63 = vld [vmem:[#allocation2 + $0x44] sm:$0x1]  ;;  %v1849_v41 = vsel %vm9964_vm1, %v1847_v20, %v1848_v9  ;;  %v1868_v11 = vrot.slane %v1866_v22, 4 }
  0xac   : > { %v1627_v15 = vpop.permute.xlu0 %1626  ;;  %v10078_v61 = vld [vmem:[#allocation2 + $0x70] sm:$0xf]  ;;  %1152 = vst.msk [vmem:[#allocation4 + $0x2c] sm:$0xf] %vm562_vm0, %v1120_v54  ;;  %v1746_v5 = vld [vmem:[#allocation2 + $0x24] sm:$0xe] }
  0xad   : > { %1952 = vrot.lane.b32.xlu1 %v1846_v17, %s9412_s12  ;;  %1714 = vst.msk [vmem:[#allocation4 + $0x24] sm:$0xf] %vm1704_vm3, %v1627_v15  ;;  %v1876_v7 = vrot.slane %v1754_v63, 5  ;;  %v1901_v23 = vrot.slane %v10078_v61, 5  ;;  %v1895_v47 = vsel %vm9964_vm1, %v9032_v37, %v1894_v38  ;;  %v1766_v28 = vld [vmem:[#allocation2 + $0x74] sm:$0x1] }
  0xae   : > { %v1615_v8 = vpop.permute.xlu1 %1614  ;;  %1148 = vst.msk [vmem:[#allocation4 + $0x1c] sm:$0xf] %vm562_vm0, %v1116_v59  ;;  %v1124_v26 = vld [vmem:[#allocation2 + $0x58] sm:$0xf]  ;;  %v9027_v10 = vrot.slane %v1746_v5, 9  ;;  %v1904_v18 = vrot.slane %v1766_v28, 5 }
  0xaf   : > { %1666 = vrot.lane.b32.xlu2 %v1583_v25, %s9411_s11  ;;  %1708 = vst.msk [vmem:[#allocation4 + $0xc] sm:$0xf] %vm1704_vm3, %v1615_v8  ;;  %v1123_v52 = vld [vmem:[#allocation2 + $0x54] sm:$0xf]  ;;  %v1119_v40 = vld [vmem:[#allocation2 + $0x3c] sm:$0xf]  ;;  %v1877_v17 = vsel %vm9964_vm1, %v1875_v6, %v1876_v7 }
  0xb0   : > { %1156 = vst.msk [vmem:[#allocation4 + $0x3c] sm:$0xf] %vm562_vm0, %v1124_v26  ;;  %v1903_v2 = vrot.slane %v1901_v23, 4  ;;  %v1758_v21 = vld [vmem:[#allocation2 + $0x54] sm:$0xe]  ;;  %v1860_v39 = vsel %vm9964_vm1, %v9027_v10, %v1859_v50  ;;  %vm2044_vm4 = vcmask 93248  }
  0xb1   : > { %v1759_v25 = vld [vmem:[#allocation2 + $0x58] sm:$0xf]  ;;  %1155 = vst.msk [vmem:[#allocation4 + $0x38] sm:$0xf] %vm562_vm0, %v1123_v52  ;;  %v1770_v30 = vld [vmem:[#allocation2 + $0x84] sm:$0xe] }
  0xb2   : > { %1151 = vst.msk [vmem:[#allocation4 + $0x28] sm:$0xf] %vm562_vm0, %v1119_v40  ;;  %v1751_v62 = vld [vmem:[#allocation2 + $0x38] sm:$0x1]  ;;  %v1887_v34 = vrot.slane %v1759_v25, 5  ;;  %v1905_v36 = vsel %vm9964_vm1, %v1903_v2, %v1904_v18  ;;  %v9035_v49 = vrot.slane %v1770_v30, 9 }
  0xb3   : > { %1968 = vrot.lane.b32.xlu0 %v1874_v42, %s9412_s12  ;;  %v9031_v42 = vrot.slane %v1758_v21, 9  ;;  %v10110_v15 = vld [vmem:[#allocation2 + $0x88] sm:$0xf]  ;;  %v1127_v35 = vld [vmem:[#allocation2 + $0x6c] sm:$0xf]  ;;  %v1869_v8 = vrot.slane %v1751_v62, 5 }
  0xb4   : > { %v1633_v56 = vpop.permute.xlu0 %1632  ;;  %v1126_v50 = vld [vmem:[#allocation2 + $0x64] sm:$0xf]  ;;  %v1122_v19 = vld [vmem:[#allocation2 + $0x4c] sm:$0xf]  ;;  %1159 = vst.msk [vmem:[#allocation4 + $0x48] sm:$0xf] %vm562_vm0, %v1127_v35 }
  0xb5   : > { %1958 = vrot.lane.b32.xlu1 %v1856_v57, %s9412_s12  ;;  %1717 = vst.msk [vmem:[#allocation4 + $0x30] sm:$0xf] %vm1704_vm3, %v1633_v56  ;;  %v1888_v57 = vsel %vm9964_vm1, %v9031_v42, %v1887_v34  ;;  %v1915_v45 = vrot.slane %v10110_v15, 5  ;;  %v1755_v31 = vld [vmem:[#allocation2 + $0x48] sm:$0xe]  ;;  %v1870_v51 = vsel %vm9964_vm1, %v1868_v11, %v1869_v8  ;;  %v1889_v6 = vrot.slane %v1887_v34, 4 }
  0xb6   : > { %1158 = vst.msk [vmem:[#allocation4 + $0x44] sm:$0xf] %vm562_vm0, %v1126_v50  ;;  %v10124_v0 = vld [vmem:[#allocation2 + $0x94] sm:$0xf]  ;;  %v9030_v22 = vrot.slane %v1755_v31, 9  ;;  %vm3329_vm10 = vcmask 224448  }
  0xb7   : > { %1948 = vrot.lane.b32.xlu2 %v1839_v53, %s9412_s12  ;;  %1154 = vst.msk [vmem:[#allocation4 + $0x34] sm:$0xf] %vm562_vm0, %v1122_v19  ;;  %v1763_v53 = vld [vmem:[#allocation2 + $0x68] sm:$0x1]  ;;  %v1922_v14 = vrot.slane %v10124_v0, 5  ;;  %v1916_v20 = vsel %vm9964_vm1, %v9035_v49, %v1915_v45  ;;  %v1917_v62 = vrot.slane %v1915_v45, 4 }
  0xb8   : > { %v1897_v12 = vrot.slane %v1763_v53, 5  ;;  %v1130_v9 = vld [vmem:[#allocation2 + $0x7c] sm:$0xf]  ;;  %v1775_v54 = vld [vmem:[#allocation2 + $0x98] sm:$0x1]  ;;  %vm469_vm14 = vcmask 1041408  }
  0xb9   : > { %1162 = vst.msk [vmem:[#allocation4 + $0x54] sm:$0xf] %vm562_vm0, %v1130_v9  ;;  %v1125_v59 = vld [vmem:[#allocation2 + $0x60] sm:$0xf]  ;;  %v1924_v37 = vrot.slane %v1922_v14, 4  ;;  %vm4227_vm15 = vcmask 290048  }
  0xba   : > { %v1625_v58 = vpop.permute.xlu2 %1624  ;;  %v1623_v60 = vpop.permute.xlu1 %1622  ;;  %1157 = vst.msk [vmem:[#allocation4 + $0x40] sm:$0xf] %vm562_vm0, %v1125_v59  ;;  %v10145_v63 = vld [vmem:[#allocation2 + $0x7c] sm:$0xf]  ;;  %v1779_v26 = vld [vmem:[#allocation2 + $0xa8] sm:$0xe] }
  0xbb   : > { %1713 = vst.msk [vmem:[#allocation4 + $0x20] sm:$0xf] %vm1704_vm3, %v1625_v58  ;;  %1974 = vrot.lane.b32.xlu0 %v1884_v33, %s9412_s12  ;;  %v1896_v33 = vrot.slane %v1894_v38, 4  ;;  %v1129_v58 = vld [vmem:[#allocation2 + $0x78] sm:$0xf]  ;;  %v1925_v38 = vrot.slane %v1775_v54, 5 }
  0xbc   : > { %1712 = vst.msk [vmem:[#allocation4 + $0x1c] sm:$0xf] %vm1704_vm3, %v1623_v60  ;;  %v1767_v60 = vld [vmem:[#allocation2 + $0x78] sm:$0xe]  ;;  %v1908_v28 = vrot.slane %v10145_v63, 5 }
  0xbd   : > { %1964 = vrot.lane.b32.xlu1 %v1867_v4, %s9412_s12  ;;  %1161 = vst.msk [vmem:[#allocation4 + $0x50] sm:$0xf] %vm562_vm0, %v1129_v58  ;;  %v1898_v55 = vsel %vm9964_vm1, %v1896_v33, %v1897_v12  ;;  %v1760_v4 = vld [vmem:[#allocation2 + $0x5c] sm:$0x1]  ;;  %v1926_v24 = vsel %vm9964_vm1, %v1924_v37, %v1925_v38  ;;  %v1132_v10 = vld [vmem:[#allocation2 + $0x88] sm:$0xf] }
  0xbe   : > { %v1890_v7 = vrot.slane %v1760_v4, 5  ;;  %v1128_v52 = vld [vmem:[#allocation2 + $0x70] sm:$0xf]  ;;  %1164 = vst.msk [vmem:[#allocation4 + $0x5c] sm:$0xf] %vm562_vm0, %v1132_v10  ;;  %v1910_v9 = vrot.slane %v1908_v28, 4 }
  0xbf   : > { %1954 = vrot.lane.b32.xlu2 %v1849_v41, %s9412_s12  ;;  %v1639_v32 = vpop.permute.xlu0 %1638  ;;  %v1881_v41 = vsel %vm9964_vm1, %v9030_v22, %v1880_v44  ;;  %v1133_v44 = vld [vmem:[#allocation2 + $0x90] sm:$0xf]  ;;  %1160 = vst.msk [vmem:[#allocation4 + $0x4c] sm:$0xf] %vm562_vm0, %v1128_v52  ;;  %v1772_v18 = vld [vmem:[#allocation2 + $0x8c] sm:$0x1] }
  0xc0   : > { %1720 = vst.msk [vmem:[#allocation4 + $0x3c] sm:$0xf] %vm1704_vm3, %v1639_v32  ;;  %v10164_v21 = vld [vmem:[#allocation2 + $0xb8] sm:$0xf]  ;;  %v1891_v25 = vsel %vm9964_vm1, %v1889_v6, %v1890_v7  ;;  %v1918_v42 = vrot.slane %v1772_v18, 5 }
  0xc1   : > { %1165 = vst.msk [vmem:[#allocation4 + $0x60] sm:$0xf] %vm562_vm0, %v1133_v44  ;;  %v1943_v34 = vrot.slane %v10164_v21, 5  ;;  %v1784_v15 = vld [vmem:[#allocation2 + $0xbc] sm:$0x1] }
  0xc2   : > { %v1631_v13 = vpop.permute.xlu2 %1630  ;;  %v1135_v35 = vld [vmem:[#allocation2 + $0x9c] sm:$0xf]  ;;  %v1131_v19 = vld [vmem:[#allocation2 + $0x84] sm:$0xf]  ;;  %v1919_v11 = vsel %vm9964_vm1, %v1917_v62, %v1918_v42  ;;  %v1777_v31 = vld [vmem:[#allocation2 + $0xa0] sm:$0xf] }
  0xc3   : > { %1716 = vst.msk [vmem:[#allocation4 + $0x2c] sm:$0xf] %vm1704_vm3, %v1631_v13  ;;  %1980 = vrot.lane.b32.xlu0 %v1895_v47, %s9412_s12  ;;  %v9034_v47 = vrot.slane %v1767_v60, 9  ;;  %v1780_v13 = vld [vmem:[#allocation2 + $0xac] sm:$0xf]  ;;  %v1945_v8 = vrot.slane %v1943_v34, 4 }
  0xc4   : > { %v1936_v2 = vrot.slane %v1780_v13, 5  ;;  %1167 = vst.msk [vmem:[#allocation4 + $0x68] sm:$0xf] %vm562_vm0, %v1135_v35  ;;  %v1776_v45 = vld [vmem:[#allocation2 + $0x9c] sm:$0xe]  ;;  %v1929_v22 = vrot.slane %v1777_v31, 5 }
  0xc5   : > { %1970 = vrot.lane.b32.xlu1 %v1877_v17, %s9412_s12  ;;  %v1909_v40 = vsel %vm9964_vm1, %v9034_v47, %v1908_v28  ;;  %v9038_v17 = vrot.slane %v1779_v26, 9  ;;  %1163 = vst.msk [vmem:[#allocation4 + $0x58] sm:$0xf] %vm562_vm0, %v1131_v19  ;;  %v1134_v61 = vld [vmem:[#allocation2 + $0x94] sm:$0xf] }
  0xc6   : > { %v1629_v29 = vpop.permute.xlu1 %1628  ;;  %v1781_v54 = vld [vmem:[#allocation2 + $0xb0] sm:$0x1]  ;;  %1166 = vst.msk [vmem:[#allocation4 + $0x64] sm:$0xf] %vm562_vm0, %v1134_v61  ;;  %v1773_v4 = vld [vmem:[#allocation2 + $0x90] sm:$0xe] }
  0xc7   : > { %1715 = vst.msk [vmem:[#allocation4 + $0x28] sm:$0xf] %vm1704_vm3, %v1629_v29  ;;  %1960 = vrot.lane.b32.xlu2 %v1860_v39, %s9412_s12  ;;  %v1764_v39 = vld [vmem:[#allocation2 + $0x6c] sm:$0xe]  ;;  %v1937_v30 = vsel %vm9964_vm1, %v9038_v17, %v1936_v2  ;;  %v1938_v37 = vrot.slane %v1936_v2, 4  ;;  %v1939_v38 = vrot.slane %v1781_v54, 5 }
  0xc8   : > { %v9033_v50 = vrot.slane %v1764_v39, 9  ;;  %v2079_v63 = vld [vmem:[#allocation2 + $0x18] sm:$0xf]  ;;  %v1137_v6 = vld [vmem:[#allocation2 + $0xa8] sm:$0xf] }
  0xc9   : > { %v1940_v7 = vsel %vm9964_vm1, %v1938_v37, %v1939_v38  ;;  %1169 = vst.msk [vmem:[#allocation4 + $0x70] sm:$0xf] %vm562_vm0, %v1137_v6  ;;  %v1778_v28 = vld [vmem:[#allocation2 + $0xa4] sm:$0x1]  ;;  %v1140_v10 = vld [vmem:[#allocation2 + $0xb8] sm:$0xf] }
  0xca   : > { %v1902_v53 = vsel %vm9964_vm1, %v9033_v50, %v1901_v23  ;;  %v1932_v44 = vrot.slane %v1778_v28, 5  ;;  %1172 = vst.msk [vmem:[#allocation4 + $0x7c] sm:$0xf] %vm562_vm0, %v1140_v10  ;;  %v2077_v0 = vld [vmem:[#allocation2 + $0xc] sm:$0xf] }
  0xcb   : > { %1986 = vrot.lane.b32.xlu0 %v1905_v36, %s9412_s12  ;;  %v1136_v36 = vld [vmem:[#allocation2 + $0xa0] sm:$0xf]  ;;  %v1782_v52 = vld [vmem:[#allocation2 + $0xb4] sm:$0xe]  ;;  %v2080_v18 = vld [vmem:[#allocation2 + $0x1c] sm:$0xf] }
  0xcc   : > { %1168 = vst.msk [vmem:[#allocation4 + $0x6c] sm:$0xf] %vm562_vm0, %v1136_v36  ;;  %v9039_v17 = vrot.slane %v1782_v52, 9  ;;  %v2088_v62 = vld [vmem:[#allocation2 + $0x4c] sm:$0xf] }
  0xcd   : > { %1976 = vrot.lane.b32.xlu1 %v1888_v57, %s9412_s12  ;;  %v1946_v57 = vrot.slane %v1784_v15, 5  ;;  %v2083_v21 = vld [vmem:[#allocation2 + $0x30] sm:$0xf]  ;;  %v2091_v36 = vld [vmem:[#allocation2 + $0x60] sm:$0xf] }
  0xce   : > { %v1645_v16 = vpop.permute.xlu0 %1644  ;;  %v2086_v50 = vld [vmem:[#allocation2 + $0x40] sm:$0xf]  ;;  %v2081_v19 = vld [vmem:[#allocation2 + $0x24] sm:$0xf]  ;;  %v2084_v31 = vld [vmem:[#allocation2 + $0x34] sm:$0xf] }
  0xcf   : > { %1723 = vst.msk [vmem:[#allocation4 + $0x48] sm:$0xf] %vm1704_vm3, %v1645_v16  ;;  %1966 = vrot.lane.b32.xlu2 %v1870_v51, %s9412_s12  ;;  %v1769_v51 = vld [vmem:[#allocation2 + $0x80] sm:$0x1]  ;;  %v9037_v16 = vrot.slane %v1776_v45, 9  ;;  %v1947_v33 = vsel %vm9964_vm1, %v1945_v8, %v1946_v57 }
  0xd0   : > { %v1635_v56 = vpop.permute.xlu1 %1634  ;;  %v1911_v58 = vrot.slane %v1769_v51, 5  ;;  %v2094_v57 = vld [vmem:[#allocation2 + $0x70] sm:$0xf]  ;;  %v2089_v45 = vld [vmem:[#allocation2 + $0x54] sm:$0xf] }
  0xd1   : > { %1718 = vst.msk [vmem:[#allocation4 + $0x34] sm:$0xf] %vm1704_vm3, %v1635_v56  ;;  %v1139_v56 = vld [vmem:[#allocation2 + $0xb4] sm:$0xf]  ;;  %v1930_v23 = vsel %vm9964_vm1, %v9037_v16, %v1929_v22  ;;  %v620_v51 = vld [vmem:[#allocation2 + $0xc0] sm:$0x1] }
  0xd2   : > { %1171 = vst.msk [vmem:[#allocation4 + $0x78] sm:$0xf] %vm562_vm0, %v1139_v56  ;;  %v621_v16 = vsel %vm9482_vm5, 0, %v620_v51  ;;  %v2100_v37 = vld [vmem:[#allocation2 + $0x94] sm:$0xf] }
  0xd3   : > { %1992 = vrot.lane.b32.xlu0 %v1916_v20, %s9412_s12  ;;  %v1138_v20 = vld [vmem:[#allocation2 + $0xac] sm:$0xf]  ;;  %622 = vst [vmem:[#allocation2 + $0xc0] sm:$0x1] %v621_v16  ;;  %v2103_v28 = vld [vmem:[#allocation2 + $0xa8] sm:$0xf] }
  0xd4   : > { %1170 = vst.msk [vmem:[#allocation4 + $0x74] sm:$0xf] %vm562_vm0, %v1138_v20 }
  0xd5   : > { %1982 = vrot.lane.b32.xlu1 %v1898_v55, %s9412_s12  ;;  %v1912_v55 = vsel %vm9964_vm1, %v1910_v9, %v1911_v58  ;;  %v2092_v9 = vld [vmem:[#allocation2 + $0x64] sm:$0xf] }
  0xd6   : > { %v1637_v5 = vpop.permute.xlu2 %1636 }
  0xd7   : > { %1719 = vst.msk [vmem:[#allocation4 + $0x38] sm:$0xf] %vm1704_vm3, %v1637_v5  ;;  %1972 = vrot.lane.b32.xlu2 %v1881_v41, %s9412_s12  ;;  %v9036_v5 = vrot.slane %v1773_v4, 9 }
  0xd8   : > { %v1651_v32 = vpop.permute.xlu0 %1650 }
  0xd9   : > { %1726 = vst.msk [vmem:[#allocation4 + $0x54] sm:$0xf] %vm1704_vm3, %v1651_v32  ;;  %v1923_v47 = vsel %vm9964_vm1, %v9036_v5, %v1922_v14  ;;  %v2082_v32 = vld [vmem:[#allocation2 + $0x28] sm:$0xf]  ;;  %v2090_v5 = vld [vmem:[#allocation2 + $0x58] sm:$0xf] }
  0xdb   : > { %1998 = vrot.lane.b32.xlu0 %v1926_v24, %s9412_s12  ;;  %v1931_v24 = vrot.slane %v1929_v22, 4 }
  0xdd   : > { %1988 = vrot.lane.b32.xlu1 %v1909_v40, %s9412_s12  ;;  %v1933_v14 = vsel %vm9964_vm1, %v1931_v24, %v1932_v44  ;;  %v2085_v40 = vld [vmem:[#allocation2 + $0x3c] sm:$0xf]  ;;  %v2098_v44 = vld [vmem:[#allocation2 + $0x88] sm:$0xf] }
  0xde   : > { %v1643_v29 = vpop.permute.xlu2 %1642 }
  0xdf   : > { %1722 = vst.msk [vmem:[#allocation4 + $0x44] sm:$0xf] %vm1704_vm3, %v1643_v29  ;;  %1978 = vrot.lane.b32.xlu2 %v1891_v25, %s9412_s12  ;;  %v1944_v25 = vsel %vm9964_vm1, %v9039_v17, %v1943_v34  ;;  %v2271_v17 = vld [vmem:[#allocation2 + $0x10] sm:$0xf] }
  0xe3   : > { %2004 = vrot.lane.b32.xlu0 %v1937_v30, %s9412_s12  ;;  %v2078_v30 = vld [vmem:[#allocation2 + $0x10] sm:$0xf] }
  0xe4   : > { %v1641_v49 = vpop.permute.xlu1 %1640 }
  0xe5   : > { %1721 = vst.msk [vmem:[#allocation4 + $0x40] sm:$0xf] %vm1704_vm3, %v1641_v49  ;;  %1994 = vrot.lane.b32.xlu1 %v1919_v11, %s9412_s12 }
  0xe7   : > { %1984 = vrot.lane.b32.xlu2 %v1902_v53, %s9412_s12 }
  0xe9   : > { %v1657_v12 = vpop.permute.xlu0 %1656 }
  0xea   : > { %1729 = vst.msk [vmem:[#allocation4 + $0x60] sm:$0xf] %vm1704_vm3, %v1657_v12  ;;  %v337_v12 = vld [vmem:[%s9504_s10 + $0x78] sm:$0xf] }
  0xeb   : > { %2010 = vrot.lane.b32.xlu0 %v1947_v33, %s9412_s12  ;;  %v2097_v33 = vld [vmem:[#allocation2 + $0x84] sm:$0xf]  ;;  %v931_v56 = vshrl.u32 %v337_v12, 16  ;;  %v934_v61 = vshll.u32 %v337_v12, 16 }
  0xed   : > { %v1647_v59 = vpop.permute.xlu1 %1646  ;;  %2000 = vrot.lane.b32.xlu1 %v1930_v23, %s9412_s12  ;;  %v933_v58 = vrot.slane %v931_v56, 7  ;;  %v2087_v23 = vld [vmem:[#allocation2 + $0x48] sm:$0xf]  ;;  %v2104_v56 = vld [vmem:[#allocation2 + $0xac] sm:$0xf] }
  0xee   : > { %1724 = vst.msk [vmem:[#allocation4 + $0x4c] sm:$0xf] %vm1704_vm3, %v1647_v59 }
  0xef   : > { %1990 = vrot.lane.b32.xlu2 %v1912_v55, %s9412_s12  ;;  %v936_v59 = vor.u32 %v934_v61, %v933_v58  ;;  %v1102_v55 = vld [vmem:[#allocation2 + $0xc0] sm:$0xf] }
  0xf1   : > { %v1649_v60 = vpop.permute.xlu2 %1648  ;;  %v1663_v41 = vpop.permute.xlu0 %1662  ;;  %v1103_v38 = vsel %vm9543_vm13, %v936_v59, %v1102_v55  ;;  %v2099_v59 = vld [vmem:[#allocation2 + $0x90] sm:$0xf]  ;;  %vm3890_vm13 = vcmask 257248  }
  0xf2   : > { %1725 = vst.msk [vmem:[#allocation4 + $0x50] sm:$0xf] %vm1704_vm3, %v1649_v60 }
  0xf3   : > { %1732 = vst.msk [vmem:[#allocation4 + $0x6c] sm:$0xf] %vm1704_vm3, %v1663_v41  ;;  %2145 = vrot.lane.b32.xlu0 %v2079_v63, %s9413_s13  ;;  %v2095_v63 = vld [vmem:[#allocation2 + $0x78] sm:$0xf]  ;;  %v2270_v41 = vld [vmem:[#allocation2 + $0xc] sm:$0xf] }
  0xf4   : > { %1104 = vst [vmem:[#allocation2 + $0xc0] sm:$0xf] %v1103_v38  ;;  %v2322_v48 = vshll.u32 %v2270_v41, 16 }
  0xf5   : > { %2006 = vrot.lane.b32.xlu1 %v1940_v7, %s9412_s12  ;;  %v2319_v7 = vshrl.u32 %v2270_v41, 16 }
  0xf7   : > { %1996 = vrot.lane.b32.xlu2 %v1923_v47, %s9412_s12  ;;  %v2321_v10 = vrot.slane %v2319_v7, 4 }
  0xf9   : > { %v1655_v26 = vpop.permute.xlu2 %1654 }
  0xfa   : > { %1728 = vst.msk [vmem:[#allocation4 + $0x5c] sm:$0xf] %vm1704_vm3, %v1655_v26  ;;  %v338_v26 = vld [vmem:[%s9504_s10 + $0x7c] sm:$0xf] }
  0xfb   : > { %2151 = vrot.lane.b32.xlu0 %v2082_v32, %s9413_s13  ;;  %v939_v24 = vshrl.u32 %v338_v26, 16  ;;  %v942_v52 = vshll.u32 %v338_v26, 16 }
  0xfd   : > { %2141 = vrot.lane.b32.xlu1 %v2077_v0, %s9413_s13  ;;  %v2324_v0 = vrot.slane %v2322_v48, 5 }
  0xfe   : > { %v1653_v13 = vpop.permute.xlu1 %1652 }
  0xff   : > { %1727 = vst.msk [vmem:[#allocation4 + $0x58] sm:$0xf] %vm1704_vm3, %v1653_v13  ;;  %2002 = vrot.lane.b32.xlu2 %v1933_v14, %s9412_s12  ;;  %v2093_v14 = vld [vmem:[#allocation2 + $0x6c] sm:$0xf]  ;;  %v10271_v13 = vrot.slane %v939_v24, 7 }
 0x101   : > { %v1661_v2 = vpop.permute.xlu2 %1660 }
 0x102   : > { %1731 = vst.msk [vmem:[#allocation4 + $0x68] sm:$0xf] %vm1704_vm3, %v1661_v2  ;;  %v2274_v2 = vld [vmem:[#allocation2 + $0x1c] sm:$0xf] }
 0x103   : > { %2157 = vrot.lane.b32.xlu0 %v2085_v40, %s9413_s13 }
 0x105   : > { %v1669_v39 = vpop.permute.xlu0 %1668  ;;  %2147 = vrot.lane.b32.xlu1 %v2080_v18, %s9413_s13  ;;  %v937_v18 = vrot.slane %v933_v58, 4 }
 0x106   : > { %1735 = vst.msk [vmem:[#allocation4 + $0x78] sm:$0xf] %vm1704_vm3, %v1669_v39  ;;  %v1659_v29 = vpop.permute.xlu1 %1658  ;;  %v2325_v39 = vor.u32 %v2324_v0, %v2321_v10 }
 0x107   : > { %1730 = vst.msk [vmem:[#allocation4 + $0x64] sm:$0xf] %vm1704_vm3, %v1659_v29  ;;  %2008 = vrot.lane.b32.xlu2 %v1944_v25, %s9412_s12  ;;  %v944_v25 = vor.u32 %v942_v52, %v10271_v13 }
 0x109   : > { %v1667_v42 = vpop.permute.xlu2 %1666 }
 0x10a   : > { %1734 = vst.msk [vmem:[#allocation4 + $0x74] sm:$0xf] %vm1704_vm3, %v1667_v42  ;;  %v2328_v42 = vshll.u32 %v2271_v17, 16 }
 0x10b   : > { %2163 = vrot.lane.b32.xlu0 %v2088_v62, %s9413_s13  ;;  %v2106_v62 = vld [vmem:[#allocation2 + $0xb8] sm:$0xf] }
 0x10d   : > { %v1951_v34 = vpop.permute.xlu0 %1950  ;;  %2153 = vrot.lane.b32.xlu1 %v2083_v21, %s9413_s13  ;;  %v2352_v21 = vshll.u32 %v2274_v2, 16 }
 0x10e   : > { %2046 = vst.msk [vmem:[#allocation4 + $0x4] sm:$0xf] %vm2044_vm4, %v1951_v34  ;;  %v945_v34 = vsel %vm9535_vm12, %v937_v18, %v944_v25  ;;  %v2288_v18 = vld [vmem:[#allocation2 + $0x54] sm:$0xf] }
 0x10f   : > { %2143 = vrot.lane.b32.xlu2 %v2078_v30, %s9413_s13  ;;  %v1665_v15 = vpop.permute.xlu1 %1664  ;;  %v2356_v30 = vshrl.u32 %v2274_v2, 16  ;;  %1105 = vst.msk [vmem:[#allocation2 + $0xc4] sm:$0xf] %vm562_vm0, %v945_v34  ;;  %v2284_v2 = vld [vmem:[#allocation2 + $0x44] sm:$0x1]  ;;  %vm2237_vm0 = vcmask 126048  }
 0x110   : > { %1733 = vst.msk [vmem:[#allocation4 + $0x70] sm:$0xf] %vm1704_vm3, %v1665_v15 }
 0x111   : > { %v1949_v35 = vpop.permute.xlu2 %1948 }
 0x112   : > { %2045 = vst.msk [vmem:[#allocation4] sm:$0xf] %vm2044_vm4, %v1949_v35  ;;  %v2326_v35 = vrot.slane %v2325_v39, 4 }
 0x113   : > { %2169 = vrot.lane.b32.xlu0 %v2091_v36, %s9413_s13  ;;  %v2101_v36 = vld [vmem:[#allocation2 + $0x9c] sm:$0xf] }
 0x115   : > { %v1957_v11 = vpop.permute.xlu0 %1956  ;;  %2159 = vrot.lane.b32.xlu1 %v2086_v50, %s9413_s13  ;;  %v10283_v50 = vrot.slane %v2328_v42, 5 }
 0x116   : > { %2049 = vst.msk [vmem:[#allocation4 + $0x10] sm:$0xf] %vm2044_vm4, %v1957_v11  ;;  %v2358_v11 = vrot.slane %v2356_v30, 4 }
 0x117   : > { %2149 = vrot.lane.b32.xlu2 %v2081_v19, %s9413_s13  ;;  %v1671_v8 = vpop.permute.xlu1 %1670  ;;  %v10285_v19 = vrot.slane %v2352_v21, 5  ;;  %v2331_v16 = vsel %vm9518_vm11, %v2326_v35, %v10283_v50  ;;  %v10318_v21 = vld [vmem:[#allocation2 + $0x28] sm:$0xf]  ;;  %v2466_v35 = vshll.u32 %v2288_v18, 16 }
 0x118   : > { %1736 = vst.msk [vmem:[#allocation4 + $0x7c] sm:$0xf] %vm1704_vm3, %v1671_v8  ;;  %v2279_v8 = vld [vmem:[#allocation2 + $0x30] sm:$0xf]  ;;  %vm4392_vm3 = vcmask 293888  }
 0x119   : > { %v1955_v49 = vpop.permute.xlu2 %1954 }
 0x11a   : > { %2048 = vst.msk [vmem:[#allocation4 + $0xc] sm:$0xf] %vm2044_vm4, %v1955_v49 }
 0x11b   : > { %2175 = vrot.lane.b32.xlu0 %v2094_v57, %s9413_s13  ;;  %v2096_v57 = vld [vmem:[#allocation2 + $0x7c] sm:$0xf] }
 0x11d   : > { %v1963_v53 = vpop.permute.xlu0 %1962  ;;  %2165 = vrot.lane.b32.xlu1 %v2089_v45, %s9413_s13  ;;  %v2275_v45 = vld [vmem:[#allocation2 + $0x20] sm:$0x1] }
 0x11e   : > { %2052 = vst.msk [vmem:[#allocation4 + $0x1c] sm:$0xf] %vm2044_vm4, %v1963_v53  ;;  %v2394_v53 = vshll.u32 %v2279_v8, 16 }
 0x11f   : > { %2155 = vrot.lane.b32.xlu2 %v2084_v31, %s9413_s13  ;;  %v1953_v22 = vpop.permute.xlu1 %1952  ;;  %v2391_v31 = vshrl.u32 %v2279_v8, 16 }
 0x120   : > { %2047 = vst.msk [vmem:[#allocation4 + $0x8] sm:$0xf] %vm2044_vm4, %v1953_v22  ;;  %v2359_v22 = vor.u32 %v2358_v11, %v10285_v19  ;;  %v2396_v58 = vrot.slane %v2394_v53, 5 }
 0x121   : > { %v1961_v20 = vpop.permute.xlu2 %1960 }
 0x122   : > { %2051 = vst.msk [vmem:[#allocation4 + $0x18] sm:$0xf] %vm2044_vm4, %v1961_v20  ;;  %v2332_v20 = vshrl.u32 %v2271_v17, 16  ;;  %v2360_v61 = vrot.slane %v2359_v22, 4  ;;  %v2292_v22 = vld [vmem:[#allocation2 + $0x64] sm:$0xf] }
 0x123   : > { %2181 = vrot.lane.b32.xlu0 %v2097_v33, %s9413_s13  ;;  %v2362_v33 = vshll.u32 %v2275_v45, 16 }
 0x125   : > { %v1969_v54 = vpop.permute.xlu0 %1968  ;;  %2171 = vrot.lane.b32.xlu1 %v2092_v9, %s9413_s13  ;;  %v2393_v9 = vrot.slane %v2391_v31, 4 }
 0x126   : > { %2055 = vst.msk [vmem:[#allocation4 + $0x28] sm:$0xf] %vm2044_vm4, %v1969_v54  ;;  %v10297_v54 = vld [vmem:[#allocation2 + $0x34] sm:$0xf] }
 0x127   : > { %2161 = vrot.lane.b32.xlu2 %v2087_v23, %s9413_s13  ;;  %v1959_v4 = vpop.permute.xlu1 %1958  ;;  %v2364_v23 = vrot.slane %v2362_v33, 5  ;;  %v2400_v38 = vshll.u32 %v10297_v54, 16  ;;  %v2404_v11 = vshrl.u32 %v10297_v54, 16  ;;  %v2105_v33 = vld [vmem:[#allocation2 + $0xb4] sm:$0xf] }
 0x128   : > { %2050 = vst.msk [vmem:[#allocation4 + $0x14] sm:$0xf] %vm2044_vm4, %v1959_v4  ;;  %v2283_v4 = vld [vmem:[#allocation2 + $0x40] sm:$0xf]  ;;  %v2281_v54 = vld [vmem:[#allocation2 + $0x38] sm:$0x1] }
 0x129   : > { %v1967_v60 = vpop.permute.xlu2 %1966  ;;  %v2424_v7 = vshll.u32 %v2283_v4, 16  ;;  %v2428_v48 = vshrl.u32 %v2283_v4, 16 }
 0x12a   : > { %2054 = vst.msk [vmem:[#allocation4 + $0x24] sm:$0xf] %vm2044_vm4, %v1967_v60  ;;  %v2334_v60 = vrot.slane %v2332_v20, 4 }
 0x12b   : > { %2187 = vrot.lane.b32.xlu0 %v2100_v37, %s9413_s13  ;;  %v2397_v37 = vor.u32 %v2396_v58, %v2393_v9  ;;  %v2430_v52 = vrot.slane %v2428_v48, 4  ;;  %v10329_v9 = vld [vmem:[#allocation2 + $0x58] sm:$0xf] }
 0x12c   : > { %v2335_v10 = vor.u32 %v2334_v60, %v10283_v50  ;;  %v2472_v60 = vshll.u32 %v10329_v9, 16 }
 0x12d   : > { %v1975_v6 = vpop.permute.xlu0 %1974  ;;  %2177 = vrot.lane.b32.xlu1 %v2095_v63, %s9413_s13  ;;  %v2276_v63 = vld [vmem:[#allocation2 + $0x24] sm:$0xf]  ;;  %v2398_v24 = vrot.slane %v2397_v37, 4 }
 0x12e   : > { %2058 = vst.msk [vmem:[#allocation4 + $0x34] sm:$0xf] %vm2044_vm4, %v1975_v6  ;;  %v2272_v6 = vld [vmem:[#allocation2 + $0x14] sm:$0x1]  ;;  %v2367_v26 = vshrl.u32 %v2276_v63, 16 }
 0x12f   : > { %2167 = vrot.lane.b32.xlu2 %v2090_v5, %s9413_s13  ;;  %v1965_v47 = vpop.permute.xlu1 %1964  ;;  %v2365_v5 = vsel %vm9518_vm11, %v2360_v61, %v2364_v23  ;;  %v2338_v0 = vshll.u32 %v2272_v6, 16  ;;  %v2406_v23 = vrot.slane %v2404_v11, 4 }
 0x130   : > { %2053 = vst.msk [vmem:[#allocation4 + $0x20] sm:$0xf] %vm2044_vm4, %v1965_v47  ;;  %v2369_v25 = vrot.slane %v2367_v26, 4 }
 0x131   : > { %v1973_v32 = vpop.permute.xlu2 %1972  ;;  %v2340_v42 = vrot.slane %v2338_v0, 5  ;;  %v10348_v0 = vrot.slane %v2472_v60, 5 }
 0x132   : > { %2057 = vst.msk [vmem:[#allocation4 + $0x30] sm:$0xf] %vm2044_vm4, %v1973_v32  ;;  %v2370_v32 = vshll.u32 %v2276_v63, 16  ;;  %v2285_v63 = vld [vmem:[#allocation2 + $0x48] sm:$0xf] }
 0x133   : > { %2193 = vrot.lane.b32.xlu0 %v2103_v28, %s9413_s13  ;;  %v2107_v28 = vld [vmem:[#allocation2 + $0xc0] sm:$0xf] }
 0x134   : > { %v2372_v39 = vrot.slane %v2370_v32, 5  ;;  %v2439_v32 = vshrl.u32 %v2285_v63, 16 }
 0x135   : > { %v1981_v40 = vpop.permute.xlu0 %1980  ;;  %2183 = vrot.lane.b32.xlu1 %v2098_v44, %s9413_s13  ;;  %v10308_v44 = vrot.slane %v2400_v38, 5 }
 0x136   : > { %2061 = vst.msk [vmem:[#allocation4 + $0x40] sm:$0xf] %vm2044_vm4, %v1981_v40  ;;  %v2102_v40 = vld [vmem:[#allocation2 + $0xa0] sm:$0xf]  ;;  %v2373_v8 = vor.u32 %v2372_v39, %v2369_v25 }
 0x137   : > { %2173 = vrot.lane.b32.xlu2 %v2093_v14, %s9413_s13  ;;  %v1971_v29 = vpop.permute.xlu1 %1970  ;;  %v10311_v14 = vrot.slane %v2424_v7, 5  ;;  %v2407_v48 = vor.u32 %v2406_v23, %v10308_v44 }
 0x138   : > { %2056 = vst.msk [vmem:[#allocation4 + $0x2c] sm:$0xf] %vm2044_vm4, %v1971_v29  ;;  %v2403_v29 = vsel %vm9518_vm11, %v2398_v24, %v10308_v44  ;;  %v2374_v58 = vrot.slane %v2373_v8, 4  ;;  %v2442_v24 = vshll.u32 %v2285_v63, 16  ;;  %v2297_v44 = vld [vmem:[#allocation2 + $0x78] sm:$0xf] }
 0x139   : > { %v1979_v15 = vpop.permute.xlu2 %1978  ;;  %v2431_v34 = vor.u32 %v2430_v52, %v10311_v14  ;;  %v2293_v52 = vld [vmem:[#allocation2 + $0x68] sm:$0x1]  ;;  %v2408_v25 = vrot.slane %v2407_v48, 4  ;;  %v2282_v8 = vld [vmem:[#allocation2 + $0x3c] sm:$0xf] }
 0x13a   : > { %2060 = vst.msk [vmem:[#allocation4 + $0x3c] sm:$0xf] %vm2044_vm4, %v1979_v15  ;;  %v2434_v15 = vshll.u32 %v2284_v2, 16 }
 0x13b   : > { %2199 = vrot.lane.b32.xlu0 %v2106_v62, %s9413_s13  ;;  %v2336_v62 = vrot.slane %v2335_v10, 4  ;;  %v2432_v31 = vrot.slane %v2431_v34, 4  ;;  %v2444_v34 = vrot.slane %v2442_v24, 5 }
 0x13c   : > { %v2436_v53 = vrot.slane %v2434_v15, 5 }
 0x13d   : > { %v1987_v49 = vpop.permute.xlu0 %1986  ;;  %2189 = vrot.lane.b32.xlu1 %v2101_v36, %s9413_s13  ;;  %v2463_v36 = vshrl.u32 %v2288_v18, 16  ;;  %v2341_v45 = vsel %vm9518_vm11, %v2336_v62, %v2340_v42  ;;  %v2506_v62 = vshll.u32 %v2293_v52, 16  ;;  %v10354_v42 = vld [vmem:[#allocation2 + $0x4c] sm:$0xf] }
 0x13e   : > { %2064 = vst.msk [vmem:[#allocation4 + $0x4c] sm:$0xf] %vm2044_vm4, %v1987_v49  ;;  %v2273_v49 = vld [vmem:[#allocation2 + $0x18] sm:$0xf]  ;;  %v2437_v37 = vsel %vm9518_vm11, %v2432_v31, %v2436_v53  ;;  %v2448_v31 = vshll.u32 %v10354_v42, 16 }
 0x13f   : > { %2179 = vrot.lane.b32.xlu2 %v2096_v57, %s9413_s13  ;;  %v1977_v51 = vpop.permute.xlu1 %1976  ;;  %v2376_v57 = vshll.u32 %v10318_v21, 16  ;;  %v2346_v20 = vshll.u32 %v2273_v49, 16 }
 0x140   : > { %2059 = vst.msk [vmem:[#allocation4 + $0x38] sm:$0xf] %vm2044_vm4, %v1977_v51  ;;  %v2465_v51 = vrot.slane %v2463_v36, 4  ;;  %v2535_v36 = vshrl.u32 %v2297_v44, 16 }
 0x141   : > { %v1985_v12 = vpop.permute.xlu2 %1984  ;;  %v10333_v61 = vrot.slane %v2376_v57, 5 }
 0x142   : > { %2063 = vst.msk [vmem:[#allocation4 + $0x48] sm:$0xf] %vm2044_vm4, %v1985_v12 }
 0x143   : > { %2702 = vrot.lane.b32.xlu0 %v2331_v16, %s9414_s14  ;;  %v2468_v16 = vrot.slane %v2466_v35, 5  ;;  %v2379_v7 = vsel %vm9518_vm11, %v2374_v58, %v10333_v61  ;;  %v2538_v35 = vshll.u32 %v2297_v44, 16  ;;  %v2301_v58 = vld [vmem:[#allocation2 + $0x88] sm:$0xf] }
 0x144   : > { %v2568_v63 = vshll.u32 %v2301_v58, 16 }
 0x145   : > { %v1993_v55 = vpop.permute.xlu0 %1992  ;;  %2195 = vrot.lane.b32.xlu1 %v2104_v56, %s9413_s13  ;;  %v2343_v56 = vshrl.u32 %v2273_v49, 16  ;;  %v2469_v38 = vor.u32 %v2468_v16, %v2465_v51  ;;  %v2476_v49 = vshrl.u32 %v10329_v9, 16  ;;  %v2508_v16 = vrot.slane %v2506_v62, 5  ;;  %v2302_v62 = vld [vmem:[#allocation2 + $0x8c] sm:$0x1] }
 0x146   : > { %2067 = vst.msk [vmem:[#allocation4 + $0x58] sm:$0xf] %vm2044_vm4, %v1993_v55  ;;  %v2500_v55 = vshrl.u32 %v2292_v22, 16 }
 0x147   : > { %2185 = vrot.lane.b32.xlu2 %v2099_v59, %s9413_s13  ;;  %v1983_v41 = vpop.permute.xlu1 %1982  ;;  %v2496_v59 = vshll.u32 %v2292_v22, 16  ;;  %v2470_v10 = vrot.slane %v2469_v38, 4 }
 0x148   : > { %2062 = vst.msk [vmem:[#allocation4 + $0x44] sm:$0xf] %vm2044_vm4, %v1983_v41  ;;  %v2345_v41 = vrot.slane %v2343_v56, 4  ;;  %v2502_v26 = vrot.slane %v2500_v55, 4  ;;  %v2537_v56 = vrot.slane %v2535_v36, 4 }
 0x149   : > { %v1991_v47 = vpop.permute.xlu2 %1990  ;;  %v10371_v55 = vld [vmem:[#allocation2 + $0x7c] sm:$0xf] }
 0x14a   : > { %2066 = vst.msk [vmem:[#allocation4 + $0x54] sm:$0xf] %vm2044_vm4, %v1991_v47  ;;  %v2410_v47 = vshll.u32 %v2281_v54, 16  ;;  %v2544_v48 = vshll.u32 %v10371_v55, 16 }
 0x14b   : > { %2708 = vrot.lane.b32.xlu0 %v2365_v5, %s9414_s14  ;;  %v2348_v5 = vrot.slane %v2346_v20, 5  ;;  %v2540_v20 = vrot.slane %v2538_v35, 5 }
 0x14c   : > { %v2412_v39 = vrot.slane %v2410_v47, 5  ;;  %v2290_v47 = vld [vmem:[#allocation2 + $0x5c] sm:$0x1] }
 0x14d   : > { %v1999_v17 = vpop.permute.xlu0 %1998  ;;  %2201 = vrot.lane.b32.xlu1 %v2107_v28, %s9413_s13  ;;  %v10346_v28 = vrot.slane %v2496_v59, 5  ;;  %v2349_v18 = vor.u32 %v2348_v5, %v2345_v41  ;;  %v2572_v41 = vshrl.u32 %v2301_v58, 16 }
 0x14e   : > { %2070 = vst.msk [vmem:[#allocation4 + $0x64] sm:$0xf] %vm2044_vm4, %v1999_v17  ;;  %v2380_v17 = vshrl.u32 %v10318_v21, 16  ;;  %v2475_v21 = vsel %vm9518_vm11, %v2470_v10, %v10348_v0  ;;  %v2413_v53 = vsel %vm9518_vm11, %v2408_v25, %v2412_v39 }
 0x14f   : > { %2191 = vrot.lane.b32.xlu2 %v2102_v40, %s9413_s13  ;;  %v1989_v30 = vpop.permute.xlu1 %1988  ;;  %v2108_v40 = vld [vmem:[#allocation2 + $0xc4] sm:$0xf]  ;;  %v2574_v44 = vrot.slane %v2572_v41, 4 }
 0x150   : > { %2065 = vst.msk [vmem:[#allocation4 + $0x50] sm:$0xf] %vm2044_vm4, %v1989_v30  ;;  %v2441_v30 = vrot.slane %v2439_v32, 4  ;;  %v2382_v11 = vrot.slane %v2380_v17, 4 }
 0x151   : > { %v1997_v50 = vpop.permute.xlu2 %1996 }
 0x152   : > { %2069 = vst.msk [vmem:[#allocation4 + $0x60] sm:$0xf] %vm2044_vm4, %v1997_v50  ;;  %v2350_v50 = vrot.slane %v2349_v18, 4  ;;  %v2445_v22 = vor.u32 %v2444_v34, %v2441_v30  ;;  %v2383_v54 = vor.u32 %v2382_v11, %v10333_v61  ;;  %v10388_v18 = vrot.slane %v2568_v63, 5 }
 0x153   : > { %2714 = vrot.lane.b32.xlu0 %v2403_v29, %s9414_s14  ;;  %v2503_v29 = vor.u32 %v2502_v26, %v10346_v28  ;;  %v2452_v30 = vshrl.u32 %v10354_v42, 16 }
 0x154   : > { %v2355_v9 = vsel %vm9518_vm11, %v2350_v50, %v10285_v19  ;;  %v2446_v60 = vrot.slane %v2445_v22, 4  ;;  %v2294_v19 = vld [vmem:[#allocation2 + $0x6c] sm:$0xf]  ;;  %v2384_v26 = vrot.slane %v2383_v54, 4  ;;  %v2575_v11 = vor.u32 %v2574_v44, %v10388_v18 }
 0x155   : > { %v2005_v12 = vpop.permute.xlu0 %2004  ;;  %2704 = vrot.lane.b32.xlu1 %v2341_v45, %s9414_s14  ;;  %v2278_v45 = vld [vmem:[#allocation2 + $0x2c] sm:$0x1]  ;;  %v2504_v51 = vrot.slane %v2503_v29, 4  ;;  %v2511_v52 = vshrl.u32 %v2294_v19, 16  ;;  %v10390_v29 = vrot.slane %v2544_v48, 5 }
 0x156   : > { %2073 = vst.msk [vmem:[#allocation4 + $0x70] sm:$0xf] %vm2044_vm4, %v2005_v12  ;;  %v2418_v12 = vshll.u32 %v2282_v8, 16  ;;  %v2386_v59 = vshll.u32 %v2278_v45, 16  ;;  %v2576_v54 = vrot.slane %v2575_v11, 4 }
 0x157   : > { %2197 = vrot.lane.b32.xlu2 %v2105_v33, %s9413_s13  ;;  %v1995_v4 = vpop.permute.xlu1 %1994  ;;  %v2415_v33 = vshrl.u32 %v2282_v8, 16  ;;  %v2509_v38 = vsel %vm9518_vm11, %v2504_v51, %v2508_v16  ;;  %v2578_v8 = vshll.u32 %v2302_v62, 16  ;;  %v670_v51 = vld [vmem:[#allocation2 + $0xc8] sm:$0x1]  ;;  %v2454_v16 = vrot.slane %v2452_v30, 4 }
 0x158   : > { %2068 = vst.msk [vmem:[#allocation4 + $0x5c] sm:$0xf] %vm2044_vm4, %v1995_v4  ;;  %v10375_v4 = vrot.slane %v2448_v31, 5  ;;  %v2388_v32 = vrot.slane %v2386_v59, 5  ;;  %v671_v22 = vsel %vm9489_vm7, 0, %v670_v51  ;;  %vm3135_vm7 = vcmask 191648  }
 0x159   : > { %v2003_v6 = vpop.permute.xlu2 %2002  ;;  %v2417_v5 = vrot.slane %v2415_v33, 4  ;;  %v2580_v59 = vrot.slane %v2578_v8, 5  ;;  %672 = vst [vmem:[#allocation2 + $0xc8] sm:$0x1] %v671_v22  ;;  %v2299_v48 = vld [vmem:[#allocation2 + $0x80] sm:$0x1] }
 0x15a   : > { %2072 = vst.msk [vmem:[#allocation4 + $0x6c] sm:$0xf] %vm2044_vm4, %v2003_v6  ;;  %v2420_v6 = vrot.slane %v2418_v12, 5  ;;  %v2451_v17 = vsel %vm9518_vm11, %v2446_v60, %v10375_v4  ;;  %v2548_v12 = vshrl.u32 %v10371_v55, 16  ;;  %v2455_v63 = vor.u32 %v2454_v16, %v10375_v4  ;;  %v2311_v11 = vld [vmem:[#allocation2 + $0xb0] sm:$0x1] }
 0x15b   : > { %2720 = vrot.lane.b32.xlu0 %v2437_v37, %s9414_s14  ;;  %v2478_v37 = vrot.slane %v2476_v49, 4  ;;  %v2650_v22 = vshll.u32 %v2311_v11, 16 }
 0x15c   : > { %v2421_v25 = vor.u32 %v2420_v6, %v2417_v5  ;;  %v10417_v5 = vld [vmem:[#allocation2 + $0xa0] sm:$0xf] }
 0x15d   : > { %v2011_v2 = vpop.permute.xlu0 %2010  ;;  %2710 = vrot.lane.b32.xlu1 %v2379_v7, %s9414_s14  ;;  %v2541_v7 = vor.u32 %v2540_v20, %v2537_v56  ;;  %v2479_v10 = vor.u32 %v2478_v37, %v10348_v0  ;;  %v2389_v0 = vsel %vm9518_vm11, %v2384_v26, %v2388_v32  ;;  %v2287_v56 = vld [vmem:[#allocation2 + $0x50] sm:$0x1] }
 0x15e   : > { %2076 = vst.msk [vmem:[#allocation4 + $0x7c] sm:$0xf] %vm2044_vm4, %v2011_v2  ;;  %v2482_v2 = vshll.u32 %v2290_v47, 16  ;;  %v2422_v45 = vrot.slane %v2421_v25, 4  ;;  %v2458_v41 = vshll.u32 %v2287_v56, 16 }
 0x15f   : > { %2203 = vrot.lane.b32.xlu2 %v2108_v40, %s9413_s13  ;;  %v2001_v15 = vpop.permute.xlu1 %2000  ;;  %v2514_v40 = vshll.u32 %v2294_v19, 16  ;;  %v2542_v39 = vrot.slane %v2541_v7, 4  ;;  %v2480_v35 = vrot.slane %v2479_v10, 4  ;;  %v2303_v32 = vld [vmem:[#allocation2 + $0x90] sm:$0xf]  ;;  %v2581_v10 = vsel %vm9518_vm11, %v2576_v54, %v2580_v59 }
 0x160   : > { %2071 = vst.msk [vmem:[#allocation4 + $0x68] sm:$0xf] %vm2044_vm4, %v2001_v15  ;;  %v2306_v15 = vld [vmem:[#allocation2 + $0x9c] sm:$0xf]  ;;  %v2484_v50 = vrot.slane %v2482_v2, 5  ;;  %v2427_v3 = vsel %vm9518_vm11, %v2422_v45, %v10311_v14  ;;  %v2550_v14 = vrot.slane %v2548_v12, 4 }
 0x161   : > { %v2009_v57 = vpop.permute.xlu2 %2008  ;;  %v2516_v36 = vrot.slane %v2514_v40, 5  ;;  %v2547_v42 = vsel %vm9518_vm11, %v2542_v39, %v10390_v29  ;;  %v2607_v31 = vshrl.u32 %v2306_v15, 16  ;;  %v2616_v40 = vshll.u32 %v10417_v5, 16  ;;  %v2304_v56 = vld [vmem:[#allocation2 + $0x94] sm:$0xf] }
 0x162   : > { %2075 = vst.msk [vmem:[#allocation4 + $0x78] sm:$0xf] %vm2044_vm4, %v2009_v57  ;;  %v10398_v57 = vld [vmem:[#allocation2 + $0x70] sm:$0xf]  ;;  %v2460_v2 = vrot.slane %v2458_v41, 5  ;;  %v2551_v62 = vor.u32 %v2550_v14, %v10390_v29  ;;  %v2586_v30 = vshll.u32 %v2303_v32, 16 }
 0x163   : > { %2726 = vrot.lane.b32.xlu0 %v2475_v21, %s9414_s14  ;;  %v2513_v21 = vrot.slane %v2511_v52, 4  ;;  %v2520_v58 = vshll.u32 %v10398_v57, 16  ;;  %v2609_v37 = vrot.slane %v2607_v31, 4  ;;  %v2315_v31 = vld [vmem:[#allocation2 + $0xc0] sm:$0xf]  ;;  %v2592_v41 = vshll.u32 %v2304_v56, 16 }
 0x164   : > { %v2300_v54 = vld [vmem:[#allocation2 + $0x84] sm:$0xf] }
 0x165   : > { %v2146_v23 = vpop.permute.xlu0 %2145  ;;  %2716 = vrot.lane.b32.xlu1 %v2413_v53, %s9414_s14  ;;  %v2610_v53 = vshll.u32 %v2306_v15, 16  ;;  %v2517_v20 = vor.u32 %v2516_v36, %v2513_v21  ;;  %v10421_v7 = vrot.slane %v2520_v58, 5  ;;  %v1106_v36 = vld [vmem:[#allocation2 + $0xc8] sm:$0x1]  ;;  %v2682_v58 = vshll.u32 %v2315_v31, 16 }
 0x166   : > { %2240 = vst.msk [vmem:[#allocation4 + $0x8] sm:$0xf] %vm2237_vm0, %v2146_v23  ;;  %v2485_v23 = vsel %vm9518_vm11, %v2480_v35, %v2484_v50  ;;  %v10437_v50 = vrot.slane %v2616_v40, 5  ;;  %v2308_v40 = vld [vmem:[#allocation2 + $0xa4] sm:$0x1] }
 0x167   : > { %2706 = vrot.lane.b32.xlu2 %v2355_v9, %s9414_s14  ;;  %v2007_v61 = vpop.permute.xlu1 %2006  ;;  %v2291_v9 = vld [vmem:[#allocation2 + $0x60] sm:$0xf]  ;;  %v2612_v55 = vrot.slane %v2610_v53, 5  ;;  %v2518_v6 = vrot.slane %v2517_v20, 4  ;;  %v2552_v53 = vrot.slane %v2551_v62, 4  ;;  %v2679_v20 = vshrl.u32 %v2315_v31, 16 }
 0x168   : > { %2074 = vst.msk [vmem:[#allocation4 + $0x74] sm:$0xf] %vm2044_vm4, %v2007_v61  ;;  %v2487_v19 = vshrl.u32 %v2291_v9, 16  ;;  %v2490_v61 = vshll.u32 %v2291_v9, 16  ;;  %v2684_v14 = vrot.slane %v2682_v58, 5  ;;  %vm420_vm4 = vcmask 31744  }
 0x169   : > { %v2144_v24 = vpop.permute.xlu2 %2143  ;;  %v2613_v52 = vor.u32 %v2612_v55, %v2609_v37  ;;  %v2296_v55 = vld [vmem:[#allocation2 + $0x74] sm:$0x1]  ;;  %v2309_v58 = vld [vmem:[#allocation2 + $0xa8] sm:$0xf] }
 0x16a   : > { %2239 = vst.msk [vmem:[#allocation4 + $0x4] sm:$0xf] %vm2237_vm0, %v2144_v24  ;;  %v946_v24 = vrot.slane %v10271_v13, 4  ;;  %v2489_v44 = vrot.slane %v2487_v19, 4  ;;  %v2492_v25 = vrot.slane %v2490_v61, 5  ;;  %v2583_v13 = vshrl.u32 %v2303_v32, 16 }
 0x16b   : > { %2732 = vrot.lane.b32.xlu0 %v2509_v38, %s9414_s14  ;;  %v2310_v38 = vld [vmem:[#allocation2 + $0xac] sm:$0xf]  ;;  %v2614_v35 = vrot.slane %v2613_v52, 4  ;;  %v2559_v19 = vshrl.u32 %v2300_v54, 16  ;;  %v2562_v61 = vshll.u32 %v2300_v54, 16  ;;  %v2594_v52 = vrot.slane %v2592_v41, 5 }
 0x16c   : > { %v2640_v47 = vshll.u32 %v2310_v38, 16  ;;  %v2644_v26 = vshrl.u32 %v2310_v38, 16  ;;  %v1107_v29 = vsel %vm9482_vm5, %v946_v24, %v1106_v36  ;;  %v2585_v1 = vrot.slane %v2583_v13, 4  ;;  %v10461_v32 = vld [vmem:[#allocation2 + $0xc4] sm:$0xf] }
 0x16d   : > { %v2152_v34 = vpop.permute.xlu0 %2151  ;;  %2722 = vrot.lane.b32.xlu1 %v2451_v17, %s9414_s14  ;;  %v2456_v17 = vrot.slane %v2455_v63, 4  ;;  %1108 = vst [vmem:[#allocation2 + $0xc8] sm:$0x1] %v1107_v29  ;;  %v2634_v41 = vshll.u32 %v2309_v58, 16  ;;  %vm2798_vm5 = vcmask 158848  }
 0x16e   : > { %2243 = vst.msk [vmem:[#allocation4 + $0x14] sm:$0xf] %vm2237_vm0, %v2152_v34  ;;  %v2523_v34 = vsel %vm9518_vm11, %v2518_v6, %v10421_v7  ;;  %v10435_v15 = vrot.slane %v2640_v47, 5  ;;  %v2646_v21 = vrot.slane %v2644_v26, 4  ;;  %v2681_v6 = vrot.slane %v2679_v20, 4 }
 0x16f   : > { %2712 = vrot.lane.b32.xlu2 %v2389_v0, %s9414_s14  ;;  %v2142_v49 = vpop.permute.xlu1 %2141  ;;  %v2554_v0 = vshll.u32 %v2299_v48, 16  ;;  %v2461_v8 = vsel %vm9518_vm11, %v2456_v17, %v2460_v2  ;;  %v2530_v26 = vshll.u32 %v2296_v55, 16  ;;  %v2561_v17 = vrot.slane %v2559_v19, 4  ;;  %v2833_v20 = vld [vmem:[#allocation2 + $0x14] sm:$0x1] }
 0x170   : > { %2238 = vst.msk [vmem:[#allocation4] sm:$0xf] %vm2237_vm0, %v2142_v49  ;;  %v2524_v49 = vshrl.u32 %v10398_v57, 16  ;;  %v2647_v16 = vor.u32 %v2646_v21, %v10435_v15  ;;  %v2619_v57 = vsel %vm9518_vm11, %v2614_v35, %v10437_v50  ;;  %v2564_v2 = vrot.slane %v2562_v61, 5 }
 0x171   : > { %v2150_v33 = vpop.permute.xlu2 %2149  ;;  %v2556_v51 = vrot.slane %v2554_v0, 5  ;;  %v2532_v62 = vrot.slane %v2530_v26, 5  ;;  %v2596_v21 = vshrl.u32 %v2304_v56, 16  ;;  %v2313_v56 = vld [vmem:[#allocation2 + $0xb8] sm:$0xf] }
 0x172   : > { %2242 = vst.msk [vmem:[#allocation4 + $0x10] sm:$0xf] %vm2237_vm0, %v2150_v33  ;;  %v2588_v33 = vrot.slane %v2586_v30, 5  ;;  %v2648_v38 = vrot.slane %v2647_v16, 4  ;;  %v2626_v30 = vshll.u32 %v2308_v40, 16  ;;  %v2565_v11 = vor.u32 %v2564_v2, %v2561_v17 }
 0x173   : > { %2738 = vrot.lane.b32.xlu0 %v2547_v42, %s9414_s14  ;;  %v2493_v42 = vor.u32 %v2492_v25, %v2489_v44  ;;  %v2557_v37 = vsel %vm9518_vm11, %v2552_v53, %v2556_v51  ;;  %v2688_v44 = vshll.u32 %v10461_v32, 16  ;;  %v2312_v25 = vld [vmem:[#allocation2 + $0xb4] sm:$0xf]  ;;  %v2598_v53 = vrot.slane %v2596_v21, 4 }
 0x174   : > { %v2589_v63 = vor.u32 %v2588_v33, %v2585_v1  ;;  %v2655_v36 = vshrl.u32 %v2312_v25, 16  ;;  %v2658_v35 = vshll.u32 %v2312_v25, 16  ;;  %v2628_v31 = vrot.slane %v2626_v30, 5 }
 0x175   : > { %v2158_v60 = vpop.permute.xlu0 %2157  ;;  %2728 = vrot.lane.b32.xlu1 %v2485_v23, %s9414_s14  ;;  %v2494_v9 = vrot.slane %v2493_v42, 4  ;;  %v2526_v23 = vrot.slane %v2524_v49, 4  ;;  %v2566_v1 = vrot.slane %v2565_v11, 4  ;;  %v2664_v55 = vshll.u32 %v2313_v56, 16 }
 0x176   : > { %2246 = vst.msk [vmem:[#allocation4 + $0x20] sm:$0xf] %vm2237_vm0, %v2158_v60  ;;  %v2652_v60 = vrot.slane %v2650_v22, 5  ;;  %v2657_v51 = vrot.slane %v2655_v36, 4  ;;  %v2660_v16 = vrot.slane %v2658_v35, 5 }
 0x177   : > { %2718 = vrot.lane.b32.xlu2 %v2427_v3, %s9414_s14  ;;  %v2148_v4 = vpop.permute.xlu1 %2147  ;;  %v2620_v3 = vshrl.u32 %v10417_v5, 16  ;;  %v2499_v5 = vsel %vm9518_vm11, %v2494_v9, %v10346_v28  ;;  %v2527_v47 = vor.u32 %v2526_v23, %v10421_v7  ;;  %v2685_v7 = vor.u32 %v2684_v14, %v2681_v6  ;;  %v2314_v35 = vld [vmem:[#allocation2 + $0xbc] sm:$0x1] }
 0x178   : > { %2241 = vst.msk [vmem:[#allocation4 + $0xc] sm:$0xf] %vm2237_vm0, %v2148_v4  ;;  %v2653_v4 = vsel %vm9518_vm11, %v2648_v38, %v2652_v60  ;;  %v2692_v23 = vshrl.u32 %v10461_v32, 16  ;;  %v2932_v60 = vrot.slane %v2833_v20, 5  ;;  %v2571_v19 = vsel %vm9518_vm11, %v2566_v1, %v10388_v18  ;;  %v2837_v18 = vld [vmem:[#allocation2 + $0x24] sm:$0xe] }
 0x179   : > { %v2156_v39 = vpop.permute.xlu2 %2155  ;;  %v2622_v24 = vrot.slane %v2620_v3, 4  ;;  %v2686_v29 = vrot.slane %v2685_v7, 4  ;;  %v2668_v7 = vshrl.u32 %v2313_v56, 16  ;;  %v2835_v1 = vld [vmem:[#allocation2 + $0x1c] sm:$0xf] }
 0x17a   : > { %2245 = vst.msk [vmem:[#allocation4 + $0x1c] sm:$0xf] %vm2237_vm0, %v2156_v39  ;;  %v2528_v39 = vrot.slane %v2527_v47, 4  ;;  %v2936_v20 = vrot.slane %v2835_v1, 5  ;;  %v2860_v1 = vld [vmem:[#allocation2 + $0x80] sm:$0x1] }
 0x17b   : > { %2744 = vrot.lane.b32.xlu0 %v2581_v10, %s9414_s14  ;;  %v2590_v10 = vrot.slane %v2589_v63, 4  ;;  %v2623_v13 = vor.u32 %v2622_v24, %v10437_v50  ;;  %v10479_v50 = vld [vmem:[#allocation2 + $0x10] sm:$0xf]  ;;  %v2631_v63 = vshrl.u32 %v2309_v58, 16  ;;  %v2670_v11 = vrot.slane %v2668_v7, 4 }
 0x17c   : > { %v2533_v49 = vsel %vm9518_vm11, %v2528_v39, %v2532_v62 }
 0x17d   : > { %v2164_v45 = vpop.permute.xlu0 %2163  ;;  %2734 = vrot.lane.b32.xlu1 %v2523_v34, %s9414_s14  ;;  %v2595_v34 = vsel %vm9518_vm11, %v2590_v10, %v2594_v52  ;;  %v2624_v42 = vrot.slane %v2623_v13, 4  ;;  %v2633_v24 = vrot.slane %v2631_v63, 4  ;;  %v2317_v10 = vld [vmem:[#allocation2 + $0xc8] sm:$0x1]  ;;  %v10515_v13 = vld [vmem:[#allocation2 + $0x34] sm:$0xf] }
 0x17e   : > { %2249 = vst.msk [vmem:[#allocation4 + $0x2c] sm:$0xf] %vm2237_vm0, %v2164_v45  ;;  %v2698_v2 = vshll.u32 %v2317_v10, 16 }
 0x17f   : > { %2724 = vrot.lane.b32.xlu2 %v2461_v8, %s9414_s14  ;;  %v2154_v12 = vpop.permute.xlu1 %2153  ;;  %v10475_v8 = vrot.slane %v2688_v44, 5  ;;  %v2629_v54 = vsel %vm9518_vm11, %v2624_v42, %v2628_v31  ;;  %v9042_v44 = vrot.slane %v2837_v18, 9  ;;  %v2674_v31 = vshll.u32 %v2314_v35, 16  ;;  %v2848_v35 = vld [vmem:[#allocation2 + $0x50] sm:$0x1] }
 0x180   : > { %2244 = vst.msk [vmem:[#allocation4 + $0x18] sm:$0xf] %vm2237_vm0, %v2154_v12  ;;  %v2305_v12 = vld [vmem:[#allocation2 + $0x98] sm:$0x1] }
 0x181   : > { %v2162_v59 = vpop.permute.xlu2 %2161  ;;  %v2691_v33 = vsel %vm9518_vm11, %v2686_v29, %v10475_v8  ;;  %v2602_v3 = vshll.u32 %v2305_v12, 16  ;;  %v2950_v29 = vrot.slane %v10515_v13, 5  ;;  %v2864_v13 = vld [vmem:[#allocation2 + $0x90] sm:$0xe] }
 0x182   : > { %2248 = vst.msk [vmem:[#allocation4 + $0x28] sm:$0xf] %vm2237_vm0, %v2162_v59  ;;  %v2599_v59 = vor.u32 %v2598_v53, %v2594_v52  ;;  %v10505_v52 = vld [vmem:[#allocation2 + $0x28] sm:$0xf] }
 0x183   : > { %2750 = vrot.lane.b32.xlu0 %v2619_v57, %s9414_s14  ;;  %v2929_v57 = vrot.slane %v10479_v50, 5  ;;  %v2604_v26 = vrot.slane %v2602_v3, 5  ;;  %v2943_v25 = vrot.slane %v10505_v52, 5  ;;  %v2847_v3 = vld [vmem:[#allocation2 + $0x4c] sm:$0xf] }
 0x184   : > { %v2600_v6 = vrot.slane %v2599_v59, 4  ;;  %v2846_v59 = vld [vmem:[#allocation2 + $0x48] sm:$0xe]  ;;  %v2843_v52 = vld [vmem:[#allocation2 + $0x3c] sm:$0xe] }
 0x185   : > { %v2170_v48 = vpop.permute.xlu0 %2169  ;;  %2740 = vrot.lane.b32.xlu1 %v2557_v37, %s9414_s14  ;;  %v2661_v37 = vor.u32 %v2660_v16, %v2657_v51  ;;  %v2931_v38 = vrot.slane %v2929_v57, 4  ;;  %v2944_v36 = vsel %vm9964_vm1, %v9042_v44, %v2943_v25  ;;  %v2952_v51 = vrot.slane %v2950_v29, 4  ;;  %v2855_v50 = vld [vmem:[#allocation2 + $0x6c] sm:$0xe] }
 0x186   : > { %2252 = vst.msk [vmem:[#allocation4 + $0x38] sm:$0xf] %vm2237_vm0, %v2170_v48  ;;  %v2694_v48 = vrot.slane %v2692_v23, 4  ;;  %v2605_v39 = vsel %vm9518_vm11, %v2600_v6, %v2604_v26  ;;  %v2676_v23 = vrot.slane %v2674_v31, 5  ;;  %v2945_v6 = vrot.slane %v2943_v25, 4 }
 0x187   : > { %2730 = vrot.lane.b32.xlu2 %v2499_v5, %s9414_s14  ;;  %v2160_v28 = vpop.permute.xlu1 %2159  ;;  %v2662_v14 = vrot.slane %v2661_v37, 4  ;;  %v2666_v5 = vrot.slane %v2664_v55, 5  ;;  %v2933_v32 = vsel %vm9964_vm1, %v2931_v38, %v2932_v60  ;;  %v9045_v55 = vrot.slane %v2846_v59, 9  ;;  %v2839_v60 = vld [vmem:[#allocation2 + $0x2c] sm:$0x1] }
 0x188   : > { %2247 = vst.msk [vmem:[#allocation4 + $0x24] sm:$0xf] %vm2237_vm0, %v2160_v28  ;;  %v2695_v17 = vor.u32 %v2694_v48, %v10475_v8  ;;  %v2964_v38 = vrot.slane %v2847_v3, 5  ;;  %v9044_v7 = vrot.slane %v2843_v52, 9  ;;  %v2967_v31 = vrot.slane %v2848_v35, 5 }
 0x189   : > { %v2168_v0 = vpop.permute.xlu2 %2167  ;;  %v2667_v28 = vsel %vm9518_vm11, %v2662_v14, %v2666_v5  ;;  %v2671_v53 = vor.u32 %v2670_v11, %v2666_v5  ;;  %v2946_v14 = vrot.slane %v2839_v60, 5  ;;  %v2845_v59 = vld [vmem:[#allocation2 + $0x44] sm:$0x1] }
 0x18a   : > { %2251 = vst.msk [vmem:[#allocation4 + $0x34] sm:$0xf] %vm2237_vm0, %v2168_v0  ;;  %v2696_v30 = vrot.slane %v2695_v17, 4  ;;  %v2965_v48 = vsel %vm9964_vm1, %v9045_v55, %v2964_v38 }
 0x18b   : > { %2756 = vrot.lane.b32.xlu0 %v2653_v4, %s9414_s14  ;;  %v2636_v4 = vrot.slane %v2634_v41, 5 }
 0x18d   : > { %v2176_v45 = vpop.permute.xlu0 %2175  ;;  %2746 = vrot.lane.b32.xlu1 %v2595_v34, %s9414_s14  ;;  %v2637_v0 = vor.u32 %v2636_v4, %v2633_v24  ;;  %v2700_v34 = vrot.slane %v2698_v2, 5  ;;  %v2947_v4 = vsel %vm9964_vm1, %v2945_v6, %v2946_v14  ;;  %v2836_v2 = vld [vmem:[#allocation2 + $0x20] sm:$0x1]  ;;  %v2857_v14 = vld [vmem:[#allocation2 + $0x74] sm:$0x1] }
 0x18e   : > { %2255 = vst.msk [vmem:[#allocation4 + $0x44] sm:$0xf] %vm2237_vm0, %v2176_v45 }
 0x18f   : > { %2736 = vrot.lane.b32.xlu2 %v2533_v49, %s9414_s14  ;;  %v2166_v22 = vpop.permute.xlu1 %2165  ;;  %v2638_v8 = vrot.slane %v2637_v0, 4  ;;  %v2842_v49 = vld [vmem:[#allocation2 + $0x38] sm:$0x1]  ;;  %v2701_v42 = vsel %vm9518_vm11, %v2696_v30, %v2700_v34 }
 0x190   : > { %2250 = vst.msk [vmem:[#allocation4 + $0x30] sm:$0xf] %vm2237_vm0, %v2166_v22  ;;  %v2953_v16 = vrot.slane %v2842_v49, 5  ;;  %v2834_v22 = vld [vmem:[#allocation2 + $0x18] sm:$0xe] }
 0x191   : > { %v2174_v9 = vpop.permute.xlu2 %2173  ;;  %v9041_v56 = vrot.slane %v2834_v22, 9  ;;  %v10576_v49 = vld [vmem:[#allocation2 + $0x7c] sm:$0xf] }
 0x192   : > { %2254 = vst.msk [vmem:[#allocation4 + $0x40] sm:$0xf] %vm2237_vm0, %v2174_v9  ;;  %v2672_v9 = vrot.slane %v2671_v53, 4 }
 0x193   : > { %2762 = vrot.lane.b32.xlu0 %v2691_v33, %s9414_s14  ;;  %v2643_v33 = vsel %vm9518_vm11, %v2638_v8, %v10435_v15  ;;  %v2937_v37 = vsel %vm9964_vm1, %v9041_v56, %v2936_v20 }
 0x194   : > { %v2677_v63 = vsel %vm9518_vm11, %v2672_v9, %v2676_v23  ;;  %v2853_v9 = vld [vmem:[#allocation2 + $0x64] sm:$0xf] }
 0x195   : > { %v2182_v61 = vpop.permute.xlu0 %2181  ;;  %2752 = vrot.lane.b32.xlu1 %v2629_v54, %s9414_s14  ;;  %v2954_v54 = vsel %vm9964_vm1, %v2952_v51, %v2953_v16  ;;  %v2992_v16 = vrot.slane %v10576_v49, 5 }
 0x196   : > { %2258 = vst.msk [vmem:[#allocation4 + $0x50] sm:$0xf] %vm2237_vm0, %v2182_v61  ;;  %v2831_v61 = vld [vmem:[#allocation2 + $0xc] sm:$0xe] }
 0x197   : > { %2742 = vrot.lane.b32.xlu2 %v2571_v19, %s9414_s14  ;;  %v2172_v47 = vpop.permute.xlu1 %2171  ;;  %v10545_v19 = vld [vmem:[#allocation2 + $0x58] sm:$0xf]  ;;  %v9040_v26 = vrot.slane %v2831_v61, 9  ;;  %v2994_v56 = vrot.slane %v2992_v16, 4  ;;  %v9051_v61 = vrot.slane %v2864_v13, 9 }
 0x198   : > { %2253 = vst.msk [vmem:[#allocation4 + $0x3c] sm:$0xf] %vm2237_vm0, %v2172_v47  ;;  %v2971_v47 = vrot.slane %v10545_v19, 5  ;;  %v2873_v19 = vld [vmem:[#allocation2 + $0xb4] sm:$0xe] }
 0x199   : > { %v2180_v40 = vpop.permute.xlu2 %2179  ;;  %v2863_v13 = vld [vmem:[#allocation2 + $0x8c] sm:$0x1] }
 0x19a   : > { %2257 = vst.msk [vmem:[#allocation4 + $0x4c] sm:$0xf] %vm2237_vm0, %v2180_v40  ;;  %v2973_v10 = vrot.slane %v2971_v47, 4  ;;  %v2844_v40 = vld [vmem:[#allocation2 + $0x40] sm:$0xf] }
 0x19b   : > { %3041 = vrot.lane.b32.xlu0 %v2933_v32, %s9415_s15  ;;  %v2851_v32 = vld [vmem:[#allocation2 + $0x5c] sm:$0x1]  ;;  %v2957_v44 = vrot.slane %v2844_v40, 5 }
 0x19c   : > { %v2974_v18 = vrot.slane %v2851_v32, 5  ;;  %v2849_v32 = vld [vmem:[#allocation2 + $0x54] sm:$0xe] }
 0x19d   : > { %v2188_v62 = vpop.permute.xlu0 %2187  ;;  %2758 = vrot.lane.b32.xlu1 %v2667_v28, %s9414_s14  ;;  %v2930_v28 = vsel %vm9964_vm1, %v9040_v26, %v2929_v57  ;;  %v2856_v57 = vld [vmem:[#allocation2 + $0x70] sm:$0xf]  ;;  %v2958_v34 = vsel %vm9964_vm1, %v9044_v7, %v2957_v44  ;;  %v2959_v55 = vrot.slane %v2957_v44, 4  ;;  %v10607_v26 = vld [vmem:[#allocation2 + $0xa0] sm:$0xf]  ;;  %v9046_v40 = vrot.slane %v2849_v32, 9 }
 0x19e   : > { %2261 = vst.msk [vmem:[#allocation4 + $0x5c] sm:$0xf] %vm2237_vm0, %v2188_v62  ;;  %v2939_v62 = vrot.slane %v2836_v2, 5  ;;  %v2975_v0 = vsel %vm9964_vm1, %v2973_v10, %v2974_v18  ;;  %v3013_v52 = vrot.slane %v10607_v26, 5  ;;  %v3169_v26 = vld [vmem:[#allocation2 + $0x18] sm:$0xf] }
 0x19f   : > { %2748 = vrot.lane.b32.xlu2 %v2605_v39, %s9414_s14  ;;  %v2178_v21 = vpop.permute.xlu1 %2177  ;;  %v2938_v39 = vrot.slane %v2936_v20, 4  ;;  %v2995_v20 = vrot.slane %v2860_v1, 5  ;;  %v2858_v1 = vld [vmem:[#allocation2 + $0x78] sm:$0xe] }
 0x1a0   : > { %2256 = vst.msk [vmem:[#allocation4 + $0x48] sm:$0xf] %vm2237_vm0, %v2178_v21  ;;  %v9048_v21 = vrot.slane %v2855_v50, 9  ;;  %v3015_v7 = vrot.slane %v3013_v52, 4  ;;  %v2854_v50 = vld [vmem:[#allocation2 + $0x68] sm:$0x1] }
 0x1a1   : > { %v2186_v45 = vpop.permute.xlu2 %2185  ;;  %v2940_v11 = vsel %vm9964_vm1, %v2938_v39, %v2939_v62  ;;  %v2996_v60 = vsel %vm9964_vm1, %v2994_v56, %v2995_v20  ;;  %v2862_v39 = vld [vmem:[#allocation2 + $0x88] sm:$0xf]  ;;  %v2972_v62 = vsel %vm9964_vm1, %v9046_v40, %v2971_v47  ;;  %v2874_v47 = vld [vmem:[#allocation2 + $0xb8] sm:$0xf]  ;;  %v3171_v40 = vld [vmem:[#allocation2 + $0x24] sm:$0xf] }
 0x1a2   : > { %2260 = vst.msk [vmem:[#allocation4 + $0x58] sm:$0xf] %vm2237_vm0, %v2186_v45  ;;  %v2840_v45 = vld [vmem:[#allocation2 + $0x30] sm:$0xe] }
 0x1a3   : > { %3047 = vrot.lane.b32.xlu0 %v2944_v36, %s9415_s15  ;;  %v2985_v36 = vrot.slane %v2856_v57, 5  ;;  %v9043_v22 = vrot.slane %v2840_v45, 9  ;;  %v9054_v45 = vrot.slane %v2873_v19, 9 }
 0x1a5   : > { %v2194_v12 = vpop.permute.xlu0 %2193  ;;  %2764 = vrot.lane.b32.xlu1 %v2701_v42, %s9414_s14  ;;  %v2966_v42 = vrot.slane %v2964_v38, 4  ;;  %v2986_v51 = vsel %vm9964_vm1, %v9048_v21, %v2985_v36  ;;  %v2951_v23 = vsel %vm9964_vm1, %v9043_v22, %v2950_v29  ;;  %v2960_v38 = vrot.slane %v2845_v59, 5  ;;  %v2865_v29 = vld [vmem:[#allocation2 + $0x94] sm:$0xf]  ;;  %v10638_v22 = vld [vmem:[#allocation2 + $0xc4] sm:$0xf] }
 0x1a6   : > { %2264 = vst.msk [vmem:[#allocation4 + $0x68] sm:$0xf] %vm2237_vm0, %v2194_v12  ;;  %v3006_v6 = vrot.slane %v2865_v29, 5 }
 0x1a7   : > { %2754 = vrot.lane.b32.xlu2 %v2643_v33, %s9414_s14  ;;  %v2184_v58 = vpop.permute.xlu1 %2183  ;;  %v2968_v12 = vsel %vm9964_vm1, %v2966_v42, %v2967_v31  ;;  %v3027_v42 = vrot.slane %v2874_v47, 5  ;;  %v2866_v31 = vld [vmem:[#allocation2 + $0x98] sm:$0x1]  ;;  %v3172_v47 = vld [vmem:[#allocation2 + $0x28] sm:$0xf] }
 0x1a8   : > { %2259 = vst.msk [vmem:[#allocation4 + $0x54] sm:$0xf] %vm2237_vm0, %v2184_v58  ;;  %v2852_v58 = vld [vmem:[#allocation2 + $0x60] sm:$0xe]  ;;  %v3007_v18 = vsel %vm9964_vm1, %v9051_v61, %v3006_v6 }
 0x1a9   : > { %v2192_v15 = vpop.permute.xlu2 %2191  ;;  %v9047_v3 = vrot.slane %v2852_v58, 9  ;;  %v3028_v20 = vsel %vm9964_vm1, %v9054_v45, %v3027_v42  ;;  %v3034_v58 = vrot.slane %v10638_v22, 5 }
 0x1aa   : > { %2263 = vst.msk [vmem:[#allocation4 + $0x64] sm:$0xf] %vm2237_vm0, %v2192_v15  ;;  %v2978_v15 = vrot.slane %v2853_v9, 5  ;;  %v9049_v9 = vrot.slane %v2858_v1, 9 }
 0x1ab   : > { %3053 = vrot.lane.b32.xlu0 %v2954_v54, %s9415_s15 }
 0x1ac   : > { %v2980_v21 = vrot.slane %v2978_v15, 4 }
 0x1ad   : > { %v2200_v41 = vpop.permute.xlu0 %2199  ;;  %3043 = vrot.lane.b32.xlu1 %v2937_v37, %s9415_s15 }
 0x1ae   : > { %2267 = vst.msk [vmem:[#allocation4 + $0x74] sm:$0xf] %vm2237_vm0, %v2200_v41  ;;  %v2979_v41 = vsel %vm9964_vm1, %v9047_v3, %v2978_v15  ;;  %v3036_v3 = vrot.slane %v3034_v58, 4 }
 0x1af   : > { %2760 = vrot.lane.b32.xlu2 %v2677_v63, %s9414_s14  ;;  %v2190_v5 = vpop.permute.xlu1 %2189 }
 0x1b0   : > { %2262 = vst.msk [vmem:[#allocation4 + $0x60] sm:$0xf] %vm2237_vm0, %v2190_v5  ;;  %v2961_v5 = vsel %vm9964_vm1, %v2959_v55, %v2960_v38  ;;  %v2871_v55 = vld [vmem:[#allocation2 + $0xac] sm:$0xf]  ;;  %v2993_v38 = vsel %vm9964_vm1, %v9049_v9, %v2992_v16 }
 0x1b1   : > { %v2198_v24 = vpop.permute.xlu2 %2197 }
 0x1b2   : > { %2266 = vst.msk [vmem:[#allocation4 + $0x70] sm:$0xf] %vm2237_vm0, %v2198_v24  ;;  %v2987_v24 = vrot.slane %v2985_v36, 4  ;;  %v2981_v36 = vrot.slane %v2854_v50, 5 }
 0x1b3   : > { %3059 = vrot.lane.b32.xlu0 %v2965_v48, %s9415_s15 }
 0x1b5   : > { %v2703_v17 = vpop.permute.xlu0 %2702  ;;  %3049 = vrot.lane.b32.xlu1 %v2947_v4, %s9415_s15  ;;  %v2988_v4 = vrot.slane %v2857_v14, 5 }
 0x1b6   : > { %2799 = vst.msk [vmem:[#allocation4] sm:$0xf] %vm2798_vm5, %v2703_v17 }
 0x1b7   : > { %3039 = vrot.lane.b32.xlu2 %v2930_v28, %s9415_s15  ;;  %v2196_v25 = vpop.permute.xlu1 %2195  ;;  %v2869_v28 = vld [vmem:[#allocation2 + $0xa4] sm:$0x1]  ;;  %v2989_v2 = vsel %vm9964_vm1, %v2987_v24, %v2988_v4  ;;  %v2867_v24 = vld [vmem:[#allocation2 + $0x9c] sm:$0xe]  ;;  %v3029_v4 = vrot.slane %v3027_v42, 4 }
 0x1b8   : > { %2265 = vst.msk [vmem:[#allocation4 + $0x6c] sm:$0xf] %vm2237_vm0, %v2196_v25  ;;  %v3016_v44 = vrot.slane %v2869_v28, 5  ;;  %v2861_v25 = vld [vmem:[#allocation2 + $0x84] sm:$0xe]  ;;  %v9052_v28 = vrot.slane %v2867_v24, 9 }
 0x1b9   : > { %v2204_v30 = vpop.permute.xlu2 %2203  ;;  %v9050_v57 = vrot.slane %v2861_v25, 9  ;;  %v2872_v25 = vld [vmem:[#allocation2 + $0xb0] sm:$0x1]  ;;  %v3180_v42 = vld [vmem:[#allocation2 + $0x58] sm:$0xf] }
 0x1ba   : > { %2269 = vst.msk [vmem:[#allocation4 + $0x7c] sm:$0xf] %vm2237_vm0, %v2204_v30  ;;  %v2999_v30 = vrot.slane %v2862_v39, 5  ;;  %v3017_v35 = vsel %vm9964_vm1, %v3015_v7, %v3016_v44  ;;  %v3014_v7 = vsel %vm9964_vm1, %v9052_v28, %v3013_v52  ;;  %v3023_v50 = vrot.slane %v2872_v25, 5  ;;  %v3195_v24 = vld [vmem:[#allocation2 + $0xb4] sm:$0xf] }
 0x1bb   : > { %3065 = vrot.lane.b32.xlu0 %v2975_v0, %s9415_s15  ;;  %v3363_v28 = vld [vmem:[#allocation2 + $0x1c] sm:$0xf] }
 0x1bc   : > { %v3001_v49 = vrot.slane %v2999_v30, 4  ;;  %v3420_v25 = vshll.u32 %v3363_v28, 16 }
 0x1bd   : > { %v2709_v8 = vpop.permute.xlu0 %2708  ;;  %3055 = vrot.lane.b32.xlu1 %v2958_v34, %s9415_s15 }
 0x1be   : > { %2802 = vst.msk [vmem:[#allocation4 + $0xc] sm:$0xf] %vm2798_vm5, %v2709_v8  ;;  %v3000_v8 = vsel %vm9964_vm1, %v9050_v57, %v2999_v30 }
 0x1bf   : > { %3045 = vrot.lane.b32.xlu2 %v2940_v11, %s9415_s15  ;;  %v2202_v53 = vpop.permute.xlu1 %2201 }
 0x1c0   : > { %2268 = vst.msk [vmem:[#allocation4 + $0x78] sm:$0xf] %vm2237_vm0, %v2202_v53  ;;  %v2982_v53 = vsel %vm9964_vm1, %v2980_v21, %v2981_v36  ;;  %v3177_v36 = vld [vmem:[#allocation2 + $0x48] sm:$0xf]  ;;  %vm11185_vm0 = vmand %vm4672_vm9, %vm573_vm2 }
 0x1c1   : > { %v2707_v33 = vpop.permute.xlu2 %2706  ;;  %vm11240_vm2 = vmand %vm4669_vm8, %vm623_vm6 }
 0x1c2   : > { %2801 = vst.msk [vmem:[#allocation4 + $0x8] sm:$0xf] %vm2798_vm5, %v2707_v33  ;;  %v3008_v33 = vrot.slane %v3006_v6, 4  ;;  %v3002_v6 = vrot.slane %v2863_v13, 5  ;;  %v3179_v13 = vld [vmem:[#allocation2 + $0x54] sm:$0xf] }
 0x1c3   : > { %3071 = vrot.lane.b32.xlu0 %v2986_v51, %s9415_s15 }
 0x1c5   : > { %v2715_v54 = vpop.permute.xlu0 %2714  ;;  %3061 = vrot.lane.b32.xlu1 %v2968_v12, %s9415_s15  ;;  %v3009_v12 = vrot.slane %v2866_v31, 5 }
 0x1c6   : > { %2805 = vst.msk [vmem:[#allocation4 + $0x18] sm:$0xf] %vm2798_vm5, %v2715_v54 }
 0x1c7   : > { %3051 = vrot.lane.b32.xlu2 %v2951_v23, %s9415_s15  ;;  %v2705_v37 = vpop.permute.xlu1 %2704  ;;  %v2878_v23 = vld [vmem:[#allocation2 + $0xc8] sm:$0x1]  ;;  %v3010_v59 = vsel %vm9964_vm1, %v3008_v33, %v3009_v12  ;;  %v3183_v33 = vld [vmem:[#allocation2 + $0x6c] sm:$0xf] }
 0x1c8   : > { %2800 = vst.msk [vmem:[#allocation4 + $0x4] sm:$0xf] %vm2798_vm5, %v2705_v37  ;;  %v3037_v15 = vrot.slane %v2878_v23, 5  ;;  %v2870_v37 = vld [vmem:[#allocation2 + $0xa8] sm:$0xe] }
 0x1c9   : > { %v2713_v63 = vpop.permute.xlu2 %2712  ;;  %v9053_v29 = vrot.slane %v2870_v37, 9  ;;  %v3186_v23 = vld [vmem:[#allocation2 + $0x7c] sm:$0xf] }
 0x1ca   : > { %2804 = vst.msk [vmem:[#allocation4 + $0x14] sm:$0xf] %vm2798_vm5, %v2713_v63  ;;  %v3020_v63 = vrot.slane %v2871_v55, 5  ;;  %v3038_v61 = vsel %vm9964_vm1, %v3036_v3, %v3037_v15  ;;  %v3176_v3 = vld [vmem:[#allocation2 + $0x40] sm:$0xf] }
 0x1cb   : > { %3077 = vrot.lane.b32.xlu0 %v2996_v60, %s9415_s15  ;;  %v3189_v55 = vld [vmem:[#allocation2 + $0x90] sm:$0xf] }
 0x1cc   : > { %v3021_v16 = vsel %vm9964_vm1, %v9053_v29, %v3020_v63 }
 0x1cd   : > { %v2721_v48 = vpop.permute.xlu0 %2720  ;;  %3067 = vrot.lane.b32.xlu1 %v2979_v41, %s9415_s15 }
 0x1ce   : > { %2808 = vst.msk [vmem:[#allocation4 + $0x24] sm:$0xf] %vm2798_vm5, %v2721_v48  ;;  %v3003_v48 = vsel %vm9964_vm1, %v3001_v49, %v3002_v6  ;;  %v3187_v49 = vld [vmem:[#allocation2 + $0x84] sm:$0xf]  ;;  %v3362_v6 = vld [vmem:[#allocation2 + $0x18] sm:$0xf] }
 0x1cf   : > { %3057 = vrot.lane.b32.xlu2 %v2961_v5, %s9415_s15  ;;  %v2711_v10 = vpop.permute.xlu1 %2710  ;;  %v2875_v5 = vld [vmem:[#allocation2 + $0xbc] sm:$0x1] }
 0x1d0   : > { %2803 = vst.msk [vmem:[#allocation4 + $0x10] sm:$0xf] %vm2798_vm5, %v2711_v10  ;;  %v3030_v10 = vrot.slane %v2875_v5, 5  ;;  %v3411_v5 = vshrl.u32 %v3362_v6, 16 }
 0x1d1   : > { %v2719_v17 = vpop.permute.xlu2 %2718 }
 0x1d2   : > { %2807 = vst.msk [vmem:[#allocation4 + $0x20] sm:$0xf] %vm2798_vm5, %v2719_v17 }
 0x1d3   : > { %3083 = vrot.lane.b32.xlu0 %v3007_v18, %s9415_s15 }
 0x1d5   : > { %v2727_v0 = vpop.permute.xlu0 %2726  ;;  %3073 = vrot.lane.b32.xlu1 %v2989_v2, %s9415_s15  ;;  %v3031_v2 = vsel %vm9964_vm1, %v3029_v4, %v3030_v10  ;;  %v3190_v10 = vld [vmem:[#allocation2 + $0x94] sm:$0xf] }
 0x1d6   : > { %2811 = vst.msk [vmem:[#allocation4 + $0x30] sm:$0xf] %vm2798_vm5, %v2727_v0  ;;  %v3022_v0 = vrot.slane %v3020_v63, 4 }
 0x1d7   : > { %3063 = vrot.lane.b32.xlu2 %v2972_v62, %s9415_s15  ;;  %v2717_v34 = vpop.permute.xlu1 %2716  ;;  %v3174_v62 = vld [vmem:[#allocation2 + $0x34] sm:$0xf] }
 0x1d8   : > { %2806 = vst.msk [vmem:[#allocation4 + $0x1c] sm:$0xf] %vm2798_vm5, %v2717_v34  ;;  %v3024_v52 = vsel %vm9964_vm1, %v3022_v0, %v3023_v50  ;;  %v2876_v34 = vld [vmem:[#allocation2 + $0xc0] sm:$0xe] }
 0x1d9   : > { %v2725_v11 = vpop.permute.xlu2 %2724 }
 0x1da   : > { %2810 = vst.msk [vmem:[#allocation4 + $0x2c] sm:$0xf] %vm2798_vm5, %v2725_v11 }
 0x1db   : > { %3089 = vrot.lane.b32.xlu0 %v3017_v35, %s9415_s15  ;;  %v9055_v35 = vrot.slane %v2876_v34, 9 }
 0x1dd   : > { %v2733_v51 = vpop.permute.xlu0 %2732  ;;  %3079 = vrot.lane.b32.xlu1 %v3000_v8, %s9415_s15  ;;  %v3035_v11 = vsel %vm9964_vm1, %v9055_v35, %v3034_v58 }
 0x1de   : > { %2814 = vst.msk [vmem:[#allocation4 + $0x3c] sm:$0xf] %vm2798_vm5, %v2733_v51  ;;  %v3170_v51 = vld [vmem:[#allocation2 + $0x1c] sm:$0xf] }
 0x1df   : > { %3069 = vrot.lane.b32.xlu2 %v2982_v53, %s9415_s15  ;;  %v2723_v56 = vpop.permute.xlu1 %2722  ;;  %v3175_v53 = vld [vmem:[#allocation2 + $0x3c] sm:$0xf] }
 0x1e0   : > { %2809 = vst.msk [vmem:[#allocation4 + $0x28] sm:$0xf] %vm2798_vm5, %v2723_v56  ;;  %v3178_v56 = vld [vmem:[#allocation2 + $0x4c] sm:$0xf] }
 0x1e1   : > { %v2731_v54 = vpop.permute.xlu2 %2730 }
 0x1e2   : > { %2813 = vst.msk [vmem:[#allocation4 + $0x38] sm:$0xf] %vm2798_vm5, %v2731_v54 }
 0x1e3   : > { %3095 = vrot.lane.b32.xlu0 %v3028_v20, %s9415_s15  ;;  %v3173_v20 = vld [vmem:[#allocation2 + $0x30] sm:$0xf] }
 0x1e5   : > { %v2739_v60 = vpop.permute.xlu0 %2738  ;;  %3085 = vrot.lane.b32.xlu1 %v3010_v59, %s9415_s15  ;;  %v3181_v59 = vld [vmem:[#allocation2 + $0x60] sm:$0xf] }
 0x1e6   : > { %2817 = vst.msk [vmem:[#allocation4 + $0x48] sm:$0xf] %vm2798_vm5, %v2739_v60  ;;  %v3184_v60 = vld [vmem:[#allocation2 + $0x70] sm:$0xf] }
 0x1e7   : > { %3075 = vrot.lane.b32.xlu2 %v2993_v38, %s9415_s15  ;;  %v2729_v41 = vpop.permute.xlu1 %2728 }
 0x1e8   : > { %2812 = vst.msk [vmem:[#allocation4 + $0x34] sm:$0xf] %vm2798_vm5, %v2729_v41  ;;  %v3192_v41 = vld [vmem:[#allocation2 + $0xa0] sm:$0xf] }
 0x1e9   : > { %v2737_v14 = vpop.permute.xlu2 %2736 }
 0x1ea   : > { %2816 = vst.msk [vmem:[#allocation4 + $0x44] sm:$0xf] %vm2798_vm5, %v2737_v14  ;;  %v3182_v14 = vld [vmem:[#allocation2 + $0x64] sm:$0xf] }
 0x1eb   : > { %3101 = vrot.lane.b32.xlu0 %v3038_v61, %s9415_s15 }
 0x1ed   : > { %v2745_v32 = vpop.permute.xlu0 %2744  ;;  %3091 = vrot.lane.b32.xlu1 %v3021_v16, %s9415_s15 }
 0x1ee   : > { %2820 = vst.msk [vmem:[#allocation4 + $0x54] sm:$0xf] %vm2798_vm5, %v2745_v32 }
 0x1ef   : > { %3081 = vrot.lane.b32.xlu2 %v3003_v48, %s9415_s15  ;;  %v2735_v18 = vpop.permute.xlu1 %2734  ;;  %v3414_v48 = vshll.u32 %v3362_v6, 16 }
 0x1f0   : > { %2815 = vst.msk [vmem:[#allocation4 + $0x40] sm:$0xf] %vm2798_vm5, %v2735_v18  ;;  %v3413_v18 = vrot.slane %v3411_v5, 4 }
 0x1f1   : > { %v2743_v17 = vpop.permute.xlu2 %2742 }
 0x1f2   : > { %2819 = vst.msk [vmem:[#allocation4 + $0x50] sm:$0xf] %vm2798_vm5, %v2743_v17  ;;  %v3185_v17 = vld [vmem:[#allocation2 + $0x78] sm:$0xf] }
 0x1f3   : > { %3237 = vrot.lane.b32.xlu0 %v3171_v40, %s9416_s16  ;;  %v3416_v40 = vrot.slane %v3414_v48, 5 }
 0x1f5   : > { %v2751_v44 = vpop.permute.xlu0 %2750  ;;  %3097 = vrot.lane.b32.xlu1 %v3031_v2, %s9415_s15 }
 0x1f6   : > { %2823 = vst.msk [vmem:[#allocation4 + $0x60] sm:$0xf] %vm2798_vm5, %v2751_v44  ;;  %v3417_v44 = vor.u32 %v3416_v40, %v3413_v18  ;;  %v3380_v18 = vld [vmem:[#allocation2 + $0x60] sm:$0xf] }
 0x1f7   : > { %3087 = vrot.lane.b32.xlu2 %v3014_v7, %s9415_s15  ;;  %v2741_v39 = vpop.permute.xlu1 %2740  ;;  %v3366_v7 = vld [vmem:[#allocation2 + $0x28] sm:$0xf] }
 0x1f8   : > { %2818 = vst.msk [vmem:[#allocation4 + $0x4c] sm:$0xf] %vm2798_vm5, %v2741_v39  ;;  %v3444_v0 = vshll.u32 %v3366_v7, 16  ;;  %v3448_v50 = vshrl.u32 %v3366_v7, 16 }
 0x1f9   : > { %v2749_v57 = vpop.permute.xlu2 %2748 }
 0x1fa   : > { %2822 = vst.msk [vmem:[#allocation4 + $0x5c] sm:$0xf] %vm2798_vm5, %v2749_v57  ;;  %v10741_v34 = vrot.slane %v3444_v0, 5  ;;  %v3555_v0 = vshrl.u32 %v3380_v18, 16 }
 0x1fb   : > { %3243 = vrot.lane.b32.xlu0 %v3174_v62, %s9416_s16  ;;  %v3198_v62 = vld [vmem:[#allocation2 + $0xc4] sm:$0xf] }
 0x1fd   : > { %v2757_v30 = vpop.permute.xlu0 %2756  ;;  %3233 = vrot.lane.b32.xlu1 %v3169_v26, %s9416_s16  ;;  %v3193_v26 = vld [vmem:[#allocation2 + $0xa8] sm:$0xf] }
 0x1fe   : > { %2826 = vst.msk [vmem:[#allocation4 + $0x6c] sm:$0xf] %vm2798_vm5, %v2757_v30  ;;  %v3422_v30 = vrot.slane %v3420_v25, 5 }
 0x1ff   : > { %3093 = vrot.lane.b32.xlu2 %v3024_v52, %s9415_s15  ;;  %v2747_v21 = vpop.permute.xlu1 %2746  ;;  %v3418_v52 = vrot.slane %v3417_v44, 4 }
 0x200   : > { %2821 = vst.msk [vmem:[#allocation4 + $0x58] sm:$0xf] %vm2798_vm5, %v2747_v21  ;;  %v3450_v21 = vrot.slane %v3448_v50, 4  ;;  %v3558_v50 = vshll.u32 %v3380_v18, 16 }
 0x201   : > { %v2755_v19 = vpop.permute.xlu2 %2754 }
 0x202   : > { %2825 = vst.msk [vmem:[#allocation4 + $0x68] sm:$0xf] %vm2798_vm5, %v2755_v19  ;;  %v3367_v19 = vld [vmem:[#allocation2 + $0x2c] sm:$0x1] }
 0x203   : > { %3249 = vrot.lane.b32.xlu0 %v3177_v36, %s9416_s16  ;;  %v3188_v36 = vld [vmem:[#allocation2 + $0x88] sm:$0xf] }
 0x205   : > { %v2763_v8 = vpop.permute.xlu0 %2762  ;;  %3239 = vrot.lane.b32.xlu1 %v3172_v47, %s9416_s16  ;;  %v3371_v47 = vld [vmem:[#allocation2 + $0x3c] sm:$0xf] }
 0x206   : > { %2829 = vst.msk [vmem:[#allocation4 + $0x78] sm:$0xf] %vm2798_vm5, %v2763_v8 }
 0x207   : > { %3099 = vrot.lane.b32.xlu2 %v3035_v11, %s9415_s15  ;;  %v2753_v45 = vpop.permute.xlu1 %2752  ;;  %v3423_v11 = vsel %vm9518_vm11, %v3418_v52, %v3422_v30 }
 0x208   : > { %2824 = vst.msk [vmem:[#allocation4 + $0x64] sm:$0xf] %vm2798_vm5, %v2753_v45  ;;  %v3451_v45 = vor.u32 %v3450_v21, %v10741_v34 }
 0x209   : > { %v2761_v31 = vpop.permute.xlu2 %2760 }
 0x20a   : > { %2828 = vst.msk [vmem:[#allocation4 + $0x74] sm:$0xf] %vm2798_vm5, %v2761_v31  ;;  %v3483_v31 = vshrl.u32 %v3371_v47, 16 }
 0x20b   : > { %3255 = vrot.lane.b32.xlu0 %v3180_v42, %s9416_s16  ;;  %v3454_v42 = vshll.u32 %v3367_v19, 16 }
 0x20d   : > { %v3042_v22 = vpop.permute.xlu0 %3041  ;;  %3245 = vrot.lane.b32.xlu1 %v3175_v53, %s9416_s16  ;;  %v3486_v53 = vshll.u32 %v3371_v47, 16  ;;  %v3197_v47 = vld [vmem:[#allocation2 + $0xc0] sm:$0xf] }
 0x20e   : > { %3137 = vst.msk [vmem:[#allocation4 + $0x4] sm:$0xf] %vm3135_vm7, %v3042_v22  ;;  %v3424_v22 = vshrl.u32 %v3363_v28, 16 }
 0x20f   : > { %3235 = vrot.lane.b32.xlu2 %v3170_v51, %s9416_s16  ;;  %v2759_v1 = vpop.permute.xlu1 %2758 }
 0x210   : > { %2827 = vst.msk [vmem:[#allocation4 + $0x70] sm:$0xf] %vm2798_vm5, %v2759_v1  ;;  %v3196_v1 = vld [vmem:[#allocation2 + $0xb8] sm:$0xf] }
 0x211   : > { %v3040_v12 = vpop.permute.xlu2 %3039 }
 0x212   : > { %3136 = vst.msk [vmem:[#allocation4] sm:$0xf] %vm3135_vm7, %v3040_v12  ;;  %v3456_v12 = vrot.slane %v3454_v42, 5 }
 0x213   : > { %3261 = vrot.lane.b32.xlu0 %v3183_v33, %s9416_s16  ;;  %v3452_v33 = vrot.slane %v3451_v45, 4  ;;  %v3560_v45 = vrot.slane %v3558_v50, 5 }
 0x215   : > { %v3048_v58 = vpop.permute.xlu0 %3047  ;;  %3251 = vrot.lane.b32.xlu1 %v3178_v56, %s9416_s16  ;;  %v3485_v56 = vrot.slane %v3483_v31, 4 }
 0x216   : > { %3140 = vst.msk [vmem:[#allocation4 + $0x10] sm:$0xf] %vm3135_vm7, %v3048_v58  ;;  %v3375_v58 = vld [vmem:[#allocation2 + $0x4c] sm:$0xf] }
 0x217   : > { %3241 = vrot.lane.b32.xlu2 %v3173_v20, %s9416_s16  ;;  %v2765_v9 = vpop.permute.xlu1 %2764  ;;  %v3488_v20 = vrot.slane %v3486_v53, 5  ;;  %v10779_v53 = vld [vmem:[#allocation2 + $0x64] sm:$0xf] }
 0x218   : > { %2830 = vst.msk [vmem:[#allocation4 + $0x7c] sm:$0xf] %vm2798_vm5, %v2765_v9  ;;  %v3191_v9 = vld [vmem:[#allocation2 + $0x9c] sm:$0xf]  ;;  %vm11194_vm5 = vmand %vm4672_vm9, %vm623_vm6  ;;  %vm5836_vm6 = vcmask 126016   ;;  %vm6173_vm9 = vcmask 191616  }
 0x219   : > { %v3046_v54 = vpop.permute.xlu2 %3045 }
 0x21a   : > { %3139 = vst.msk [vmem:[#allocation4 + $0xc] sm:$0xf] %vm3135_vm7, %v3046_v54  ;;  %v3372_v54 = vld [vmem:[#allocation2 + $0x40] sm:$0xf] }
 0x21b   : > { %3267 = vrot.lane.b32.xlu0 %v3186_v23, %s9416_s16 }
 0x21d   : > { %v3054_v15 = vpop.permute.xlu0 %3053  ;;  %3257 = vrot.lane.b32.xlu1 %v3181_v59, %s9416_s16  ;;  %v3426_v59 = vrot.slane %v3424_v22, 4  ;;  %v3384_v22 = vld [vmem:[#allocation2 + $0x70] sm:$0xf] }
 0x21e   : > { %3143 = vst.msk [vmem:[#allocation4 + $0x1c] sm:$0xf] %vm3135_vm7, %v3054_v15  ;;  %v3516_v15 = vshll.u32 %v3375_v58, 16 }
 0x21f   : > { %3247 = vrot.lane.b32.xlu2 %v3176_v3, %s9416_s16  ;;  %v3044_v37 = vpop.permute.xlu1 %3043  ;;  %v3364_v3 = vld [vmem:[#allocation2 + $0x20] sm:$0x1] }
 0x220   : > { %3138 = vst.msk [vmem:[#allocation4 + $0x8] sm:$0xf] %vm3135_vm7, %v3044_v37  ;;  %v3520_v37 = vshrl.u32 %v3375_v58, 16  ;;  %v10760_v6 = vrot.slane %v3516_v15, 5 }
 0x221   : > { %v3052_v38 = vpop.permute.xlu2 %3051 }
 0x222   : > { %3142 = vst.msk [vmem:[#allocation4 + $0x18] sm:$0xf] %vm3135_vm7, %v3052_v38  ;;  %v3457_v38 = vsel %vm9518_vm11, %v3452_v33, %v3456_v12 }
 0x223   : > { %3273 = vrot.lane.b32.xlu0 %v3189_v55, %s9416_s16 }
 0x225   : > { %v3060_v29 = vpop.permute.xlu0 %3059  ;;  %3263 = vrot.lane.b32.xlu1 %v3184_v60, %s9416_s16  ;;  %v3489_v60 = vor.u32 %v3488_v20, %v3485_v56  ;;  %v3377_v20 = vld [vmem:[#allocation2 + $0x54] sm:$0xf] }
 0x226   : > { %3146 = vst.msk [vmem:[#allocation4 + $0x28] sm:$0xf] %vm3135_vm7, %v3060_v29  ;;  %v3368_v29 = vld [vmem:[#allocation2 + $0x30] sm:$0xf] }
 0x227   : > { %3253 = vrot.lane.b32.xlu2 %v3179_v13, %s9416_s16  ;;  %v3050_v63 = vpop.permute.xlu1 %3049  ;;  %v3492_v13 = vshll.u32 %v3372_v54, 16  ;;  %v3462_v5 = vshll.u32 %v3368_v29, 16  ;;  %v3490_v48 = vrot.slane %v3489_v60, 4  ;;  %v3531_v60 = vshrl.u32 %v3377_v20, 16 }
 0x228   : > { %3141 = vst.msk [vmem:[#allocation4 + $0x14] sm:$0xf] %vm3135_vm7, %v3050_v63 }
 0x229   : > { %v3058_v61 = vpop.permute.xlu2 %3057  ;;  %v3464_v44 = vrot.slane %v3462_v5, 5  ;;  %v3533_v18 = vrot.slane %v3531_v60, 4 }
 0x22a   : > { %3145 = vst.msk [vmem:[#allocation4 + $0x24] sm:$0xf] %vm3135_vm7, %v3058_v61  ;;  %v3427_v61 = vor.u32 %v3426_v59, %v3422_v30  ;;  %v3592_v59 = vshrl.u32 %v3384_v22, 16 }
 0x22b   : > { %3279 = vrot.lane.b32.xlu0 %v3192_v41, %s9416_s16  ;;  %v3199_v41 = vld [vmem:[#allocation2 + $0xcc] sm:$0xf] }
 0x22c   : > { %v3428_v40 = vrot.slane %v3427_v61, 4 }
 0x22d   : > { %v3066_v16 = vpop.permute.xlu0 %3065  ;;  %3269 = vrot.lane.b32.xlu1 %v3187_v49, %s9416_s16  ;;  %v3430_v49 = vshll.u32 %v3364_v3, 16 }
 0x22e   : > { %3149 = vst.msk [vmem:[#allocation4 + $0x34] sm:$0xf] %vm3135_vm7, %v3066_v16  ;;  %v3459_v16 = vshrl.u32 %v3368_v29, 16  ;;  %v3200_v29 = vld [vmem:[#allocation2 + $0xd0] sm:$0xf] }
 0x22f   : > { %3259 = vrot.lane.b32.xlu2 %v3182_v14, %s9416_s16  ;;  %v3056_v32 = vpop.permute.xlu1 %3055  ;;  %v3522_v14 = vrot.slane %v3520_v37, 4  ;;  %v3432_v28 = vrot.slane %v3430_v49, 5 }
 0x230   : > { %3144 = vst.msk [vmem:[#allocation4 + $0x20] sm:$0xf] %vm3135_vm7, %v3056_v32  ;;  %v10762_v32 = vrot.slane %v3492_v13, 5  ;;  %v3461_v7 = vrot.slane %v3459_v16, 4  ;;  %v3534_v13 = vshll.u32 %v3377_v20, 16 }
 0x231   : > { %v3064_v4 = vpop.permute.xlu2 %3063  ;;  %v3433_v30 = vsel %vm9518_vm11, %v3428_v40, %v3432_v28  ;;  %v3389_v16 = vld [vmem:[#allocation2 + $0x84] sm:$0xf]  ;;  %v10803_v28 = vld [vmem:[#allocation2 + $0x58] sm:$0xf] }
 0x232   : > { %3148 = vst.msk [vmem:[#allocation4 + $0x30] sm:$0xf] %vm3135_vm7, %v3064_v4  ;;  %v3194_v4 = vld [vmem:[#allocation2 + $0xac] sm:$0xf]  ;;  %v3536_v40 = vrot.slane %v3534_v13, 5 }
 0x233   : > { %3285 = vrot.lane.b32.xlu0 %v3195_v24, %s9416_s16  ;;  %v3376_v24 = vld [vmem:[#allocation2 + $0x50] sm:$0x1] }
 0x235   : > { %v3072_v2 = vpop.permute.xlu0 %3071  ;;  %3275 = vrot.lane.b32.xlu1 %v3190_v10, %s9416_s16 }
 0x236   : > { %3152 = vst.msk [vmem:[#allocation4 + $0x40] sm:$0xf] %vm3135_vm7, %v3072_v2  ;;  %v3526_v2 = vshll.u32 %v3376_v24, 16 }
 0x237   : > { %3265 = vrot.lane.b32.xlu2 %v3185_v17, %s9416_s16  ;;  %v3062_v39 = vpop.permute.xlu1 %3061  ;;  %v3523_v17 = vor.u32 %v3522_v14, %v10760_v6  ;;  %v3594_v14 = vrot.slane %v3592_v59, 4  ;;  %v3386_v59 = vld [vmem:[#allocation2 + $0x78] sm:$0xf] }
 0x238   : > { %3147 = vst.msk [vmem:[#allocation4 + $0x2c] sm:$0xf] %vm3135_vm7, %v3062_v39  ;;  %v3495_v39 = vsel %vm9518_vm11, %v3490_v48, %v10762_v32 }
 0x239   : > { %v3070_v57 = vpop.permute.xlu2 %3069  ;;  %v3524_v21 = vrot.slane %v3523_v17, 4  ;;  %v3374_v17 = vld [vmem:[#allocation2 + $0x48] sm:$0xf] }
 0x23a   : > { %3151 = vst.msk [vmem:[#allocation4 + $0x3c] sm:$0xf] %vm3135_vm7, %v3070_v57  ;;  %v3496_v57 = vshrl.u32 %v3372_v54, 16  ;;  %v3588_v54 = vshll.u32 %v3384_v22, 16 }
 0x23b   : > { %3291 = vrot.lane.b32.xlu0 %v3198_v62, %s9416_s16  ;;  %v10771_v62 = vld [vmem:[#allocation2 + $0x34] sm:$0xf] }
 0x23c   : > { %v3468_v19 = vshll.u32 %v10771_v62, 16  ;;  %v10798_v49 = vrot.slane %v3588_v54, 5  ;;  %v3472_v5 = vshrl.u32 %v10771_v62, 16 }
 0x23d   : > { %v3078_v35 = vpop.permute.xlu0 %3077  ;;  %3281 = vrot.lane.b32.xlu1 %v3193_v26, %s9416_s16  ;;  %v3365_v26 = vld [vmem:[#allocation2 + $0x24] sm:$0xf] }
 0x23e   : > { %3155 = vst.msk [vmem:[#allocation4 + $0x4c] sm:$0xf] %vm3135_vm7, %v3078_v35  ;;  %v3465_v35 = vor.u32 %v3464_v44, %v3461_v7  ;;  %v3438_v31 = vshll.u32 %v3365_v26, 16  ;;  %v10785_v56 = vrot.slane %v3468_v19, 5  ;;  %v3630_v7 = vshll.u32 %v3389_v16, 16 }
 0x23f   : > { %3271 = vrot.lane.b32.xlu2 %v3188_v36, %s9416_s16  ;;  %v3068_v8 = vpop.permute.xlu1 %3067  ;;  %v3528_v36 = vrot.slane %v3526_v2, 5  ;;  %v3627_v2 = vshrl.u32 %v3389_v16, 16  ;;  %v3568_v19 = vshrl.u32 %v10779_v53, 16 }
 0x240   : > { %3150 = vst.msk [vmem:[#allocation4 + $0x38] sm:$0xf] %vm3135_vm7, %v3068_v8  ;;  %v3557_v8 = vrot.slane %v3555_v0, 4  ;;  %v3466_v12 = vrot.slane %v3465_v35, 4  ;;  %v3440_v15 = vrot.slane %v3438_v31, 5  ;;  %v3510_v35 = vshll.u32 %v3374_v17, 16 }
 0x241   : > { %v3076_v51 = vpop.permute.xlu2 %3075  ;;  %v3529_v33 = vsel %vm9518_vm11, %v3524_v21, %v3528_v36  ;;  %v3540_v21 = vshll.u32 %v10803_v28, 16  ;;  %v3507_v36 = vshrl.u32 %v3374_v17, 16  ;;  %v3570_v54 = vrot.slane %v3568_v19, 4  ;;  %v3398_v17 = vld [vmem:[#allocation2 + $0xa8] sm:$0xf] }
 0x242   : > { %3154 = vst.msk [vmem:[#allocation4 + $0x48] sm:$0xf] %vm3135_vm7, %v3076_v51  ;;  %v3498_v51 = vrot.slane %v3496_v57, 4  ;;  %v3474_v57 = vrot.slane %v3472_v5, 4  ;;  %v3383_v19 = vld [vmem:[#allocation2 + $0x6c] sm:$0xf] }
 0x243   : > { %3794 = vrot.lane.b32.xlu0 %v3423_v11, %s9417_s17  ;;  %v3435_v11 = vshrl.u32 %v3365_v26, 16  ;;  %v3509_v20 = vrot.slane %v3507_v36, 4 }
 0x244   : > { %v3499_v37 = vor.u32 %v3498_v51, %v10762_v32  ;;  %v3475_v22 = vor.u32 %v3474_v57, %v10785_v56  ;;  %v3699_v57 = vshrl.u32 %v3398_v17, 16 }
 0x245   : > { %v3084_v23 = vpop.permute.xlu0 %3083  ;;  %3287 = vrot.lane.b32.xlu1 %v3196_v1, %s9416_s16  ;;  %v3373_v1 = vld [vmem:[#allocation2 + $0x44] sm:$0x1]  ;;  %v3437_v3 = vrot.slane %v3435_v11, 4  ;;  %v3632_v11 = vrot.slane %v3630_v7, 5 }
 0x246   : > { %3158 = vst.msk [vmem:[#allocation4 + $0x58] sm:$0xf] %vm3135_vm7, %v3084_v23  ;;  %v3564_v23 = vshll.u32 %v10779_v53, 16  ;;  %v3500_v24 = vrot.slane %v3499_v37, 4 }
 0x247   : > { %3277 = vrot.lane.b32.xlu2 %v3191_v9, %s9416_s16  ;;  %v3074_v55 = vpop.permute.xlu1 %3073  ;;  %v3561_v9 = vor.u32 %v3560_v45, %v3557_v8  ;;  %v3441_v32 = vor.u32 %v3440_v15, %v3437_v3  ;;  %v3382_v3 = vld [vmem:[#allocation2 + $0x68] sm:$0x1] }
 0x248   : > { %3153 = vst.msk [vmem:[#allocation4 + $0x44] sm:$0xf] %vm3135_vm7, %v3074_v55  ;;  %v3502_v55 = vshll.u32 %v3373_v1, 16  ;;  %v10796_v61 = vrot.slane %v3564_v23, 5 }
 0x249   : > { %v3082_v63 = vpop.permute.xlu2 %3081  ;;  %v3442_v0 = vrot.slane %v3441_v32, 4 }
 0x24a   : > { %3157 = vst.msk [vmem:[#allocation4 + $0x54] sm:$0xf] %vm3135_vm7, %v3082_v63  ;;  %v3471_v63 = vsel %vm9518_vm11, %v3466_v12, %v10785_v56  ;;  %v10825_v12 = vrot.slane %v3540_v21, 5  ;;  %v3571_v5 = vor.u32 %v3570_v54, %v10796_v61  ;;  %v3379_v21 = vld [vmem:[#allocation2 + $0x5c] sm:$0x1] }
 0x24b   : > { %3800 = vrot.lane.b32.xlu0 %v3457_v38, %s9417_s17  ;;  %v3447_v31 = vsel %vm9518_vm11, %v3442_v0, %v10741_v34 }
 0x24d   : > { %v3090_v10 = vpop.permute.xlu0 %3089  ;;  %3293 = vrot.lane.b32.xlu1 %v3199_v41, %s9416_s16  ;;  %v3562_v41 = vrot.slane %v3561_v9, 4 }
 0x24e   : > { %3161 = vst.msk [vmem:[#allocation4 + $0x64] sm:$0xf] %vm3135_vm7, %v3090_v10  ;;  %v3385_v10 = vld [vmem:[#allocation2 + $0x74] sm:$0x1] }
 0x24f   : > { %3283 = vrot.lane.b32.xlu2 %v3194_v4, %s9416_s16  ;;  %v3080_v25 = vpop.permute.xlu1 %3079  ;;  %v3504_v4 = vrot.slane %v3502_v55, 5  ;;  %v3598_v62 = vshll.u32 %v3385_v10, 16  ;;  %v3476_v55 = vrot.slane %v3475_v22, 4  ;;  %v3544_v10 = vshrl.u32 %v10803_v28, 16 }
 0x250   : > { %3156 = vst.msk [vmem:[#allocation4 + $0x50] sm:$0xf] %vm3135_vm7, %v3080_v25  ;;  %v3567_v25 = vsel %vm9518_vm11, %v3562_v41, %v10796_v61  ;;  %v3606_v41 = vshll.u32 %v3386_v59, 16 }
 0x251   : > { %v3088_v52 = vpop.permute.xlu2 %3087  ;;  %v3505_v50 = vsel %vm9518_vm11, %v3500_v24, %v3504_v4  ;;  %v3600_v45 = vrot.slane %v3598_v62, 5  ;;  %v10850_v62 = vld [vmem:[#allocation2 + $0x7c] sm:$0xf] }
 0x252   : > { %3160 = vst.msk [vmem:[#allocation4 + $0x60] sm:$0xf] %vm3135_vm7, %v3088_v52  ;;  %v3370_v52 = vld [vmem:[#allocation2 + $0x38] sm:$0x1]  ;;  %v3608_v7 = vrot.slane %v3606_v41, 5 }
 0x253   : > { %3806 = vrot.lane.b32.xlu0 %v3495_v39, %s9417_s17  ;;  %v3595_v39 = vor.u32 %v3594_v14, %v10798_v49  ;;  %v3478_v1 = vshll.u32 %v3370_v52, 16  ;;  %v3546_v52 = vrot.slane %v3544_v10, 4 }
 0x255   : > { %v3096_v42 = vpop.permute.xlu0 %3095  ;;  %3796 = vrot.lane.b32.xlu1 %v3433_v30, %s9417_s17  ;;  %v3537_v30 = vor.u32 %v3536_v40, %v3533_v18  ;;  %v3596_v8 = vrot.slane %v3595_v39, 4  ;;  %v3394_v40 = vld [vmem:[#allocation2 + $0x98] sm:$0x1] }
 0x256   : > { %3164 = vst.msk [vmem:[#allocation4 + $0x70] sm:$0xf] %vm3135_vm7, %v3096_v42  ;;  %v10817_v42 = vld [vmem:[#allocation2 + $0x88] sm:$0xf] }
 0x257   : > { %3289 = vrot.lane.b32.xlu2 %v3197_v47, %s9416_s16  ;;  %v3086_v58 = vpop.permute.xlu1 %3085  ;;  %v3629_v47 = vrot.slane %v3627_v2, 4  ;;  %v3538_v53 = vrot.slane %v3537_v30, 4  ;;  %v3636_v23 = vshll.u32 %v10817_v42, 16  ;;  %v3601_v56 = vsel %vm9518_vm11, %v3596_v8, %v3600_v45 }
 0x258   : > { %3159 = vst.msk [vmem:[#allocation4 + $0x5c] sm:$0xf] %vm3135_vm7, %v3086_v58  ;;  %v3512_v58 = vrot.slane %v3510_v35, 5  ;;  %v3612_v35 = vshll.u32 %v10850_v62, 16 }
 0x259   : > { %v3094_v38 = vpop.permute.xlu2 %3093  ;;  %v3633_v9 = vor.u32 %v3632_v11, %v3629_v47  ;;  %v3543_v13 = vsel %vm9518_vm11, %v3538_v53, %v10825_v12  ;;  %v10837_v16 = vrot.slane %v3636_v23, 5  ;;  %v3640_v11 = vshrl.u32 %v10817_v42, 16  ;;  %v10865_v23 = vld [vmem:[#allocation2 + $0xac] sm:$0xf] }
 0x25a   : > { %3163 = vst.msk [vmem:[#allocation4 + $0x6c] sm:$0xf] %vm3135_vm7, %v3094_v38  ;;  %v3480_v38 = vrot.slane %v3478_v1, 5  ;;  %v3402_v1 = vld [vmem:[#allocation2 + $0xb8] sm:$0xf]  ;;  %v3547_v53 = vor.u32 %v3546_v52, %v10825_v12  ;;  %v10869_v42 = vrot.slane %v3612_v35, 5 }
 0x25b   : > { %3812 = vrot.lane.b32.xlu0 %v3529_v33, %s9417_s17  ;;  %v3393_v33 = vld [vmem:[#allocation2 + $0x94] sm:$0xf]  ;;  %v3634_v14 = vrot.slane %v3633_v9, 4  ;;  %v3582_v9 = vshll.u32 %v3383_v19, 16  ;;  %v3642_v54 = vrot.slane %v3640_v11, 4 }
 0x25c   : > { %v3660_v15 = vshll.u32 %v3393_v33, 16  ;;  %v3664_v37 = vshrl.u32 %v3393_v33, 16  ;;  %v3481_v4 = vsel %vm9518_vm11, %v3476_v55, %v3480_v38  ;;  %v3391_v55 = vld [vmem:[#allocation2 + $0x8c] sm:$0x1]  ;;  %v3548_v38 = vrot.slane %v3547_v53, 4 }
 0x25d   : > { %v3102_v48 = vpop.permute.xlu0 %3101  ;;  %3802 = vrot.lane.b32.xlu1 %v3471_v63, %s9417_s17  ;;  %v3603_v63 = vshrl.u32 %v3386_v59, 16  ;;  %v3639_v61 = vsel %vm9518_vm11, %v3634_v14, %v10837_v16  ;;  %v3732_v59 = vshll.u32 %v3402_v1, 16  ;;  %v3388_v11 = vld [vmem:[#allocation2 + $0x80] sm:$0x1] }
 0x25e   : > { %3167 = vst.msk [vmem:[#allocation4 + $0x7c] sm:$0xf] %vm3135_vm7, %v3102_v48  ;;  %v3574_v48 = vshll.u32 %v3382_v3, 16  ;;  %v10840_v32 = vrot.slane %v3660_v15, 5  ;;  %v3666_v24 = vrot.slane %v3664_v37, 4  ;;  %v3708_v37 = vshll.u32 %v10865_v23, 16 }
 0x25f   : > { %3295 = vrot.lane.b32.xlu2 %v3200_v29, %s9416_s16  ;;  %v3092_v44 = vpop.permute.xlu1 %3091  ;;  %v3513_v29 = vor.u32 %v3512_v58, %v3509_v20  ;;  %v3605_v2 = vrot.slane %v3603_v63, 4  ;;  %v3550_v20 = vshll.u32 %v3379_v21, 16  ;;  %v3579_v58 = vshrl.u32 %v3383_v19, 16 }
 0x260   : > { %3162 = vst.msk [vmem:[#allocation4 + $0x68] sm:$0xf] %vm3135_vm7, %v3092_v44  ;;  %v3576_v39 = vrot.slane %v3574_v48, 5  ;;  %v3667_v0 = vor.u32 %v3666_v24, %v10840_v32  ;;  %v3643_v48 = vor.u32 %v3642_v54, %v10837_v16  ;;  %v3646_v24 = vshll.u32 %v3391_v55, 16 }
 0x261   : > { %v3100_v26 = vpop.permute.xlu2 %3099  ;;  %v3514_v44 = vrot.slane %v3513_v29, 4  ;;  %v3609_v36 = vor.u32 %v3608_v7, %v3605_v2  ;;  %v3584_v29 = vrot.slane %v3582_v9, 5  ;;  %v3616_v2 = vshrl.u32 %v10850_v62, 16 }
 0x262   : > { %3166 = vst.msk [vmem:[#allocation4 + $0x78] sm:$0xf] %vm3135_vm7, %v3100_v26  ;;  %v3702_v26 = vshll.u32 %v3398_v17, 16  ;;  %v3668_v45 = vrot.slane %v3667_v0, 4  ;;  %v3648_v0 = vrot.slane %v3646_v24, 5 }
 0x263   : > { %3818 = vrot.lane.b32.xlu0 %v3567_v25, %s9417_s17  ;;  %v3572_v25 = vrot.slane %v3571_v5, 4  ;;  %v3519_v47 = vsel %vm9518_vm11, %v3514_v44, %v10760_v6  ;;  %v3610_v6 = vrot.slane %v3609_v36, 4  ;;  %v3618_v19 = vrot.slane %v3616_v2, 4 }
 0x264   : > { %v3704_v22 = vrot.slane %v3702_v26, 5 }
 0x265   : > { %v3238_v51 = vpop.permute.xlu0 %3237  ;;  %3808 = vrot.lane.b32.xlu1 %v3505_v50, %s9417_s17  ;;  %v3670_v50 = vshll.u32 %v3394_v40, 16  ;;  %v3577_v8 = vsel %vm9518_vm11, %v3572_v25, %v3576_v39  ;;  %v3615_v41 = vsel %vm9518_vm11, %v3610_v6, %v10869_v42  ;;  %v10884_v40 = vrot.slane %v3708_v37, 5  ;;  %v3407_v25 = vld [vmem:[#allocation2 + $0xcc] sm:$0xf] }
 0x266   : > { %3332 = vst.msk [vmem:[#allocation4 + $0x8] sm:$0xf] %vm3329_vm10, %v3238_v51  ;;  %v3701_v51 = vrot.slane %v3699_v57, 4  ;;  %v10892_v57 = vld [vmem:[#allocation2 + $0xa0] sm:$0xf]  ;;  %v3771_v21 = vshrl.u32 %v3407_v25, 16  ;;  %v3619_v54 = vor.u32 %v3618_v19, %v10869_v42 }
 0x267   : > { %3798 = vrot.lane.b32.xlu2 %v3447_v31, %s9417_s17  ;;  %v3098_v34 = vpop.permute.xlu1 %3097  ;;  %v3672_v31 = vrot.slane %v3670_v50, 5  ;;  %v3774_v36 = vshll.u32 %v3407_v25, 16 }
 0x268   : > { %3165 = vst.msk [vmem:[#allocation4 + $0x74] sm:$0xf] %vm3135_vm7, %v3098_v34  ;;  %v3736_v34 = vshrl.u32 %v3402_v1, 16  ;;  %v3705_v15 = vor.u32 %v3704_v22, %v3701_v51  ;;  %vm8586_vm7 = vcmask 1043456  }
 0x269   : > { %v3236_v60 = vpop.permute.xlu2 %3235  ;;  %v3673_v12 = vsel %vm9518_vm11, %v3668_v45, %v3672_v31  ;;  %v3684_v45 = vshll.u32 %v10892_v57, 16  ;;  %v3712_v31 = vshrl.u32 %v10865_v23, 16  ;;  %v10909_v23 = vld [vmem:[#allocation2 + $0xd0] sm:$0xf] }
 0x26a   : > { %3331 = vst.msk [vmem:[#allocation4 + $0x4] sm:$0xf] %vm3329_vm10, %v3236_v60  ;;  %v3552_v60 = vrot.slane %v3550_v20, 5  ;;  %v3738_v10 = vrot.slane %v3736_v34, 4  ;;  %v3773_v20 = vrot.slane %v3771_v21, 4  ;;  %v3780_v55 = vshll.u32 %v10909_v23, 16 }
 0x26b   : > { %3824 = vrot.lane.b32.xlu0 %v3601_v56, %s9417_s17  ;;  %v3395_v56 = vld [vmem:[#allocation2 + $0x9c] sm:$0xf]  ;;  %v3397_v21 = vld [vmem:[#allocation2 + $0xa4] sm:$0x1] }
 0x26c   : > { %v3675_v14 = vshrl.u32 %v3395_v56, 16  ;;  %v3678_v5 = vshll.u32 %v3395_v56, 16  ;;  %v3553_v17 = vsel %vm9518_vm11, %v3548_v38, %v3552_v60  ;;  %v10913_v56 = vrot.slane %v3684_v45, 5  ;;  %v3400_v38 = vld [vmem:[#allocation2 + $0xb0] sm:$0x1] }
 0x26d   : > { %v3244_v18 = vpop.permute.xlu0 %3243  ;;  %3814 = vrot.lane.b32.xlu1 %v3543_v13, %s9417_s17  ;;  %v3581_v13 = vrot.slane %v3579_v58, 4  ;;  %v3776_v58 = vrot.slane %v3774_v36, 5  ;;  %v3404_v60 = vld [vmem:[#allocation2 + $0xc0] sm:$0xf]  ;;  %v3401_v36 = vld [vmem:[#allocation2 + $0xb4] sm:$0xf] }
 0x26e   : > { %3335 = vst.msk [vmem:[#allocation4 + $0x14] sm:$0xf] %vm3329_vm10, %v3244_v18  ;;  %v3706_v18 = vrot.slane %v3705_v15, 4  ;;  %v3677_v16 = vrot.slane %v3675_v14, 4  ;;  %v3680_v39 = vrot.slane %v3678_v5, 5  ;;  %v3718_v5 = vshll.u32 %v3400_v38, 16 }
 0x26f   : > { %3804 = vrot.lane.b32.xlu2 %v3481_v4, %s9417_s17  ;;  %v3234_v28 = vpop.permute.xlu1 %3233  ;;  %v10882_v4 = vrot.slane %v3732_v59, 5  ;;  %v3585_v44 = vor.u32 %v3584_v29, %v3581_v13  ;;  %v3622_v59 = vshll.u32 %v3388_v11, 16  ;;  %v3777_v42 = vor.u32 %v3776_v58, %v3773_v20 }
 0x270   : > { %3330 = vst.msk [vmem:[#allocation4] sm:$0xf] %vm3329_vm10, %v3234_v28  ;;  %v3644_v28 = vrot.slane %v3643_v48, 4  ;;  %v3711_v62 = vsel %vm9518_vm11, %v3706_v18, %v10884_v40  ;;  %v3620_v13 = vrot.slane %v3619_v54, 4  ;;  %v3747_v48 = vshrl.u32 %v3404_v60, 16 }
 0x271   : > { %v3242_v30 = vpop.permute.xlu2 %3241  ;;  %v3739_v50 = vor.u32 %v3738_v10, %v10882_v4  ;;  %v3586_v35 = vrot.slane %v3585_v44, 4  ;;  %v3624_v29 = vrot.slane %v3622_v59, 5  ;;  %v3750_v24 = vshll.u32 %v3404_v60, 16 }
 0x272   : > { %3334 = vst.msk [vmem:[#allocation4 + $0x10] sm:$0xf] %vm3329_vm10, %v3242_v30  ;;  %v3392_v30 = vld [vmem:[#allocation2 + $0x90] sm:$0xf]  ;;  %v3649_v51 = vsel %vm9518_vm11, %v3644_v28, %v3648_v0  ;;  %v3778_v18 = vrot.slane %v3777_v42, 4  ;;  %v3720_v25 = vrot.slane %v3718_v5, 5 }
 0x273   : > { %3830 = vrot.lane.b32.xlu0 %v3639_v61, %s9417_s17  ;;  %v3403_v61 = vld [vmem:[#allocation2 + $0xbc] sm:$0x1]  ;;  %v3740_v22 = vrot.slane %v3739_v50, 4  ;;  %v3651_v1 = vshrl.u32 %v3392_v30, 16  ;;  %v3654_v53 = vshll.u32 %v3392_v30, 16  ;;  %v3591_v9 = vsel %vm9518_vm11, %v3586_v35, %v10798_v49 }
 0x274   : > { %v3742_v52 = vshll.u32 %v3403_v61, 16  ;;  %v3625_v2 = vsel %vm9518_vm11, %v3620_v13, %v3624_v29  ;;  %v10931_v61 = vld [vmem:[#allocation2 + $0x1c] sm:$0xf]  ;;  %v3784_v35 = vshrl.u32 %v10909_v23, 16  ;;  %v3930_v42 = vld [vmem:[#allocation2 + $0x34] sm:$0xf] }
 0x275   : > { %v3250_v33 = vpop.permute.xlu0 %3249  ;;  %3820 = vrot.lane.b32.xlu1 %v3577_v8, %s9417_s17  ;;  %v3681_v8 = vor.u32 %v3680_v39, %v3677_v16  ;;  %v3656_v37 = vrot.slane %v3654_v53, 5  ;;  %v3749_v16 = vrot.slane %v3747_v48, 4  ;;  %v3752_v39 = vrot.slane %v3750_v24, 5 }
 0x276   : > { %3338 = vst.msk [vmem:[#allocation4 + $0x20] sm:$0xf] %vm3329_vm10, %v3250_v33  ;;  %v3744_v33 = vrot.slane %v3742_v52, 5  ;;  %v3925_v52 = vld [vmem:[#allocation2 + $0x20] sm:$0x1]  ;;  %v3726_v53 = vshll.u32 %v3401_v36, 16 }
 0x277   : > { %3810 = vrot.lane.b32.xlu2 %v3519_v47, %s9417_s17  ;;  %v3240_v3 = vpop.permute.xlu1 %3239  ;;  %v3682_v34 = vrot.slane %v3681_v8, 4 }
 0x278   : > { %3333 = vst.msk [vmem:[#allocation4 + $0xc] sm:$0xf] %vm3329_vm10, %v3240_v3  ;;  %v3653_v3 = vrot.slane %v3651_v1, 4  ;;  %v3745_v49 = vsel %vm9518_vm11, %v3740_v22, %v3744_v33  ;;  %v3694_v1 = vshll.u32 %v3397_v21, 16  ;;  %v3723_v33 = vshrl.u32 %v3401_v36, 16 }
 0x279   : > { %v3248_v63 = vpop.permute.xlu2 %3247  ;;  %v3934_v21 = vld [vmem:[#allocation2 + $0x44] sm:$0x1] }
 0x27a   : > { %3337 = vst.msk [vmem:[#allocation4 + $0x1c] sm:$0xf] %vm3329_vm10, %v3248_v63  ;;  %v3657_v10 = vor.u32 %v3656_v37, %v3653_v3  ;;  %v3696_v23 = vrot.slane %v3694_v1, 5  ;;  %v3929_v37 = vld [vmem:[#allocation2 + $0x30] sm:$0xe] }
 0x27b   : > { %3836 = vrot.lane.b32.xlu0 %v3673_v12, %s9417_s17  ;;  %v3714_v12 = vrot.slane %v3712_v31, 4  ;;  %v4024_v31 = vrot.slane %v3925_v52, 5 }
 0x27c   : > { %v3658_v0 = vrot.slane %v3657_v10, 4 }
 0x27d   : > { %v3256_v7 = vpop.permute.xlu0 %3255  ;;  %3826 = vrot.lane.b32.xlu1 %v3615_v41, %s9417_s17  ;;  %v3687_v41 = vsel %vm9518_vm11, %v3682_v34, %v10913_v56  ;;  %v3715_v14 = vor.u32 %v3714_v12, %v10884_v40  ;;  %v3725_v34 = vrot.slane %v3723_v33, 4 }
 0x27e   : > { %3341 = vst.msk [vmem:[#allocation4 + $0x2c] sm:$0xf] %vm3329_vm10, %v3256_v7  ;;  %v3688_v7 = vshrl.u32 %v10892_v57, 16  ;;  %v4021_v57 = vrot.slane %v10931_v61, 5  ;;  %v3663_v8 = vsel %vm9518_vm11, %v3658_v0, %v10840_v32  ;;  %v3935_v61 = vld [vmem:[#allocation2 + $0x48] sm:$0xe] }
 0x27f   : > { %3816 = vrot.lane.b32.xlu2 %v3553_v17, %s9417_s17  ;;  %v3246_v26 = vpop.permute.xlu1 %3245  ;;  %v10926_v17 = vrot.slane %v3780_v55, 5  ;;  %v3716_v40 = vrot.slane %v3715_v14, 4  ;;  %v9058_v55 = vrot.slane %v3929_v37, 9 }
 0x280   : > { %3336 = vst.msk [vmem:[#allocation4 + $0x18] sm:$0xf] %vm3329_vm10, %v3246_v26  ;;  %v3405_v26 = vld [vmem:[#allocation2 + $0xc4] sm:$0xf]  ;;  %v4023_v45 = vrot.slane %v4021_v57, 4 }
 0x281   : > { %v3254_v47 = vpop.permute.xlu2 %3253  ;;  %v3783_v50 = vsel %vm9518_vm11, %v3778_v18, %v10926_v17  ;;  %v3721_v19 = vsel %vm9518_vm11, %v3716_v40, %v3720_v25  ;;  %v3756_v11 = vshll.u32 %v3405_v26, 16  ;;  %v3760_v60 = vshrl.u32 %v3405_v26, 16 }
 0x282   : > { %3340 = vst.msk [vmem:[#allocation4 + $0x28] sm:$0xf] %vm3329_vm10, %v3254_v47  ;;  %v3753_v47 = vor.u32 %v3752_v39, %v3749_v16  ;;  %v4025_v54 = vsel %vm9964_vm1, %v4023_v45, %v4024_v31  ;;  %v3923_v45 = vld [vmem:[#allocation2 + $0x18] sm:$0xe] }
 0x283   : > { %3842 = vrot.lane.b32.xlu0 %v3711_v62, %s9417_s17  ;;  %v3690_v62 = vrot.slane %v3688_v7, 4  ;;  %v3758_v58 = vrot.slane %v3756_v11, 5  ;;  %v3762_v10 = vrot.slane %v3760_v60, 4  ;;  %v3926_v7 = vld [vmem:[#allocation2 + $0x24] sm:$0xe]  ;;  %v9056_v33 = vrot.slane %v3923_v45, 9 }
 0x284   : > { %v3754_v20 = vrot.slane %v3753_v47, 4  ;;  %v3944_v45 = vld [vmem:[#allocation2 + $0x6c] sm:$0xe] }
 0x285   : > { %v3262_v6 = vpop.permute.xlu0 %3261  ;;  %3832 = vrot.lane.b32.xlu1 %v3649_v51, %s9417_s17  ;;  %v3691_v22 = vor.u32 %v3690_v62, %v10913_v56  ;;  %v3728_v56 = vrot.slane %v3726_v53, 5  ;;  %v3763_v16 = vor.u32 %v3762_v10, %v3758_v58 }
 0x286   : > { %3344 = vst.msk [vmem:[#allocation4 + $0x38] sm:$0xf] %vm3329_vm10, %v3262_v6  ;;  %v3786_v6 = vrot.slane %v3784_v35, 4  ;;  %v3931_v35 = vld [vmem:[#allocation2 + $0x38] sm:$0x1] }
 0x287   : > { %3822 = vrot.lane.b32.xlu2 %v3591_v9, %s9417_s17  ;;  %v3252_v15 = vpop.permute.xlu1 %3251  ;;  %v3409_v9 = vld [vmem:[#allocation2 + $0xd4] sm:$0x1]  ;;  %v3692_v59 = vrot.slane %v3691_v22, 4  ;;  %v3729_v29 = vor.u32 %v3728_v56, %v3725_v34  ;;  %v3764_v26 = vrot.slane %v3763_v16, 4  ;;  %v3936_v34 = vld [vmem:[#allocation2 + $0x4c] sm:$0xf] }
 0x288   : > { %3339 = vst.msk [vmem:[#allocation4 + $0x24] sm:$0xf] %vm3329_vm10, %v3252_v15  ;;  %v3790_v12 = vshll.u32 %v3409_v9, 16  ;;  %v3759_v15 = vsel %vm9518_vm11, %v3754_v20, %v3758_v58  ;;  %v4022_v58 = vsel %vm9964_vm1, %v9056_v33, %v4021_v57  ;;  %v9060_v56 = vrot.slane %v3935_v61, 9 }
 0x289   : > { %v3260_v63 = vpop.permute.xlu2 %3259  ;;  %v3697_v38 = vsel %vm9518_vm11, %v3692_v59, %v3696_v23  ;;  %v3730_v24 = vrot.slane %v3729_v29, 4  ;;  %v4049_v57 = vrot.slane %v3936_v34, 5 }
 0x28a   : > { %3343 = vst.msk [vmem:[#allocation4 + $0x34] sm:$0xf] %vm3329_vm10, %v3260_v63  ;;  %v4035_v63 = vrot.slane %v3930_v42, 5  ;;  %v3792_v14 = vrot.slane %v3790_v12, 5  ;;  %v3932_v42 = vld [vmem:[#allocation2 + $0x3c] sm:$0xe] }
 0x28b   : > { %3848 = vrot.lane.b32.xlu0 %v3745_v49, %s9417_s17  ;;  %v3787_v49 = vor.u32 %v3786_v6, %v10926_v17  ;;  %v3406_v17 = vld [vmem:[#allocation2 + $0xc8] sm:$0x1]  ;;  %v3735_v40 = vsel %vm9518_vm11, %v3730_v24, %v10882_v4  ;;  %v3928_v6 = vld [vmem:[#allocation2 + $0x2c] sm:$0x1] }
 0x28c   : > { %v4036_v48 = vsel %vm9964_vm1, %v9058_v55, %v4035_v63  ;;  %v3766_v39 = vshll.u32 %v3406_v17, 16  ;;  %v4037_v31 = vrot.slane %v4035_v63, 4  ;;  %v4031_v59 = vrot.slane %v3928_v6, 5  ;;  %v3939_v63 = vld [vmem:[#allocation2 + $0x58] sm:$0xf] }
 0x28d   : > { %v3268_v44 = vpop.permute.xlu0 %3267  ;;  %3838 = vrot.lane.b32.xlu1 %v3687_v41, %s9417_s17  ;;  %v3788_v41 = vrot.slane %v3787_v49, 4  ;;  %v9059_v55 = vrot.slane %v3932_v42, 9  ;;  %v3947_v6 = vld [vmem:[#allocation2 + $0x78] sm:$0xe] }
 0x28e   : > { %3347 = vst.msk [vmem:[#allocation4 + $0x44] sm:$0xf] %vm3329_vm10, %v3268_v44  ;;  %v3927_v44 = vld [vmem:[#allocation2 + $0x28] sm:$0xf]  ;;  %v3768_v62 = vrot.slane %v3766_v39, 5 }
 0x28f   : > { %3828 = vrot.lane.b32.xlu2 %v3625_v2, %s9417_s17  ;;  %v3258_v28 = vpop.permute.xlu1 %3257  ;;  %v3793_v2 = vsel %vm9518_vm11, %v3788_v41, %v3792_v14  ;;  %v4028_v0 = vrot.slane %v3927_v44, 5  ;;  %v3938_v41 = vld [vmem:[#allocation2 + $0x54] sm:$0xe]  ;;  %v4056_v14 = vrot.slane %v3939_v63, 5 }
 0x290   : > { %3342 = vst.msk [vmem:[#allocation4 + $0x30] sm:$0xf] %vm3329_vm10, %v3258_v28  ;;  %v9057_v28 = vrot.slane %v3926_v7, 9  ;;  %v3769_v47 = vsel %vm9518_vm11, %v3764_v26, %v3768_v62  ;;  %v3942_v26 = vld [vmem:[#allocation2 + $0x64] sm:$0xf] }
 0x291   : > { %v3266_v30 = vpop.permute.xlu2 %3265  ;;  %v4058_v10 = vrot.slane %v4056_v14, 4  ;;  %v3943_v62 = vld [vmem:[#allocation2 + $0x68] sm:$0x1] }
 0x292   : > { %3346 = vst.msk [vmem:[#allocation4 + $0x40] sm:$0xf] %vm3329_vm10, %v3266_v30  ;;  %v3933_v30 = vld [vmem:[#allocation2 + $0x40] sm:$0xf]  ;;  %v4029_v4 = vsel %vm9964_vm1, %v9057_v28, %v4028_v0 }
 0x293   : > { %3854 = vrot.lane.b32.xlu0 %v3783_v50, %s9417_s17  ;;  %v4042_v36 = vrot.slane %v3933_v30, 5  ;;  %v4066_v30 = vrot.slane %v3943_v62, 5  ;;  %v11095_v62 = vld [vmem:[#allocation2 + $0xac] sm:$0xf] }
 0x295   : > { %v3274_v51 = vpop.permute.xlu0 %3273  ;;  %3844 = vrot.lane.b32.xlu1 %v3721_v19, %s9417_s17  ;;  %v4045_v19 = vrot.slane %v3934_v21, 5  ;;  %v4043_v60 = vsel %vm9964_vm1, %v9059_v55, %v4042_v36 }
 0x296   : > { %3350 = vst.msk [vmem:[#allocation4 + $0x50] sm:$0xf] %vm3329_vm10, %v3274_v51  ;;  %v4038_v51 = vrot.slane %v3931_v35, 5 }
 0x297   : > { %3834 = vrot.lane.b32.xlu2 %v3663_v8, %s9417_s17  ;;  %v3264_v32 = vpop.permute.xlu1 %3263  ;;  %v4044_v8 = vrot.slane %v4042_v36, 4 }
 0x298   : > { %3345 = vst.msk [vmem:[#allocation4 + $0x3c] sm:$0xf] %vm3329_vm10, %v3264_v32  ;;  %v4039_v20 = vsel %vm9964_vm1, %v4037_v31, %v4038_v51  ;;  %v3945_v31 = vld [vmem:[#allocation2 + $0x70] sm:$0xf]  ;;  %v9063_v51 = vrot.slane %v3944_v45, 9 }
 0x299   : > { %v3272_v3 = vpop.permute.xlu2 %3271  ;;  %v4046_v22 = vsel %vm9964_vm1, %v4044_v8, %v4045_v19  ;;  %v3958_v45 = vld [vmem:[#allocation2 + $0xa4] sm:$0x1] }
 0x29a   : > { %3349 = vst.msk [vmem:[#allocation4 + $0x4c] sm:$0xf] %vm3329_vm10, %v3272_v3 }
 0x29b   : > { %4133 = vrot.lane.b32.xlu0 %v4025_v54, %s9418_s18  ;;  %v4030_v54 = vrot.slane %v4028_v0, 4 }
 0x29d   : > { %v3280_v13 = vpop.permute.xlu0 %3279  ;;  %3850 = vrot.lane.b32.xlu1 %v3759_v15, %s9417_s17  ;;  %v4032_v12 = vsel %vm9964_vm1, %v4030_v54, %v4031_v59  ;;  %v4050_v15 = vsel %vm9964_vm1, %v9060_v56, %v4049_v57  ;;  %v9064_v59 = vrot.slane %v3947_v6, 9  ;;  %v11063_v56 = vld [vmem:[%s12799_s2 + $0x8] sm:$0xff] }
 0x29e   : > { %3353 = vst.msk [vmem:[#allocation4 + $0x5c] sm:$0xf] %vm3329_vm10, %v3280_v13 }
 0x29f   : > { %3840 = vrot.lane.b32.xlu2 %v3697_v38, %s9417_s17  ;;  %v3270_v5 = vpop.permute.xlu1 %3269 }
 0x2a0   : > { %3348 = vst.msk [vmem:[#allocation4 + $0x48] sm:$0xf] %vm3329_vm10, %v3270_v5  ;;  %v9061_v5 = vrot.slane %v3938_v41, 9  ;;  %v3949_v41 = vld [vmem:[#allocation2 + $0x80] sm:$0x1] }
 0x2a1   : > { %v3278_v18 = vpop.permute.xlu2 %3277 }
 0x2a2   : > { %3352 = vst.msk [vmem:[#allocation4 + $0x58] sm:$0xf] %vm3329_vm10, %v3278_v18  ;;  %v4057_v17 = vsel %vm9964_vm1, %v9061_v5, %v4056_v14 }
 0x2a3   : > { %4139 = vrot.lane.b32.xlu0 %v4036_v48, %s9418_s18  ;;  %v3940_v48 = vld [vmem:[#allocation2 + $0x5c] sm:$0x1] }
 0x2a4   : > { %v4059_v18 = vrot.slane %v3940_v48, 5  ;;  %v4080_v48 = vrot.slane %v3949_v41, 5 }
 0x2a5   : > { %v3286_v25 = vpop.permute.xlu0 %3285  ;;  %3856 = vrot.lane.b32.xlu1 %v3793_v2, %s9417_s17 }
 0x2a6   : > { %3356 = vst.msk [vmem:[#allocation4 + $0x68] sm:$0xf] %vm3329_vm10, %v3286_v25  ;;  %v4060_v2 = vsel %vm9964_vm1, %v4058_v10, %v4059_v18  ;;  %v4051_v25 = vrot.slane %v4049_v57, 4  ;;  %v3941_v57 = vld [vmem:[#allocation2 + $0x60] sm:$0xe] }
 0x2a7   : > { %3846 = vrot.lane.b32.xlu2 %v3735_v40, %s9417_s17  ;;  %v3276_v50 = vpop.permute.xlu1 %3275  ;;  %v3937_v40 = vld [vmem:[#allocation2 + $0x50] sm:$0x1]  ;;  %v3956_v18 = vld [vmem:[#allocation2 + $0x9c] sm:$0xe] }
 0x2a8   : > { %3351 = vst.msk [vmem:[#allocation4 + $0x54] sm:$0xf] %vm3329_vm10, %v3276_v50  ;;  %v4052_v16 = vrot.slane %v3937_v40, 5 }
 0x2a9   : > { %v3284_v52 = vpop.permute.xlu2 %3283 }
 0x2aa   : > { %3355 = vst.msk [vmem:[#allocation4 + $0x64] sm:$0xf] %vm3329_vm10, %v3284_v52  ;;  %v4053_v28 = vsel %vm9964_vm1, %v4051_v25, %v4052_v16  ;;  %v4063_v52 = vrot.slane %v3942_v26, 5 }
 0x2ab   : > { %4145 = vrot.lane.b32.xlu0 %v4046_v22, %s9418_s18  ;;  %v4070_v22 = vrot.slane %v3945_v31, 5 }
 0x2ac   : > { %v4065_v21 = vrot.slane %v4063_v52, 4 }
 0x2ad   : > { %v3292_v11 = vpop.permute.xlu0 %3291  ;;  %4135 = vrot.lane.b32.xlu1 %v4029_v4, %s9418_s18  ;;  %v4072_v25 = vrot.slane %v4070_v22, 4 }
 0x2ae   : > { %3359 = vst.msk [vmem:[#allocation4 + $0x74] sm:$0xf] %vm3329_vm10, %v3292_v11  ;;  %v4067_v36 = vsel %vm9964_vm1, %v4065_v21, %v4066_v30  ;;  %v3961_v30 = vld [vmem:[#allocation2 + $0xb0] sm:$0x1] }
 0x2af   : > { %3852 = vrot.lane.b32.xlu2 %v3769_v47, %s9417_s17  ;;  %v3282_v1 = vpop.permute.xlu1 %3281 }
 0x2b0   : > { %3354 = vst.msk [vmem:[#allocation4 + $0x60] sm:$0xf] %vm3329_vm10, %v3282_v1  ;;  %v4296_v1 = vld [vmem:[%s12799_s2 + $0x10] sm:$0x3] }
 0x2b1   : > { %v3290_v53 = vpop.permute.xlu2 %3289 }
 0x2b2   : > { %3358 = vst.msk [vmem:[#allocation4 + $0x70] sm:$0xf] %vm3329_vm10, %v3290_v53  ;;  %v4386_v53 = vunpack.c.l.b16 %v4296_v1  ;;  %v4101_v1 = vrot.slane %v3958_v45, 5 }
 0x2b3   : > { %4151 = vrot.lane.b32.xlu0 %v4057_v17, %s9418_s18  ;;  %v3957_v17 = vld [vmem:[#allocation2 + $0xa0] sm:$0xf] }
 0x2b5   : > { %v3795_v9 = vpop.permute.xlu0 %3794  ;;  %4141 = vrot.lane.b32.xlu1 %v4039_v20, %s9418_s18  ;;  %v4071_v20 = vsel %vm9964_vm1, %v9063_v51, %v4070_v22  ;;  %v3950_v51 = vld [vmem:[#allocation2 + $0x84] sm:$0xe] }
 0x2b6   : > { %3891 = vst.msk [vmem:[#allocation4] sm:$0xf] %vm3890_vm13, %v3795_v9 }
 0x2b7   : > { %4131 = vrot.lane.b32.xlu2 %v4022_v58, %s9418_s18  ;;  %v3288_v32 = vpop.permute.xlu1 %3287  ;;  %v4389_v58 = vpack.c.b16 %v4386_v53, %v4386_v53  ;;  %v3955_v53 = vld [vmem:[#allocation2 + $0x98] sm:$0x1] }
 0x2b8   : > { %3357 = vst.msk [vmem:[#allocation4 + $0x6c] sm:$0xf] %vm3329_vm10, %v3288_v32  ;;  %v3948_v32 = vld [vmem:[#allocation2 + $0x7c] sm:$0xf] }
 0x2b9   : > { %v3296_v23 = vpop.permute.xlu2 %3295  ;;  %v11054_v54 = vsel %vm469_vm14, %v4389_v58, 0  ;;  %v3963_v58 = vld [vmem:[#allocation2 + $0xb8] sm:$0xf] }
 0x2ba   : > { %3361 = vst.msk [vmem:[#allocation4 + $0x7c] sm:$0xf] %vm3329_vm10, %v3296_v23  ;;  %v4077_v23 = vrot.slane %v3948_v32, 5  ;;  %4449 = vmatpush.bf16.msra.mxu1 %v11054_v54 }
 0x2bb   : > { %4157 = vrot.lane.b32.xlu0 %v4067_v36, %s9418_s18 }
 0x2bc   : > { %v4078_v34 = vsel %vm9964_vm1, %v9064_v59, %v4077_v23  ;;  %v4079_v14 = vrot.slane %v4077_v23, 4  ;;  %v4094_v23 = vrot.slane %v3955_v53, 5 }
 0x2bd   : > { %v3801_v3 = vpop.permute.xlu0 %3800  ;;  %4147 = vrot.lane.b32.xlu1 %v4050_v15, %s9418_s18 }
 0x2be   : > { %3894 = vst.msk [vmem:[#allocation4 + $0xc] sm:$0xf] %vm3890_vm13, %v3801_v3  ;;  %v9062_v3 = vrot.slane %v3941_v57, 9  ;;  %4450 = vmatpush.bf16.msra.mxu1 %v11063_v56 }
 0x2bf   : > { %v3294_v49 = vpop.permute.xlu1 %3293  ;;  %4137 = vrot.lane.b32.xlu2 %v4032_v12, %s9418_s18 }
 0x2c0   : > { %3360 = vst.msk [vmem:[#allocation4 + $0x78] sm:$0xf] %vm3329_vm10, %v3294_v49  ;;  %v4064_v15 = vsel %vm9964_vm1, %v9062_v3, %v4063_v52  ;;  %v11073_v49 = vld [vmem:[%s12799_s2] sm:$0xff]  ;;  %vm7264_vm10 = vcmask 388416  }
 0x2c1   : > { %v3799_v37 = vpop.permute.xlu2 %3798 }
 0x2c2   : > { %3893 = vst.msk [vmem:[#allocation4 + $0x8] sm:$0xf] %vm3890_vm13, %v3799_v37  ;;  %v11075_v37 = vld [vmem:[#allocation2 + $0x88] sm:$0xf]  ;;  %4451 = vmatpush.bf16.msra.mxu1 %v11073_v49 }
 0x2c3   : > { %4163 = vrot.lane.b32.xlu0 %v4078_v34, %s9418_s18  ;;  %v4084_v42 = vrot.slane %v11075_v37, 5  ;;  %v4112_v34 = vrot.slane %v3963_v58, 5 }
 0x2c5   : > { %v3807_v38 = vpop.permute.xlu0 %3806  ;;  %4153 = vrot.lane.b32.xlu1 %v4060_v2, %s9418_s18  ;;  %v9067_v2 = vrot.slane %v3956_v18, 9 }
 0x2c6   : > { %3897 = vst.msk [vmem:[#allocation4 + $0x18] sm:$0xf] %vm3890_vm13, %v3807_v38  ;;  %v3952_v38 = vld [vmem:[#allocation2 + $0x8c] sm:$0x1] }
 0x2c7   : > { %v3797_v13 = vpop.permute.xlu1 %3796  ;;  %4143 = vrot.lane.b32.xlu2 %v4043_v60, %s9418_s18  ;;  %v4086_v60 = vrot.slane %v4084_v42, 4 }
 0x2c8   : > { %3892 = vst.msk [vmem:[#allocation4 + $0x4] sm:$0xf] %vm3890_vm13, %v3797_v13  ;;  %v4087_v13 = vrot.slane %v3952_v38, 5  ;;  %v3959_v38 = vld [vmem:[#allocation2 + $0xa8] sm:$0xe] }
 0x2c9   : > { %v3805_v29 = vpop.permute.xlu2 %3804 }
 0x2ca   : > { %3896 = vst.msk [vmem:[#allocation4 + $0x14] sm:$0xf] %vm3890_vm13, %v3805_v29  ;;  %v4088_v63 = vsel %vm9964_vm1, %v4086_v60, %v4087_v13  ;;  %v3965_v60 = vld [vmem:[#allocation2 + $0xc0] sm:$0xe]  ;;  %v3966_v13 = vld [vmem:[#allocation2 + $0xc4] sm:$0xf] }
 0x2cb   : > { %4169 = vrot.lane.b32.xlu0 %v4088_v63, %s9418_s18  ;;  %v9070_v63 = vrot.slane %v3965_v60, 9  ;;  %v4119_v41 = vrot.slane %v3966_v13, 5  ;;  %v5308_v60 = vld [vmem:[#allocation3] sm:$0xf] }
 0x2cd   : > { %v3813_v24 = vpop.permute.xlu0 %3812  ;;  %4159 = vrot.lane.b32.xlu1 %v4071_v20, %s9418_s18  ;;  %v3962_v20 = vld [vmem:[#allocation2 + $0xb4] sm:$0xe] }
 0x2ce   : > { %3900 = vst.msk [vmem:[#allocation4 + $0x24] sm:$0xf] %vm3890_vm13, %v3813_v24  ;;  %v4081_v24 = vsel %vm9964_vm1, %v4079_v14, %v4080_v48  ;;  %v3967_v14 = vld [vmem:[#allocation2 + $0xc8] sm:$0x1] }
 0x2cf   : > { %v3803_v7 = vpop.permute.xlu1 %3802  ;;  %4149 = vrot.lane.b32.xlu2 %v4053_v28, %s9418_s18  ;;  %v3954_v28 = vld [vmem:[#allocation2 + $0x94] sm:$0xf] }
 0x2d0   : > { %3895 = vst.msk [vmem:[#allocation4 + $0x10] sm:$0xf] %vm3890_vm13, %v3803_v7  ;;  %v4098_v7 = vrot.slane %v3957_v17, 5  ;;  %v4091_v26 = vrot.slane %v3954_v28, 5 }
 0x2d1   : > { %v3811_v44 = vpop.permute.xlu2 %3810 }
 0x2d2   : > { %3899 = vst.msk [vmem:[#allocation4 + $0x20] sm:$0xf] %vm3890_vm13, %v3811_v44  ;;  %v3946_v44 = vld [vmem:[#allocation2 + $0x74] sm:$0x1]  ;;  %v4100_v31 = vrot.slane %v4098_v7, 4  ;;  %v4093_v59 = vrot.slane %v4091_v26, 4 }
 0x2d3   : > { %v4073_v16 = vrot.slane %v3946_v44, 5 }
 0x2d5   : > { %v3819_v39 = vpop.permute.xlu0 %3818  ;;  %4165 = vrot.lane.b32.xlu1 %v4081_v24, %s9418_s18  ;;  %v4074_v52 = vsel %vm9964_vm1, %v4072_v25, %v4073_v16  ;;  %v4120_v24 = vsel %vm9964_vm1, %v9070_v63, %v4119_v41  ;;  %v3964_v25 = vld [vmem:[#allocation2 + $0xbc] sm:$0x1]  ;;  %v4114_v16 = vrot.slane %v4112_v34, 4  ;;  %v5360_v63 = vshll.u32 %v5308_v60, 16 }
 0x2d6   : > { %3903 = vst.msk [vmem:[#allocation4 + $0x30] sm:$0xf] %vm3890_vm13, %v3819_v39  ;;  %v3953_v39 = vld [vmem:[#allocation2 + $0x90] sm:$0xe] }
 0x2d7   : > { %v3809_v0 = vpop.permute.xlu1 %3808  ;;  %4155 = vrot.lane.b32.xlu2 %v4064_v15, %s9418_s18 }
 0x2d8   : > { %3898 = vst.msk [vmem:[#allocation4 + $0x1c] sm:$0xf] %vm3890_vm13, %v3809_v0  ;;  %v4099_v0 = vsel %vm9964_vm1, %v9067_v2, %v4098_v7 }
 0x2d9   : > { %v3817_v50 = vpop.permute.xlu2 %3816  ;;  %4175 = vrot.lane.b32.xlu0 %v4099_v0, %s9418_s18 }
 0x2da   : > { %3902 = vst.msk [vmem:[#allocation4 + $0x2c] sm:$0xf] %vm3890_vm13, %v3817_v50  ;;  %v9066_v50 = vrot.slane %v3953_v39, 9  ;;  %v4115_v39 = vrot.slane %v3964_v25, 5 }
 0x2dc   : > { %v4092_v36 = vsel %vm9964_vm1, %v9066_v50, %v4091_v26  ;;  %v4116_v28 = vsel %vm9964_vm1, %v4114_v16, %v4115_v39  ;;  %v4733_v39 = vld [vmem:[#allocation3 + $0x20] sm:$0x1] }
 0x2dd   : > { %v3825_v4 = vpop.permute.xlu0 %3824  ;;  %4171 = vrot.lane.b32.xlu1 %v4092_v36, %s9418_s18  ;;  %v9321_v36 = vld [vmem:[%s9504_s10 + $0x68] sm:$0xff] }
 0x2de   : > { %3906 = vst.msk [vmem:[#allocation4 + $0x3c] sm:$0xf] %vm3890_vm13, %v3825_v4  ;;  %v4105_v4 = vrot.slane %v11095_v62, 5 }
 0x2df   : > { %v3815_v35 = vpop.permute.xlu1 %3814  ;;  %4161 = vrot.lane.b32.xlu2 %v4074_v52, %s9418_s18 }
 0x2e0   : > { %3901 = vst.msk [vmem:[#allocation4 + $0x28] sm:$0xf] %vm3890_vm13, %v3815_v35  ;;  %v4108_v35 = vrot.slane %v3961_v30, 5 }
 0x2e1   : > { %v3823_v19 = vpop.permute.xlu2 %3822 }
 0x2e2   : > { %3905 = vst.msk [vmem:[#allocation4 + $0x38] sm:$0xf] %vm3890_vm13, %v3823_v19  ;;  %v4107_v19 = vrot.slane %v4105_v4, 4 }
 0x2e5   : > { %v3831_v47 = vpop.permute.xlu0 %3830 }
 0x2e6   : > { %3909 = vst.msk [vmem:[#allocation4 + $0x48] sm:$0xf] %vm3890_vm13, %v3831_v47 }
 0x2e7   : > { %v3821_v11 = vpop.permute.xlu1 %3820 }
 0x2e8   : > { %3904 = vst.msk [vmem:[#allocation4 + $0x34] sm:$0xf] %vm3890_vm13, %v3821_v11  ;;  %v4109_v11 = vsel %vm9964_vm1, %v4107_v19, %v4108_v35 }
 0x2e9   : > { %v3829_v8 = vpop.permute.xlu2 %3828  ;;  %4181 = vrot.lane.b32.xlu0 %v4109_v11, %s9418_s18  ;;  %v9322_v11 = vld [vmem:[%s9504_s10 + $0x70] sm:$0xff] }
 0x2ea   : > { %3908 = vst.msk [vmem:[#allocation4 + $0x44] sm:$0xf] %vm3890_vm13, %v3829_v8 }
 0x2ed   : > { %v3837_v33 = vpop.permute.xlu0 %3836 }
 0x2ee   : > { %3912 = vst.msk [vmem:[#allocation4 + $0x54] sm:$0xf] %vm3890_vm13, %v3837_v33  ;;  %v9065_v33 = vrot.slane %v3950_v51, 9 }
 0x2ef   : > { %v3827_v9 = vpop.permute.xlu1 %3826 }
 0x2f0   : > { %3907 = vst.msk [vmem:[#allocation4 + $0x40] sm:$0xf] %vm3890_vm13, %v3827_v9  ;;  %v4102_v9 = vsel %vm9964_vm1, %v4100_v31, %v4101_v1  ;;  %v4085_v6 = vsel %vm9964_vm1, %v9065_v33, %v4084_v42 }
 0x2f1   : > { %v3835_v61 = vpop.permute.xlu2 %3834  ;;  %4177 = vrot.lane.b32.xlu1 %v4102_v9, %s9418_s18  ;;  %4167 = vrot.lane.b32.xlu2 %v4085_v6, %s9418_s18 }
 0x2f2   : > { %3911 = vst.msk [vmem:[#allocation4 + $0x50] sm:$0xf] %vm3890_vm13, %v3835_v61  ;;  %v9069_v61 = vrot.slane %v3962_v20, 9  ;;  %4187 = vrot.lane.b32.xlu0 %v4120_v24, %s9418_s18 }
 0x2f4   : > { %v4113_v15 = vsel %vm9964_vm1, %v9069_v61, %v4112_v34 }
 0x2f5   : > { %v3843_v12 = vpop.permute.xlu0 %3842 }
 0x2f6   : > { %3915 = vst.msk [vmem:[#allocation4 + $0x60] sm:$0xf] %vm3890_vm13, %v3843_v12  ;;  %v4095_v12 = vsel %vm9964_vm1, %v4093_v59, %v4094_v23 }
 0x2f7   : > { %v3833_v55 = vpop.permute.xlu1 %3832 }
 0x2f8   : > { %3910 = vst.msk [vmem:[#allocation4 + $0x4c] sm:$0xf] %vm3890_vm13, %v3833_v55 }
 0x2f9   : > { %v3841_v29 = vpop.permute.xlu2 %3840  ;;  %4173 = vrot.lane.b32.xlu2 %v4095_v12, %s9418_s18  ;;  %4183 = vrot.lane.b32.xlu1 %v4113_v15, %s9418_s18 }
 0x2fa   : > { %3914 = vst.msk [vmem:[#allocation4 + $0x5c] sm:$0xf] %vm3890_vm13, %v3841_v29  ;;  %v9068_v29 = vrot.slane %v3959_v38, 9  ;;  %v3969_v38 = vld [vmem:[#allocation2 + $0xd0] sm:$0xf] }
 0x2fb   : > { %v4126_v13 = vrot.slane %v3969_v38, 5 }
 0x2fc   : > { %v4106_v48 = vsel %vm9964_vm1, %v9068_v29, %v4105_v4  ;;  %v339_v4 = vld [vmem:[%s12798_s1] sm:$0x3]  ;;  %v5357_v29 = vshrl.u32 %v5308_v60, 16 }
 0x2fd   : > { %v3849_v5 = vpop.permute.xlu0 %3848 }
 0x2fe   : > { %3918 = vst.msk [vmem:[#allocation4 + $0x6c] sm:$0xf] %vm3890_vm13, %v3849_v5  ;;  %v4122_v5 = vrot.slane %v3967_v14, 5  ;;  %v11210_v14 = vld [vmem:[%s12801_s4] ss:$0 sm:$0xff]  ;;  %v5359_v24 = vrot.slane %v5357_v29, 4 }
 0x2ff   : > { %v3839_v10 = vpop.permute.xlu1 %3838 }
 0x300   : > { %3913 = vst.msk [vmem:[#allocation4 + $0x58] sm:$0xf] %vm3890_vm13, %v3839_v10  ;;  %v4121_v10 = vrot.slane %v4119_v41, 4  ;;  %v3970_v41 = vld [vmem:[#allocation2 + $0xd4] sm:$0x1] }
 0x301   : > { %v3847_v40 = vpop.permute.xlu2 %3846  ;;  %4179 = vrot.lane.b32.xlu2 %v4106_v48, %s9418_s18  ;;  %v4129_v48 = vrot.slane %v3970_v41, 5 }
 0x302   : > { %3917 = vst.msk [vmem:[#allocation4 + $0x68] sm:$0xf] %vm3890_vm13, %v3847_v40  ;;  %v4123_v17 = vsel %vm9964_vm1, %v4121_v10, %v4122_v5  ;;  %v4128_v5 = vrot.slane %v4126_v13, 4  ;;  %v5362_v10 = vrot.slane %v5360_v63, 5 }
 0x303   : > { %4189 = vrot.lane.b32.xlu1 %v4123_v17, %s9418_s18  ;;  %v11215_v17 = vld [vmem:[%s12802_s5] ss:$0 sm:$0xff] }
 0x305   : > { %v3855_v21 = vpop.permute.xlu0 %3854 }
 0x306   : > { %3921 = vst.msk [vmem:[#allocation4 + $0x78] sm:$0xf] %vm3890_vm13, %v3855_v21  ;;  %v471_v21 = vsel %vm469_vm14, %v339_v4, 0  ;;  %vm8019_vm14 = vcmask 519616  }
 0x307   : > { %v3845_v47 = vpop.permute.xlu1 %3844  ;;  %9362 = vmatpush.bf16.msra.mxu3 %v471_v21  ;;  %480 = vmatpush.bf16.msra.mxu0 %v471_v21 }
 0x308   : > { %3916 = vst.msk [vmem:[#allocation4 + $0x64] sm:$0xf] %vm3890_vm13, %v3845_v47 }
 0x309   : > { %v3853_v8 = vpop.permute.xlu2 %3852  ;;  %4185 = vrot.lane.b32.xlu2 %v4116_v28, %s9418_s18 }
 0x30a   : > { %3920 = vst.msk [vmem:[#allocation4 + $0x74] sm:$0xf] %vm3890_vm13, %v3853_v8  ;;  %9021 = vmatmul.msk.bf16.vlgmr.msra.gmra.mxu3 %vm420_vm4, %v9321_v36 }
 0x30b   : > { %9363 = vmatpush.bf16.msrb.mxu3 %v11054_v54 }
 0x30d   : > { %v4134_v22 = vpop.permute.xlu0 %4133 }
 0x30e   : > { %4229 = vst.msk [vmem:[#allocation4 + $0x4] sm:$0xf] %vm4227_vm15, %v4134_v22 }
 0x30f   : > { %v3851_v32 = vpop.permute.xlu1 %3850  ;;  %9364 = vmatpush.bf16.msrb.mxu3 %v11063_v56 }
 0x310   : > { %3919 = vst.msk [vmem:[#allocation4 + $0x70] sm:$0xf] %vm3890_vm13, %v3851_v32  ;;  %v4681_v32 = vld [vmem:[#allocation3 + $0xc] sm:$0x1] }
 0x311   : > { %v4132_v57 = vpop.permute.xlu2 %4131  ;;  %v4682_v59 = vsel %vm11185_vm0, 0, %v4681_v32 }
 0x312   : > { %4228 = vst.msk [vmem:[#allocation4] sm:$0xf] %vm4227_vm15, %v4132_v57 }
 0x313   : > { %9365 = vmatpush.bf16.msrb.mxu3 %v11073_v49  ;;  %v9323_v49 = vld [vmem:[%s9504_s10 + $0x78] sm:$0xff]  ;;  %4683 = vst [vmem:[#allocation3 + $0xc] sm:$0x1] %v4682_v59 }
 0x315   : > { %v4140_v3 = vpop.permute.xlu0 %4139 }
 0x316   : > { %4232 = vst.msk [vmem:[#allocation4 + $0x10] sm:$0xf] %vm4227_vm15, %v4140_v3  ;;  %v4730_v3 = vld [vmem:[#allocation3 + $0x14] sm:$0x1] }
 0x317   : > { %v3857_v37 = vpop.permute.xlu1 %3856  ;;  %v4731_v12 = vsel %vm11194_vm5, 0, %v4730_v3 }
 0x318   : > { %3922 = vst.msk [vmem:[#allocation4 + $0x7c] sm:$0xf] %vm3890_vm13, %v3857_v37  ;;  %vm7458_vm13 = vcmask 454016  }
 0x319   : > { %v9324_v42 = vld [vmem:[#allocation4] sm:$0xff]  ;;  %v4138_v55 = vpop.permute.xlu2 %4137  ;;  %4732 = vst [vmem:[#allocation3 + $0x14] sm:$0x1] %v4731_v12 }
 0x31a   : > { %4231 = vst.msk [vmem:[#allocation4 + $0xc] sm:$0xf] %vm4227_vm15, %v4138_v55  ;;  %9144 = vmatmul.msk.bf16.vlgmr.msra.gmra.mxu1 %vm4392_vm3, %v9324_v42  ;;  %9022 = vmatmul.msk.bf16.gmra.mxu3 %vm420_vm4, %v9322_v11  ;;  %v4684_v42 = vld [vmem:[#allocation3 + $0x18] sm:$0x1] }
 0x31b   : > { %v4685_v55 = vsel %vm11185_vm0, 0, %v4684_v42 }
 0x31c   : > { %4686 = vst [vmem:[#allocation3 + $0x18] sm:$0x1] %v4685_v55 }
 0x31d   : > { %v4146_v7 = vpop.permute.xlu0 %4145 }
 0x31e   : > { %4235 = vst.msk [vmem:[#allocation4 + $0x1c] sm:$0xf] %vm4227_vm15, %v4146_v7  ;;  %v4130_v7 = vsel %vm9964_vm1, %v4128_v5, %v4129_v48 }
 0x31f   : > { %v4136_v18 = vpop.permute.xlu1 %4135  ;;  %4193 = vrot.lane.b32.xlu0 %v4130_v7, %s9418_s18 }
 0x320   : > { %4230 = vst.msk [vmem:[#allocation4 + $0x8] sm:$0xf] %vm4227_vm15, %v4136_v18  ;;  %v5309_v18 = vld [vmem:[#allocation3 + $0x4] sm:$0xf] }
 0x321   : > { %v4144_v2 = vpop.permute.xlu2 %4143  ;;  %v5366_v25 = vshll.u32 %v5309_v18, 16 }
 0x322   : > { %4234 = vst.msk [vmem:[#allocation4 + $0x18] sm:$0xf] %vm4227_vm15, %v4144_v2 }
 0x325   : > { %v4152_v62 = vpop.permute.xlu0 %4151 }
 0x326   : > { %4238 = vst.msk [vmem:[#allocation4 + $0x28] sm:$0xf] %vm4227_vm15, %v4152_v62 }
 0x327   : > { %v9325_v44 = vld [vmem:[#allocation4 + $0x8] sm:$0xff]  ;;  %v4142_v40 = vpop.permute.xlu1 %4141 }
 0x328   : > { %4233 = vst.msk [vmem:[#allocation4 + $0x14] sm:$0xf] %vm4227_vm15, %v4142_v40  ;;  %v5363_v40 = vor.u32 %v5362_v10, %v5359_v24  ;;  %v5136_v10 = vld [vmem:[#allocation3 + $0x14] sm:$0x1] }
 0x329   : > { %v4150_v0 = vpop.permute.xlu2 %4149  ;;  %v9327_v30 = vld [vmem:[#allocation4 + $0x18] sm:$0xff] }
 0x32a   : > { %9145 = vmatmul.msk.bf16.gmra.mxu1 %vm4392_vm3, %v9325_v44  ;;  %4237 = vst.msk [vmem:[#allocation4 + $0x24] sm:$0xf] %vm4227_vm15, %v4150_v0  ;;  %9023 = vmatmul.msk.bf16.gmra.mxu3 %vm420_vm4, %v9323_v49  ;;  %v4734_v0 = vsel %vm11194_vm5, 0, %v4733_v39 }
 0x32b   : > { %4735 = vst [vmem:[#allocation3 + $0x20] sm:$0x1] %v4734_v0 }
 0x32d   : > { %v4158_v19 = vpop.permute.xlu0 %4157 }
 0x32e   : > { %4241 = vst.msk [vmem:[#allocation4 + $0x34] sm:$0xf] %vm4227_vm15, %v4158_v19 }
 0x32f   : > { %v4148_v50 = vpop.permute.xlu1 %4147  ;;  %v9326_v26 = vld [vmem:[#allocation4 + $0x10] sm:$0xff] }
 0x330   : > { %4236 = vst.msk [vmem:[#allocation4 + $0x20] sm:$0xf] %vm4227_vm15, %v4148_v50  ;;  %v5364_v50 = vrot.slane %v5363_v40, 4 }
 0x331   : > { %v4156_v35 = vpop.permute.xlu2 %4155 }
 0x332   : > { %4240 = vst.msk [vmem:[#allocation4 + $0x30] sm:$0xf] %vm4227_vm15, %v4156_v35 }
 0x335   : > { %v4164_v45 = vpop.permute.xlu0 %4163 }
 0x336   : > { %4244 = vst.msk [vmem:[#allocation4 + $0x40] sm:$0xf] %vm4227_vm15, %v4164_v45 }
 0x337   : > { %v4154_v52 = vpop.permute.xlu1 %4153  ;;  %v9328_v47 = vld [vmem:[#allocation4 + $0x20] sm:$0xff] }
 0x338   : > { %4239 = vst.msk [vmem:[#allocation4 + $0x2c] sm:$0xf] %vm4227_vm15, %v4154_v52 }
 0x339   : > { %v4162_v8 = vpop.permute.xlu2 %4161  ;;  %v9330_v53 = vld [vmem:[#allocation4 + $0x30] sm:$0xff] }
 0x33a   : > { %9146 = vmatmul.msk.bf16.gmra.mxu1 %vm4392_vm3, %v9326_v26  ;;  %4243 = vst.msk [vmem:[#allocation4 + $0x3c] sm:$0xf] %vm4227_vm15, %v4162_v8  ;;  %v5368_v26 = vrot.slane %v5366_v25, 5  ;;  %v4690_v25 = vld [vmem:[#allocation3 + $0x30] sm:$0x1] }
 0x33c   : > { %v5369_v52 = vsel %vm9518_vm11, %v5364_v50, %v5368_v26 }
 0x33d   : > { %v4170_v51 = vpop.permute.xlu0 %4169  ;;  %5740 = vrot.lane.b32.xlu1 %v5369_v52, %s9412_s12 }
 0x33e   : > { %4247 = vst.msk [vmem:[#allocation4 + $0x4c] sm:$0xf] %vm4227_vm15, %v4170_v51  ;;  %v5310_v51 = vld [vmem:[#allocation3 + $0x8] sm:$0x1] }
 0x33f   : > { %v4160_v54 = vpop.permute.xlu1 %4159  ;;  %v9329_v31 = vld [vmem:[#allocation4 + $0x28] sm:$0xff] }
 0x340   : > { %4242 = vst.msk [vmem:[#allocation4 + $0x38] sm:$0xf] %vm4227_vm15, %v4160_v54  ;;  %v4687_v54 = vld [vmem:[#allocation3 + $0x24] sm:$0x1] }
 0x347   : > { %v4166_v22 = vpop.permute.xlu1 %4165  ;;  %v9331_v57 = vld [vmem:[#allocation4 + $0x38] sm:$0xff] }
 0x348   : > { %4245 = vst.msk [vmem:[#allocation4 + $0x44] sm:$0xf] %vm4227_vm15, %v4166_v22 }
 0x34a   : > { %9147 = vmatmul.msk.bf16.gmra.mxu1 %vm4392_vm3, %v9327_v30  ;;  %v3968_v30 = vld [vmem:[#allocation2 + $0xcc] sm:$0xe] }
 0x34b   : > { %v4168_v56 = vpop.permute.xlu2 %4167  ;;  %v4176_v33 = vpop.permute.xlu0 %4175  ;;  %v9071_v21 = vrot.slane %v3968_v30, 9 }
 0x34c   : > { %4246 = vst.msk [vmem:[#allocation4 + $0x48] sm:$0xf] %vm4227_vm15, %v4168_v56  ;;  %v4688_v56 = vsel %vm11185_vm0, 0, %v4687_v54 }
 0x34d   : > { %4250 = vst.msk [vmem:[#allocation4 + $0x58] sm:$0xf] %vm4227_vm15, %v4176_v33  ;;  %v4127_v11 = vsel %vm9964_vm1, %v9071_v21, %v4126_v13  ;;  %v4691_v21 = vsel %vm11185_vm0, 0, %v4690_v25 }
 0x34e   : > { %4191 = vrot.lane.b32.xlu2 %v4127_v11, %s9418_s18  ;;  %4689 = vst [vmem:[#allocation3 + $0x24] sm:$0x1] %v4688_v56 }
 0x34f   : > { %v4172_v20 = vpop.permute.xlu1 %4171  ;;  %v9332_v2 = vld [vmem:[#allocation4 + $0x40] sm:$0xff]  ;;  %4692 = vst [vmem:[#allocation3 + $0x30] sm:$0x1] %v4691_v21 }
 0x350   : > { %4248 = vst.msk [vmem:[#allocation4 + $0x50] sm:$0xf] %vm4227_vm15, %v4172_v20 }
 0x353   : > { %v4174_v1 = vpop.permute.xlu2 %4173  ;;  %v9333_v13 = vld [vmem:[#allocation4 + $0x48] sm:$0xff] }
 0x354   : > { %4249 = vst.msk [vmem:[#allocation4 + $0x54] sm:$0xf] %vm4227_vm15, %v4174_v1 }
 0x35a   : > { %9148 = vmatmul.msk.bf16.gmra.mxu1 %vm4392_vm3, %v9328_v47  ;;  %v5370_v47 = vshrl.u32 %v5309_v18, 16 }
 0x35b   : > { %v4180_v58 = vpop.permute.xlu2 %4179  ;;  %v4182_v9 = vpop.permute.xlu0 %4181 }
 0x35c   : > { %4252 = vst.msk [vmem:[#allocation4 + $0x60] sm:$0xf] %vm4227_vm15, %v4180_v58  ;;  %v5372_v49 = vrot.slane %v5370_v47, 4 }
 0x35d   : > { %4253 = vst.msk [vmem:[#allocation4 + $0x64] sm:$0xf] %vm4227_vm15, %v4182_v9 }
 0x35e   : > { %v5373_v33 = vor.u32 %v5372_v49, %v5368_v26  ;;  %v4739_v49 = vld [vmem:[#allocation3 + $0x38] sm:$0x1] }
 0x360   : > { %v5374_v32 = vrot.slane %v5373_v33, 4  ;;  %v9334_v33 = vld [vmem:[#allocation4 + $0x50] sm:$0xff] }
 0x363   : > { %v4178_v23 = vpop.permute.xlu1 %4177  ;;  %v4186_v15 = vpop.permute.xlu2 %4185 }
 0x364   : > { %4251 = vst.msk [vmem:[#allocation4 + $0x5c] sm:$0xf] %vm4227_vm15, %v4178_v23  ;;  %v9336_v34 = vld [vmem:[#allocation4 + $0x60] sm:$0xff]  ;;  %v4188_v36 = vpop.permute.xlu0 %4187  ;;  %v5132_v23 = vld [vmem:[#allocation3 + $0xc] sm:$0xf] }
 0x365   : > { %9156 = vmatmul.msk.bf16.vlgmr.msrb.gmra.mxu3 %vm4392_vm3, %v9336_v34  ;;  %4255 = vst.msk [vmem:[#allocation4 + $0x6c] sm:$0xf] %vm4227_vm15, %v4186_v15 }
 0x366   : > { %4256 = vst.msk [vmem:[#allocation4 + $0x70] sm:$0xf] %vm4227_vm15, %v4188_v36 }
 0x36a   : > { %9149 = vmatmul.msk.bf16.gmra.mxu1 %vm4392_vm3, %v9329_v31 }
 0x36b   : > { %v4184_v37 = vpop.permute.xlu1 %4183 }
 0x36c   : > { %4254 = vst.msk [vmem:[#allocation4 + $0x68] sm:$0xf] %vm4227_vm15, %v4184_v37  ;;  %v4736_v37 = vld [vmem:[#allocation3 + $0x2c] sm:$0x1] }
 0x36d   : > { %v4737_v29 = vsel %vm11194_vm5, 0, %v4736_v37 }
 0x36e   : > { %4738 = vst [vmem:[#allocation3 + $0x2c] sm:$0x1] %v4737_v29 }
 0x373   : > { %v9337_v44 = vld [vmem:[#allocation4 + $0x68] sm:$0xff] }
 0x375   : > { %9157 = vmatmul.msk.bf16.gmra.mxu3 %vm4392_vm3, %v9337_v44  ;;  %v4190_v35 = vpop.permute.xlu1 %4189 }
 0x376   : > { %4257 = vst.msk [vmem:[#allocation4 + $0x74] sm:$0xf] %vm4227_vm15, %v4190_v35 }
 0x37a   : > { %9150 = vmatmul.msk.bf16.gmra.mxu1 %vm4392_vm3, %v9330_v53  ;;  %v5376_v53 = vshll.u32 %v5310_v51, 16 }
 0x37c   : > { %v5378_v34 = vrot.slane %v5376_v53, 5 }
 0x37d   : > { %v9338_v12 = vld [vmem:[#allocation4 + $0x70] sm:$0xff] }
 0x37e   : > { %v5379_v42 = vsel %vm9518_vm11, %v5374_v32, %v5378_v34 }
 0x37f   : > { %5742 = vrot.lane.b32.xlu2 %v5379_v42, %s9412_s12 }
 0x385   : > { %9158 = vmatmul.msk.bf16.gmra.mxu3 %vm4392_vm3, %v9338_v12 }
 0x38a   : > { %9151 = vmatmul.msk.bf16.gmra.mxu1 %vm4392_vm3, %v9331_v57 }
 0x397   : > { %v4453_v16 = vpop.f32.mrf.mxu1 }
 0x398   : > { %v4537_v28 = vmul.f32 %v11210_v14, %v4453_v16 }
 0x39a   : > { %v4573_v62 = vadd.f32 %v11215_v17, %v4537_v28  ;;  %9152 = vmatmul.msk.bf16.gmra.mxu1 %vm4392_vm3, %v9332_v2 }
 0x39c   : > { %v4605_v4 = vmul.f32 0.2, %v4573_v62 }
 0x39e   : > { %v4637_v19 = vmax.f32 %v4573_v62, %v4605_v4 }
 0x39f   : > { %v4455_v8 = vpop.f32.mrf.mxu1 }
 0x3a0   : > { %v4778_v45 = vpack.c.bf16 %v4637_v19, %v4637_v19  ;;  %v4538_v31 = vmul.f32 %v11210_v14, %v4455_v8  ;;  %v5139_v8 = vld [vmem:[#allocation3 + $0x18] sm:$0xf] }
 0x3a2   : > { %v4811_v22 = vshrl.u32 %v4778_v45, 16  ;;  %v4574_v1 = vadd.f32 %v11215_v17, %v4538_v31  ;;  %v4814_v58 = vshll.u32 %v4778_v45, 16 }
 0x3a4   : > { %v4813_v20 = vrot.slane %v4811_v22, 7  ;;  %v4606_v9 = vmul.f32 0.2, %v4574_v1 }
 0x3a6   : > { %v4816_v57 = vor.u32 %v4814_v58, %v4813_v20  ;;  %v4638_v3 = vmax.f32 %v4574_v1, %v4606_v9  ;;  %v4817_v18 = vrot.slane %v4813_v20, 4  ;;  %v4740_v20 = vsel %vm11194_vm5, 0, %v4739_v49 }
 0x3a7   : > { %v4458_v15 = vpop.f32.mrf.mxu1  ;;  %4741 = vst [vmem:[#allocation3 + $0x38] sm:$0x1] %v4740_v20 }
 0x3a8   : > { %v5133_v55 = vsel %vm11240_vm2, %v4816_v57, %v5132_v23  ;;  %v4779_v38 = vpack.c.bf16 %v4638_v3, %v4638_v3  ;;  %v4539_v60 = vmul.f32 %v11210_v14, %v4458_v15 }
 0x3a9   : > { %5134 = vst [vmem:[#allocation3 + $0xc] sm:$0xf] %v5133_v55 }
 0x3aa   : > { %v4819_v63 = vshrl.u32 %v4779_v38, 16  ;;  %v4575_v41 = vadd.f32 %v11215_v17, %v4539_v60  ;;  %9153 = vmatmul.msk.bf16.gmra.mxu1 %vm4392_vm3, %v9333_v13  ;;  %v4822_v48 = vshll.u32 %v4779_v38, 16  ;;  %v5143_v60 = vld [vmem:[#allocation3 + $0x20] sm:$0x1] }
 0x3ac   : > { %v4821_v5 = vrot.slane %v4819_v63, 7  ;;  %v4607_v24 = vmul.f32 0.2, %v4575_v41 }
 0x3ae   : > { %v4824_v2 = vor.u32 %v4822_v48, %v4821_v5  ;;  %v4826_v7 = vrot.slane %v4821_v5, 4  ;;  %v4639_v44 = vmax.f32 %v4575_v41, %v4607_v24 }
 0x3af   : > { %v4460_v40 = vpop.f32.mrf.mxu1 }
 0x3b0   : > { %v4825_v16 = vsel %vm9535_vm12, %v4817_v18, %v4824_v2  ;;  %v5137_v39 = vsel %vm11185_vm0, %v4826_v7, %v5136_v10  ;;  %v4780_v28 = vpack.c.bf16 %v4639_v44, %v4639_v44  ;;  %v4540_v0 = vmul.f32 %v11210_v14, %v4460_v40  ;;  %v5311_v50 = vld [vmem:[#allocation3 + $0xc] sm:$0xf]  ;;  %v4693_v2 = vld [vmem:[#allocation3 + $0x3c] sm:$0x1] }
 0x3b1   : > { %5135 = vst.msk [vmem:[#allocation3 + $0x10] sm:$0xf] %vm4669_vm8, %v4825_v16  ;;  %v5381_v26 = vshrl.u32 %v5311_v50, 16  ;;  %v5384_v62 = vshll.u32 %v5311_v50, 16  ;;  %v5246_v52 = vld [vmem:[#allocation3 + $0xc] sm:$0xf] }
 0x3b2   : > { %5138 = vst [vmem:[#allocation3 + $0x14] sm:$0x1] %v5137_v39  ;;  %v4828_v30 = vshrl.u32 %v4780_v28, 16  ;;  %v4576_v4 = vadd.f32 %v11215_v17, %v4540_v0  ;;  %v4831_v47 = vshll.u32 %v4780_v28, 16 }
 0x3b3   : > { %v5383_v36 = vrot.slane %v5381_v26, 4  ;;  %v5386_v35 = vrot.slane %v5384_v62, 5  ;;  %5278 = vst.msk [vmem:[#allocation5 + $0x8] sm:$0xf] %vm4669_vm8, %v5246_v52  ;;  %v4694_v26 = vsel %vm11185_vm0, 0, %v4693_v2 }
 0x3b4   : > { %v4830_v19 = vrot.slane %v4828_v30, 7  ;;  %v4608_v11 = vmul.f32 0.2, %v4576_v4  ;;  %4695 = vst [vmem:[#allocation3 + $0x3c] sm:$0x1] %v4694_v26 }
 0x3b5   : > { %v5387_v56 = vor.u32 %v5386_v35, %v5383_v36 }
 0x3b6   : > { %v4833_v54 = vor.u32 %v4831_v47, %v4830_v19  ;;  %v4640_v45 = vmax.f32 %v4576_v4, %v4608_v11  ;;  %v4834_v63 = vrot.slane %v4830_v19, 4  ;;  %v5146_v19 = vld [vmem:[#allocation3 + $0x24] sm:$0xf] }
 0x3b7   : > { %v4463_v31 = vpop.f32.mrf.mxu1  ;;  %v5388_v3 = vrot.slane %v5387_v56, 4 }
 0x3b8   : > { %v5140_v51 = vsel %vm11240_vm2, %v4833_v54, %v5139_v8  ;;  %v4781_v22 = vpack.c.bf16 %v4640_v45, %v4640_v45  ;;  %v4541_v1 = vmul.f32 %v11210_v14, %v4463_v31  ;;  %v5312_v53 = vld [vmem:[#allocation3 + $0x10] sm:$0xf]  ;;  %v4742_v45 = vld [vmem:[#allocation3 + $0x44] sm:$0x1] }
 0x3b9   : > { %v5247_v58 = vld [vmem:[#allocation3 + $0x10] sm:$0xf]  ;;  %5141 = vst [vmem:[#allocation3 + $0x18] sm:$0xf] %v5140_v51  ;;  %v5390_v9 = vshll.u32 %v5312_v53, 16  ;;  %v5394_v32 = vshrl.u32 %v5312_v53, 16 }
 0x3ba   : > { %v5313_v23 = vld [vmem:[#allocation3 + $0x14] sm:$0x1]  ;;  %v4836_v34 = vshrl.u32 %v4781_v22, 16  ;;  %v4577_v57 = vadd.f32 %v11215_v17, %v4541_v1  ;;  %9154 = vmatmul.msk.bf16.gmra.mxu1 %vm4392_vm3, %v9334_v33  ;;  %v4839_v55 = vshll.u32 %v4781_v22, 16  ;;  %5279 = vst.msk [vmem:[#allocation5 + $0xc] sm:$0xf] %vm4669_vm8, %v5247_v58 }
 0x3bb   : > { %v5392_v12 = vrot.slane %v5390_v9, 5  ;;  %v5396_v15 = vrot.slane %v5394_v32, 4  ;;  %v5400_v37 = vshll.u32 %v5313_v23, 16  ;;  %v9335_v51 = vld [vmem:[#allocation4 + $0x58] sm:$0xff]  ;;  %v4743_v1 = vsel %vm11194_vm5, 0, %v4742_v45 }
 0x3bc   : > { %v4838_v42 = vrot.slane %v4836_v34, 7  ;;  %v4609_v38 = vmul.f32 0.2, %v4577_v57  ;;  %4744 = vst [vmem:[#allocation3 + $0x44] sm:$0x1] %v4743_v1 }
 0x3bd   : > { %v5393_v13 = vsel %vm9518_vm11, %v5388_v3, %v5392_v12  ;;  %v5397_v29 = vor.u32 %v5396_v15, %v5392_v12  ;;  %v5402_v18 = vrot.slane %v5400_v37, 5 }
 0x3be   : > { %v4841_v41 = vor.u32 %v4839_v55, %v4838_v42  ;;  %v4843_v5 = vrot.slane %v4838_v42, 4  ;;  %v4641_v48 = vmax.f32 %v4577_v57, %v4609_v38  ;;  %5744 = vrot.lane.b32.xlu0 %v5393_v13, %s9412_s12  ;;  %v5150_v42 = vld [vmem:[#allocation3 + $0x2c] sm:$0x1] }
 0x3bf   : > { %v4465_v24 = vpop.f32.mrf.mxu1  ;;  %v5398_v10 = vrot.slane %v5397_v29, 4 }
 0x3c0   : > { %v4842_v7 = vsel %vm9535_vm12, %v4834_v63, %v4841_v41  ;;  %v5144_v44 = vsel %vm11185_vm0, %v4843_v5, %v5143_v60  ;;  %v4782_v40 = vpack.c.bf16 %v4641_v48, %v4641_v48  ;;  %v4542_v25 = vmul.f32 %v11210_v14, %v4465_v24  ;;  %v5314_v16 = vld [vmem:[#allocation3 + $0x18] sm:$0xf]  ;;  %v4696_v24 = vld [vmem:[#allocation3 + $0x48] sm:$0x1] }
 0x3c1   : > { %v5248_v39 = vld [vmem:[#allocation3 + $0x18] sm:$0xf]  ;;  %5142 = vst.msk [vmem:[#allocation3 + $0x1c] sm:$0xf] %vm4669_vm8, %v4842_v7  ;;  %v5403_v28 = vsel %vm9518_vm11, %v5398_v10, %v5402_v18  ;;  %v5405_v0 = vshrl.u32 %v5314_v16, 16  ;;  %v5408_v50 = vshll.u32 %v5314_v16, 16 }
 0x3c2   : > { %5145 = vst [vmem:[#allocation3 + $0x20] sm:$0x1] %v5144_v44  ;;  %v4845_v62 = vshrl.u32 %v4782_v40, 16  ;;  %v4578_v52 = vadd.f32 %v11215_v17, %v4542_v25  ;;  %5746 = vrot.lane.b32.xlu1 %v5403_v28, %s9412_s12  ;;  %v4848_v36 = vshll.u32 %v4782_v40, 16  ;;  %v4697_v28 = vsel %vm11185_vm0, 0, %v4696_v24 }
 0x3c3   : > { %v5407_v30 = vrot.slane %v5405_v0, 4  ;;  %v5410_v4 = vrot.slane %v5408_v50, 5  ;;  %5280 = vst.msk [vmem:[#allocation5 + $0x10] sm:$0xf] %vm4669_vm8, %v5248_v39 }
 0x3c4   : > { %v4847_v21 = vrot.slane %v4845_v62, 7  ;;  %v4610_v35 = vmul.f32 0.2, %v4578_v52  ;;  %4698 = vst [vmem:[#allocation3 + $0x48] sm:$0x1] %v4697_v28 }
 0x3c5   : > { %v5411_v54 = vor.u32 %v5410_v4, %v5407_v30 }
 0x3c6   : > { %v4850_v47 = vor.u32 %v4848_v36, %v4847_v21  ;;  %v4642_v11 = vmax.f32 %v4578_v52, %v4610_v35  ;;  %v4851_v60 = vrot.slane %v4847_v21, 4  ;;  %v5153_v21 = vld [vmem:[#allocation3 + $0x30] sm:$0xf] }
 0x3c7   : > { %v4468_v8 = vpop.f32.mrf.mxu1  ;;  %v5412_v23 = vrot.slane %v5411_v54, 4 }
 0x3c8   : > { %v5147_v31 = vsel %vm11240_vm2, %v4850_v47, %v5146_v19  ;;  %v4783_v56 = vpack.c.bf16 %v4642_v11, %v4642_v11  ;;  %v4543_v49 = vmul.f32 %v11210_v14, %v4468_v8  ;;  %v5315_v22 = vld [vmem:[#allocation3 + $0x1c] sm:$0xf]  ;;  %v4745_v11 = vld [vmem:[#allocation3 + $0x50] sm:$0x1] }
 0x3c9   : > { %v5249_v33 = vld [vmem:[#allocation3 + $0x1c] sm:$0xf]  ;;  %5148 = vst [vmem:[#allocation3 + $0x24] sm:$0xf] %v5147_v31  ;;  %v5414_v53 = vshll.u32 %v5315_v22, 16  ;;  %v5418_v20 = vshrl.u32 %v5315_v22, 16 }
 0x3ca   : > { %v5316_v58 = vld [vmem:[#allocation3 + $0x20] sm:$0x1]  ;;  %v4853_v9 = vshrl.u32 %v4783_v56, 16  ;;  %v4579_v32 = vadd.f32 %v11215_v17, %v4543_v49  ;;  %9155 = vmatmul.msk.bf16.gmra.mxu1 %vm4392_vm3, %v9335_v51  ;;  %v4856_v15 = vshll.u32 %v4783_v56, 16  ;;  %5281 = vst.msk [vmem:[#allocation5 + $0x14] sm:$0xf] %vm4669_vm8, %v5249_v33 }
 0x3cb   : > { %v5416_v34 = vrot.slane %v5414_v53, 5  ;;  %v5420_v57 = vrot.slane %v5418_v20, 4  ;;  %v5424_v3 = vshll.u32 %v5316_v58, 16  ;;  %v4746_v56 = vsel %vm11194_vm5, 0, %v4745_v11  ;;  %v11319_v20 = vpop.f32.mrf.mxu3 }
 0x3cc   : > { %v4855_v12 = vrot.slane %v4853_v9, 7  ;;  %v4611_v37 = vmul.f32 0.2, %v4579_v32  ;;  %4747 = vst [vmem:[#allocation3 + $0x50] sm:$0x1] %v4746_v56 }
 0x3cd   : > { %v5417_v55 = vsel %vm9518_vm11, %v5412_v23, %v5416_v34  ;;  %v5421_v38 = vor.u32 %v5420_v57, %v5416_v34  ;;  %v5426_v48 = vrot.slane %v5424_v3, 5 }
 0x3ce   : > { %v4858_v13 = vor.u32 %v4856_v15, %v4855_v12  ;;  %v4860_v29 = vrot.slane %v4855_v12, 4  ;;  %v4643_v63 = vmax.f32 %v4579_v32, %v4611_v37  ;;  %5748 = vrot.lane.b32.xlu2 %v5417_v55, %s9412_s12  ;;  %v5157_v12 = vld [vmem:[#allocation3 + $0x38] sm:$0x1] }
 0x3cf   : > { %v4470_v41 = vpop.f32.mrf.mxu1  ;;  %v5422_v5 = vrot.slane %v5421_v38, 4 }
 0x3d0   : > { %v4859_v10 = vsel %vm9535_vm12, %v4851_v60, %v4858_v13  ;;  %v5151_v18 = vsel %vm11185_vm0, %v4860_v29, %v5150_v42  ;;  %v4784_v2 = vpack.c.bf16 %v4643_v63, %v4643_v63  ;;  %v4544_v7 = vmul.f32 %v11210_v14, %v4470_v41  ;;  %v5317_v44 = vld [vmem:[#allocation3 + $0x24] sm:$0xf]  ;;  %v4699_v41 = vld [vmem:[#allocation3 + $0x54] sm:$0x1] }
 0x3d1   : > { %v5250_v40 = vld [vmem:[#allocation3 + $0x24] sm:$0xf]  ;;  %5149 = vst.msk [vmem:[#allocation3 + $0x28] sm:$0xf] %vm4669_vm8, %v4859_v10  ;;  %v5427_v25 = vsel %vm9518_vm11, %v5422_v5, %v5426_v48  ;;  %v5429_v16 = vshrl.u32 %v5317_v44, 16  ;;  %v5432_v39 = vshll.u32 %v5317_v44, 16 }
 0x3d2   : > { %5152 = vst [vmem:[#allocation3 + $0x2c] sm:$0x1] %v5151_v18  ;;  %v4862_v0 = vshrl.u32 %v4784_v2, 16  ;;  %v4580_v50 = vadd.f32 %v11215_v17, %v4544_v7  ;;  %5750 = vrot.lane.b32.xlu0 %v5427_v25, %s9412_s12  ;;  %v4865_v30 = vshll.u32 %v4784_v2, 16  ;;  %v4700_v25 = vsel %vm11185_vm0, 0, %v4699_v41 }
 0x3d3   : > { %v5431_v26 = vrot.slane %v5429_v16, 4  ;;  %v5434_v62 = vrot.slane %v5432_v39, 5  ;;  %5282 = vst.msk [vmem:[#allocation5 + $0x18] sm:$0xf] %vm4669_vm8, %v5250_v40  ;;  %v11337_v28 = vpop.f32.mrf.mxu3 }
 0x3d4   : > { %v4864_v52 = vrot.slane %v4862_v0, 7  ;;  %v4612_v4 = vmul.f32 0.2, %v4580_v50  ;;  %4701 = vst [vmem:[#allocation3 + $0x54] sm:$0x1] %v4700_v25 }
 0x3d5   : > { %v5435_v47 = vor.u32 %v5434_v62, %v5431_v26 }
 0x3d6   : > { %v4867_v36 = vor.u32 %v4865_v30, %v4864_v52  ;;  %v4644_v35 = vmax.f32 %v4580_v50, %v4612_v4  ;;  %v4868_v42 = vrot.slane %v4864_v52, 4  ;;  %v5160_v30 = vld [vmem:[#allocation3 + $0x3c] sm:$0xf] }
 0x3d7   : > { %v4473_v19 = vpop.f32.mrf.mxu1  ;;  %v5436_v58 = vrot.slane %v5435_v47, 4 }
 0x3d8   : > { %v5154_v8 = vsel %vm11240_vm2, %v4867_v36, %v5153_v21  ;;  %v4785_v54 = vpack.c.bf16 %v4644_v35, %v4644_v35  ;;  %v4545_v45 = vmul.f32 %v11210_v14, %v4473_v19  ;;  %v5318_v31 = vld [vmem:[#allocation3 + $0x28] sm:$0xf]  ;;  %v4748_v19 = vld [vmem:[#allocation3 + $0x5c] sm:$0x1] }
 0x3d9   : > { %v5251_v49 = vld [vmem:[#allocation3 + $0x28] sm:$0xf]  ;;  %5155 = vst [vmem:[#allocation3 + $0x30] sm:$0xf] %v5154_v8  ;;  %v5438_v51 = vshll.u32 %v5318_v31, 16  ;;  %v5442_v22 = vshrl.u32 %v5318_v31, 16 }
 0x3da   : > { %v5319_v1 = vld [vmem:[#allocation3 + $0x2c] sm:$0x1]  ;;  %v4870_v33 = vshrl.u32 %v4785_v54, 16  ;;  %v4581_v53 = vadd.f32 %v11215_v17, %v4545_v45  ;;  %v4873_v57 = vshll.u32 %v4785_v54, 16  ;;  %5283 = vst.msk [vmem:[#allocation5 + $0x1c] sm:$0xf] %vm4669_vm8, %v5251_v49 }
 0x3db   : > { %v5440_v9 = vrot.slane %v5438_v51, 5  ;;  %v5444_v32 = vrot.slane %v5442_v22, 4  ;;  %v5448_v23 = vshll.u32 %v5319_v1, 16  ;;  %v4749_v45 = vsel %vm11194_vm5, 0, %v4748_v19  ;;  %v4751_v19 = vld [vmem:[#allocation3 + $0x68] sm:$0x1] }
 0x3dc   : > { %v4872_v34 = vrot.slane %v4870_v33, 7  ;;  %v4613_v3 = vmul.f32 0.2, %v4581_v53  ;;  %v11346_v33 = vpop.f32.mrf.mxu3  ;;  %4750 = vst [vmem:[#allocation3 + $0x5c] sm:$0x1] %v4749_v45  ;;  %v4752_v45 = vsel %vm11194_vm5, 0, %v4751_v19 }
 0x3dd   : > { %v5441_v15 = vsel %vm9518_vm11, %v5436_v58, %v5440_v9  ;;  %v5445_v37 = vor.u32 %v5444_v32, %v5440_v9  ;;  %v5450_v63 = vrot.slane %v5448_v23, 5  ;;  %4753 = vst [vmem:[#allocation3 + $0x68] sm:$0x1] %v4752_v45 }
 0x3de   : > { %v4875_v55 = vor.u32 %v4873_v57, %v4872_v34  ;;  %v4877_v38 = vrot.slane %v4872_v34, 4  ;;  %v4645_v60 = vmax.f32 %v4581_v53, %v4613_v3  ;;  %5752 = vrot.lane.b32.xlu1 %v5441_v15, %s9412_s12  ;;  %v5164_v3 = vld [vmem:[#allocation3 + $0x44] sm:$0x1] }
 0x3df   : > { %v4475_v13 = vpop.f32.mrf.mxu1  ;;  %v5446_v29 = vrot.slane %v5445_v37, 4 }
 0x3e0   : > { %v4876_v5 = vsel %vm9535_vm12, %v4868_v42, %v4875_v55  ;;  %v5158_v48 = vsel %vm11185_vm0, %v4877_v38, %v5157_v12  ;;  %v4786_v24 = vpack.c.bf16 %v4645_v60, %v4645_v60  ;;  %v4546_v10 = vmul.f32 %v11210_v14, %v4475_v13  ;;  %v5320_v18 = vld [vmem:[#allocation3 + $0x30] sm:$0xf] }
 0x3e1   : > { %v5252_v2 = vld [vmem:[#allocation3 + $0x30] sm:$0xf]  ;;  %5156 = vst.msk [vmem:[#allocation3 + $0x34] sm:$0xf] %vm4669_vm8, %v4876_v5  ;;  %v5451_v7 = vsel %vm9518_vm11, %v5446_v29, %v5450_v63  ;;  %v5453_v44 = vshrl.u32 %v5320_v18, 16  ;;  %v5456_v40 = vshll.u32 %v5320_v18, 16 }
 0x3e2   : > { %5159 = vst [vmem:[#allocation3 + $0x38] sm:$0x1] %v5158_v48  ;;  %v4879_v16 = vshrl.u32 %v4786_v24, 16  ;;  %v4582_v39 = vadd.f32 %v11215_v17, %v4546_v10  ;;  %5754 = vrot.lane.b32.xlu2 %v5451_v7, %s9412_s12  ;;  %v4882_v62 = vshll.u32 %v4786_v24, 16  ;;  %v4702_v63 = vld [vmem:[#allocation3 + $0x60] sm:$0x1] }
 0x3e3   : > { %v5455_v0 = vrot.slane %v5453_v44, 4  ;;  %v5458_v50 = vrot.slane %v5456_v40, 5  ;;  %5284 = vst.msk [vmem:[#allocation5 + $0x20] sm:$0xf] %vm4669_vm8, %v5252_v2  ;;  %v4703_v40 = vsel %vm11185_vm0, 0, %v4702_v63 }
 0x3e4   : > { %v4881_v26 = vrot.slane %v4879_v16, 7  ;;  %v4614_v52 = vmul.f32 0.2, %v4582_v39  ;;  %4704 = vst [vmem:[#allocation3 + $0x60] sm:$0x1] %v4703_v40 }
 0x3e5   : > { %v5459_v35 = vor.u32 %v5458_v50, %v5455_v0 }
 0x3e6   : > { %v4884_v4 = vor.u32 %v4882_v62, %v4881_v26  ;;  %v4646_v21 = vmax.f32 %v4582_v39, %v4614_v52  ;;  %v4885_v37 = vrot.slane %v4881_v26, 4  ;;  %v11364_v39 = vpop.f32.mrf.mxu3 }
 0x3e7   : > { %v4478_v36 = vpop.f32.mrf.mxu1  ;;  %v5460_v53 = vrot.slane %v5459_v35, 4 }
 0x3e8   : > { %v5161_v47 = vsel %vm11240_vm2, %v4884_v4, %v5160_v30  ;;  %v4787_v11 = vpack.c.bf16 %v4646_v21, %v4646_v21  ;;  %v4547_v8 = vmul.f32 %v11210_v14, %v4478_v36  ;;  %v5321_v54 = vld [vmem:[#allocation3 + $0x34] sm:$0xf]  ;;  %v5167_v30 = vld [vmem:[#allocation3 + $0x48] sm:$0xf] }
 0x3e9   : > { %v5253_v31 = vld [vmem:[#allocation3 + $0x34] sm:$0xf]  ;;  %5162 = vst [vmem:[#allocation3 + $0x3c] sm:$0xf] %v5161_v47  ;;  %v5462_v56 = vshll.u32 %v5321_v54, 16  ;;  %v5466_v49 = vshrl.u32 %v5321_v54, 16 }
 0x3ea   : > { %v5322_v51 = vld [vmem:[#allocation3 + $0x38] sm:$0x1]  ;;  %v4887_v22 = vshrl.u32 %v4787_v11, 16  ;;  %v4583_v1 = vadd.f32 %v11215_v17, %v4547_v8  ;;  %v4890_v34 = vshll.u32 %v4787_v11, 16  ;;  %5285 = vst.msk [vmem:[#allocation5 + $0x24] sm:$0xf] %vm4669_vm8, %v5253_v31 }
 0x3eb   : > { %v5464_v58 = vrot.slane %v5462_v56, 5  ;;  %v5468_v9 = vrot.slane %v5466_v49, 4  ;;  %v5472_v32 = vshll.u32 %v5322_v51, 16 }
 0x3ec   : > { %v4889_v23 = vrot.slane %v4887_v22, 7  ;;  %v4615_v57 = vmul.f32 0.2, %v4583_v1 }
 0x3ed   : > { %v5465_v12 = vsel %vm9518_vm11, %v5460_v53, %v5464_v58  ;;  %v5469_v15 = vor.u32 %v5468_v9, %v5464_v58  ;;  %v5474_v29 = vrot.slane %v5472_v32, 5 }
 0x3ee   : > { %v4892_v42 = vor.u32 %v4890_v34, %v4889_v23  ;;  %v4894_v55 = vrot.slane %v4889_v23, 4  ;;  %v4647_v38 = vmax.f32 %v4583_v1, %v4615_v57  ;;  %5756 = vrot.lane.b32.xlu0 %v5465_v12, %s9412_s12  ;;  %v11373_v1 = vpop.f32.mrf.mxu3  ;;  %v4192_v34 = vpop.permute.xlu2 %4191 }
 0x3ef   : > { %v4480_v60 = vpop.f32.mrf.mxu1  ;;  %v5470_v13 = vrot.slane %v5469_v15, 4  ;;  %4258 = vst.msk [vmem:[#allocation4 + $0x78] sm:$0xf] %vm4227_vm15, %v4192_v34  ;;  %v5171_v15 = vld [vmem:[#allocation3 + $0x50] sm:$0x1] }
 0x3f0   : > { %v4893_v41 = vsel %vm9535_vm12, %v4885_v37, %v4892_v42  ;;  %v5165_v5 = vsel %vm11185_vm0, %v4894_v55, %v5164_v3  ;;  %v4788_v48 = vpack.c.bf16 %v4647_v38, %v4647_v38  ;;  %v4548_v24 = vmul.f32 %v11210_v14, %v4480_v60  ;;  %v5323_v10 = vld [vmem:[#allocation3 + $0x3c] sm:$0xf] }
 0x3f1   : > { %v5254_v18 = vld [vmem:[#allocation3 + $0x3c] sm:$0xf]  ;;  %5163 = vst.msk [vmem:[#allocation3 + $0x40] sm:$0xf] %vm4669_vm8, %v4893_v41  ;;  %v5475_v2 = vsel %vm9518_vm11, %v5470_v13, %v5474_v29  ;;  %v5477_v7 = vshrl.u32 %v5323_v10, 16  ;;  %v5480_v44 = vshll.u32 %v5323_v10, 16 }
 0x3f2   : > { %5166 = vst [vmem:[#allocation3 + $0x44] sm:$0x1] %v5165_v5  ;;  %v4896_v25 = vshrl.u32 %v4788_v48, 16  ;;  %v4584_v16 = vadd.f32 %v11215_v17, %v4548_v24  ;;  %5758 = vrot.lane.b32.xlu1 %v5475_v2, %s9412_s12  ;;  %v4899_v62 = vshll.u32 %v4788_v48, 16  ;;  %v4705_v5 = vld [vmem:[#allocation3 + $0x6c] sm:$0x1] }
 0x3f3   : > { %v5479_v0 = vrot.slane %v5477_v7, 4  ;;  %v5482_v50 = vrot.slane %v5480_v44, 5  ;;  %5286 = vst.msk [vmem:[#allocation5 + $0x28] sm:$0xf] %vm4669_vm8, %v5254_v18  ;;  %v6214_v61 = vld [vmem:[#allocation3 + $0x3c] sm:$0xf] }
 0x3f4   : > { %v4898_v26 = vrot.slane %v4896_v25, 7  ;;  %v4616_v52 = vmul.f32 0.2, %v4584_v16 }
 0x3f5   : > { %v5483_v35 = vor.u32 %v5482_v50, %v5479_v0 }
 0x3f6   : > { %v4901_v4 = vor.u32 %v4899_v62, %v4898_v26  ;;  %v4648_v21 = vmax.f32 %v4584_v16, %v4616_v52  ;;  %v4902_v55 = vrot.slane %v4898_v26, 4  ;;  %v4706_v16 = vsel %vm11185_vm0, 0, %v4705_v5  ;;  %v11392_v26 = vpop.f32.mrf.mxu3 }
 0x3f7   : > { %v4483_v36 = vpop.f32.mrf.mxu1  ;;  %v5484_v58 = vrot.slane %v5483_v35, 4  ;;  %4707 = vst [vmem:[#allocation3 + $0x6c] sm:$0x1] %v4706_v16 }
 0x3f8   : > { %v5168_v47 = vsel %vm11240_vm2, %v4901_v4, %v5167_v30  ;;  %v4789_v11 = vpack.c.bf16 %v4648_v21, %v4648_v21  ;;  %v4549_v8 = vmul.f32 %v11210_v14, %v4483_v36  ;;  %v5324_v54 = vld [vmem:[#allocation3 + $0x40] sm:$0xf]  ;;  %v5174_v36 = vld [vmem:[#allocation3 + $0x54] sm:$0xf] }
 0x3f9   : > { %5169 = vst [vmem:[#allocation3 + $0x48] sm:$0xf] %v5168_v47  ;;  %v5486_v31 = vshll.u32 %v5324_v54, 16  ;;  %v5490_v56 = vshrl.u32 %v5324_v54, 16  ;;  %v5325_v49 = vld [vmem:[#allocation3 + $0x44] sm:$0x1] }
 0x3fa   : > { %v4904_v51 = vshrl.u32 %v4789_v11, 16  ;;  %v4585_v22 = vadd.f32 %v11215_v17, %v4549_v8  ;;  %v5255_v53 = vld [vmem:[#allocation3 + $0x40] sm:$0xf]  ;;  %v5496_v23 = vshll.u32 %v5325_v49, 16  ;;  %v4907_v3 = vshll.u32 %v4789_v11, 16 }
 0x3fb   : > { %v5488_v9 = vrot.slane %v5486_v31, 5  ;;  %v5492_v32 = vrot.slane %v5490_v56, 4  ;;  %5287 = vst.msk [vmem:[#allocation5 + $0x2c] sm:$0xf] %vm4669_vm8, %v5255_v53  ;;  %v4754_v8 = vld [vmem:[#allocation3 + $0x74] sm:$0x1] }
 0x3fc   : > { %v4906_v57 = vrot.slane %v4904_v51, 7  ;;  %v4617_v12 = vmul.f32 0.2, %v4585_v22  ;;  %v5498_v41 = vrot.slane %v5496_v23, 5  ;;  %v4755_v49 = vsel %vm11194_vm5, 0, %v4754_v8 }
 0x3fd   : > { %v5489_v37 = vsel %vm9518_vm11, %v5484_v58, %v5488_v9  ;;  %v5493_v42 = vor.u32 %v5492_v32, %v5488_v9  ;;  %4756 = vst [vmem:[#allocation3 + $0x74] sm:$0x1] %v4755_v49 }
 0x3fe   : > { %v4909_v38 = vor.u32 %v4907_v3, %v4906_v57  ;;  %v4911_v60 = vrot.slane %v4906_v57, 4  ;;  %v4649_v13 = vmax.f32 %v4585_v22, %v4617_v12  ;;  %5760 = vrot.lane.b32.xlu2 %v5489_v37, %s9412_s12  ;;  %v4194_v12 = vpop.permute.xlu0 %4193 }
 0x3ff   : > { %v4485_v29 = vpop.f32.mrf.mxu1  ;;  %v5494_v63 = vrot.slane %v5493_v42, 4  ;;  %4259 = vst.msk [vmem:[#allocation4 + $0x7c] sm:$0xf] %vm4227_vm15, %v4194_v12  ;;  %vm8356_vm15 = vcmask 585216  }
 0x400   : > { %v4910_v48 = vsel %vm9535_vm12, %v4902_v55, %v4909_v38  ;;  %v5172_v24 = vsel %vm11185_vm0, %v4911_v60, %v5171_v15  ;;  %v4790_v10 = vpack.c.bf16 %v4649_v13, %v4649_v13  ;;  %v4550_v18 = vmul.f32 %v11210_v14, %v4485_v29  ;;  %v5326_v2 = vld [vmem:[#allocation3 + $0x48] sm:$0xf]  ;;  %v4513_v55 = vpop.f32.mrf.mxu3  ;;  %v5178_v38 = vld [vmem:[#allocation3 + $0x5c] sm:$0x1] }
 0x401   : > { %v5256_v7 = vld [vmem:[#allocation3 + $0x48] sm:$0xf]  ;;  %5170 = vst.msk [vmem:[#allocation3 + $0x4c] sm:$0xf] %vm4669_vm8, %v4910_v48  ;;  %v5499_v44 = vsel %vm9518_vm11, %v5494_v63, %v5498_v41  ;;  %v5501_v40 = vshrl.u32 %v5326_v2, 16  ;;  %v5504_v25 = vshll.u32 %v5326_v2, 16 }
 0x402   : > { %5173 = vst [vmem:[#allocation3 + $0x50] sm:$0x1] %v5172_v24  ;;  %v4913_v0 = vshrl.u32 %v4790_v10, 16  ;;  %v4586_v50 = vadd.f32 %v11215_v17, %v4550_v18  ;;  %5762 = vrot.lane.b32.xlu0 %v5499_v44, %s9412_s12  ;;  %v4916_v4 = vshll.u32 %v4790_v10, 16  ;;  %v4708_v18 = vld [vmem:[#allocation3 + $0x78] sm:$0x1] }
 0x403   : > { %v5503_v62 = vrot.slane %v5501_v40, 4  ;;  %v5506_v52 = vrot.slane %v5504_v25, 5  ;;  %5288 = vst.msk [vmem:[#allocation5 + $0x30] sm:$0xf] %vm4669_vm8, %v5256_v7 }
 0x404   : > { %v4915_v30 = vrot.slane %v4913_v0, 7  ;;  %v4618_v21 = vmul.f32 0.2, %v4586_v50 }
 0x405   : > { %v5507_v11 = vor.u32 %v5506_v52, %v5503_v62  ;;  %v4709_v62 = vsel %vm11185_vm0, 0, %v4708_v18 }
 0x406   : > { %v4918_v35 = vor.u32 %v4916_v4, %v4915_v30  ;;  %v4650_v19 = vmax.f32 %v4586_v50, %v4618_v21  ;;  %v4919_v29 = vrot.slane %v4915_v30, 4  ;;  %4710 = vst [vmem:[#allocation3 + $0x78] sm:$0x1] %v4709_v62  ;;  %v4757_v62 = vld [vmem:[#allocation3 + $0x80] sm:$0x1] }
 0x407   : > { %v4488_v47 = vpop.f32.mrf.mxu1  ;;  %v5508_v23 = vrot.slane %v5507_v11, 4 }
 0x408   : > { %v5175_v54 = vsel %vm11240_vm2, %v4918_v35, %v5174_v36  ;;  %v4791_v45 = vpack.c.bf16 %v4650_v19, %v4650_v19  ;;  %v4551_v31 = vmul.f32 %v11210_v14, %v4488_v47  ;;  %v5327_v56 = vld [vmem:[#allocation3 + $0x4c] sm:$0xf]  ;;  %v5245_v35 = vld [vmem:[#allocation3 + $0x4] sm:$0xf]  ;;  %v4561_v19 = vmul.f32 %v11210_v14, %v4513_v55 }
 0x409   : > { %5176 = vst [vmem:[#allocation3 + $0x54] sm:$0xf] %v5175_v54  ;;  %v5510_v51 = vshll.u32 %v5327_v56, 16  ;;  %v5514_v22 = vshrl.u32 %v5327_v56, 16  ;;  %v5328_v53 = vld [vmem:[#allocation3 + $0x50] sm:$0x1]  ;;  %v5743_v54 = vpop.permute.xlu2 %5742 }
 0x40a   : > { %v4921_v58 = vshrl.u32 %v4791_v45, 16  ;;  %v4587_v9 = vadd.f32 %v11215_v17, %v4551_v31  ;;  %v5257_v32 = vld [vmem:[#allocation3 + $0x4c] sm:$0xf]  ;;  %v5520_v3 = vshll.u32 %v5328_v53, 16  ;;  %v4924_v37 = vshll.u32 %v4791_v45, 16  ;;  %v4515_v45 = vpop.f32.mrf.mxu3 }
 0x40b   : > { %v5512_v34 = vrot.slane %v5510_v51, 5  ;;  %v5516_v57 = vrot.slane %v5514_v22, 4  ;;  %5289 = vst.msk [vmem:[#allocation5 + $0x34] sm:$0xf] %vm4669_vm8, %v5257_v32  ;;  %v5181_v31 = vld [vmem:[#allocation3 + $0x60] sm:$0xf]  ;;  %v4597_v49 = vadd.f32 %v11215_v17, %v4561_v19  ;;  %v4562_v32 = vmul.f32 %v11210_v14, %v4515_v45 }
 0x40c   : > { %v4923_v15 = vrot.slane %v4921_v58, 7  ;;  %v4619_v42 = vmul.f32 0.2, %v4587_v9  ;;  %v5522_v10 = vrot.slane %v5520_v3, 5  ;;  %5277 = vst.msk [vmem:[#allocation5 + $0x4] sm:$0xf] %vm4669_vm8, %v5245_v35 }
 0x40d   : > { %v5513_v60 = vsel %vm9518_vm11, %v5508_v23, %v5512_v34  ;;  %v5517_v13 = vor.u32 %v5516_v57, %v5512_v34  ;;  %5838 = vst.msk [vmem:[#allocation5 + $0x4] sm:$0xf] %vm5836_vm6, %v5743_v54 }
 0x40e   : > { %v4926_v63 = vor.u32 %v4924_v37, %v4923_v15  ;;  %v4928_v41 = vrot.slane %v4923_v15, 4  ;;  %v4651_v5 = vmax.f32 %v4587_v9, %v4619_v42  ;;  %5764 = vrot.lane.b32.xlu1 %v5513_v60, %s9412_s12  ;;  %v4629_v9 = vmul.f32 0.2, %v4597_v49 }
 0x40f   : > { %v4490_v48 = vpop.f32.mrf.mxu1  ;;  %v5518_v24 = vrot.slane %v5517_v13, 4 }
 0x410   : > { %v4927_v2 = vsel %vm9535_vm12, %v4919_v29, %v4926_v63  ;;  %v5179_v7 = vsel %vm11185_vm0, %v4928_v41, %v5178_v38  ;;  %v4792_v44 = vpack.c.bf16 %v4651_v5, %v4651_v5  ;;  %v4552_v40 = vmul.f32 %v11210_v14, %v4490_v48  ;;  %v5329_v25 = vld [vmem:[#allocation3 + $0x54] sm:$0xf]  ;;  %v5185_v63 = vld [vmem:[#allocation3 + $0x68] sm:$0x1]  ;;  %v4717_v48 = vld [vmem:[#allocation3 + $0x9c] sm:$0x1] }
 0x411   : > { %5177 = vst.msk [vmem:[#allocation3 + $0x58] sm:$0xf] %vm4669_vm8, %v4927_v2  ;;  %v5523_v16 = vsel %vm9518_vm11, %v5518_v24, %v5522_v10  ;;  %v5525_v0 = vshrl.u32 %v5329_v25, 16  ;;  %v5528_v50 = vshll.u32 %v5329_v25, 16  ;;  %v5258_v4 = vld [vmem:[#allocation3 + $0x54] sm:$0xf]  ;;  %v4661_v55 = vmax.f32 %v4597_v49, %v4629_v9 }
 0x412   : > { %5180 = vst [vmem:[#allocation3 + $0x5c] sm:$0x1] %v5179_v7  ;;  %v4930_v52 = vshrl.u32 %v4792_v44, 16  ;;  %v4588_v30 = vadd.f32 %v11215_v17, %v4552_v40  ;;  %5766 = vrot.lane.b32.xlu2 %v5523_v16, %s9412_s12  ;;  %v4933_v11 = vshll.u32 %v4792_v44, 16  ;;  %v5244_v10 = vld [vmem:[#allocation3] sm:$0xf]  ;;  %v4518_v40 = vpop.f32.mrf.mxu3 }
 0x413   : > { %v5527_v21 = vrot.slane %v5525_v0, 4  ;;  %v5530_v36 = vrot.slane %v5528_v50, 5  ;;  %5290 = vst.msk [vmem:[#allocation5 + $0x38] sm:$0xf] %vm4669_vm8, %v5258_v4  ;;  %v4802_v24 = vpack.c.bf16 %v4661_v55, %v4661_v55  ;;  %v4711_v9 = vld [vmem:[#allocation3 + $0x84] sm:$0x1] }
 0x414   : > { %v11419_v47 = vrot.slane %v4930_v52, 7  ;;  %v4620_v8 = vmul.f32 0.2, %v4588_v30  ;;  %5276 = vst.msk [vmem:[#allocation5] sm:$0xf] %vm4669_vm8, %v5244_v10 }
 0x415   : > { %v5531_v56 = vor.u32 %v5530_v36, %v5527_v21  ;;  %v5015_v0 = vshrl.u32 %v4802_v24, 16  ;;  %v5018_v50 = vshll.u32 %v4802_v24, 16  ;;  %v5741_v21 = vpop.permute.xlu1 %5740  ;;  %v4758_v36 = vsel %vm11194_vm5, 0, %v4757_v62 }
 0x416   : > { %v4935_v51 = vor.u32 %v4933_v11, %v11419_v47  ;;  %v4652_v22 = vmax.f32 %v4588_v30, %v4620_v8  ;;  %v4936_v53 = vrot.slane %v11419_v47, 4  ;;  %5837 = vst.msk [vmem:[#allocation5] sm:$0xf] %vm5836_vm6, %v5741_v21 }
 0x417   : > { %v4493_v58 = vpop.f32.mrf.mxu1  ;;  %v5532_v12 = vrot.slane %v5531_v56, 4  ;;  %v11446_v47 = vrot.slane %v5015_v0, 7  ;;  %4759 = vst [vmem:[#allocation3 + $0x80] sm:$0x1] %v4758_v36 }
 0x418   : > { %v5182_v23 = vsel %vm11240_vm2, %v4935_v51, %v5181_v31  ;;  %v4793_v34 = vpack.c.bf16 %v4652_v22, %v4652_v22  ;;  %v4553_v57 = vmul.f32 %v11210_v14, %v4493_v58  ;;  %v5330_v3 = vld [vmem:[#allocation3 + $0x58] sm:$0xf]  ;;  %v11435_v14 = vld [vmem:[%s12802_s5] ss:$0 sm:$0xff]  ;;  %v4766_v51 = vld [vmem:[#allocation3 + $0xa4] sm:$0x1] }
 0x419   : > { %5183 = vst [vmem:[#allocation3 + $0x60] sm:$0xf] %v5182_v23  ;;  %v5534_v15 = vshll.u32 %v5330_v3, 16  ;;  %v5538_v37 = vshrl.u32 %v5330_v3, 16  ;;  %v5331_v42 = vld [vmem:[#allocation3 + $0x5c] sm:$0x1]  ;;  %v4598_v18 = vadd.f32 %v11435_v14, %v4562_v32 }
 0x41a   : > { %v4938_v38 = vshrl.u32 %v4793_v34, 16  ;;  %v4941_v60 = vshll.u32 %v4793_v34, 16  ;;  %v4589_v13 = vadd.f32 %v11215_v17, %v4553_v57  ;;  %v5544_v29 = vshll.u32 %v5331_v42, 16  ;;  %v11456_v31 = vld [vmem:[%s12801_s4] ss:$0 sm:$0xff] }
 0x41b   : > { %v5536_v41 = vrot.slane %v5534_v15, 5  ;;  %v5540_v5 = vrot.slane %v5538_v37, 4  ;;  %v4718_v17 = vsel %vm11185_vm0, 0, %v4717_v48  ;;  %v4630_v11 = vmul.f32 0.2, %v4598_v18 }
 0x41c   : > { %v4940_v2 = vrot.slane %v4938_v38, 7  ;;  %v4621_v7 = vmul.f32 0.2, %v4589_v13  ;;  %v5546_v44 = vrot.slane %v5544_v29, 5  ;;  %4719 = vst [vmem:[#allocation3 + $0x9c] sm:$0x1] %v4718_v17 }
 0x41d   : > { %v5537_v25 = vsel %vm9518_vm11, %v5532_v12, %v5536_v41  ;;  %v5541_v16 = vor.u32 %v5540_v5, %v5536_v41  ;;  %v4662_v12 = vmax.f32 %v4598_v18, %v4630_v11  ;;  %v4767_v15 = vsel %vm11194_vm5, 0, %v4766_v51  ;;  %v5188_v29 = vld [vmem:[#allocation3 + $0x6c] sm:$0xf] }
 0x41e   : > { %v4943_v52 = vor.u32 %v4941_v60, %v4940_v2  ;;  %v4945_v30 = vrot.slane %v4940_v2, 4  ;;  %v4653_v4 = vmax.f32 %v4589_v13, %v4621_v7  ;;  %5768 = vrot.lane.b32.xlu0 %v5537_v25, %s9412_s12  ;;  %v4712_v37 = vsel %vm11185_vm0, 0, %v4711_v9  ;;  %v4520_v13 = vpop.f32.mrf.mxu3  ;;  %4768 = vst [vmem:[#allocation3 + $0xa4] sm:$0x1] %v4767_v15 }
 0x41f   : > { %v4495_v35 = vpop.f32.mrf.mxu1  ;;  %v5542_v19 = vrot.slane %v5541_v16, 4  ;;  %v4803_v41 = vpack.c.bf16 %v4662_v12, %v4662_v12  ;;  %v4563_v18 = vmul.f32 %v11456_v31, %v4518_v40  ;;  %v5021_v7 = vrot.slane %v11446_v47, 4  ;;  %4713 = vst [vmem:[#allocation3 + $0x84] sm:$0x1] %v4712_v37  ;;  %v5259_v40 = vld [vmem:[#allocation3 + $0x58] sm:$0xf] }
 0x420   : > { %v4944_v8 = vsel %vm9535_vm12, %v4936_v53, %v4943_v52  ;;  %v5186_v54 = vsel %vm11185_vm0, %v4945_v30, %v5185_v63  ;;  %v4794_v45 = vpack.c.bf16 %v4653_v4, %v4653_v4  ;;  %v4554_v56 = vmul.f32 %v11456_v31, %v4495_v35  ;;  %v5332_v49 = vld [vmem:[#allocation3 + $0x60] sm:$0xf]  ;;  %5291 = vst.msk [vmem:[#allocation5 + $0x3c] sm:$0xf] %vm4669_vm8, %v5259_v40  ;;  %v5195_v40 = vld [vmem:[#allocation3 + $0x78] sm:$0xf] }
 0x421   : > { %5184 = vst.msk [vmem:[#allocation3 + $0x64] sm:$0xf] %vm4669_vm8, %v4944_v8  ;;  %v5547_v22 = vsel %vm9518_vm11, %v5542_v19, %v5546_v44  ;;  %v5020_v53 = vor.u32 %v5018_v50, %v11446_v47  ;;  %v5549_v58 = vshrl.u32 %v5332_v49, 16  ;;  %v5552_v57 = vshll.u32 %v5332_v49, 16  ;;  %v5260_v5 = vld [vmem:[#allocation3 + $0x60] sm:$0xf] }
 0x422   : > { %5187 = vst [vmem:[#allocation3 + $0x68] sm:$0x1] %v5186_v54  ;;  %v4947_v32 = vshrl.u32 %v4794_v45, 16  ;;  %v4950_v23 = vshll.u32 %v4794_v45, 16  ;;  %v4590_v34 = vadd.f32 %v11435_v14, %v4554_v56  ;;  %5770 = vrot.lane.b32.xlu1 %v5547_v22, %s9412_s12  ;;  %v5023_v44 = vshrl.u32 %v4803_v41, 16 }
 0x423   : > { %v5551_v3 = vrot.slane %v5549_v58, 4  ;;  %v5216_v38 = vld [vmem:[#allocation3 + $0x9c] sm:$0xf]  ;;  %v5554_v60 = vrot.slane %v5552_v57, 5  ;;  %v5026_v17 = vshll.u32 %v4803_v41, 16  ;;  %v4564_v25 = vmul.f32 %v11456_v31, %v4520_v13 }
 0x424   : > { %v11469_v42 = vrot.slane %v4947_v32, 7  ;;  %v4622_v55 = vmul.f32 0.2, %v4590_v34  ;;  %v5217_v63 = vsel %vm11240_vm2, %v5020_v53, %v5216_v38  ;;  %5292 = vst.msk [vmem:[#allocation5 + $0x40] sm:$0xf] %vm4669_vm8, %v5260_v5  ;;  %v5025_v35 = vrot.slane %v5023_v44, 7 }
 0x425   : > { %5218 = vst [vmem:[#allocation3 + $0x9c] sm:$0xf] %v5217_v63  ;;  %v5555_v10 = vor.u32 %v5554_v60, %v5551_v3  ;;  %v4599_v54 = vadd.f32 %v11435_v14, %v4563_v18  ;;  %v4720_v22 = vld [vmem:[#allocation3 + $0xa8] sm:$0x1]  ;;  %v5220_v9 = vld [vmem:[#allocation3 + $0xa4] sm:$0x1]  ;;  %v4600_v41 = vadd.f32 %v11435_v14, %v4564_v25 }
 0x426   : > { %v4952_v48 = vor.u32 %v4950_v23, %v11469_v42  ;;  %v4654_v24 = vmax.f32 %v4590_v34, %v4622_v55  ;;  %v4953_v16 = vrot.slane %v11469_v42, 4  ;;  %v5028_v56 = vor.u32 %v5026_v17, %v5025_v35  ;;  %v5192_v23 = vld [vmem:[#allocation3 + $0x74] sm:$0x1]  ;;  %v4760_v38 = vld [vmem:[#allocation3 + $0x8c] sm:$0x1]  ;;  %v4523_v5 = vpop.f32.mrf.mxu3 }
 0x427   : > { %v4498_v2 = vpop.f32.mrf.mxu1  ;;  %v5556_v4 = vrot.slane %v5555_v10, 4  ;;  %v5030_v49 = vrot.slane %v5025_v35, 4  ;;  %v4721_v63 = vsel %vm11185_vm0, 0, %v4720_v22  ;;  %v4632_v35 = vmul.f32 0.2, %v4600_v41 }
 0x428   : > { %v5189_v0 = vsel %vm11240_vm2, %v4952_v48, %v5188_v29  ;;  %v4795_v50 = vpack.c.bf16 %v4654_v24, %v4654_v24  ;;  %v4555_v62 = vmul.f32 %v11456_v31, %v4498_v2  ;;  %v5749_v52 = vpop.permute.xlu2 %5748  ;;  %v5333_v30 = vld [vmem:[#allocation3 + $0x64] sm:$0xf]  ;;  %v5029_v57 = vsel %vm9535_vm12, %v5021_v7, %v5028_v56  ;;  %4722 = vst [vmem:[#allocation3 + $0xa8] sm:$0x1] %v4721_v63  ;;  %v4714_v22 = vld [vmem:[#allocation3 + $0x90] sm:$0x1] }
 0x429   : > { %5190 = vst [vmem:[#allocation3 + $0x6c] sm:$0xf] %v5189_v0  ;;  %v5558_v21 = vshll.u32 %v5333_v30, 16  ;;  %v5562_v36 = vshrl.u32 %v5333_v30, 16  ;;  %v5334_v8 = vld [vmem:[#allocation3 + $0x68] sm:$0x1]  ;;  %v5221_v3 = vsel %vm11185_vm0, %v5030_v49, %v5220_v9 }
 0x42a   : > { %v4955_v19 = vshrl.u32 %v4795_v50, 16  ;;  %v4958_v47 = vshll.u32 %v4795_v50, 16  ;;  %v4591_v11 = vadd.f32 %v11435_v14, %v4555_v62  ;;  %5841 = vst.msk [vmem:[#allocation5 + $0x10] sm:$0xf] %vm5836_vm6, %v5749_v52  ;;  %v5568_v32 = vshll.u32 %v5334_v8, 16 }
 0x42b   : > { %v5560_v45 = vrot.slane %v5558_v21, 5  ;;  %v5564_v51 = vrot.slane %v5562_v36, 4  ;;  %5219 = vst.msk [vmem:[#allocation3 + $0xa0] sm:$0xf] %vm4669_vm8, %v5029_v57  ;;  %v4631_v29 = vmul.f32 0.2, %v4599_v54 }
 0x42c   : > { %v4957_v53 = vrot.slane %v4955_v19, 7  ;;  %v4623_v58 = vmul.f32 0.2, %v4591_v11  ;;  %v5570_v55 = vrot.slane %v5568_v32, 5  ;;  %5222 = vst [vmem:[#allocation3 + $0xa4] sm:$0x1] %v5221_v3 }
 0x42d   : > { %v5561_v34 = vsel %vm9518_vm11, %v5556_v4, %v5560_v45  ;;  %v5565_v12 = vor.u32 %v5564_v51, %v5560_v45  ;;  %v4663_v17 = vmax.f32 %v4599_v54, %v4631_v29  ;;  %v4769_v50 = vld [vmem:[#allocation3 + $0xb0] sm:$0x1]  ;;  %v4761_v30 = vsel %vm11194_vm5, 0, %v4760_v38 }
 0x42e   : > { %v4960_v15 = vor.u32 %v4958_v47, %v4957_v53  ;;  %v4962_v37 = vrot.slane %v4957_v53, 4  ;;  %v4655_v42 = vmax.f32 %v4591_v11, %v4623_v58  ;;  %5772 = vrot.lane.b32.xlu2 %v5561_v34, %s9412_s12  ;;  %4762 = vst [vmem:[#allocation3 + $0x8c] sm:$0x1] %v4761_v30  ;;  %v4770_v8 = vsel %vm11194_vm5, 0, %v4769_v50  ;;  %v4525_v63 = vpop.f32.mrf.mxu3 }
 0x42f   : > { %v4500_v60 = vpop.f32.mrf.mxu1  ;;  %v5566_v13 = vrot.slane %v5565_v12, 4  ;;  %v4804_v4 = vpack.c.bf16 %v4663_v17, %v4663_v17  ;;  %v4565_v54 = vmul.f32 %v11456_v31, %v4523_v5  ;;  %v4664_v51 = vmax.f32 %v4600_v41, %v4632_v35  ;;  %4771 = vst [vmem:[#allocation3 + $0xb0] sm:$0x1] %v4770_v8 }
 0x430   : > { %v4961_v48 = vsel %vm9535_vm12, %v4953_v16, %v4960_v15  ;;  %v5193_v24 = vsel %vm11185_vm0, %v4962_v37, %v5192_v23  ;;  %v4796_v10 = vpack.c.bf16 %v4655_v42, %v4655_v42  ;;  %v4556_v18 = vmul.f32 %v11456_v31, %v4500_v60  ;;  %v5745_v2 = vpop.permute.xlu0 %5744  ;;  %v5335_v7 = vld [vmem:[#allocation3 + $0x6c] sm:$0xf]  ;;  %v5223_v37 = vld [vmem:[#allocation3 + $0xa8] sm:$0xf] }
 0x431   : > { %5191 = vst.msk [vmem:[#allocation3 + $0x70] sm:$0xf] %vm4669_vm8, %v4961_v48  ;;  %v5571_v44 = vsel %vm9518_vm11, %v5566_v13, %v5570_v55  ;;  %v5573_v25 = vshrl.u32 %v5335_v7, 16  ;;  %v5576_v0 = vshll.u32 %v5335_v7, 16  ;;  %v5032_v45 = vshrl.u32 %v4804_v4, 16 }
 0x432   : > { %5194 = vst [vmem:[#allocation3 + $0x74] sm:$0x1] %v5193_v24  ;;  %v4964_v16 = vshrl.u32 %v4796_v10, 16  ;;  %v4967_v62 = vshll.u32 %v4796_v10, 16  ;;  %v4592_v52 = vadd.f32 %v11435_v14, %v4556_v18  ;;  %5774 = vrot.lane.b32.xlu0 %v5571_v44, %s9412_s12  ;;  %v5035_v56 = vshll.u32 %v4804_v4, 16 }
 0x433   : > { %5839 = vst.msk [vmem:[#allocation5 + $0x8] sm:$0xf] %vm5836_vm6, %v5745_v2  ;;  %v5575_v21 = vrot.slane %v5573_v25, 4  ;;  %v5578_v36 = vrot.slane %v5576_v0, 5  ;;  %v4715_v9 = vsel %vm11185_vm0, 0, %v4714_v22  ;;  %v5034_v34 = vrot.slane %v5032_v45, 7 }
 0x434   : > { %v11510_v19 = vrot.slane %v4964_v16, 7  ;;  %v4624_v47 = vmul.f32 0.2, %v4592_v52  ;;  %v5747_v11 = vpop.permute.xlu1 %5746  ;;  %v4805_v57 = vpack.c.bf16 %v4664_v51, %v4664_v51  ;;  %4716 = vst [vmem:[#allocation3 + $0x90] sm:$0x1] %v4715_v9  ;;  %v4601_v29 = vadd.f32 %v11435_v14, %v4565_v54 }
 0x435   : > { %5840 = vst.msk [vmem:[#allocation5 + $0xc] sm:$0xf] %vm5836_vm6, %v5747_v11  ;;  %v5579_v49 = vor.u32 %v5578_v36, %v5575_v21  ;;  %v5037_v38 = vor.u32 %v5035_v56, %v5034_v34  ;;  %v4566_v16 = vmul.f32 %v11456_v31, %v4525_v63  ;;  %v8087_v27 = vld [vmem:[#allocation3 + $0xa4] sm:$0x1] }
 0x436   : > { %v4969_v53 = vor.u32 %v4967_v62, %v11510_v19  ;;  %v4656_v58 = vmax.f32 %v4592_v52, %v4624_v47  ;;  %v4970_v32 = vrot.slane %v11510_v19, 4  ;;  %v5040_v24 = vshrl.u32 %v4805_v57, 16  ;;  %v5199_v62 = vld [vmem:[#allocation3 + $0x80] sm:$0x1]  ;;  %v5227_v47 = vld [vmem:[#allocation3 + $0xb0] sm:$0x1] }
 0x437   : > { %v4503_v23 = vpop.f32.mrf.mxu1  ;;  %v5580_v55 = vrot.slane %v5579_v49, 4  ;;  %v5224_v18 = vsel %vm11240_vm2, %v5037_v38, %v5223_v37  ;;  %v5043_v7 = vshll.u32 %v4805_v57, 16  ;;  %v5038_v52 = vrot.slane %v5034_v34, 4  ;;  %v5202_v38 = vld [vmem:[#allocation3 + $0x84] sm:$0xf] }
 0x438   : > { %v5196_v3 = vsel %vm11240_vm2, %v4969_v53, %v5195_v40  ;;  %v4797_v12 = vpack.c.bf16 %v4656_v58, %v4656_v58  ;;  %v4557_v15 = vmul.f32 %v11456_v31, %v4503_v23  ;;  %v5336_v42 = vld [vmem:[#allocation3 + $0x70] sm:$0xf]  ;;  %5225 = vst [vmem:[#allocation3 + $0xa8] sm:$0xf] %v5224_v18  ;;  %v5042_v50 = vrot.slane %v5040_v24, 7 }
 0x439   : > { %5197 = vst [vmem:[#allocation3 + $0x78] sm:$0xf] %v5196_v3  ;;  %v5582_v60 = vshll.u32 %v5336_v42, 16  ;;  %v5586_v13 = vshrl.u32 %v5336_v42, 16  ;;  %v5337_v10 = vld [vmem:[#allocation3 + $0x74] sm:$0x1]  ;;  %v4602_v42 = vadd.f32 %v11435_v14, %v4566_v16 }
 0x43a   : > { %v4972_v41 = vshrl.u32 %v4797_v12, 16  ;;  %v4975_v5 = vshll.u32 %v4797_v12, 16  ;;  %v4593_v48 = vadd.f32 %v11435_v14, %v4557_v15  ;;  %v5592_v4 = vshll.u32 %v5337_v10, 16  ;;  %v4723_v58 = vld [vmem:[#allocation3 + $0xb4] sm:$0x1] }
 0x43b   : > { %v5584_v2 = vrot.slane %v5582_v60, 5  ;;  %v5588_v44 = vrot.slane %v5586_v13, 4  ;;  %v5045_v19 = vor.u32 %v5043_v7, %v5042_v50  ;;  %v5047_v8 = vrot.slane %v5042_v50, 4  ;;  %v4763_v3 = vld [vmem:[#allocation3 + $0x98] sm:$0x1] }
 0x43c   : > { %v4974_v17 = vrot.slane %v4972_v41, 7  ;;  %v4625_v25 = vmul.f32 0.2, %v4593_v48  ;;  %v5755_v0 = vpop.permute.xlu2 %5754  ;;  %v5594_v45 = vrot.slane %v5592_v4, 5  ;;  %v4633_v56 = vmul.f32 0.2, %v4601_v29 }
 0x43d   : > { %5844 = vst.msk [vmem:[#allocation5 + $0x1c] sm:$0xf] %vm5836_vm6, %v5755_v0  ;;  %v5585_v30 = vsel %vm9518_vm11, %v5580_v55, %v5584_v2  ;;  %v5589_v40 = vor.u32 %v5588_v44, %v5584_v2  ;;  %v5046_v23 = vsel %vm9535_vm12, %v5038_v52, %v5045_v19  ;;  %v5228_v34 = vsel %vm11185_vm0, %v5047_v8, %v5227_v47  ;;  %v4772_v55 = vld [vmem:[#allocation3 + $0xbc] sm:$0x1] }
 0x43e   : > { %v4977_v21 = vor.u32 %v4975_v5, %v4974_v17  ;;  %v4979_v36 = vrot.slane %v4974_v17, 4  ;;  %v4657_v35 = vmax.f32 %v4593_v48, %v4625_v25  ;;  %5776 = vrot.lane.b32.xlu1 %v5585_v30, %s9412_s12  ;;  %5226 = vst.msk [vmem:[#allocation3 + $0xac] sm:$0xf] %vm4669_vm8, %v5046_v23  ;;  %v4724_v60 = vsel %vm11185_vm0, 0, %v4723_v58 }
 0x43f   : > { %v4505_v11 = vpop.f32.mrf.mxu1  ;;  %v5590_v54 = vrot.slane %v5589_v40, 4  ;;  %5229 = vst [vmem:[#allocation3 + $0xb0] sm:$0x1] %v5228_v34  ;;  %v4764_v24 = vsel %vm11194_vm5, 0, %v4763_v3  ;;  %v4773_v7 = vsel %vm11194_vm5, 0, %v4772_v55 }
 0x440   : > { %v4978_v49 = vsel %vm9535_vm12, %v4970_v32, %v4977_v21  ;;  %v5200_v51 = vsel %vm11185_vm0, %v4979_v36, %v5199_v62  ;;  %v4798_v22 = vpack.c.bf16 %v4657_v35, %v4657_v35  ;;  %v4558_v53 = vmul.f32 %v11456_v31, %v4505_v11  ;;  %v5338_v9 = vld [vmem:[#allocation3 + $0x78] sm:$0xf]  ;;  %4725 = vst [vmem:[#allocation3 + $0xb4] sm:$0x1] %v4724_v60 }
 0x441   : > { %5198 = vst.msk [vmem:[#allocation3 + $0x7c] sm:$0xf] %vm4669_vm8, %v4978_v49  ;;  %v5595_v57 = vsel %vm9518_vm11, %v5590_v54, %v5594_v45  ;;  %v4665_v32 = vmax.f32 %v4601_v29, %v4633_v56  ;;  %v5597_v63 = vshrl.u32 %v5338_v9, 16  ;;  %v5600_v29 = vshll.u32 %v5338_v9, 16  ;;  %v5206_v54 = vld [vmem:[#allocation3 + $0x8c] sm:$0x1] }
 0x442   : > { %5201 = vst [vmem:[#allocation3 + $0x80] sm:$0x1] %v5200_v51  ;;  %v4981_v12 = vshrl.u32 %v4798_v22, 16  ;;  %v4984_v15 = vshll.u32 %v4798_v22, 16  ;;  %v4594_v37 = vadd.f32 %v11435_v14, %v4558_v53  ;;  %5778 = vrot.lane.b32.xlu2 %v5595_v57, %s9412_s12  ;;  %v4634_v0 = vmul.f32 0.2, %v4602_v42 }
 0x443   : > { %v4806_v13 = vpack.c.bf16 %v4665_v32, %v4665_v32  ;;  %v5599_v18 = vrot.slane %v5597_v63, 4  ;;  %v5602_v2 = vrot.slane %v5600_v29, 5  ;;  %4765 = vst [vmem:[#allocation3 + $0x98] sm:$0x1] %v4764_v24  ;;  %v5263_v22 = vld [vmem:[#allocation3 + $0x70] sm:$0xf] }
 0x444   : > { %v4983_v41 = vrot.slane %v4981_v12, 7  ;;  %v4626_v5 = vmul.f32 0.2, %v4594_v37  ;;  %v5751_v48 = vpop.permute.xlu0 %5750  ;;  %v4666_v21 = vmax.f32 %v4602_v42, %v4634_v0  ;;  %4774 = vst [vmem:[#allocation3 + $0xbc] sm:$0x1] %v4773_v7 }
 0x445   : > { %5842 = vst.msk [vmem:[#allocation5 + $0x14] sm:$0xf] %vm5836_vm6, %v5751_v48  ;;  %v5049_v10 = vshrl.u32 %v4806_v13, 16  ;;  %v5052_v25 = vshll.u32 %v4806_v13, 16  ;;  %v5603_v62 = vor.u32 %v5602_v2, %v5599_v18 }
 0x446   : > { %v4986_v44 = vor.u32 %v4984_v15, %v4983_v41  ;;  %v4658_v17 = vmax.f32 %v4594_v37, %v4626_v5  ;;  %v4807_v49 = vpack.c.bf16 %v4666_v21, %v4666_v21  ;;  %v4987_v34 = vrot.slane %v4983_v41, 4  ;;  %5295 = vst.msk [vmem:[#allocation5 + $0x4c] sm:$0xf] %vm4669_vm8, %v5263_v22 }
 0x447   : > { %v4508_v50 = vpop.f32.mrf.mxu1  ;;  %v11555_v16 = vrot.slane %v5049_v10, 7  ;;  %v5604_v45 = vrot.slane %v5603_v62, 4  ;;  %v5230_v57 = vld [vmem:[#allocation3 + $0xb4] sm:$0xf] }
 0x448   : > { %v5203_v52 = vsel %vm11240_vm2, %v4986_v44, %v5202_v38  ;;  %v4799_v30 = vpack.c.bf16 %v4658_v17, %v4658_v17  ;;  %v4559_v40 = vmul.f32 %v11456_v31, %v4508_v50  ;;  %v5339_v4 = vld [vmem:[#allocation3 + $0x7c] sm:$0xf]  ;;  %v5057_v3 = vshrl.u32 %v4807_v49, 16 }
 0x449   : > { %5204 = vst [vmem:[#allocation3 + $0x84] sm:$0xf] %v5203_v52  ;;  %v5606_v36 = vshll.u32 %v5339_v4, 16  ;;  %v5054_v47 = vor.u32 %v5052_v25, %v11555_v16  ;;  %v5610_v11 = vshrl.u32 %v5339_v4, 16  ;;  %v5340_v8 = vld [vmem:[#allocation3 + $0x80] sm:$0x1] }
 0x44a   : > { %v4989_v35 = vshrl.u32 %v4799_v30, 16  ;;  %v4595_v19 = vadd.f32 %v11435_v14, %v4559_v40  ;;  %v5616_v51 = vshll.u32 %v5340_v8, 16  ;;  %v4992_v58 = vshll.u32 %v4799_v30, 16  ;;  %v6225_v6 = vld [vmem:[#allocation3 + $0x7c] sm:$0xf] }
 0x44b   : > { %v5608_v56 = vrot.slane %v5606_v36, 5  ;;  %v5612_v23 = vrot.slane %v5610_v11, 4  ;;  %v5060_v12 = vshll.u32 %v4807_v49, 16  ;;  %v5231_v55 = vsel %vm11240_vm2, %v5054_v47, %v5230_v57  ;;  %v5234_v18 = vld [vmem:[#allocation3 + $0xbc] sm:$0x1] }
 0x44c   : > { %v4991_v53 = vrot.slane %v4989_v35, 7  ;;  %v4627_v9 = vmul.f32 0.2, %v4595_v19  ;;  %v5055_v38 = vrot.slane %v11555_v16, 4  ;;  %5232 = vst [vmem:[#allocation3 + $0xb4] sm:$0xf] %v5231_v55 }
 0x44d   : > { %v5609_v32 = vsel %vm9518_vm11, %v5604_v45, %v5608_v56  ;;  %v5059_v13 = vrot.slane %v5057_v3, 7  ;;  %v5613_v63 = vor.u32 %v5612_v23, %v5608_v56  ;;  %v5618_v29 = vrot.slane %v5616_v51, 5  ;;  %v5209_v36 = vld [vmem:[#allocation3 + $0x90] sm:$0xf]  ;;  %v5347_v35 = vld [vmem:[#allocation3 + $0x9c] sm:$0xf] }
 0x44e   : > { %v4994_v15 = vor.u32 %v4992_v58, %v4991_v53  ;;  %v4996_v37 = vrot.slane %v4991_v53, 4  ;;  %v4659_v42 = vmax.f32 %v4595_v19, %v4627_v9  ;;  %5780 = vrot.lane.b32.xlu0 %v5609_v32, %s9412_s12  ;;  %v5669_v49 = vshrl.u32 %v5347_v35, 16  ;;  %v5351_v23 = vld [vmem:[#allocation3 + $0xac] sm:$0xf]  ;;  %v5213_v55 = vld [vmem:[#allocation3 + $0x98] sm:$0x1] }
 0x44f   : > { %v4510_v60 = vpop.f32.mrf.mxu1  ;;  %v5062_v7 = vor.u32 %v5060_v12, %v5059_v13  ;;  %v5064_v44 = vrot.slane %v5059_v13, 4  ;;  %v5614_v17 = vrot.slane %v5613_v63, 4  ;;  %v5672_v51 = vshll.u32 %v5347_v35, 16  ;;  %v9339_v12 = vld [vmem:[#allocation4 + $0x78] sm:$0xff]  ;;  %v5350_v35 = vld [vmem:[#allocation3 + $0xa8] sm:$0xf] }
 0x450   : > { %v4995_v41 = vsel %vm9535_vm12, %v4987_v34, %v4994_v15  ;;  %v5207_v5 = vsel %vm11185_vm0, %v4996_v37, %v5206_v54  ;;  %v4800_v48 = vpack.c.bf16 %v4659_v42, %v4659_v42  ;;  %v4560_v24 = vmul.f32 %v11456_v31, %v4510_v60  ;;  %v5753_v10 = vpop.permute.xlu1 %5752  ;;  %v5341_v2 = vld [vmem:[#allocation3 + $0x84] sm:$0xf]  ;;  %9159 = vmatmul.msk.bf16.gmra.mxu3 %vm4392_vm3, %v9339_v12 }
 0x451   : > { %5205 = vst.msk [vmem:[#allocation3 + $0x88] sm:$0xf] %vm4669_vm8, %v4995_v41  ;;  %v5621_v25 = vshrl.u32 %v5341_v2, 16  ;;  %v5624_v62 = vshll.u32 %v5341_v2, 16  ;;  %v5063_v31 = vsel %vm9535_vm12, %v5055_v38, %v5062_v7  ;;  %v5235_v52 = vsel %vm11185_vm0, %v5064_v44, %v5234_v18  ;;  %v5348_v18 = vld [vmem:[#allocation3 + $0xa0] sm:$0xf] }
 0x452   : > { %5208 = vst [vmem:[#allocation3 + $0x8c] sm:$0x1] %v5207_v5  ;;  %v4998_v0 = vshrl.u32 %v4800_v48, 16  ;;  %v5001_v50 = vshll.u32 %v4800_v48, 16  ;;  %v4596_v16 = vadd.f32 %v11435_v14, %v4560_v24  ;;  %v5619_v30 = vsel %vm9518_vm11, %v5614_v17, %v5618_v29 }
 0x453   : > { %5843 = vst.msk [vmem:[#allocation5 + $0x18] sm:$0xf] %vm5836_vm6, %v5753_v10  ;;  %v5623_v40 = vrot.slane %v5621_v25, 4  ;;  %5782 = vrot.lane.b32.xlu1 %v5619_v30, %s9412_s12  ;;  %v5626_v14 = vrot.slane %v5624_v62, 5  ;;  %v5671_v42 = vrot.slane %v5669_v49, 4  ;;  %v5674_v13 = vrot.slane %v5672_v51, 5 }
 0x454   : > { %v5000_v4 = vrot.slane %v4998_v0, 7  ;;  %v4628_v21 = vmul.f32 0.2, %v4596_v16  ;;  %5233 = vst.msk [vmem:[#allocation3 + $0xb8] sm:$0xf] %vm4669_vm8, %v5063_v31  ;;  %v5702_v63 = vshll.u32 %v5351_v23, 16 }
 0x455   : > { %5236 = vst [vmem:[#allocation3 + $0xbc] sm:$0x1] %v5235_v52  ;;  %v5627_v11 = vor.u32 %v5626_v14, %v5623_v40  ;;  %v5706_v48 = vshrl.u32 %v5351_v23, 16  ;;  %v5675_v0 = vor.u32 %v5674_v13, %v5671_v42  ;;  %v5678_v62 = vshll.u32 %v5348_v18, 16  ;;  %v5353_v51 = vld [vmem:[#allocation3 + $0xb4] sm:$0xf] }
 0x456   : > { %v5003_v19 = vor.u32 %v5001_v50, %v5000_v4  ;;  %v4660_v47 = vmax.f32 %v4596_v16, %v4628_v21  ;;  %v5004_v29 = vrot.slane %v5000_v4, 4  ;;  %v11600_v31 = vrot.slane %v5702_v63, 5  ;;  %v5352_v4 = vld [vmem:[#allocation3 + $0xb0] sm:$0x1] }
 0x457   : > { %v5628_v34 = vrot.slane %v5627_v11, 4  ;;  %v5708_v52 = vrot.slane %v5706_v48, 4  ;;  %v5682_v14 = vshrl.u32 %v5348_v18, 16  ;;  %v5680_v11 = vrot.slane %v5678_v62, 5  ;;  %v5869_v18 = vld [vmem:[#allocation3] sm:$0xe] }
 0x458   : > { %v5210_v8 = vsel %vm11240_vm2, %v5003_v19, %v5209_v36  ;;  %v4801_v54 = vpack.c.bf16 %v4660_v47, %v4660_v47  ;;  %v5761_v45 = vpop.permute.xlu2 %5760  ;;  %v5342_v56 = vld [vmem:[#allocation3 + $0x88] sm:$0xf]  ;;  %v5676_v36 = vrot.slane %v5675_v0, 4  ;;  %v5712_v47 = vshll.u32 %v5352_v4, 16 }
 0x459   : > { %5211 = vst [vmem:[#allocation3 + $0x90] sm:$0xf] %v5210_v8  ;;  %v5630_v22 = vshll.u32 %v5342_v56, 16  ;;  %v5634_v53 = vshrl.u32 %v5342_v56, 16  ;;  %v5343_v58 = vld [vmem:[#allocation3 + $0x8c] sm:$0x1]  ;;  %v5709_v19 = vor.u32 %v5708_v52, %v11600_v31 }
 0x45a   : > { %v5006_v9 = vshrl.u32 %v4801_v54, 16  ;;  %5847 = vst.msk [vmem:[#allocation5 + $0x28] sm:$0xf] %vm5836_vm6, %v5761_v45  ;;  %v5640_v3 = vshll.u32 %v5343_v58, 16  ;;  %v5009_v37 = vshll.u32 %v4801_v54, 16  ;;  %v5684_v56 = vrot.slane %v5682_v14, 4 }
 0x45b   : > { %v5632_v57 = vrot.slane %v5630_v22, 5  ;;  %v5636_v32 = vrot.slane %v5634_v53, 4  ;;  %v5349_v54 = vld [vmem:[#allocation3 + $0xa4] sm:$0x1]  ;;  %v5693_v49 = vshrl.u32 %v5350_v35, 16  ;;  %v5681_v22 = vsel %vm9518_vm11, %v5676_v36, %v5680_v11 }
 0x45c   : > { %v5008_v15 = vrot.slane %v5006_v9, 7  ;;  %v5642_v10 = vrot.slane %v5640_v3, 5  ;;  %v5696_v23 = vshll.u32 %v5350_v35, 16  ;;  %v5685_v42 = vor.u32 %v5684_v56, %v5680_v11  ;;  %v5261_v11 = vld [vmem:[#allocation3 + $0x64] sm:$0xf] }
 0x45d   : > { %v5633_v38 = vsel %vm9518_vm11, %v5628_v34, %v5632_v57  ;;  %v5637_v60 = vor.u32 %v5636_v32, %v5632_v57  ;;  %v5710_v34 = vrot.slane %v5709_v19, 4  ;;  %v5714_v57 = vrot.slane %v5712_v47, 5  ;;  %v5355_v47 = vld [vmem:[#allocation3 + $0xbc] sm:$0x1]  ;;  %5293 = vst.msk [vmem:[#allocation5 + $0x44] sm:$0xf] %vm4669_vm8, %v5261_v11 }
 0x45e   : > { %v5011_v41 = vor.u32 %v5009_v37, %v5008_v15  ;;  %v5013_v5 = vrot.slane %v5008_v15, 4  ;;  %5784 = vrot.lane.b32.xlu2 %v5633_v38, %s9412_s12  ;;  %v5695_v38 = vrot.slane %v5693_v49, 4  ;;  %v9160_v52 = vrot.slane %v5869_v18, 9  ;;  %v5887_v11 = vld [vmem:[#allocation3 + $0x48] sm:$0xe] }
 0x45f   : > { %v5638_v24 = vrot.slane %v5637_v60, 4  ;;  %v5717_v60 = vshrl.u32 %v5353_v51, 16  ;;  %v5715_v48 = vsel %vm9518_vm11, %v5710_v34, %v5714_v57  ;;  %v5262_v57 = vld [vmem:[#allocation3 + $0x6c] sm:$0xf]  ;;  %vm8537_vm3 = vcmask 588800  }
 0x460   : > { %v5012_v2 = vsel %vm9535_vm12, %v5004_v29, %v5011_v41  ;;  %v5214_v7 = vsel %vm11185_vm0, %v5013_v5, %v5213_v55  ;;  %v5757_v44 = vpop.permute.xlu0 %5756  ;;  %v5344_v17 = vld [vmem:[#allocation3 + $0x90] sm:$0xf]  ;;  %v5688_v55 = vshll.u32 %v5349_v54, 16  ;;  %v5698_v29 = vrot.slane %v5696_v23, 5  ;;  %v5354_v41 = vld [vmem:[#allocation3 + $0xb8] sm:$0xf] }
 0x461   : > { %5212 = vst.msk [vmem:[#allocation3 + $0x94] sm:$0xf] %vm4669_vm8, %v5012_v2  ;;  %v5643_v25 = vsel %vm9518_vm11, %v5638_v24, %v5642_v10  ;;  %v5645_v50 = vshrl.u32 %v5344_v17, 16  ;;  %v5648_v16 = vshll.u32 %v5344_v17, 16  ;;  %v5720_v5 = vshll.u32 %v5353_v51, 16 }
 0x462   : > { %5215 = vst [vmem:[#allocation3 + $0x98] sm:$0x1] %v5214_v7  ;;  %5786 = vrot.lane.b32.xlu0 %v5643_v25, %s9412_s12  ;;  %v5686_v2 = vrot.slane %v5685_v42, 4  ;;  %v5690_v7 = vrot.slane %v5688_v55, 5  ;;  %v5719_v17 = vrot.slane %v5717_v60, 4  ;;  %v5726_v25 = vshll.u32 %v5354_v41, 16 }
 0x463   : > { %5845 = vst.msk [vmem:[#allocation5 + $0x20] sm:$0xf] %vm5836_vm6, %v5757_v44  ;;  %v5647_v30 = vrot.slane %v5645_v50, 4  ;;  %v5650_v40 = vrot.slane %v5648_v16, 5  ;;  %v5870_v44 = vld [vmem:[#allocation3 + $0x4] sm:$0xf]  ;;  %v5699_v50 = vor.u32 %v5698_v29, %v5695_v38 }
 0x464   : > { %v5759_v21 = vpop.permute.xlu1 %5758  ;;  %v5722_v16 = vrot.slane %v5720_v5, 5  ;;  %v5730_v62 = vshrl.u32 %v5354_v41, 16  ;;  %v5691_v4 = vsel %vm9518_vm11, %v5686_v2, %v5690_v7  ;;  %v5728_v35 = vrot.slane %v5726_v25, 5  ;;  %5294 = vst.msk [vmem:[#allocation5 + $0x48] sm:$0xf] %vm4669_vm8, %v5262_v57 }
 0x465   : > { %5846 = vst.msk [vmem:[#allocation5 + $0x24] sm:$0xf] %vm5836_vm6, %v5759_v21  ;;  %v5651_v8 = vor.u32 %v5650_v40, %v5647_v30  ;;  %v5967_v30 = vrot.slane %v5870_v44, 5  ;;  %v5873_v21 = vld [vmem:[#allocation3 + $0x10] sm:$0xf]  ;;  %v5700_v14 = vrot.slane %v5699_v50, 4 }
 0x466   : > { %v5723_v36 = vor.u32 %v5722_v16, %v5719_v17  ;;  %v5732_v19 = vrot.slane %v5730_v62, 4  ;;  %v5974_v54 = vrot.slane %v5873_v21, 5  ;;  %v5736_v51 = vshll.u32 %v5355_v47, 16  ;;  %v5879_v42 = vld [vmem:[#allocation3 + $0x28] sm:$0xf] }
 0x467   : > { %v5652_v32 = vrot.slane %v5651_v8, 4  ;;  %v5968_v8 = vsel %vm9964_vm1, %v9160_v52, %v5967_v30  ;;  %v5878_v38 = vld [vmem:[#allocation3 + $0x24] sm:$0xe]  ;;  %v5872_v60 = vld [vmem:[#allocation3 + $0xc] sm:$0xe] }
 0x468   : > { %v5345_v45 = vld [vmem:[#allocation3 + $0x94] sm:$0xf]  ;;  %v5724_v56 = vrot.slane %v5723_v36, 4  ;;  %v5733_v49 = vor.u32 %v5732_v19, %v5728_v35  ;;  %v5738_v34 = vrot.slane %v5736_v51, 5  ;;  %v9163_v41 = vrot.slane %v5878_v38, 9 }
 0x469   : > { %v5654_v53 = vshll.u32 %v5345_v45, 16  ;;  %v5658_v58 = vshrl.u32 %v5345_v45, 16  ;;  %v5346_v9 = vld [vmem:[#allocation3 + $0x98] sm:$0x1]  ;;  %v5705_v45 = vsel %vm9518_vm11, %v5700_v14, %v11600_v31  ;;  %v5969_v31 = vrot.slane %v5967_v30, 4 }
 0x46a   : > { %5792 = vrot.lane.b32.xlu0 %v5681_v22, %s9412_s12  ;;  %v5664_v15 = vshll.u32 %v5346_v9, 16  ;;  %v5874_v22 = vld [vmem:[#allocation3 + $0x14] sm:$0x1]  ;;  %v5976_v9 = vrot.slane %v5974_v54, 4  ;;  %v5734_v23 = vrot.slane %v5733_v49, 4  ;;  %v9161_v5 = vrot.slane %v5872_v60, 9 }
 0x46b   : > { %v5656_v3 = vrot.slane %v5654_v53, 5  ;;  %v5660_v12 = vrot.slane %v5658_v58, 4  ;;  %v5871_v53 = vld [vmem:[#allocation3 + $0x8] sm:$0x1]  ;;  %v5729_v58 = vsel %vm9518_vm11, %v5724_v56, %v5728_v35  ;;  %v5882_v29 = vld [vmem:[#allocation3 + $0x34] sm:$0xf] }
 0x46c   : > { %v5767_v37 = vpop.permute.xlu2 %5766  ;;  %v5666_v10 = vrot.slane %v5664_v15, 5  ;;  %v5975_v18 = vsel %vm9964_vm1, %v9161_v5, %v5974_v54  ;;  %v5995_v7 = vrot.slane %v5882_v29, 5  ;;  %v5883_v17 = vld [vmem:[#allocation3 + $0x38] sm:$0x1]  ;;  %v5877_v25 = vld [vmem:[#allocation3 + $0x20] sm:$0x1] }
 0x46d   : > { %5850 = vst.msk [vmem:[#allocation5 + $0x34] sm:$0xf] %vm5836_vm6, %v5767_v37  ;;  %v5657_v13 = vsel %vm9518_vm11, %v5652_v32, %v5656_v3  ;;  %v5661_v63 = vor.u32 %v5660_v12, %v5656_v3  ;;  %v5977_v32 = vrot.slane %v5874_v22, 5  ;;  %v5970_v3 = vrot.slane %v5871_v53, 5  ;;  %v5264_v62 = vld [vmem:[#allocation3 + $0x78] sm:$0xf] }
 0x46e   : > { %5788 = vrot.lane.b32.xlu1 %v5657_v13, %s9412_s12  ;;  %v5739_v37 = vsel %vm9518_vm11, %v5734_v23, %v5738_v34  ;;  %v5988_v13 = vrot.slane %v5879_v42, 5  ;;  %v5997_v50 = vrot.slane %v5995_v7, 4  ;;  %v5998_v52 = vrot.slane %v5883_v17, 5  ;;  %5296 = vst.msk [vmem:[#allocation5 + $0x50] sm:$0xf] %vm4669_vm8, %v5264_v62 }
 0x46f   : > { %v5662_v24 = vrot.slane %v5661_v63, 4  ;;  %v5978_v15 = vsel %vm9964_vm1, %v5976_v9, %v5977_v32  ;;  %v5971_v55 = vsel %vm9964_vm1, %v5969_v31, %v5970_v3  ;;  %v5876_v63 = vld [vmem:[#allocation3 + $0x1c] sm:$0xf]  ;;  %v5984_v30 = vrot.slane %v5877_v25, 5  ;;  %v5888_v35 = vld [vmem:[#allocation3 + $0x4c] sm:$0xf] }
 0x470   : > { %v5981_v2 = vrot.slane %v5876_v63, 5  ;;  %v5999_v21 = vsel %vm9964_vm1, %v5997_v50, %v5998_v52  ;;  %v5990_v36 = vrot.slane %v5988_v13, 4  ;;  %v5885_v56 = vld [vmem:[#allocation3 + $0x40] sm:$0xf]  ;;  %v5891_v49 = vld [vmem:[#allocation3 + $0x58] sm:$0xf] }
 0x471   : > { %v5667_v0 = vsel %vm9518_vm11, %v5662_v24, %v5666_v10  ;;  %v5875_v24 = vld [vmem:[#allocation3 + $0x18] sm:$0xe]  ;;  %v5989_v10 = vsel %vm9964_vm1, %v9163_v41, %v5988_v13  ;;  %v5266_v51 = vld [vmem:[#allocation3 + $0x84] sm:$0xf]  ;;  %v5265_v22 = vld [vmem:[#allocation3 + $0x7c] sm:$0xf] }
 0x472   : > { %5798 = vrot.lane.b32.xlu0 %v5715_v48, %s9412_s12  ;;  %5790 = vrot.lane.b32.xlu2 %v5667_v0, %s9412_s12  ;;  %v9162_v44 = vrot.slane %v5875_v24, 9  ;;  %v5983_v16 = vrot.slane %v5981_v2, 4  ;;  %v9166_v53 = vrot.slane %v5887_v11, 9  ;;  %5298 = vst.msk [vmem:[#allocation5 + $0x58] sm:$0xf] %vm4669_vm8, %v5266_v51  ;;  %v6002_v57 = vrot.slane %v5885_v56, 5 }
 0x473   : > { %v5884_v9 = vld [vmem:[#allocation3 + $0x3c] sm:$0xe]  ;;  %5297 = vst.msk [vmem:[#allocation5 + $0x54] sm:$0xf] %vm4669_vm8, %v5265_v22  ;;  %v6016_v32 = vrot.slane %v5891_v49, 5 }
 0x474   : > { %v5763_v40 = vpop.permute.xlu0 %5762  ;;  %v5982_v0 = vsel %vm9964_vm1, %v9162_v44, %v5981_v2  ;;  %v5985_v14 = vsel %vm9964_vm1, %v5983_v16, %v5984_v30  ;;  %v9165_v31 = vrot.slane %v5884_v9, 9  ;;  %v6004_v38 = vrot.slane %v6002_v57, 4  ;;  %v5271_v60 = vld [vmem:[#allocation3 + $0xa0] sm:$0xf]  ;;  %v5889_v29 = vld [vmem:[#allocation3 + $0x50] sm:$0x1] }
 0x475   : > { %5848 = vst.msk [vmem:[#allocation5 + $0x2c] sm:$0xf] %vm5836_vm6, %v5763_v40  ;;  %v5897_v24 = vld [vmem:[#allocation3 + $0x70] sm:$0xf]  ;;  %v5896_v2 = vld [vmem:[#allocation3 + $0x6c] sm:$0xe] }
 0x476   : > { %5794 = vrot.lane.b32.xlu1 %v5691_v4, %s9412_s12  ;;  %v5880_v4 = vld [vmem:[#allocation3 + $0x2c] sm:$0x1]  ;;  %v6003_v42 = vsel %vm9964_vm1, %v9165_v31, %v6002_v57  ;;  %5303 = vst.msk [vmem:[#allocation5 + $0x6c] sm:$0xf] %vm4669_vm8, %v5271_v60  ;;  %v6030_v17 = vrot.slane %v5897_v24, 5  ;;  %v9169_v16 = vrot.slane %v5896_v2, 9 }
 0x477   : > { %v5991_v19 = vrot.slane %v5880_v4, 5  ;;  %v5894_v25 = vld [vmem:[#allocation3 + $0x64] sm:$0xf]  ;;  %v5267_v50 = vld [vmem:[#allocation3 + $0x88] sm:$0xf] }
 0x478   : > { %v5893_v52 = vld [vmem:[#allocation3 + $0x60] sm:$0xe]  ;;  %5299 = vst.msk [vmem:[#allocation5 + $0x5c] sm:$0xf] %vm4669_vm8, %v5267_v50  ;;  %v6031_v30 = vsel %vm9964_vm1, %v9169_v16, %v6030_v17  ;;  %v6023_v4 = vrot.slane %v5894_v25, 5 }
 0x479   : > { %v5992_v54 = vsel %vm9964_vm1, %v5990_v36, %v5991_v19  ;;  %v5272_v36 = vld [vmem:[#allocation3 + $0xa8] sm:$0xf]  ;;  %v5273_v19 = vld [vmem:[#allocation3 + $0xac] sm:$0xf]  ;;  %v5269_v11 = vld [vmem:[#allocation3 + $0x94] sm:$0xf] }
 0x47a   : > { %6077 = vrot.lane.b32.xlu0 %v5968_v8, %s9414_s14  ;;  %5796 = vrot.lane.b32.xlu2 %v5705_v45, %s9412_s12  ;;  %v5881_v8 = vld [vmem:[#allocation3 + $0x30] sm:$0xe]  ;;  %v6009_v45 = vrot.slane %v5888_v35, 5  ;;  %v5895_v35 = vld [vmem:[#allocation3 + $0x68] sm:$0x1] }
 0x47b   : > { %5304 = vst.msk [vmem:[#allocation5 + $0x70] sm:$0xf] %vm4669_vm8, %v5272_v36  ;;  %v5268_v56 = vld [vmem:[#allocation3 + $0x90] sm:$0xf]  ;;  %v6026_v51 = vrot.slane %v5895_v35, 5 }
 0x47c   : > { %v6010_v23 = vsel %vm9964_vm1, %v9166_v53, %v6009_v45  ;;  %5305 = vst.msk [vmem:[#allocation5 + $0x74] sm:$0xf] %vm4669_vm8, %v5273_v19  ;;  %v5898_v53 = vld [vmem:[#allocation3 + $0x74] sm:$0x1]  ;;  %v5899_v31 = vld [vmem:[#allocation3 + $0x78] sm:$0xe] }
 0x47d   : > { %5301 = vst.msk [vmem:[#allocation5 + $0x64] sm:$0xf] %vm4669_vm8, %v5269_v11  ;;  %v6033_v57 = vrot.slane %v5898_v53, 5  ;;  %v5902_v60 = vld [vmem:[#allocation3 + $0x84] sm:$0xe] }
 0x47e   : > { %5800 = vrot.lane.b32.xlu1 %v5729_v58, %s9412_s12  ;;  %v9164_v58 = vrot.slane %v5881_v8, 9  ;;  %5300 = vst.msk [vmem:[#allocation5 + $0x60] sm:$0xf] %vm4669_vm8, %v5268_v56  ;;  %v5274_v24 = vld [vmem:[#allocation3 + $0xb4] sm:$0xf] }
 0x47f   : > { %5306 = vst.msk [vmem:[#allocation5 + $0x78] sm:$0xf] %vm4669_vm8, %v5274_v24  ;;  %v5907_v50 = vld [vmem:[#allocation3 + $0x98] sm:$0x1]  ;;  %v5911_v11 = vld [vmem:[#allocation3 + $0xa8] sm:$0xe] }
 0x480   : > { %v5765_v12 = vpop.permute.xlu1 %5764  ;;  %v5996_v34 = vsel %vm9964_vm1, %v9164_v58, %v5995_v7  ;;  %v5890_v7 = vld [vmem:[#allocation3 + $0x54] sm:$0xe]  ;;  %v9174_v56 = vrot.slane %v5911_v11, 9  ;;  %v9398_v24 = vld [vmem:[%s12801_s4] ss:$0 sm:$0xff] }
 0x481   : > { %5849 = vst.msk [vmem:[#allocation5 + $0x30] sm:$0xf] %vm5836_vm6, %v5765_v12  ;;  %v5892_v12 = vld [vmem:[#allocation3 + $0x5c] sm:$0x1]  ;;  %v9167_v62 = vrot.slane %v5890_v7, 9 }
 0x482   : > { %6083 = vrot.lane.b32.xlu0 %v5978_v15, %s9414_s14  ;;  %5802 = vrot.lane.b32.xlu2 %v5739_v37, %s9412_s12  ;;  %v5886_v15 = vld [vmem:[#allocation3 + $0x44] sm:$0x1]  ;;  %v5270_v37 = vld [vmem:[#allocation3 + $0x9c] sm:$0xf]  ;;  %v6019_v13 = vrot.slane %v5892_v12, 5 }
 0x483   : > { %5302 = vst.msk [vmem:[#allocation5 + $0x68] sm:$0xf] %vm4669_vm8, %v5270_v37  ;;  %v6005_v63 = vrot.slane %v5886_v15, 5  ;;  %v5903_v15 = vld [vmem:[#allocation3 + $0x88] sm:$0xf] }
 0x484   : > { %v5909_v37 = vld [vmem:[#allocation3 + $0xa0] sm:$0xf] }
 0x485   : > { %v6006_v5 = vsel %vm9964_vm1, %v6004_v38, %v6005_v63 }
 0x486   : > { %6079 = vrot.lane.b32.xlu1 %v5971_v55, %s9414_s14  ;;  %v6018_v55 = vrot.slane %v6016_v32, 4 }
 0x488   : > { %v5773_v48 = vpop.permute.xlu2 %5772  ;;  %v6020_v41 = vsel %vm9964_vm1, %v6018_v55, %v6019_v13  ;;  %v9170_v55 = vrot.slane %v5899_v31, 9 }
 0x489   : > { %5853 = vst.msk [vmem:[#allocation5 + $0x40] sm:$0xf] %vm5836_vm6, %v5773_v48  ;;  %v6011_v48 = vrot.slane %v6009_v45, 4  ;;  %v6025_v45 = vrot.slane %v6023_v4, 4 }
 0x48a   : > { %6089 = vrot.lane.b32.xlu0 %v5989_v10, %s9414_s14  ;;  %6081 = vrot.lane.b32.xlu2 %v5975_v18, %s9414_s14  ;;  %v6012_v10 = vrot.slane %v5889_v29, 5  ;;  %v6044_v29 = vrot.slane %v5903_v15, 5 }
 0x48b   : > { %v6027_v9 = vsel %vm9964_vm1, %v6025_v45, %v6026_v51  ;;  %v5913_v51 = vld [vmem:[#allocation3 + $0xb0] sm:$0x1] }
 0x48c   : > { %v6013_v44 = vsel %vm9964_vm1, %v6011_v48, %v6012_v10  ;;  %v5275_v48 = vld [vmem:[#allocation3 + $0xb8] sm:$0xf]  ;;  %v9171_v10 = vrot.slane %v5902_v60, 9 }
 0x48d   : > { %5307 = vst.msk [vmem:[#allocation5 + $0x7c] sm:$0xf] %vm4669_vm8, %v5275_v48  ;;  %v6208_v60 = vld [vmem:[#allocation3 + $0x18] sm:$0xf]  ;;  %v6209_v48 = vld [vmem:[#allocation3 + $0x1c] sm:$0xf] }
 0x48e   : > { %6085 = vrot.lane.b32.xlu1 %v5982_v0, %s9414_s14  ;;  %v5900_v0 = vld [vmem:[#allocation3 + $0x7c] sm:$0xf]  ;;  %v6045_v2 = vsel %vm9964_vm1, %v9171_v10, %v6044_v29 }
 0x490   : > { %v5769_v40 = vpop.permute.xlu0 %5768 }
 0x491   : > { %5851 = vst.msk [vmem:[#allocation5 + $0x38] sm:$0xf] %vm5836_vm6, %v5769_v40  ;;  %v6017_v40 = vsel %vm9964_vm1, %v9167_v62, %v6016_v32  ;;  %v5905_v32 = vld [vmem:[#allocation3 + $0x90] sm:$0xe] }
 0x492   : > { %6095 = vrot.lane.b32.xlu0 %v5999_v21, %s9414_s14  ;;  %6087 = vrot.lane.b32.xlu2 %v5985_v14, %s9414_s14  ;;  %v6037_v21 = vrot.slane %v5900_v0, 5  ;;  %v9168_v14 = vrot.slane %v5893_v52, 9 }
 0x494   : > { %v5771_v47 = vpop.permute.xlu1 %5770  ;;  %v6024_v8 = vsel %vm9964_vm1, %v9168_v14, %v6023_v4  ;;  %v6038_v63 = vsel %vm9964_vm1, %v9170_v55, %v6037_v21  ;;  %v5908_v4 = vld [vmem:[#allocation3 + $0x9c] sm:$0xe] }
 0x495   : > { %5852 = vst.msk [vmem:[#allocation5 + $0x3c] sm:$0xf] %vm5836_vm6, %v5771_v47  ;;  %v5901_v47 = vld [vmem:[#allocation3 + $0x80] sm:$0x1]  ;;  %v9173_v19 = vrot.slane %v5908_v4, 9 }
 0x496   : > { %6091 = vrot.lane.b32.xlu1 %v5992_v54, %s9414_s14  ;;  %v6039_v54 = vrot.slane %v6037_v21, 4  ;;  %v6040_v49 = vrot.slane %v5901_v47, 5  ;;  %v6054_v21 = vrot.slane %v5907_v50, 5 }
 0x498   : > { %v6041_v58 = vsel %vm9964_vm1, %v6039_v54, %v6040_v49 }
 0x49a   : > { %6101 = vrot.lane.b32.xlu0 %v6010_v23, %s9414_s14  ;;  %6093 = vrot.lane.b32.xlu2 %v5996_v34, %s9414_s14  ;;  %v6032_v23 = vrot.slane %v6030_v17, 4  ;;  %v5906_v34 = vld [vmem:[#allocation3 + $0x94] sm:$0xf]  ;;  %v6046_v17 = vrot.slane %v6044_v29, 4 }
 0x49b   : > { %v6051_v12 = vrot.slane %v5906_v34, 5  ;;  %v6207_v34 = vld [vmem:[#allocation3 + $0x10] sm:$0xf] }
 0x49c   : > { %v5779_v3 = vpop.permute.xlu2 %5778 }
 0x49d   : > { %5856 = vst.msk [vmem:[#allocation5 + $0x4c] sm:$0xf] %vm5836_vm6, %v5779_v3  ;;  %v6034_v3 = vsel %vm9964_vm1, %v6032_v23, %v6033_v57  ;;  %v6053_v52 = vrot.slane %v6051_v12, 4  ;;  %v5916_v23 = vld [vmem:[#allocation3 + $0xbc] sm:$0x1] }
 0x49e   : > { %6097 = vrot.lane.b32.xlu1 %v6003_v42, %s9414_s14  ;;  %v9172_v42 = vrot.slane %v5905_v32, 9  ;;  %v6075_v31 = vrot.slane %v5916_v23, 5 }
 0x49f   : > { %v6055_v14 = vsel %vm9964_vm1, %v6053_v52, %v6054_v21 }
 0x4a0   : > { %v6052_v13 = vsel %vm9964_vm1, %v9172_v42, %v6051_v12  ;;  %v6206_v42 = vld [vmem:[#allocation3 + $0xc] sm:$0xf] }
 0x4a2   : > { %6107 = vrot.lane.b32.xlu0 %v6020_v41, %s9414_s14  ;;  %6099 = vrot.lane.b32.xlu2 %v6006_v5, %s9414_s14  ;;  %v6058_v41 = vrot.slane %v5909_v37, 5  ;;  %v5910_v5 = vld [vmem:[#allocation3 + $0xa4] sm:$0x1] }
 0x4a3   : > { %v6210_v37 = vld [vmem:[#allocation3 + $0x24] sm:$0xf] }
 0x4a4   : > { %v5775_v18 = vpop.permute.xlu0 %5774  ;;  %v6060_v7 = vrot.slane %v6058_v41, 4  ;;  %v6059_v45 = vsel %vm9964_vm1, %v9173_v19, %v6058_v41 }
 0x4a5   : > { %5854 = vst.msk [vmem:[#allocation5 + $0x44] sm:$0xf] %vm5836_vm6, %v5775_v18  ;;  %v5904_v18 = vld [vmem:[#allocation3 + $0x8c] sm:$0x1] }
 0x4a6   : > { %6103 = vrot.lane.b32.xlu1 %v6013_v44, %s9414_s14  ;;  %v6061_v44 = vrot.slane %v5910_v5, 5  ;;  %v6047_v25 = vrot.slane %v5904_v18, 5  ;;  %v6213_v5 = vld [vmem:[#allocation3 + $0x34] sm:$0xf]  ;;  %v9399_v18 = vld [vmem:[%s12802_s5] ss:$0 sm:$0xff] }
 0x4a8   : > { %v6062_v16 = vsel %vm9964_vm1, %v6060_v7, %v6061_v44  ;;  %v6048_v62 = vsel %vm9964_vm1, %v6046_v17, %v6047_v25  ;;  %v6211_v17 = vld [vmem:[#allocation3 + $0x28] sm:$0xf] }
 0x4aa   : > { %6113 = vrot.lane.b32.xlu0 %v6031_v30, %s9414_s14  ;;  %6105 = vrot.lane.b32.xlu2 %v6017_v40, %s9414_s14  ;;  %v5914_v30 = vld [vmem:[#allocation3 + $0xb4] sm:$0xe]  ;;  %v5915_v40 = vld [vmem:[#allocation3 + $0xb8] sm:$0xf] }
 0x4ab   : > { %v9175_v36 = vrot.slane %v5914_v30, 9  ;;  %v6072_v35 = vrot.slane %v5915_v40, 5  ;;  %v6216_v30 = vld [vmem:[#allocation3 + $0x48] sm:$0xf]  ;;  %v6212_v40 = vld [vmem:[#allocation3 + $0x30] sm:$0xf] }
 0x4ad   : > { %v6073_v54 = vsel %vm9964_vm1, %v9175_v36, %v6072_v35  ;;  %v6074_v32 = vrot.slane %v6072_v35, 4 }
 0x4ae   : > { %6109 = vrot.lane.b32.xlu1 %v6024_v8, %s9414_s14  ;;  %v5912_v8 = vld [vmem:[#allocation3 + $0xac] sm:$0xf] }
 0x4af   : > { %v6065_v49 = vrot.slane %v5912_v8, 5  ;;  %v6076_v15 = vsel %vm9964_vm1, %v6074_v32, %v6075_v31  ;;  %v6217_v32 = vld [vmem:[#allocation3 + $0x4c] sm:$0xf] }
 0x4b0   : > { %v5777_v22 = vpop.permute.xlu1 %5776 }
 0x4b1   : > { %5855 = vst.msk [vmem:[#allocation5 + $0x48] sm:$0xf] %vm5836_vm6, %v5777_v22  ;;  %v6066_v53 = vsel %vm9964_vm1, %v9174_v56, %v6065_v49 }
 0x4b2   : > { %6119 = vrot.lane.b32.xlu0 %v6041_v58, %s9414_s14  ;;  %6111 = vrot.lane.b32.xlu2 %v6027_v9, %s9414_s14  ;;  %v6067_v58 = vrot.slane %v6065_v49, 4  ;;  %v6068_v9 = vrot.slane %v5913_v51, 5  ;;  %v6219_v51 = vld [vmem:[#allocation3 + $0x58] sm:$0xf] }
 0x4b4   : > { %v6069_v57 = vsel %vm9964_vm1, %v6067_v58, %v6068_v9 }
 0x4b6   : > { %6115 = vrot.lane.b32.xlu1 %v6034_v3, %s9414_s14 }
 0x4b8   : > { %v5785_v38 = vpop.permute.xlu2 %5784 }
 0x4b9   : > { %5859 = vst.msk [vmem:[#allocation5 + $0x58] sm:$0xf] %vm5836_vm6, %v5785_v38 }
 0x4ba   : > { %6125 = vrot.lane.b32.xlu0 %v6052_v13, %s9414_s14  ;;  %6117 = vrot.lane.b32.xlu2 %v6038_v63, %s9414_s14  ;;  %v4726_v13 = vld [vmem:[#allocation3 + $0xc0] sm:$0x1] }
 0x4bb   : > { %v4727_v63 = vsel %vm11185_vm0, 0, %v4726_v13 }
 0x4bc   : > { %4728 = vst [vmem:[#allocation3 + $0xc0] sm:$0x1] %v4727_v63 }
 0x4be   : > { %6121 = vrot.lane.b32.xlu1 %v6045_v2, %s9414_s14 }
 0x4c0   : > { %v5781_v0 = vpop.permute.xlu0 %5780 }
 0x4c1   : > { %5857 = vst.msk [vmem:[#allocation5 + $0x50] sm:$0xf] %vm5836_vm6, %v5781_v0  ;;  %v4775_v0 = vld [vmem:[#allocation3 + $0xc8] sm:$0x1] }
 0x4c2   : > { %6131 = vrot.lane.b32.xlu0 %v6062_v16, %s9414_s14  ;;  %6123 = vrot.lane.b32.xlu2 %v6048_v62, %s9414_s14  ;;  %v4776_v16 = vsel %vm11194_vm5, 0, %v4775_v0  ;;  %v6231_v0 = vld [vmem:[#allocation3 + $0xa0] sm:$0xf] }
 0x4c3   : > { %4777 = vst [vmem:[#allocation3 + $0xc8] sm:$0x1] %v4776_v16 }
 0x4c5   : > { %v5783_v47 = vpop.permute.xlu1 %5782 }
 0x4c6   : > { %6127 = vrot.lane.b32.xlu1 %v6055_v14, %s9414_s14  ;;  %5858 = vst.msk [vmem:[#allocation5 + $0x54] sm:$0xf] %vm5836_vm6, %v5783_v47 }
 0x4ca   : > { %6137 = vrot.lane.b32.xlu0 %v6073_v54, %s9414_s14  ;;  %6129 = vrot.lane.b32.xlu2 %v6059_v45, %s9414_s14  ;;  %v5237_v54 = vld [vmem:[#allocation3 + $0xc0] sm:$0xf]  ;;  %v5241_v59 = vld [vmem:[#allocation3 + $0xc8] sm:$0x1] }
 0x4cc   : > { %v5791_v22 = vpop.permute.xlu2 %5790 }
 0x4cd   : > { %5862 = vst.msk [vmem:[#allocation5 + $0x64] sm:$0xf] %vm5836_vm6, %v5791_v22  ;;  %v6215_v22 = vld [vmem:[#allocation3 + $0x40] sm:$0xf] }
 0x4ce   : > { %6133 = vrot.lane.b32.xlu1 %v6066_v53, %s9414_s14 }
 0x4d2   : > { %6272 = vrot.lane.b32.xlu0 %v6207_v34, %s9416_s16  ;;  %6135 = vrot.lane.b32.xlu2 %v6069_v57, %s9414_s14 }
 0x4d3   : > { %v4528_v41 = vpop.f32.mrf.mxu3 }
 0x4d4   : > { %v5787_v3 = vpop.permute.xlu0 %5786  ;;  %v5797_v12 = vpop.permute.xlu2 %5796  ;;  %v4567_v10 = vmul.f32 %v9398_v24, %v4528_v41  ;;  %v6221_v41 = vld [vmem:[#allocation3 + $0x64] sm:$0xf] }
 0x4d5   : > { %5860 = vst.msk [vmem:[#allocation5 + $0x5c] sm:$0xf] %vm5836_vm6, %v5787_v3 }
 0x4d6   : > { %5865 = vst.msk [vmem:[#allocation5 + $0x70] sm:$0xf] %vm5836_vm6, %v5797_v12  ;;  %6139 = vrot.lane.b32.xlu1 %v6076_v15, %s9414_s14  ;;  %v4603_v2 = vadd.f32 %v9399_v18, %v4567_v10 }
 0x4d8   : > { %v4635_v25 = vmul.f32 0.2, %v4603_v2 }
 0x4da   : > { %6278 = vrot.lane.b32.xlu0 %v6210_v37, %s9416_s16  ;;  %6270 = vrot.lane.b32.xlu2 %v6206_v42, %s9416_s16  ;;  %v4667_v50 = vmax.f32 %v4603_v2, %v4635_v25  ;;  %v6222_v42 = vld [vmem:[#allocation3 + $0x6c] sm:$0xf]  ;;  %v6224_v2 = vld [vmem:[#allocation3 + $0x78] sm:$0xf] }
 0x4db   : > { %v4530_v52 = vpop.f32.mrf.mxu3 }
 0x4dc   : > { %v5793_v55 = vpop.permute.xlu0 %5792  ;;  %v5803_v38 = vpop.permute.xlu2 %5802  ;;  %v4808_v4 = vpack.c.bf16 %v4667_v50, %v4667_v50  ;;  %v4568_v21 = vmul.f32 %v9398_v24, %v4530_v52  ;;  %v6223_v24 = vld [vmem:[#allocation3 + $0x70] sm:$0xf]  ;;  %v6227_v50 = vld [vmem:[#allocation3 + $0x88] sm:$0xf]  ;;  %v6229_v52 = vld [vmem:[#allocation3 + $0x94] sm:$0xf] }
 0x4dd   : > { %5863 = vst.msk [vmem:[#allocation5 + $0x68] sm:$0xf] %vm5836_vm6, %v5793_v55  ;;  %v6218_v55 = vld [vmem:[#allocation3 + $0x54] sm:$0xf] }
 0x4de   : > { %5868 = vst.msk [vmem:[#allocation5 + $0x7c] sm:$0xf] %vm5836_vm6, %v5803_v38  ;;  %6274 = vrot.lane.b32.xlu1 %v6208_v60, %s9416_s16  ;;  %v5066_v14 = vshrl.u32 %v4808_v4, 16  ;;  %v5069_v36 = vshll.u32 %v4808_v4, 16  ;;  %v4604_v35 = vadd.f32 %v9399_v18, %v4568_v21  ;;  %v6228_v18 = vld [vmem:[#allocation3 + $0x90] sm:$0xf] }
 0x4df   : > { %v6234_v4 = vld [vmem:[#allocation3 + $0xb4] sm:$0xf]  ;;  %v6230_v21 = vld [vmem:[#allocation3 + $0x9c] sm:$0xf] }
 0x4e0   : > { %v5789_v29 = vpop.permute.xlu1 %5788  ;;  %v5068_v11 = vrot.slane %v5066_v14, 7  ;;  %v4636_v8 = vmul.f32 0.2, %v4604_v35 }
 0x4e1   : > { %5861 = vst.msk [vmem:[#allocation5 + $0x60] sm:$0xf] %vm5836_vm6, %v5789_v29  ;;  %v6220_v29 = vld [vmem:[#allocation3 + $0x60] sm:$0xf] }
 0x4e2   : > { %6284 = vrot.lane.b32.xlu0 %v6213_v5, %s9416_s16  ;;  %6276 = vrot.lane.b32.xlu2 %v6209_v48, %s9416_s16  ;;  %v5071_v45 = vor.u32 %v5069_v36, %v5068_v11  ;;  %v4668_v56 = vmax.f32 %v4604_v35, %v4636_v8  ;;  %v5072_v31 = vrot.slane %v5068_v11, 4  ;;  %v6232_v11 = vld [vmem:[#allocation3 + $0xa8] sm:$0xf] }
 0x4e3   : > { %v6406_v8 = vld [vmem:[#allocation3 + $0x28] sm:$0xf] }
 0x4e4   : > { %v5799_v7 = vpop.permute.xlu0 %5798  ;;  %v6082_v44 = vpop.permute.xlu2 %6081  ;;  %v5238_v53 = vsel %vm11240_vm2, %v5071_v45, %v5237_v54  ;;  %v4809_v58 = vpack.c.bf16 %v4668_v56, %v4668_v56  ;;  %v6403_v54 = vld [vmem:[#allocation3 + $0x1c] sm:$0xf] }
 0x4e5   : > { %5866 = vst.msk [vmem:[#allocation5 + $0x74] sm:$0xf] %vm5836_vm6, %v5799_v7 }
 0x4e6   : > { %6176 = vst.msk [vmem:[#allocation5 + $0x8] sm:$0xf] %vm6173_vm9, %v6082_v44  ;;  %6280 = vrot.lane.b32.xlu1 %v6211_v17, %s9416_s16  ;;  %v5074_v9 = vshrl.u32 %v4809_v58, 16  ;;  %v5077_v23 = vshll.u32 %v4809_v58, 16  ;;  %v6226_v17 = vld [vmem:[#allocation3 + $0x84] sm:$0xf] }
 0x4e7   : > { %5239 = vst [vmem:[#allocation3 + $0xc0] sm:$0xf] %v5238_v53 }
 0x4e8   : > { %v5795_v62 = vpop.permute.xlu1 %5794  ;;  %v5076_v3 = vrot.slane %v5074_v9, 7 }
 0x4e9   : > { %5864 = vst.msk [vmem:[#allocation5 + $0x6c] sm:$0xf] %vm5836_vm6, %v5795_v62 }
 0x4ea   : > { %6290 = vrot.lane.b32.xlu0 %v6216_v30, %s9416_s16  ;;  %6282 = vrot.lane.b32.xlu2 %v6212_v40, %s9416_s16  ;;  %v5079_v12 = vor.u32 %v5077_v23, %v5076_v3  ;;  %v5081_v15 = vrot.slane %v5076_v3, 4  ;;  %v6402_v40 = vld [vmem:[#allocation3 + $0x18] sm:$0xf]  ;;  %v6505_v23 = vshll.u32 %v6406_v8, 16  ;;  %v6485_v3 = vshrl.u32 %v6403_v54, 16 }
 0x4eb   : > { %v6472_v14 = vshrl.u32 %v6402_v40, 16  ;;  %v6475_v36 = vshll.u32 %v6402_v40, 16 }
 0x4ec   : > { %v6078_v19 = vpop.permute.xlu0 %6077  ;;  %v6088_v47 = vpop.permute.xlu2 %6087  ;;  %v5080_v38 = vsel %vm9535_vm12, %v5072_v31, %v5079_v12  ;;  %v5242_v60 = vsel %vm11185_vm0, %v5081_v15, %v5241_v59  ;;  %v6401_v15 = vld [vmem:[#allocation3 + $0x14] sm:$0x1]  ;;  %vm6927_vm12 = vcmask 322816   ;;  %vm8847_vm0 = vcmask 64512  }
 0x4ed   : > { %6174 = vst.msk [vmem:[#allocation5] sm:$0xf] %vm6173_vm9, %v6078_v19  ;;  %v6474_v56 = vrot.slane %v6472_v14, 4 }
 0x4ee   : > { %6179 = vst.msk [vmem:[#allocation5 + $0x14] sm:$0xf] %vm6173_vm9, %v6088_v47  ;;  %6286 = vrot.lane.b32.xlu1 %v6214_v61, %s9416_s16  ;;  %v6399_v47 = vld [vmem:[#allocation3 + $0xc] sm:$0xf]  ;;  %v6400_v61 = vld [vmem:[#allocation3 + $0x10] sm:$0xf] }
 0x4ef   : > { %5240 = vst.msk [vmem:[#allocation3 + $0xc4] sm:$0xf] %vm4669_vm8, %v5080_v38  ;;  %v6457_v58 = vshll.u32 %v6400_v61, 16  ;;  %v6461_v9 = vshrl.u32 %v6400_v61, 16  ;;  %v11829_v38 = vrot.slane %v6505_v23, 5  ;;  %vm6366_vm8 = vcmask 257216  }
 0x4f0   : > { %v5801_v49 = vpop.permute.xlu1 %5800  ;;  %5243 = vst [vmem:[#allocation3 + $0xc8] sm:$0x1] %v5242_v60  ;;  %v6408_v61 = vld [vmem:[#allocation3 + $0x30] sm:$0xf] }
 0x4f1   : > { %5867 = vst.msk [vmem:[#allocation5 + $0x78] sm:$0xf] %vm5836_vm6, %v5801_v49  ;;  %v6477_v49 = vrot.slane %v6475_v36, 5 }
 0x4f2   : > { %6296 = vrot.lane.b32.xlu0 %v6219_v51, %s9416_s16  ;;  %6288 = vrot.lane.b32.xlu2 %v6215_v22, %s9416_s16  ;;  %v6448_v51 = vshrl.u32 %v6399_v47, 16  ;;  %v6451_v22 = vshll.u32 %v6399_v47, 16 }
 0x4f3   : > { %v6478_v31 = vor.u32 %v6477_v49, %v6474_v56  ;;  %v6415_v49 = vld [vmem:[#allocation3 + $0x4c] sm:$0xf] }
 0x4f4   : > { %v6084_v34 = vpop.permute.xlu0 %6083  ;;  %v6094_v57 = vpop.permute.xlu2 %6093  ;;  %v6450_v59 = vrot.slane %v6448_v51, 4  ;;  %v6453_v12 = vrot.slane %v6451_v22, 5 }
 0x4f5   : > { %6177 = vst.msk [vmem:[#allocation5 + $0xc] sm:$0xf] %vm6173_vm9, %v6084_v34  ;;  %v6509_v34 = vshrl.u32 %v6406_v8, 16  ;;  %v6412_v8 = vld [vmem:[#allocation3 + $0x40] sm:$0xf] }
 0x4f6   : > { %6182 = vst.msk [vmem:[#allocation5 + $0x20] sm:$0xf] %vm6173_vm9, %v6094_v57  ;;  %6292 = vrot.lane.b32.xlu1 %v6217_v32, %s9416_s16  ;;  %v6237_v45 = vld [vmem:[#allocation3 + $0xc4] sm:$0xf]  ;;  %v6233_v57 = vld [vmem:[#allocation3 + $0xac] sm:$0xf] }
 0x4f7   : > { %v6481_v32 = vshll.u32 %v6403_v54, 16  ;;  %v6511_v60 = vrot.slane %v6509_v34, 4  ;;  %v6409_v54 = vld [vmem:[#allocation3 + $0x34] sm:$0xf]  ;;  %v6553_v34 = vshll.u32 %v6412_v8, 16 }
 0x4f8   : > { %v6080_v37 = vpop.permute.xlu1 %6079 }
 0x4f9   : > { %6175 = vst.msk [vmem:[#allocation5 + $0x4] sm:$0xf] %vm6173_vm9, %v6080_v37 }
 0x4fa   : > { %6302 = vrot.lane.b32.xlu0 %v6222_v42, %s9416_s16  ;;  %6294 = vrot.lane.b32.xlu2 %v6218_v55, %s9416_s16  ;;  %v6459_v55 = vrot.slane %v6457_v58, 5  ;;  %v6523_v58 = vshll.u32 %v6408_v61, 16 }
 0x4fc   : > { %v6090_v13 = vpop.permute.xlu0 %6089  ;;  %v6100_v63 = vpop.permute.xlu2 %6099 }
 0x4fd   : > { %6180 = vst.msk [vmem:[#allocation5 + $0x18] sm:$0xf] %vm6173_vm9, %v6090_v13  ;;  %v6463_v13 = vrot.slane %v6461_v9, 4 }
 0x4fe   : > { %6185 = vst.msk [vmem:[#allocation5 + $0x2c] sm:$0xf] %vm6173_vm9, %v6100_v63  ;;  %6298 = vrot.lane.b32.xlu1 %v6220_v29, %s9416_s16  ;;  %v6405_v63 = vld [vmem:[#allocation3 + $0x24] sm:$0xf]  ;;  %v6235_v29 = vld [vmem:[#allocation3 + $0xb8] sm:$0xf] }
 0x500   : > { %v6086_v43 = vpop.permute.xlu1 %6085 }
 0x501   : > { %6178 = vst.msk [vmem:[#allocation5 + $0x10] sm:$0xf] %vm6173_vm9, %v6086_v43  ;;  %v6483_v43 = vrot.slane %v6481_v32, 5  ;;  %v6533_v32 = vshrl.u32 %v6409_v54, 16 }
 0x502   : > { %6308 = vrot.lane.b32.xlu0 %v6225_v6, %s9416_s16  ;;  %6300 = vrot.lane.b32.xlu2 %v6221_v41, %s9416_s16  ;;  %v6479_v6 = vrot.slane %v6478_v31, 4  ;;  %v6454_v41 = vor.u32 %v6453_v12, %v6450_v59  ;;  %v6577_v59 = vshll.u32 %v6415_v49, 16  ;;  %v6581_v12 = vshrl.u32 %v6415_v49, 16 }
 0x504   : > { %v6096_v5 = vpop.permute.xlu0 %6095  ;;  %v6106_v48 = vpop.permute.xlu2 %6105 }
 0x505   : > { %6183 = vst.msk [vmem:[#allocation5 + $0x24] sm:$0xf] %vm6173_vm9, %v6096_v5  ;;  %v6407_v5 = vld [vmem:[#allocation3 + $0x2c] sm:$0x1] }
 0x506   : > { %6188 = vst.msk [vmem:[#allocation5 + $0x38] sm:$0xf] %vm6173_vm9, %v6106_v48  ;;  %6304 = vrot.lane.b32.xlu1 %v6223_v24, %s9416_s16  ;;  %v6467_v48 = vshll.u32 %v6401_v15, 16  ;;  %v6404_v24 = vld [vmem:[#allocation3 + $0x20] sm:$0x1] }
 0x508   : > { %v6092_v10 = vpop.permute.xlu1 %6091 }
 0x509   : > { %6181 = vst.msk [vmem:[#allocation5 + $0x1c] sm:$0xf] %vm6173_vm9, %v6092_v10 }
 0x50a   : > { %6314 = vrot.lane.b32.xlu0 %v6228_v18, %s9416_s16  ;;  %6306 = vrot.lane.b32.xlu2 %v6224_v2, %s9416_s16  ;;  %v6512_v18 = vor.u32 %v6511_v60, %v11829_v38  ;;  %v6464_v2 = vor.u32 %v6463_v13, %v6459_v55  ;;  %v6525_v60 = vrot.slane %v6523_v58, 5 }
 0x50c   : > { %v6102_v7 = vpop.permute.xlu0 %6101  ;;  %v6112_v44 = vpop.permute.xlu2 %6111  ;;  %v6513_v36 = vrot.slane %v6512_v18, 4  ;;  %v6414_v18 = vld [vmem:[#allocation3 + $0x48] sm:$0xf] }
 0x50d   : > { %6186 = vst.msk [vmem:[#allocation5 + $0x30] sm:$0xf] %vm6173_vm9, %v6102_v7  ;;  %v6487_v7 = vrot.slane %v6485_v3, 4 }
 0x50e   : > { %6191 = vst.msk [vmem:[#allocation5 + $0x44] sm:$0xf] %vm6173_vm9, %v6112_v44  ;;  %6310 = vrot.lane.b32.xlu1 %v6226_v17, %s9416_s16  ;;  %v6411_v44 = vld [vmem:[#allocation3 + $0x3c] sm:$0xf]  ;;  %v6496_v17 = vshrl.u32 %v6405_v63, 16 }
 0x50f   : > { %v6544_v40 = vshrl.u32 %v6411_v44, 16 }
 0x510   : > { %v6098_v25 = vpop.permute.xlu1 %6097  ;;  %v6498_v47 = vrot.slane %v6496_v17, 4 }
 0x511   : > { %6184 = vst.msk [vmem:[#allocation5 + $0x28] sm:$0xf] %vm6173_vm9, %v6098_v25  ;;  %v6484_v25 = vsel %vm9518_vm11, %v6479_v6, %v6483_v43  ;;  %v6546_v51 = vrot.slane %v6544_v40, 4 }
 0x512   : > { %6320 = vrot.lane.b32.xlu0 %v6231_v0, %s9416_s16  ;;  %6312 = vrot.lane.b32.xlu2 %v6227_v50, %s9416_s16  ;;  %v6236_v0 = vld [vmem:[#allocation3 + $0xc0] sm:$0xf]  ;;  %v6515_v50 = vshll.u32 %v6407_v5, 16  ;;  %v6535_v5 = vrot.slane %v6533_v32, 4  ;;  %v6424_v32 = vld [vmem:[#allocation3 + $0x70] sm:$0xf] }
 0x514   : > { %v6108_v16 = vpop.permute.xlu0 %6107  ;;  %v6118_v62 = vpop.permute.xlu2 %6117 }
 0x515   : > { %6189 = vst.msk [vmem:[#allocation5 + $0x3c] sm:$0xf] %vm6173_vm9, %v6108_v16  ;;  %v6491_v16 = vshll.u32 %v6404_v24, 16  ;;  %v11857_v24 = vrot.slane %v6577_v59, 5 }
 0x516   : > { %6194 = vst.msk [vmem:[#allocation5 + $0x50] sm:$0xf] %vm6173_vm9, %v6118_v62  ;;  %6316 = vrot.lane.b32.xlu1 %v6229_v52, %s9416_s16  ;;  %v6499_v62 = vshll.u32 %v6405_v63, 16  ;;  %v6455_v52 = vrot.slane %v6454_v41, 4  ;;  %v6410_v41 = vld [vmem:[#allocation3 + $0x38] sm:$0x1] }
 0x517   : > { %v6493_v15 = vrot.slane %v6491_v16, 5 }
 0x518   : > { %v6104_v30 = vpop.permute.xlu1 %6103  ;;  %v6501_v56 = vrot.slane %v6499_v62, 5  ;;  %v6420_v62 = vld [vmem:[#allocation3 + $0x60] sm:$0xf] }
 0x519   : > { %6187 = vst.msk [vmem:[#allocation5 + $0x34] sm:$0xf] %vm6173_vm9, %v6104_v30  ;;  %v6469_v30 = vrot.slane %v6467_v48, 5 }
 0x51a   : > { %6326 = vrot.lane.b32.xlu0 %v6234_v4, %s9416_s16  ;;  %6318 = vrot.lane.b32.xlu2 %v6230_v21, %s9416_s16  ;;  %v6547_v4 = vshll.u32 %v6411_v44, 16 }
 0x51c   : > { %v6114_v35 = vpop.permute.xlu0 %6113  ;;  %v6124_v19 = vpop.permute.xlu2 %6123  ;;  %v6549_v22 = vrot.slane %v6547_v4, 5 }
 0x51d   : > { %6192 = vst.msk [vmem:[#allocation5 + $0x48] sm:$0xf] %vm6173_vm9, %v6114_v35  ;;  %v6465_v35 = vrot.slane %v6464_v2, 4 }
 0x51e   : > { %6197 = vst.msk [vmem:[#allocation5 + $0x5c] sm:$0xf] %vm6173_vm9, %v6124_v19  ;;  %6322 = vrot.lane.b32.xlu1 %v6232_v11, %s9416_s16  ;;  %v6488_v19 = vor.u32 %v6487_v7, %v6483_v43  ;;  %v6460_v11 = vsel %vm9518_vm11, %v6455_v52, %v6459_v55  ;;  %v6557_v43 = vshrl.u32 %v6412_v8, 16  ;;  %v6416_v7 = vld [vmem:[#allocation3 + $0x50] sm:$0x1]  ;;  %v6568_v52 = vshrl.u32 %v6414_v18, 16 }
 0x51f   : > { %v6470_v3 = vsel %vm9518_vm11, %v6465_v35, %v6469_v30  ;;  %v6571_v30 = vshll.u32 %v6414_v18, 16 }
 0x520   : > { %v6110_v53 = vpop.permute.xlu1 %6109  ;;  %v6489_v23 = vrot.slane %v6488_v19, 4  ;;  %v6616_v19 = vshrl.u32 %v6420_v62, 16 }
 0x521   : > { %6190 = vst.msk [vmem:[#allocation5 + $0x40] sm:$0xf] %vm6173_vm9, %v6110_v53  ;;  %v6520_v53 = vshrl.u32 %v6408_v61, 16  ;;  %v6417_v61 = vld [vmem:[#allocation3 + $0x54] sm:$0xf]  ;;  %v6573_v49 = vrot.slane %v6571_v30, 5 }
 0x522   : > { %6332 = vrot.lane.b32.xlu0 %v6237_v45, %s9416_s16  ;;  %6324 = vrot.lane.b32.xlu2 %v6233_v57, %s9416_s16  ;;  %v6517_v45 = vrot.slane %v6515_v50, 5  ;;  %v6529_v57 = vshll.u32 %v6409_v54, 16  ;;  %v6494_v48 = vsel %vm9518_vm11, %v6489_v23, %v6493_v15  ;;  %v6421_v23 = vld [vmem:[#allocation3 + $0x64] sm:$0xf] }
 0x523   : > { %v6522_v55 = vrot.slane %v6520_v53, 4 }
 0x524   : > { %v6120_v37 = vpop.permute.xlu0 %6119  ;;  %v6130_v42 = vpop.permute.xlu2 %6129  ;;  %v6518_v31 = vsel %vm9518_vm11, %v6513_v36, %v6517_v45  ;;  %v6531_v6 = vrot.slane %v6529_v57, 5  ;;  %v6559_v36 = vrot.slane %v6557_v43, 4  ;;  %v6595_v57 = vshll.u32 %v6417_v61, 16 }
 0x525   : > { %6195 = vst.msk [vmem:[#allocation5 + $0x54] sm:$0xf] %vm6173_vm9, %v6120_v37  ;;  %v6502_v37 = vor.u32 %v6501_v56, %v6498_v47  ;;  %v6526_v17 = vor.u32 %v6525_v60, %v6522_v55  ;;  %v6619_v47 = vshll.u32 %v6420_v62, 16  ;;  %v6570_v56 = vrot.slane %v6568_v52, 4  ;;  %v6425_v52 = vld [vmem:[#allocation3 + $0x74] sm:$0x1] }
 0x526   : > { %6200 = vst.msk [vmem:[#allocation5 + $0x68] sm:$0xf] %vm6173_vm9, %v6130_v42  ;;  %6328 = vrot.lane.b32.xlu1 %v6235_v29, %s9416_s16  ;;  %v6550_v42 = vor.u32 %v6549_v22, %v6546_v51  ;;  %v11852_v29 = vrot.slane %v6553_v34, 5  ;;  %v6536_v16 = vor.u32 %v6535_v5, %v6531_v6  ;;  %v6418_v51 = vld [vmem:[#allocation3 + $0x58] sm:$0xf]  ;;  %v6592_v34 = vshrl.u32 %v6417_v61, 16 }
 0x527   : > { %v6503_v2 = vrot.slane %v6502_v37, 4  ;;  %v6601_v59 = vshll.u32 %v6418_v51, 16  ;;  %v6574_v5 = vor.u32 %v6573_v49, %v6570_v56 }
 0x528   : > { %v6116_v10 = vpop.permute.xlu1 %6115  ;;  %v6551_v44 = vrot.slane %v6550_v42, 4  ;;  %v6537_v54 = vrot.slane %v6536_v16, 4  ;;  %v6625_v42 = vshll.u32 %v6421_v23, 16  ;;  %v6594_v43 = vrot.slane %v6592_v34, 4  ;;  %v6423_v16 = vld [vmem:[#allocation3 + $0x6c] sm:$0xf] }
 0x529   : > { %6193 = vst.msk [vmem:[#allocation5 + $0x4c] sm:$0xf] %vm6173_vm9, %v6116_v10  ;;  %v6583_v10 = vrot.slane %v6581_v12, 4  ;;  %v6508_v50 = vsel %vm9518_vm11, %v6503_v2, %v11829_v38  ;;  %v6527_v38 = vrot.slane %v6526_v17, 4  ;;  %v6605_v12 = vshrl.u32 %v6418_v51, 16 }
 0x52a   : > { %6835 = vrot.lane.b32.xlu0 %v6484_v25, %s9418_s18  ;;  %6330 = vrot.lane.b32.xlu2 %v6236_v0, %s9416_s16  ;;  %v6539_v25 = vshll.u32 %v6410_v41, 16  ;;  %v6556_v40 = vsel %vm9518_vm11, %v6551_v44, %v11852_v29  ;;  %v6629_v44 = vshrl.u32 %v6421_v23, 16  ;;  %v6419_v17 = vld [vmem:[#allocation3 + $0x5c] sm:$0x1]  ;;  %s9419_s16 = smov 40  }
 0x52b   : > { %v6584_v4 = vor.u32 %v6583_v10, %v11857_v24  ;;  %v6532_v22 = vsel %vm9518_vm11, %v6527_v38, %v6531_v6  ;;  %v6597_v6 = vrot.slane %v6595_v57, 5  ;;  %v6607_v10 = vrot.slane %v6605_v12, 4  ;;  %v6429_v38 = vld [vmem:[#allocation3 + $0x84] sm:$0xf]  ;;  %v6430_v12 = vld [vmem:[#allocation3 + $0x88] sm:$0xf] }
 0x52c   : > { %v6126_v21 = vpop.permute.xlu0 %6125  ;;  %v6136_v14 = vpop.permute.xlu2 %6135  ;;  %v6541_v35 = vrot.slane %v6539_v25, 5  ;;  %v6688_v51 = vshrl.u32 %v6429_v38, 16 }
 0x52d   : > { %6198 = vst.msk [vmem:[#allocation5 + $0x60] sm:$0xf] %vm6173_vm9, %v6126_v21  ;;  %v6587_v21 = vshll.u32 %v6416_v7, 16  ;;  %v6585_v53 = vrot.slane %v6584_v4, 4  ;;  %v6627_v7 = vrot.slane %v6625_v42, 5  ;;  %v6598_v62 = vor.u32 %v6597_v6, %v6594_v43 }
 0x52e   : > { %6203 = vst.msk [vmem:[#allocation5 + $0x74] sm:$0xf] %vm6173_vm9, %v6136_v14  ;;  %6831 = vrot.lane.b32.xlu1 %v6460_v11, %s9418_s18  ;;  %v6413_v14 = vld [vmem:[#allocation3 + $0x44] sm:$0x1]  ;;  %v6542_v37 = vsel %vm9518_vm11, %v6537_v54, %v6541_v35  ;;  %v6640_v35 = vshrl.u32 %v6423_v16, 16 }
 0x52f   : > { %v6563_v45 = vshll.u32 %v6413_v14, 16  ;;  %v6589_v58 = vrot.slane %v6587_v21, 5  ;;  %v6611_v21 = vshll.u32 %v6419_v17, 16  ;;  %v6422_v54 = vld [vmem:[#allocation3 + $0x68] sm:$0x1] }
 0x530   : > { %v6122_v9 = vpop.permute.xlu1 %6121  ;;  %v6635_v23 = vshll.u32 %v6422_v54, 16  ;;  %v6642_v34 = vrot.slane %v6640_v35, 4 }
 0x531   : > { %6196 = vst.msk [vmem:[#allocation5 + $0x58] sm:$0xf] %vm6173_vm9, %v6122_v9  ;;  %v6560_v9 = vor.u32 %v6559_v36, %v11852_v29  ;;  %v6590_v55 = vsel %vm9518_vm11, %v6585_v53, %v6589_v58  ;;  %v6565_v29 = vrot.slane %v6563_v45, 5  ;;  %v6631_v36 = vrot.slane %v6629_v44, 4 }
 0x532   : > { %6841 = vrot.lane.b32.xlu0 %v6518_v31, %s9418_s18  ;;  %6833 = vrot.lane.b32.xlu2 %v6470_v3, %s9418_s18  ;;  %v6618_v31 = vrot.slane %v6616_v19, 4  ;;  %v6621_v3 = vrot.slane %v6619_v47, 5  ;;  %v6643_v19 = vshll.u32 %v6423_v16, 16  ;;  %v6599_v45 = vrot.slane %v6598_v62, 4 }
 0x533   : > { %v6561_v60 = vrot.slane %v6560_v9, 4  ;;  %v6613_v49 = vrot.slane %v6611_v21, 5  ;;  %v6632_v9 = vor.u32 %v6631_v36, %v6627_v7 }
 0x534   : > { %v6132_v13 = vpop.permute.xlu0 %6131  ;;  %v6271_v63 = vpop.permute.xlu2 %6270  ;;  %v6622_v41 = vor.u32 %v6621_v3, %v6618_v31  ;;  %v6645_v57 = vrot.slane %v6643_v19, 5  ;;  %v6428_v19 = vld [vmem:[#allocation3 + $0x80] sm:$0x1] }
 0x535   : > { %6201 = vst.msk [vmem:[#allocation5 + $0x6c] sm:$0xf] %vm6173_vm9, %v6132_v13  ;;  %v6649_v13 = vshll.u32 %v6424_v32, 16  ;;  %v6566_v25 = vsel %vm9518_vm11, %v6561_v60, %v6565_v29  ;;  %v6633_v29 = vrot.slane %v6632_v9, 4 }
 0x536   : > { %6367 = vst.msk [vmem:[#allocation5] sm:$0xf] %vm6366_vm8, %v6271_v63  ;;  %6837 = vrot.lane.b32.xlu1 %v6494_v48, %s9418_s18  ;;  %v6653_v63 = vshrl.u32 %v6424_v32, 16  ;;  %v6603_v48 = vrot.slane %v6601_v59, 5  ;;  %v6623_v30 = vrot.slane %v6622_v41, 4 }
 0x537   : > { %v6427_v59 = vld [vmem:[#allocation3 + $0x7c] sm:$0xf] }
 0x538   : > { %v6128_v0 = vpop.permute.xlu1 %6127  ;;  %v6608_v4 = vor.u32 %v6607_v10, %v6603_v48  ;;  %v6628_v47 = vsel %vm9518_vm11, %v6623_v30, %v6627_v7  ;;  %v6604_v32 = vsel %vm9518_vm11, %v6599_v45, %v6603_v48  ;;  %v6673_v43 = vshll.u32 %v6427_v59, 16  ;;  %v6438_v30 = vld [vmem:[#allocation3 + $0xa8] sm:$0xf]  ;;  %v6432_v45 = vld [vmem:[#allocation3 + $0x90] sm:$0xf] }
 0x539   : > { %6199 = vst.msk [vmem:[#allocation5 + $0x64] sm:$0xf] %vm6173_vm9, %v6128_v0  ;;  %v11887_v0 = vrot.slane %v6649_v13, 5  ;;  %v6677_v6 = vshrl.u32 %v6427_v59, 16  ;;  %v6763_v54 = vshll.u32 %v6438_v30, 16 }
 0x53a   : > { %6847 = vrot.lane.b32.xlu0 %v6556_v40, %s9418_s18  ;;  %6839 = vrot.lane.b32.xlu2 %v6508_v50, %s9418_s18  ;;  %v6655_v50 = vrot.slane %v6653_v63, 4  ;;  %v6575_v40 = vrot.slane %v6574_v5, 4  ;;  %v6609_v56 = vrot.slane %v6608_v4, 4  ;;  %v6697_v5 = vshll.u32 %v6430_v12, 16 }
 0x53b   : > { %v6675_v62 = vrot.slane %v6673_v43, 5  ;;  %v6701_v4 = vshrl.u32 %v6430_v12, 16  ;;  %v6765_v59 = vrot.slane %v6763_v54, 5 }
 0x53c   : > { %v6138_v11 = vpop.permute.xlu0 %6137  ;;  %v6277_v8 = vpop.permute.xlu2 %6276  ;;  %v6580_v61 = vsel %vm9518_vm11, %v6575_v40, %v11857_v24  ;;  %v6426_v24 = vld [vmem:[#allocation3 + $0x78] sm:$0xf]  ;;  %v6614_v63 = vsel %vm9518_vm11, %v6609_v56, %v6613_v49  ;;  %v6699_v40 = vrot.slane %v6697_v5, 5 }
 0x53d   : > { %6204 = vst.msk [vmem:[#allocation5 + $0x78] sm:$0xf] %vm6173_vm9, %v6138_v11  ;;  %v6656_v11 = vor.u32 %v6655_v50, %v11887_v0  ;;  %v6667_v60 = vshll.u32 %v6426_v24, 16 }
 0x53e   : > { %6370 = vst.msk [vmem:[#allocation5 + $0xc] sm:$0xf] %vm6366_vm8, %v6277_v8  ;;  %6843 = vrot.lane.b32.xlu1 %v6532_v22, %s9418_s18  ;;  %v6659_v8 = vshll.u32 %v6425_v52, 16  ;;  %v6691_v22 = vshll.u32 %v6429_v38, 16  ;;  %v6679_v52 = vrot.slane %v6677_v6, 4 }
 0x53f   : > { %v6657_v31 = vrot.slane %v6656_v11, 4  ;;  %v6669_v17 = vrot.slane %v6667_v60, 5  ;;  %v6434_v11 = vld [vmem:[#allocation3 + $0x98] sm:$0x1] }
 0x540   : > { %v6134_v15 = vpop.permute.xlu1 %6133  ;;  %v6661_v3 = vrot.slane %v6659_v8, 5  ;;  %v6693_v42 = vrot.slane %v6691_v22, 5  ;;  %v6760_v8 = vshrl.u32 %v6438_v30, 16  ;;  %v6703_v22 = vrot.slane %v6701_v4, 4 }
 0x541   : > { %6202 = vst.msk [vmem:[#allocation5 + $0x70] sm:$0xf] %vm6173_vm9, %v6134_v15  ;;  %v6433_v15 = vld [vmem:[#allocation3 + $0x94] sm:$0xf]  ;;  %v6731_v9 = vshll.u32 %v6434_v11, 16 }
 0x542   : > { %6853 = vrot.lane.b32.xlu0 %v6590_v55, %s9418_s18  ;;  %6845 = vrot.lane.b32.xlu2 %v6542_v37, %s9418_s18  ;;  %v6690_v37 = vrot.slane %v6688_v51, 4  ;;  %v6664_v55 = vshrl.u32 %v6426_v24, 16  ;;  %v6662_v41 = vsel %vm9518_vm11, %v6657_v31, %v6661_v3  ;;  %v6721_v48 = vshll.u32 %v6433_v15, 16  ;;  %v6431_v31 = vld [vmem:[#allocation3 + $0x8c] sm:$0x1] }
 0x543   : > { %v6725_v10 = vshrl.u32 %v6433_v15, 16  ;;  %v6680_v51 = vor.u32 %v6679_v52, %v6675_v62  ;;  %v6762_v3 = vrot.slane %v6760_v8, 4  ;;  %v6704_v60 = vor.u32 %v6703_v22, %v6699_v40  ;;  %v6437_v11 = vld [vmem:[#allocation3 + $0xa4] sm:$0x1] }
 0x544   : > { %v6273_v18 = vpop.permute.xlu0 %6272  ;;  %v6283_v2 = vpop.permute.xlu2 %6282  ;;  %v6694_v7 = vor.u32 %v6693_v42, %v6690_v37  ;;  %v6666_v44 = vrot.slane %v6664_v55, 4  ;;  %v11915_v21 = vrot.slane %v6721_v48, 5  ;;  %v6733_v6 = vrot.slane %v6731_v9, 5 }
 0x545   : > { %6368 = vst.msk [vmem:[#allocation5 + $0x4] sm:$0xf] %vm6366_vm8, %v6273_v18  ;;  %v6637_v18 = vrot.slane %v6635_v23, 5  ;;  %v6712_v23 = vshrl.u32 %v6432_v45, 16  ;;  %v6681_v55 = vrot.slane %v6680_v51, 4 }
 0x546   : > { %6373 = vst.msk [vmem:[#allocation5 + $0x18] sm:$0xf] %vm6366_vm8, %v6283_v2  ;;  %6849 = vrot.lane.b32.xlu1 %v6566_v25, %s9418_s18  ;;  %v6646_v2 = vor.u32 %v6645_v57, %v6642_v34  ;;  %v6695_v38 = vrot.slane %v6694_v7, 4  ;;  %v6670_v35 = vor.u32 %v6669_v17, %v6666_v44  ;;  %v6715_v34 = vshll.u32 %v6432_v45, 16  ;;  %v6436_v57 = vld [vmem:[#allocation3 + $0xa0] sm:$0xf] }
 0x547   : > { %v6638_v16 = vsel %vm9518_vm11, %v6633_v29, %v6637_v18  ;;  %v6745_v29 = vshll.u32 %v6436_v57, 16  ;;  %v6749_v43 = vshrl.u32 %v6436_v57, 16  ;;  %v6714_v5 = vrot.slane %v6712_v23, 4  ;;  %v6439_v18 = vld [vmem:[#allocation3 + $0xac] sm:$0xf] }
 0x548   : > { %v6140_v14 = vpop.permute.xlu1 %6139  ;;  %v6647_v36 = vrot.slane %v6646_v2, 4  ;;  %v6700_v56 = vsel %vm9518_vm11, %v6695_v38, %v6699_v40  ;;  %v6717_v48 = vrot.slane %v6715_v34, 5  ;;  %v6766_v2 = vor.u32 %v6765_v59, %v6762_v3  ;;  %v6443_v45 = vld [vmem:[#allocation3 + $0xbc] sm:$0x1]  ;;  %v6440_v34 = vld [vmem:[#allocation3 + $0xb0] sm:$0x1] }
 0x549   : > { %6205 = vst.msk [vmem:[#allocation5 + $0x7c] sm:$0xf] %vm6173_vm9, %v6140_v14  ;;  %v6727_v14 = vrot.slane %v6725_v10, 4  ;;  %v6747_v52 = vrot.slane %v6745_v29, 5  ;;  %v6751_v30 = vrot.slane %v6749_v43, 4  ;;  %v6769_v4 = vshll.u32 %v6439_v18, 16 }
 0x54a   : > { %6859 = vrot.lane.b32.xlu0 %v6628_v47, %s9418_s18  ;;  %6851 = vrot.lane.b32.xlu2 %v6580_v61, %s9418_s18  ;;  %v6652_v61 = vsel %vm9518_vm11, %v6647_v36, %v11887_v0  ;;  %v6671_v0 = vrot.slane %v6670_v35, 4  ;;  %v6718_v36 = vor.u32 %v6717_v48, %v6714_v5  ;;  %v6803_v23 = vshll.u32 %v6443_v45, 16  ;;  %v6444_v59 = vld [vmem:[#allocation3 + $0xc0] sm:$0xf]  ;;  %v6445_v5 = vld [vmem:[#allocation3 + $0xc4] sm:$0xf] }
 0x54b   : > { %v6728_v49 = vor.u32 %v6727_v14, %v11915_v21  ;;  %v6773_v14 = vshrl.u32 %v6439_v18, 16  ;;  %v6771_v51 = vrot.slane %v6769_v4, 5 }
 0x54c   : > { %v6279_v53 = vpop.permute.xlu0 %6278  ;;  %v6289_v58 = vpop.permute.xlu2 %6288  ;;  %v6676_v37 = vsel %vm9518_vm11, %v6671_v0, %v6675_v62  ;;  %v6719_v22 = vrot.slane %v6718_v36, 4  ;;  %v7492_v36 = vld [vmem:[#allocation3 + $0x1c] sm:$0xf] }
 0x54d   : > { %6371 = vst.msk [vmem:[#allocation5 + $0x10] sm:$0xf] %vm6366_vm8, %v6279_v53  ;;  %v6435_v53 = vld [vmem:[#allocation3 + $0x9c] sm:$0xf]  ;;  %v6729_v42 = vrot.slane %v6728_v49, 4  ;;  %v6752_v49 = vor.u32 %v6751_v30, %v6747_v52 }
 0x54e   : > { %6376 = vst.msk [vmem:[#allocation5 + $0x24] sm:$0xf] %vm6366_vm8, %v6289_v58  ;;  %6855 = vrot.lane.b32.xlu1 %v6604_v32, %s9418_s18  ;;  %v6683_v58 = vshll.u32 %v6428_v19, 16  ;;  %v6736_v12 = vshrl.u32 %v6435_v53, 16  ;;  %v6739_v15 = vshll.u32 %v6435_v53, 16  ;;  %v6767_v19 = vrot.slane %v6766_v2, 4 }
 0x54f   : > { %v6755_v53 = vshll.u32 %v6437_v11, 16 }
 0x550   : > { %v6275_v13 = vpop.permute.xlu1 %6274  ;;  %v6738_v7 = vrot.slane %v6736_v12, 4  ;;  %v6741_v62 = vrot.slane %v6739_v15, 5  ;;  %v6753_v12 = vrot.slane %v6752_v49, 4  ;;  %v7553_v49 = vshrl.u32 %v7492_v36, 16 }
 0x551   : > { %6369 = vst.msk [vmem:[#allocation5 + $0x8] sm:$0xf] %vm6366_vm8, %v6275_v13  ;;  %v6442_v13 = vld [vmem:[#allocation3 + $0xb8] sm:$0xf]  ;;  %v6757_v15 = vrot.slane %v6755_v53, 5 }
 0x552   : > { %6865 = vrot.lane.b32.xlu0 %v6662_v41, %s9418_s18  ;;  %6857 = vrot.lane.b32.xlu2 %v6614_v63, %s9418_s18  ;;  %v6685_v63 = vrot.slane %v6683_v58, 5  ;;  %v6707_v41 = vshll.u32 %v6431_v31, 16  ;;  %v6793_v44 = vshll.u32 %v6442_v13, 16  ;;  %v6797_v17 = vshrl.u32 %v6442_v13, 16 }
 0x553   : > { %v6742_v54 = vor.u32 %v6741_v62, %v6738_v7  ;;  %v6775_v58 = vrot.slane %v6773_v14, 4  ;;  %v6724_v31 = vsel %vm9518_vm11, %v6719_v22, %v11915_v21  ;;  %v6758_v48 = vsel %vm9518_vm11, %v6753_v12, %v6757_v15  ;;  %v7298_v12 = vld [vmem:[#allocation3 + $0x18] sm:$0xf] }
 0x554   : > { %v6285_v25 = vpop.permute.xlu0 %6284  ;;  %v6295_v50 = vpop.permute.xlu2 %6294  ;;  %v6709_v40 = vrot.slane %v6707_v41, 5  ;;  %v6811_v41 = vshll.u32 %v6444_v59, 16  ;;  %v6821_v62 = vshrl.u32 %v6445_v5, 16 }
 0x555   : > { %6374 = vst.msk [vmem:[#allocation5 + $0x1c] sm:$0xf] %vm6366_vm8, %v6285_v25  ;;  %v6734_v25 = vsel %vm9518_vm11, %v6729_v42, %v6733_v6  ;;  %v6743_v3 = vrot.slane %v6742_v54, 4  ;;  %v6779_v42 = vshll.u32 %v6440_v34, 16  ;;  %v6808_v6 = vshrl.u32 %v6444_v59, 16 }
 0x556   : > { %6379 = vst.msk [vmem:[#allocation5 + $0x30] sm:$0xf] %vm6366_vm8, %v6295_v50  ;;  %6861 = vrot.lane.b32.xlu1 %v6638_v16, %s9418_s18  ;;  %v6686_v50 = vsel %vm9518_vm11, %v6681_v55, %v6685_v63  ;;  %v6705_v16 = vrot.slane %v6704_v60, 4  ;;  %v6805_v63 = vrot.slane %v6803_v23, 5  ;;  %v7491_v59 = vld [vmem:[#allocation3 + $0x18] sm:$0xf] }
 0x557   : > { %v6748_v21 = vsel %vm9518_vm11, %v6743_v3, %v6747_v52  ;;  %v6781_v7 = vrot.slane %v6779_v42, 5  ;;  %v6960_v52 = vld [vmem:[#allocation3 + $0xc] sm:$0xe]  ;;  %v7493_v3 = vld [vmem:[#allocation3 + $0x20] sm:$0x1] }
 0x558   : > { %v6281_v47 = vpop.permute.xlu1 %6280  ;;  %v6710_v8 = vsel %vm9518_vm11, %v6705_v16, %v6709_v40  ;;  %v6817_v16 = vshll.u32 %v6445_v5, 16  ;;  %v9176_v11 = vrot.slane %v6960_v52, 9 }
 0x559   : > { %6372 = vst.msk [vmem:[#allocation5 + $0x14] sm:$0xf] %vm6366_vm8, %v6281_v47  ;;  %v11940_v47 = vrot.slane %v6793_v44, 5  ;;  %v6961_v44 = vld [vmem:[#allocation3 + $0x10] sm:$0xf] }
 0x55a   : > { %6871 = vrot.lane.b32.xlu0 %v6700_v56, %s9418_s18  ;;  %6863 = vrot.lane.b32.xlu2 %v6652_v61, %s9418_s18  ;;  %v6799_v61 = vrot.slane %v6797_v17, 4  ;;  %v6441_v56 = vld [vmem:[#allocation3 + $0xb4] sm:$0xf]  ;;  %v7058_v14 = vrot.slane %v6961_v44, 5 }
 0x55b   : > { %v6784_v57 = vshrl.u32 %v6441_v56, 16 }
 0x55c   : > { %v6291_v24 = vpop.permute.xlu0 %6290  ;;  %v6301_v32 = vpop.permute.xlu2 %6300  ;;  %v6800_v9 = vor.u32 %v6799_v61, %v11940_v47  ;;  %v6823_v61 = vrot.slane %v6821_v62, 4  ;;  %v7059_v45 = vsel %vm9964_vm1, %v9176_v11, %v7058_v14 }
 0x55d   : > { %6377 = vst.msk [vmem:[#allocation5 + $0x28] sm:$0xf] %vm6366_vm8, %v6291_v24  ;;  %v6787_v24 = vshll.u32 %v6441_v56, 16  ;;  %v6786_v29 = vrot.slane %v6784_v57, 4  ;;  %v7549_v56 = vshll.u32 %v7492_v36, 16 }
 0x55e   : > { %6382 = vst.msk [vmem:[#allocation5 + $0x3c] sm:$0xf] %vm6366_vm8, %v6301_v32  ;;  %6867 = vrot.lane.b32.xlu1 %v6676_v37, %s9418_s18  ;;  %v6772_v32 = vsel %vm9518_vm11, %v6767_v19, %v6771_v51  ;;  %v6776_v37 = vor.u32 %v6775_v58, %v6771_v51  ;;  %v6801_v13 = vrot.slane %v6800_v9, 4  ;;  %v6819_v19 = vrot.slane %v6817_v16, 5 }
 0x55f   : > { %v6789_v43 = vrot.slane %v6787_v24, 5  ;;  %v11981_v23 = vrot.slane %v7549_v56, 5 }
 0x560   : > { %v6287_v10 = vpop.permute.xlu1 %6286  ;;  %v6806_v18 = vsel %vm9518_vm11, %v6801_v13, %v6805_v63  ;;  %v6777_v2 = vrot.slane %v6776_v37, 4  ;;  %v6824_v53 = vor.u32 %v6823_v61, %v6819_v19  ;;  %v7060_v37 = vrot.slane %v7058_v14, 4  ;;  %v7299_v14 = vld [vmem:[#allocation3 + $0x1c] sm:$0xf] }
 0x561   : > { %6375 = vst.msk [vmem:[#allocation5 + $0x20] sm:$0xf] %vm6366_vm8, %v6287_v10  ;;  %v6790_v17 = vor.u32 %v6789_v43, %v6786_v29  ;;  %v7559_v13 = vshll.u32 %v7493_v3, 16  ;;  %v7540_v63 = vshrl.u32 %v7491_v59, 16  ;;  %v7543_v29 = vshll.u32 %v7491_v59, 16 }
 0x562   : > { %6877 = vrot.lane.b32.xlu0 %v6734_v25, %s9418_s18  ;;  %6869 = vrot.lane.b32.xlu2 %v6686_v50, %s9418_s18  ;;  %v6810_v25 = vrot.slane %v6808_v6, 4  ;;  %v6813_v50 = vrot.slane %v6811_v41, 5  ;;  %v6782_v4 = vsel %vm9518_vm11, %v6777_v2, %v6781_v7  ;;  %v6825_v57 = vrot.slane %v6824_v53, 4  ;;  %v6963_v6 = vld [vmem:[#allocation3 + $0x18] sm:$0xe] }
 0x563   : > { %v7542_v2 = vrot.slane %v7540_v63, 4  ;;  %v7545_v7 = vrot.slane %v7543_v29, 5  ;;  %v7496_v63 = vld [vmem:[#allocation3 + $0x2c] sm:$0x1]  ;;  %v7300_v29 = vld [vmem:[#allocation3 + $0x24] sm:$0xf] }
 0x564   : > { %v6297_v38 = vpop.permute.xlu0 %6296  ;;  %v6307_v35 = vpop.permute.xlu2 %6306 }
 0x565   : > { %6380 = vst.msk [vmem:[#allocation5 + $0x34] sm:$0xf] %vm6366_vm8, %v6297_v38  ;;  %v6791_v38 = vrot.slane %v6790_v17, 4  ;;  %v7494_v17 = vld [vmem:[#allocation3 + $0x24] sm:$0xf]  ;;  %v7546_v16 = vor.u32 %v7545_v7, %v7542_v2 }
 0x566   : > { %6385 = vst.msk [vmem:[#allocation5 + $0x48] sm:$0xf] %vm6366_vm8, %v6307_v35  ;;  %6873 = vrot.lane.b32.xlu1 %v6710_v8, %s9418_s18  ;;  %v6814_v35 = vor.u32 %v6813_v50, %v6810_v25  ;;  %v6446_v8 = vld [vmem:[#allocation3 + $0xc8] sm:$0x1]  ;;  %v7564_v62 = vshrl.u32 %v7494_v17, 16  ;;  %v7567_v52 = vshll.u32 %v7494_v17, 16 }
 0x567   : > { %v6796_v51 = vsel %vm9518_vm11, %v6791_v38, %v11940_v47  ;;  %v6827_v58 = vshll.u32 %v6446_v8, 16  ;;  %v7555_v47 = vrot.slane %v7553_v49, 4  ;;  %v8053_v38 = vld [vmem:[#allocation3 + $0x1c] sm:$0xf]  ;;  %v7547_v61 = vrot.slane %v7546_v16, 4 }
 0x568   : > { %v6293_v0 = vpop.permute.xlu1 %6292  ;;  %v6815_v22 = vrot.slane %v6814_v35, 4  ;;  %v7495_v35 = vld [vmem:[#allocation3 + $0x28] sm:$0xf]  ;;  %v7566_v11 = vrot.slane %v7564_v62, 4  ;;  %v7569_v8 = vrot.slane %v7567_v52, 5 }
 0x569   : > { %6378 = vst.msk [vmem:[#allocation5 + $0x2c] sm:$0xf] %vm6366_vm8, %v6293_v0  ;;  %v6829_v24 = vrot.slane %v6827_v58, 5  ;;  %v7556_v42 = vor.u32 %v7555_v47, %v11981_v23  ;;  %v7552_v49 = vsel %vm9518_vm11, %v7547_v61, %v11981_v23  ;;  %v7577_v47 = vshrl.u32 %v7495_v35, 16  ;;  %v8056_v23 = vld [vmem:[#allocation3 + $0x28] sm:$0xf] }
 0x56a   : > { %6883 = vrot.lane.b32.xlu0 %v6772_v32, %s9418_s18  ;;  %6875 = vrot.lane.b32.xlu2 %v6724_v31, %s9418_s18  ;;  %v6820_v34 = vsel %vm9518_vm11, %v6815_v22, %v6819_v19  ;;  %v6962_v31 = vld [vmem:[#allocation3 + $0x14] sm:$0x1]  ;;  %v7573_v22 = vshll.u32 %v7495_v35, 16  ;;  %v7570_v58 = vor.u32 %v7569_v8, %v7566_v11  ;;  %v8055_v16 = vld [vmem:[#allocation3 + $0x24] sm:$0xe] }
 0x56b   : > { %v6830_v15 = vsel %vm9518_vm11, %v6825_v57, %v6829_v24  ;;  %v7557_v5 = vrot.slane %v7556_v42, 4  ;;  %v7579_v42 = vrot.slane %v7577_v47, 4  ;;  %v7497_v35 = vld [vmem:[#allocation3 + $0x30] sm:$0xf] }
 0x56c   : > { %v6303_v55 = vpop.permute.xlu0 %6302  ;;  %v6313_v60 = vpop.permute.xlu2 %6312  ;;  %v7575_v24 = vrot.slane %v7573_v22, 5 }
 0x56d   : > { %6383 = vst.msk [vmem:[#allocation5 + $0x40] sm:$0xf] %vm6366_vm8, %v6303_v55  ;;  %v6964_v55 = vld [vmem:[#allocation3 + $0x1c] sm:$0xf] }
 0x56e   : > { %6388 = vst.msk [vmem:[#allocation5 + $0x54] sm:$0xf] %vm6366_vm8, %v6313_v60  ;;  %6879 = vrot.lane.b32.xlu1 %v6748_v21, %s9418_s18  ;;  %v7061_v60 = vrot.slane %v6962_v31, 5  ;;  %v7571_v31 = vrot.slane %v7570_v58, 4 }
 0x570   : > { %v6299_v10 = vpop.permute.xlu1 %6298  ;;  %v7062_v41 = vsel %vm9964_vm1, %v7060_v37, %v7061_v60  ;;  %v8157_v37 = vrot.slane %v8056_v23, 5 }
 0x571   : > { %6381 = vst.msk [vmem:[#allocation5 + $0x38] sm:$0xf] %vm6366_vm8, %v6299_v10  ;;  %v7561_v10 = vrot.slane %v7559_v13, 5  ;;  %v8057_v13 = vld [vmem:[#allocation3 + $0x2c] sm:$0x1] }
 0x572   : > { %6889 = vrot.lane.b32.xlu0 %v6806_v18, %s9418_s18  ;;  %6881 = vrot.lane.b32.xlu2 %v6758_v48, %s9418_s18  ;;  %v7065_v48 = vrot.slane %v6964_v55, 5  ;;  %v9177_v18 = vrot.slane %v6963_v6, 9  ;;  %v7498_v6 = vld [vmem:[#allocation3 + $0x34] sm:$0xf] }
 0x573   : > { %v7562_v25 = vsel %vm9518_vm11, %v7557_v5, %v7561_v10  ;;  %v7583_v5 = vshll.u32 %v7496_v63, 16  ;;  %v7301_v10 = vld [vmem:[#allocation3 + $0x28] sm:$0xf]  ;;  %v7597_v7 = vshll.u32 %v7498_v6, 16 }
 0x574   : > { %v6309_v30 = vpop.permute.xlu0 %6308  ;;  %v6319_v40 = vpop.permute.xlu2 %6318  ;;  %v7066_v50 = vsel %vm9964_vm1, %v9177_v18, %v7065_v48  ;;  %v7067_v36 = vrot.slane %v7065_v48, 4 }
 0x575   : > { %6386 = vst.msk [vmem:[#allocation5 + $0x4c] sm:$0xf] %vm6366_vm8, %v6309_v30  ;;  %v7585_v17 = vrot.slane %v7583_v5, 5  ;;  %v7599_v52 = vrot.slane %v7597_v7, 5 }
 0x576   : > { %6391 = vst.msk [vmem:[#allocation5 + $0x60] sm:$0xf] %vm6366_vm8, %v6319_v40  ;;  %6885 = vrot.lane.b32.xlu1 %v6782_v4, %s9418_s18  ;;  %v6965_v4 = vld [vmem:[#allocation3 + $0x20] sm:$0x1] }
 0x577   : > { %v7068_v19 = vrot.slane %v6965_v4, 5  ;;  %v9193_v4 = vrot.slane %v8055_v16, 9 }
 0x578   : > { %v6305_v54 = vpop.permute.xlu1 %6304 }
 0x579   : > { %6384 = vst.msk [vmem:[#allocation5 + $0x44] sm:$0xf] %vm6366_vm8, %v6305_v54  ;;  %v7069_v56 = vsel %vm9964_vm1, %v7067_v36, %v7068_v19  ;;  %v6966_v36 = vld [vmem:[#allocation3 + $0x24] sm:$0xe]  ;;  %v7302_v19 = vld [vmem:[#allocation3 + $0x30] sm:$0xf]  ;;  %v8158_v61 = vsel %vm9964_vm1, %v9193_v4, %v8157_v37 }
 0x57a   : > { %7168 = vrot.lane.b32.xlu0 %v7059_v45, %s9419_s16  ;;  %6887 = vrot.lane.b32.xlu2 %v6796_v51, %s9418_s18  ;;  %v8052_v45 = vld [vmem:[#allocation3 + $0x18] sm:$0xe]  ;;  %v8150_v51 = vrot.slane %v8053_v38, 5  ;;  %v7499_v38 = vld [vmem:[#allocation3 + $0x38] sm:$0x1] }
 0x57b   : > { %v9192_v53 = vrot.slane %v8052_v45, 9  ;;  %v7607_v45 = vshll.u32 %v7499_v38, 16  ;;  %v8062_v38 = vld [vmem:[#allocation3 + $0x40] sm:$0xf] }
 0x57c   : > { %v6315_v0 = vpop.permute.xlu0 %6314  ;;  %v6325_v9 = vpop.permute.xlu2 %6324 }
 0x57d   : > { %6389 = vst.msk [vmem:[#allocation5 + $0x58] sm:$0xf] %vm6366_vm8, %v6315_v0  ;;  %v8151_v57 = vsel %vm9964_vm1, %v9192_v53, %v8150_v51  ;;  %v6968_v53 = vld [vmem:[#allocation3 + $0x2c] sm:$0x1] }
 0x57e   : > { %6394 = vst.msk [vmem:[#allocation5 + $0x6c] sm:$0xf] %vm6366_vm8, %v6325_v9  ;;  %6891 = vrot.lane.b32.xlu1 %v6820_v34, %s9418_s18  ;;  %v8054_v34 = vld [vmem:[#allocation3 + $0x20] sm:$0x1] }
 0x57f   : > { %v8153_v3 = vrot.slane %v8054_v34, 5  ;;  %v7609_v34 = vrot.slane %v7607_v45, 5 }
 0x580   : > { %v6311_v32 = vpop.permute.xlu1 %6310 }
 0x581   : > { %6387 = vst.msk [vmem:[#allocation5 + $0x50] sm:$0xf] %vm6366_vm8, %v6311_v32  ;;  %v8152_v32 = vrot.slane %v8150_v51, 4 }
 0x582   : > { %7362 = vrot.lane.b32.xlu0 %v7298_v12, %s9420_s22  ;;  %6893 = vrot.lane.b32.xlu2 %v6830_v15, %s9418_s18  ;;  %s9421_s18 = smov 56   ;;  %v7576_v12 = vsel %vm9518_vm11, %v7571_v31, %v7575_v24 }
 0x583   : > { %v8154_v15 = vsel %vm9964_vm1, %v8152_v32, %v8153_v3  ;;  %v6970_v3 = vld [vmem:[#allocation3 + $0x34] sm:$0xf] }
 0x584   : > { %v6321_v43 = vpop.permute.xlu0 %6320  ;;  %v6331_v21 = vpop.permute.xlu2 %6330 }
 0x585   : > { %6392 = vst.msk [vmem:[#allocation5 + $0x64] sm:$0xf] %vm6366_vm8, %v6321_v43  ;;  %v8159_v43 = vrot.slane %v8157_v37, 4  ;;  %v6969_v37 = vld [vmem:[#allocation3 + $0x30] sm:$0xe] }
 0x586   : > { %6397 = vst.msk [vmem:[#allocation5 + $0x78] sm:$0xf] %vm6366_vm8, %v6331_v21  ;;  %7170 = vrot.lane.b32.xlu1 %v7062_v41, %s9419_s16  ;;  %v7580_v21 = vor.u32 %v7579_v42, %v7575_v24  ;;  %v8160_v41 = vrot.slane %v8057_v13, 5  ;;  %v7303_v42 = vld [vmem:[#allocation3 + $0x34] sm:$0xf]  ;;  %v9179_v13 = vrot.slane %v6969_v37, 9 }
 0x587   : > { %v6974_v37 = vld [vmem:[#allocation3 + $0x44] sm:$0x1] }
 0x588   : > { %v6317_v44 = vpop.permute.xlu1 %6316  ;;  %v8161_v18 = vsel %vm9964_vm1, %v8159_v43, %v8160_v41  ;;  %v7581_v2 = vrot.slane %v7580_v21, 4  ;;  %v8058_v43 = vld [vmem:[#allocation3 + $0x30] sm:$0xe] }
 0x589   : > { %6390 = vst.msk [vmem:[#allocation5 + $0x5c] sm:$0xf] %vm6366_vm8, %v6317_v44  ;;  %v7601_v44 = vshrl.u32 %v7498_v6, 16  ;;  %v9194_v5 = vrot.slane %v8058_v43, 9 }
 0x58a   : > { %7925 = vrot.lane.b32.xlu0 %v7562_v25, %s9421_s18  ;;  %7172 = vrot.lane.b32.xlu2 %v7066_v50, %s9419_s16  ;;  %v7586_v62 = vsel %vm9518_vm11, %v7581_v2, %v7585_v17  ;;  %v7500_v2 = vld [vmem:[#allocation3 + $0x3c] sm:$0xf]  ;;  %v7501_v17 = vld [vmem:[#allocation3 + $0x40] sm:$0xf] }
 0x58b   : > { %v7615_v16 = vshll.u32 %v7500_v2, 16 }
 0x58c   : > { %v6327_v30 = vpop.permute.xlu0 %6326  ;;  %v6834_v40 = vpop.permute.xlu2 %6833 }
 0x58d   : > { %6395 = vst.msk [vmem:[#allocation5 + $0x70] sm:$0xf] %vm6366_vm8, %v6327_v30  ;;  %v7603_v30 = vrot.slane %v7601_v44, 4 }
 0x58e   : > { %6929 = vst.msk [vmem:[#allocation5 + $0x4] sm:$0xf] %vm6927_vm12, %v6834_v40  ;;  %7364 = vrot.lane.b32.xlu1 %v7299_v14, %s9420_s22  ;;  %v6967_v40 = vld [vmem:[#allocation3 + $0x28] sm:$0xf] }
 0x58f   : > { %v7072_v11 = vrot.slane %v6967_v40, 5  ;;  %v7604_v8 = vor.u32 %v7603_v30, %v7599_v52  ;;  %v6971_v30 = vld [vmem:[#allocation3 + $0x38] sm:$0x1] }
 0x590   : > { %v6323_v54 = vpop.permute.xlu1 %6322 }
 0x591   : > { %6393 = vst.msk [vmem:[#allocation5 + $0x68] sm:$0xf] %vm6366_vm8, %v6323_v54  ;;  %v9178_v54 = vrot.slane %v6966_v36, 9  ;;  %v7625_v36 = vshrl.u32 %v7501_v17, 16 }
 0x592   : > { %7174 = vrot.lane.b32.xlu0 %v7069_v56, %s9419_s16  ;;  %7923 = vrot.lane.b32.xlu2 %v7552_v49, %s9421_s18  ;;  %v7588_v56 = vshrl.u32 %v7497_v35, 16  ;;  %v7591_v49 = vshll.u32 %v7497_v35, 16  ;;  %v7082_v35 = vrot.slane %v6971_v30, 5 }
 0x593   : > { %v7073_v58 = vsel %vm9964_vm1, %v9178_v54, %v7072_v11  ;;  %v8061_v54 = vld [vmem:[#allocation3 + $0x3c] sm:$0xe] }
 0x594   : > { %v6333_v0 = vpop.permute.xlu0 %6332  ;;  %v6840_v9 = vpop.permute.xlu2 %6839  ;;  %v7590_v24 = vrot.slane %v7588_v56, 4  ;;  %v7593_v47 = vrot.slane %v7591_v49, 5  ;;  %v8171_v56 = vrot.slane %v8062_v38, 5 }
 0x595   : > { %6398 = vst.msk [vmem:[#allocation5 + $0x7c] sm:$0xf] %vm6366_vm8, %v6333_v0  ;;  %v7605_v0 = vrot.slane %v7604_v8, 4 }
 0x596   : > { %6932 = vst.msk [vmem:[#allocation5 + $0x10] sm:$0xf] %vm6927_vm12, %v6840_v9  ;;  %8260 = vrot.lane.b32.xlu1 %v8151_v57, %s9422_s23  ;;  %v7074_v9 = vrot.slane %v7072_v11, 4  ;;  %v7075_v57 = vrot.slane %v6968_v53, 5  ;;  %v9195_v53 = vrot.slane %v8061_v54, 9 }
 0x597   : > { %v7610_v23 = vsel %vm9518_vm11, %v7605_v0, %v7609_v34  ;;  %v7503_v34 = vld [vmem:[#allocation3 + $0x48] sm:$0xf]  ;;  %v7505_v54 = vld [vmem:[#allocation3 + $0x50] sm:$0x1] }
 0x598   : > { %v6329_v59 = vpop.permute.xlu1 %6328  ;;  %v7076_v31 = vsel %vm9964_vm1, %v7074_v9, %v7075_v57  ;;  %v7502_v9 = vld [vmem:[#allocation3 + $0x44] sm:$0x1]  ;;  %v8172_v57 = vsel %vm9964_vm1, %v9195_v53, %v8171_v56  ;;  %v7655_v53 = vshll.u32 %v7505_v54, 16 }
 0x599   : > { %6396 = vst.msk [vmem:[#allocation5 + $0x74] sm:$0xf] %vm6366_vm8, %v6329_v59  ;;  %v7594_v59 = vor.u32 %v7593_v47, %v7590_v24  ;;  %v7304_v24 = vld [vmem:[#allocation3 + $0x3c] sm:$0xf] }
 0x59a   : > { %7927 = vrot.lane.b32.xlu0 %v7576_v12, %s9421_s18  ;;  %8262 = vrot.lane.b32.xlu2 %v8154_v15, %s9422_s23 }
 0x59b   : > { %v7595_v63 = vrot.slane %v7594_v59, 4  ;;  %v7639_v59 = vshll.u32 %v7503_v34, 16 }
 0x59c   : > { %v6836_v55 = vpop.permute.xlu0 %6835  ;;  %v6846_v60 = vpop.permute.xlu2 %6845 }
 0x59d   : > { %6930 = vst.msk [vmem:[#allocation5 + $0x8] sm:$0xf] %vm6927_vm12, %v6836_v55  ;;  %v7079_v55 = vrot.slane %v6970_v3, 5  ;;  %v7600_v6 = vsel %vm9518_vm11, %v7595_v63, %v7599_v52  ;;  %v7305_v52 = vld [vmem:[#allocation3 + $0x40] sm:$0xf]  ;;  %v7636_v3 = vshrl.u32 %v7503_v34, 16 }
 0x59e   : > { %6935 = vst.msk [vmem:[#allocation5 + $0x1c] sm:$0xf] %vm6927_vm12, %v6846_v60  ;;  %7366 = vrot.lane.b32.xlu1 %v7300_v29, %s9420_s22  ;;  %v8059_v60 = vld [vmem:[#allocation3 + $0x34] sm:$0xf]  ;;  %v7089_v63 = vrot.slane %v6974_v37, 5 }
 0x59f   : > { %v7080_v21 = vsel %vm9964_vm1, %v9179_v13, %v7079_v55  ;;  %v8164_v41 = vrot.slane %v8059_v60, 5  ;;  %v7081_v4 = vrot.slane %v7079_v55, 4  ;;  %v7504_v13 = vld [vmem:[#allocation3 + $0x4c] sm:$0xf]  ;;  %v7638_v43 = vrot.slane %v7636_v3, 4 }
 0x5a0   : > { %v6832_v48 = vpop.permute.xlu1 %6831  ;;  %v7307_v34 = vld [vmem:[#allocation3 + $0x4c] sm:$0xf] }
 0x5a1   : > { %6928 = vst.msk [vmem:[#allocation5] sm:$0xf] %vm6927_vm12, %v6832_v48  ;;  %v8165_v7 = vsel %vm9964_vm1, %v9194_v5, %v8164_v41  ;;  %v8166_v44 = vrot.slane %v8164_v41, 4  ;;  %v7083_v45 = vsel %vm9964_vm1, %v7081_v4, %v7082_v35  ;;  %v8063_v41 = vld [vmem:[#allocation3 + $0x44] sm:$0x1] }
 0x5a2   : > { %8266 = vrot.lane.b32.xlu0 %v8161_v18, %s9422_s23  ;;  %7368 = vrot.lane.b32.xlu2 %v7301_v10, %s9420_s22  ;;  %v8060_v18 = vld [vmem:[#allocation3 + $0x38] sm:$0x1] }
 0x5a4   : > { %v6842_v25 = vpop.permute.xlu0 %6841  ;;  %v6852_v50 = vpop.permute.xlu2 %6851 }
 0x5a5   : > { %6933 = vst.msk [vmem:[#allocation5 + $0x14] sm:$0xf] %vm6927_vm12, %v6842_v25  ;;  %v8167_v25 = vrot.slane %v8060_v18, 5  ;;  %v7645_v18 = vshll.u32 %v7504_v13, 16 }
 0x5a6   : > { %6938 = vst.msk [vmem:[#allocation5 + $0x28] sm:$0xf] %vm6927_vm12, %v6852_v50  ;;  %7929 = vrot.lane.b32.xlu1 %v7586_v62, %s9421_s18  ;;  %v7612_v50 = vshrl.u32 %v7500_v2, 16  ;;  %v8174_v2 = vrot.slane %v8063_v41, 5  ;;  %v7308_v41 = vld [vmem:[#allocation3 + $0x54] sm:$0xf] }
 0x5a7   : > { %v8168_v40 = vsel %vm9964_vm1, %v8166_v44, %v8167_v25  ;;  %v6972_v25 = vld [vmem:[#allocation3 + $0x3c] sm:$0xe] }
 0x5a8   : > { %v6838_v14 = vpop.permute.xlu1 %6837 }
 0x5a9   : > { %6931 = vst.msk [vmem:[#allocation5 + $0xc] sm:$0xf] %vm6927_vm12, %v6838_v14  ;;  %v7621_v14 = vshll.u32 %v7501_v17, 16 }
 0x5aa   : > { %7370 = vrot.lane.b32.xlu0 %v7302_v19, %s9420_s22  ;;  %8264 = vrot.lane.b32.xlu2 %v8158_v61, %s9422_s23  ;;  %v7614_v19 = vrot.slane %v7612_v50, 4  ;;  %v7617_v61 = vrot.slane %v7615_v16, 5  ;;  %v7647_v16 = vrot.slane %v7645_v18, 5 }
 0x5ab   : > { %v7623_v49 = vrot.slane %v7621_v14, 5 }
 0x5ac   : > { %v6848_v51 = vpop.permute.xlu0 %6847  ;;  %v6858_v22 = vpop.permute.xlu2 %6857 }
 0x5ad   : > { %6936 = vst.msk [vmem:[#allocation5 + $0x20] sm:$0xf] %vm6927_vm12, %v6848_v51  ;;  %v7627_v51 = vrot.slane %v7625_v36, 4 }
 0x5ae   : > { %6941 = vst.msk [vmem:[#allocation5 + $0x34] sm:$0xf] %vm6927_vm12, %v6858_v22  ;;  %7176 = vrot.lane.b32.xlu1 %v7073_v58, %s9419_s16  ;;  %v6973_v22 = vld [vmem:[#allocation3 + $0x40] sm:$0xf]  ;;  %v7618_v58 = vor.u32 %v7617_v61, %v7614_v19  ;;  %v8066_v19 = vld [vmem:[#allocation3 + $0x50] sm:$0x1] }
 0x5af   : > { %v7086_v47 = vrot.slane %v6973_v22, 5  ;;  %v8429_v22 = vld [vmem:[%s12800_s3 + $0x20] sm:$0xf] }
 0x5b0   : > { %v6844_v32 = vpop.permute.xlu1 %6843 }
 0x5b1   : > { %6934 = vst.msk [vmem:[#allocation5 + $0x18] sm:$0xf] %vm6927_vm12, %v6844_v32  ;;  %v7628_v32 = vor.u32 %v7627_v51, %v7623_v49  ;;  %v7088_v55 = vrot.slane %v7086_v47, 4  ;;  %v7507_v51 = vld [vmem:[#allocation3 + $0x58] sm:$0xf] }
 0x5b2   : > { %7933 = vrot.lane.b32.xlu0 %v7610_v23, %s9421_s18  ;;  %7178 = vrot.lane.b32.xlu2 %v7076_v31, %s9419_s16  ;;  %v7619_v23 = vrot.slane %v7618_v58, 4  ;;  %v7631_v31 = vshll.u32 %v7502_v9, 16  ;;  %v8527_v58 = vunpack.c.l.b16 %v8429_v22  ;;  %v8068_v22 = vld [vmem:[#allocation3 + $0x58] sm:$0xf] }
 0x5b3   : > { %v7629_v60 = vrot.slane %v7628_v32, 4  ;;  %v7090_v5 = vsel %vm9964_vm1, %v7088_v55, %v7089_v63  ;;  %v6975_v63 = vld [vmem:[#allocation3 + $0x48] sm:$0xe] }
 0x5b4   : > { %v6854_v12 = vpop.permute.xlu0 %6853  ;;  %v6864_v15 = vpop.permute.xlu2 %6863  ;;  %v8532_v32 = vpack.c.b16 %v8527_v58, %v8527_v58  ;;  %v9181_v18 = vrot.slane %v6975_v63, 9  ;;  %v6980_v63 = vld [vmem:[#allocation3 + $0x5c] sm:$0x1] }
 0x5b5   : > { %6939 = vst.msk [vmem:[#allocation5 + $0x2c] sm:$0xf] %vm6927_vm12, %v6854_v12 }
 0x5b6   : > { %6944 = vst.msk [vmem:[#allocation5 + $0x40] sm:$0xf] %vm6927_vm12, %v6864_v15  ;;  %7372 = vrot.lane.b32.xlu1 %v7303_v42, %s9420_s22  ;;  %v7624_v42 = vsel %vm9518_vm11, %v7619_v23, %v7623_v49  ;;  %v7657_v23 = vrot.slane %v7655_v53, 5 }
 0x5b8   : > { %v6850_v29 = vpop.permute.xlu1 %6849 }
 0x5b9   : > { %6937 = vst.msk [vmem:[#allocation5 + $0x24] sm:$0xf] %vm6927_vm12, %v6850_v29  ;;  %v7633_v29 = vrot.slane %v7631_v31, 5  ;;  %v8588_v31 = vsel %vm8586_vm7, %v8532_v32, 0 }
 0x5ba   : > { %7180 = vrot.lane.b32.xlu0 %v7080_v21, %s9419_s16  ;;  %7931 = vrot.lane.b32.xlu2 %v7600_v6, %s9421_s18  ;;  %v7641_v21 = vrot.slane %v7639_v59, 5 }
 0x5bb   : > { %8593 = vmatpush.bf16.msra.mxu2 %v8588_v31  ;;  %9366 = vmatpush.bf16.msra.mxu3 %v8588_v31  ;;  %v8069_v31 = vld [vmem:[#allocation3 + $0x5c] sm:$0x1] }
 0x5bc   : > { %v6860_v48 = vpop.permute.xlu0 %6859  ;;  %v6870_v10 = vpop.permute.xlu2 %6869 }
 0x5bd   : > { %6942 = vst.msk [vmem:[#allocation5 + $0x38] sm:$0xf] %vm6927_vm12, %v6860_v48  ;;  %v7634_v48 = vsel %vm9518_vm11, %v7629_v60, %v7633_v29  ;;  %v6976_v60 = vld [vmem:[#allocation3 + $0x4c] sm:$0xf] }
 0x5be   : > { %6947 = vst.msk [vmem:[#allocation5 + $0x4c] sm:$0xf] %vm6927_vm12, %v6870_v10  ;;  %8268 = vrot.lane.b32.xlu1 %v8165_v7, %s9422_s23  ;;  %v8173_v10 = vrot.slane %v8171_v56, 4  ;;  %v7642_v7 = vor.u32 %v7641_v21, %v7638_v43  ;;  %v8181_v56 = vrot.slane %v8066_v19, 5  ;;  %v7508_v43 = vld [vmem:[#allocation3 + $0x5c] sm:$0x1] }
 0x5bf   : > { %v7506_v21 = vld [vmem:[#allocation3 + $0x54] sm:$0xf] }
 0x5c0   : > { %v6856_v62 = vpop.permute.xlu1 %6855  ;;  %v8175_v50 = vsel %vm9964_vm1, %v8173_v10, %v8174_v2  ;;  %v7643_v30 = vrot.slane %v7642_v7, 4  ;;  %v7679_v2 = vshll.u32 %v7508_v43, 16  ;;  %v7660_v7 = vshrl.u32 %v7506_v21, 16  ;;  %v7311_v43 = vld [vmem:[#allocation3 + $0x64] sm:$0xf] }
 0x5c1   : > { %6940 = vst.msk [vmem:[#allocation5 + $0x30] sm:$0xf] %vm6927_vm12, %v6856_v62  ;;  %v7649_v62 = vshrl.u32 %v7504_v13, 16 }
 0x5c2   : > { %7376 = vrot.lane.b32.xlu0 %v7305_v52, %s9420_s22  ;;  %8270 = vrot.lane.b32.xlu2 %v8168_v40, %s9422_s23  ;;  %v12104_v52 = vld [vmem:[#allocation3 + $0x4c] sm:$0xf]  ;;  %v9180_v40 = vrot.slane %v6972_v25, 9  ;;  %v7648_v36 = vsel %vm9518_vm11, %v7643_v30, %v7647_v16 }
 0x5c3   : > { %v8178_v14 = vrot.slane %v12104_v52, 5  ;;  %v7651_v35 = vrot.slane %v7649_v62, 4 }
 0x5c4   : > { %v6866_v11 = vpop.permute.xlu0 %6865  ;;  %v6876_v8 = vpop.permute.xlu2 %6875  ;;  %v7087_v38 = vsel %vm9964_vm1, %v9180_v40, %v7086_v47  ;;  %v7673_v47 = vshrl.u32 %v7507_v51, 16  ;;  %v7681_v40 = vrot.slane %v7679_v2, 5 }
 0x5c5   : > { %6945 = vst.msk [vmem:[#allocation5 + $0x44] sm:$0xf] %vm6927_vm12, %v6866_v11  ;;  %v7652_v49 = vor.u32 %v7651_v35, %v7647_v16  ;;  %v9359_v16 = vld [vmem:[%s12800_s3 + $0x8] sm:$0xff]  ;;  %v9358_v35 = vld [vmem:[%s12800_s3] sm:$0xff] }
 0x5c6   : > { %6950 = vst.msk [vmem:[#allocation5 + $0x58] sm:$0xf] %vm6927_vm12, %v6876_v8  ;;  %7182 = vrot.lane.b32.xlu1 %v7083_v45, %s9419_s16  ;;  %v8180_v8 = vrot.slane %v8178_v14, 4  ;;  %v7306_v45 = vld [vmem:[#allocation3 + $0x48] sm:$0xf]  ;;  %v7675_v55 = vrot.slane %v7673_v47, 4 }
 0x5c8   : > { %v6862_v0 = vpop.permute.xlu1 %6861  ;;  %v8182_v9 = vsel %vm9964_vm1, %v8180_v8, %v8181_v56  ;;  %v6978_v56 = vld [vmem:[#allocation3 + $0x54] sm:$0xe] }
 0x5c9   : > { %6943 = vst.msk [vmem:[#allocation5 + $0x3c] sm:$0xf] %vm6927_vm12, %v6862_v0  ;;  %v9182_v53 = vrot.slane %v6978_v56, 9 }
 0x5ca   : > { %8272 = vrot.lane.b32.xlu0 %v8172_v57, %s9422_s23  ;;  %7374 = vrot.lane.b32.xlu2 %v7304_v24, %s9420_s22  ;;  %v7653_v57 = vrot.slane %v7652_v49, 4  ;;  %v7669_v24 = vshll.u32 %v7507_v51, 16  ;;  %v7309_v49 = vld [vmem:[#allocation3 + $0x58] sm:$0xf] }
 0x5cc   : > { %v6872_v12 = vpop.permute.xlu0 %6871  ;;  %v6882_v15 = vpop.permute.xlu2 %6881  ;;  %v7658_v37 = vsel %vm9518_vm11, %v7653_v57, %v7657_v23 }
 0x5cd   : > { %6948 = vst.msk [vmem:[#allocation5 + $0x50] sm:$0xf] %vm6927_vm12, %v6872_v12  ;;  %v8064_v12 = vld [vmem:[#allocation3 + $0x48] sm:$0xe] }
 0x5ce   : > { %6953 = vst.msk [vmem:[#allocation5 + $0x64] sm:$0xf] %vm6927_vm12, %v6882_v15  ;;  %7935 = vrot.lane.b32.xlu1 %v7624_v42, %s9421_s18  ;;  %v9361_v15 = vld [vmem:[%s12800_s3 + $0x18] sm:$0xff]  ;;  %v12133_v42 = vrot.slane %v7669_v24, 5  ;;  %v9196_v13 = vrot.slane %v8064_v12, 9  ;;  %v8185_v24 = vrot.slane %v8068_v22, 5 }
 0x5cf   : > { %8594 = vmatpush.bf16.msra.mxu2 %v9361_v15  ;;  %9367 = vmatpush.bf16.msra.mxu3 %v9361_v15 }
 0x5d0   : > { %v6868_v6 = vpop.permute.xlu1 %6867  ;;  %v7676_v10 = vor.u32 %v7675_v55, %v12133_v42  ;;  %v8187_v15 = vrot.slane %v8185_v24, 4 }
 0x5d1   : > { %6946 = vst.msk [vmem:[#allocation5 + $0x48] sm:$0xf] %vm6927_vm12, %v6868_v6  ;;  %v9360_v6 = vld [vmem:[%s12800_s3 + $0x10] sm:$0xff] }
 0x5d2   : > { %7186 = vrot.lane.b32.xlu0 %v7090_v5, %s9419_s16  ;;  %7937 = vrot.lane.b32.xlu2 %v7634_v48, %s9421_s18  ;;  %v8179_v5 = vsel %vm9964_vm1, %v9196_v13, %v8178_v14  ;;  %v7093_v48 = vrot.slane %v6976_v60, 5  ;;  %v7677_v52 = vrot.slane %v7676_v10, 4  ;;  %v7662_v14 = vrot.slane %v7660_v7, 4 }
 0x5d3   : > { %8595 = vmatpush.bf16.msra.mxu2 %v9360_v6  ;;  %9368 = vmatpush.bf16.msra.mxu3 %v9360_v6 }
 0x5d4   : > { %v6878_v44 = vpop.permute.xlu0 %6877  ;;  %v6888_v17 = vpop.permute.xlu2 %6887  ;;  %v7094_v62 = vsel %vm9964_vm1, %v9181_v18, %v7093_v48  ;;  %v7095_v30 = vrot.slane %v7093_v48, 4  ;;  %v7682_v19 = vsel %vm9518_vm11, %v7677_v52, %v7681_v40  ;;  %v7103_v48 = vrot.slane %v6980_v63, 5 }
 0x5d5   : > { %6951 = vst.msk [vmem:[#allocation5 + $0x5c] sm:$0xf] %vm6927_vm12, %v6878_v44  ;;  %v7663_v44 = vshll.u32 %v7506_v21, 16 }
 0x5d6   : > { %6956 = vst.msk [vmem:[#allocation5 + $0x70] sm:$0xf] %vm6927_vm12, %v6888_v17  ;;  %8274 = vrot.lane.b32.xlu1 %v8175_v50, %s9422_s23  ;;  %v6977_v50 = vld [vmem:[#allocation3 + $0x50] sm:$0x1] }
 0x5d7   : > { %8596 = vmatpush.bf16.msra.mxu2 %v9359_v16  ;;  %9369 = vmatpush.bf16.msra.mxu3 %v9359_v16 }
 0x5d8   : > { %v6874_v4 = vpop.permute.xlu1 %6873 }
 0x5d9   : > { %6949 = vst.msk [vmem:[#allocation5 + $0x54] sm:$0xf] %vm6927_vm12, %v6874_v4  ;;  %v7096_v4 = vrot.slane %v6977_v50, 5 }
 0x5da   : > { %7939 = vrot.lane.b32.xlu0 %v7648_v36, %s9421_s18  ;;  %7184 = vrot.lane.b32.xlu2 %v7087_v38, %s9419_s16  ;;  %v7665_v36 = vrot.slane %v7663_v44, 5  ;;  %v8070_v44 = vld [vmem:[#allocation3 + $0x60] sm:$0xe] }
 0x5db   : > { %8597 = vmatpush.bf16.msra.mxu2 %v9358_v35  ;;  %9370 = vmatpush.bf16.msra.mxu3 %v9358_v35  ;;  %v9198_v52 = vrot.slane %v8070_v44, 9  ;;  %v8075_v44 = vld [vmem:[#allocation3 + $0x74] sm:$0x1] }
 0x5dc   : > { %v6884_v61 = vpop.permute.xlu0 %6883  ;;  %v6894_v11 = vpop.permute.xlu2 %6893  ;;  %v7666_v8 = vor.u32 %v7665_v36, %v7662_v14  ;;  %v7512_v14 = vld [vmem:[#allocation3 + $0x6c] sm:$0xf] }
 0x5dd   : > { %6954 = vst.msk [vmem:[#allocation5 + $0x68] sm:$0xf] %vm6927_vm12, %v6884_v61  ;;  %v7097_v61 = vsel %vm9964_vm1, %v7095_v30, %v7096_v4  ;;  %v7511_v4 = vld [vmem:[#allocation3 + $0x68] sm:$0x1] }
 0x5de   : > { %6959 = vst.msk [vmem:[#allocation5 + $0x7c] sm:$0xf] %vm6927_vm12, %v6894_v11  ;;  %7378 = vrot.lane.b32.xlu1 %v7306_v45, %s9420_s22  ;;  %v6979_v11 = vld [vmem:[#allocation3 + $0x58] sm:$0xf]  ;;  %v7667_v58 = vrot.slane %v7666_v8, 4  ;;  %v7708_v8 = vshrl.u32 %v7512_v14, 16 }
 0x5df   : > { %v7100_v51 = vrot.slane %v6979_v11, 5  ;;  %v7703_v11 = vshll.u32 %v7511_v4, 16 }
 0x5e0   : > { %v6880_v0 = vpop.permute.xlu1 %6879  ;;  %v7672_v57 = vsel %vm9518_vm11, %v7667_v58, %v12133_v42  ;;  %v8188_v42 = vrot.slane %v8069_v31, 5  ;;  %v7513_v58 = vld [vmem:[#allocation3 + $0x70] sm:$0xf] }
 0x5e1   : > { %6952 = vst.msk [vmem:[#allocation5 + $0x60] sm:$0xf] %vm6927_vm12, %v6880_v0 }
 0x5e2   : > { %8278 = vrot.lane.b32.xlu0 %v8182_v9, %s9422_s23  ;;  %7380 = vrot.lane.b32.xlu2 %v7307_v34, %s9420_s22  ;;  %v8067_v9 = vld [vmem:[#allocation3 + $0x54] sm:$0xe]  ;;  %v7101_v34 = vsel %vm9964_vm1, %v9182_v53, %v7100_v51  ;;  %v8189_v21 = vsel %vm9964_vm1, %v8187_v15, %v8188_v42 }
 0x5e3   : > { %v9197_v47 = vrot.slane %v8067_v9, 9 }
 0x5e4   : > { %v6890_v3 = vpop.permute.xlu0 %6889  ;;  %v7173_v59 = vpop.permute.xlu2 %7172 }
 0x5e5   : > { %6957 = vst.msk [vmem:[#allocation5 + $0x74] sm:$0xf] %vm6927_vm12, %v6890_v3  ;;  %v7509_v3 = vld [vmem:[#allocation3 + $0x60] sm:$0xf]  ;;  %v8186_v12 = vsel %vm9964_vm1, %v9197_v47, %v8185_v24 }
 0x5e6   : > { %7267 = vst.msk [vmem:[#allocation5 + $0x8] sm:$0xf] %vm7264_vm10, %v7173_v59  ;;  %7941 = vrot.lane.b32.xlu1 %v7658_v37, %s9421_s18  ;;  %v9308_v59 = vld [vmem:[%s9504_s10] sm:$0xff]  ;;  %v7510_v37 = vld [vmem:[#allocation3 + $0x64] sm:$0xf]  ;;  %v7684_v55 = vshrl.u32 %v7509_v3, 16 }
 0x5e7   : > { %9008 = vmatmul.msk.bf16.vlgmr.msra.gmra.mxu0 %vm420_vm4, %v9308_v59  ;;  %v7687_v60 = vshll.u32 %v7509_v3, 16  ;;  %v7693_v6 = vshll.u32 %v7510_v37, 16 }
 0x5e8   : > { %v6886_v29 = vpop.permute.xlu1 %6885  ;;  %v7686_v10 = vrot.slane %v7684_v55, 4 }
 0x5e9   : > { %6955 = vst.msk [vmem:[#allocation5 + $0x6c] sm:$0xf] %vm6927_vm12, %v6886_v29  ;;  %v7102_v29 = vrot.slane %v7100_v51, 4  ;;  %v7689_v18 = vrot.slane %v7687_v60, 5  ;;  %v7695_v50 = vrot.slane %v7693_v6, 5 }
 0x5ea   : > { %7382 = vrot.lane.b32.xlu0 %v7308_v41, %s9420_s22  ;;  %8276 = vrot.lane.b32.xlu2 %v8179_v5, %s9422_s23  ;;  %v7697_v41 = vshrl.u32 %v7510_v37, 16  ;;  %v8071_v5 = vld [vmem:[#allocation3 + $0x64] sm:$0xf]  ;;  %v6981_v60 = vld [vmem:[#allocation3 + $0x60] sm:$0xe] }
 0x5eb   : > { %v7690_v30 = vor.u32 %v7689_v18, %v7686_v10  ;;  %v9183_v6 = vrot.slane %v6981_v60, 9 }
 0x5ec   : > { %v7169_v17 = vpop.permute.xlu0 %7168  ;;  %v7924_v25 = vpop.permute.xlu2 %7923  ;;  %v7699_v16 = vrot.slane %v7697_v41, 4 }
 0x5ed   : > { %7265 = vst.msk [vmem:[#allocation5] sm:$0xf] %vm7264_vm10, %v7169_v17  ;;  %v7104_v17 = vsel %vm9964_vm1, %v7102_v29, %v7103_v48  ;;  %v7721_v29 = vshrl.u32 %v7513_v58, 16 }
 0x5ee   : > { %7188 = vrot.lane.b32.xlu1 %v7094_v62, %s9419_s16  ;;  %v12191_v62 = vld [vmem:[#allocation3 + $0x64] sm:$0xf] }
 0x5ef   : > { %v7107_v35 = vrot.slane %v12191_v62, 5  ;;  %v7723_v18 = vrot.slane %v7721_v29, 4 }
 0x5f0   : > { %v6892_v38 = vpop.permute.xlu1 %6891 }
 0x5f1   : > { %6958 = vst.msk [vmem:[#allocation5 + $0x78] sm:$0xf] %vm6927_vm12, %v6892_v38  ;;  %v7310_v38 = vld [vmem:[#allocation3 + $0x60] sm:$0xf]  ;;  %v7109_v22 = vrot.slane %v7107_v35, 4  ;;  %v7108_v48 = vsel %vm9964_vm1, %v9183_v6, %v7107_v35 }
 0x5f2   : > { %7945 = vrot.lane.b32.xlu0 %v7682_v19, %s9421_s18  ;;  %7190 = vrot.lane.b32.xlu2 %v7097_v61, %s9419_s16  ;;  %v7700_v19 = vor.u32 %v7699_v16, %v7695_v50  ;;  %v7691_v61 = vrot.slane %v7690_v30, 4  ;;  %v6996_v35 = vld [vmem:[#allocation3 + $0x9c] sm:$0xe] }
 0x5f4   : > { %v7363_v54 = vpop.permute.xlu0 %7362  ;;  %v8263_v45 = vpop.permute.xlu2 %8262  ;;  %v7696_v51 = vsel %vm9518_vm11, %v7691_v61, %v7695_v50  ;;  %v7701_v53 = vrot.slane %v7700_v19, 4  ;;  %v7312_v50 = vld [vmem:[#allocation3 + $0x6c] sm:$0xf]  ;;  %v6997_v19 = vld [vmem:[#allocation3 + $0xa0] sm:$0xf] }
 0x5f5   : > { %7459 = vst.msk [vmem:[#allocation5] sm:$0xf] %vm7458_vm13, %v7363_v54  ;;  %v7711_v54 = vshll.u32 %v7512_v14, 16  ;;  %v7313_v14 = vld [vmem:[#allocation3 + $0x70] sm:$0xf] }
 0x5f6   : > { %7384 = vrot.lane.b32.xlu1 %v7309_v49, %s9420_s22  ;;  %8020 = vst.msk [vmem:[#allocation5] sm:$0xf] %vm8019_vm14, %v7924_v25  ;;  %v8192_v25 = vrot.slane %v8071_v5, 5  ;;  %v6983_v49 = vld [vmem:[#allocation3 + $0x68] sm:$0x1] }
 0x5f7   : > { %v7110_v9 = vrot.slane %v6983_v49, 5  ;;  %v7713_v24 = vrot.slane %v7711_v54, 5  ;;  %v8073_v54 = vld [vmem:[#allocation3 + $0x6c] sm:$0xe]  ;;  %v7142_v49 = vrot.slane %v6997_v19, 5 }
 0x5f8   : > { %v7171_v0 = vpop.permute.xlu1 %7170  ;;  %v8193_v36 = vsel %vm9964_vm1, %v9198_v52, %v8192_v25  ;;  %v8194_v59 = vrot.slane %v8192_v25, 4  ;;  %v9310_v25 = vld [vmem:[%s9504_s10 + $0x10] sm:$0xff]  ;;  %v8202_v52 = vrot.slane %v8075_v44, 5 }
 0x5f9   : > { %7266 = vst.msk [vmem:[#allocation5 + $0x4] sm:$0xf] %vm7264_vm10, %v7171_v0  ;;  %v9309_v0 = vld [vmem:[%s9504_s10 + $0x8] sm:$0xff]  ;;  %v7111_v31 = vsel %vm9964_vm1, %v7109_v22, %v7110_v9  ;;  %v9199_v22 = vrot.slane %v8073_v54, 9 }
 0x5fa   : > { %7192 = vrot.lane.b32.xlu0 %v7101_v34, %s9419_s16  ;;  %7943 = vrot.lane.b32.xlu2 %v7672_v57, %s9421_s18  ;;  %v7705_v34 = vrot.slane %v7703_v11, 5  ;;  %v7710_v57 = vrot.slane %v7708_v8, 4 }
 0x5fb   : > { %9009 = vmatmul.msk.bf16.gmra.mxu0 %vm420_vm4, %v9309_v0  ;;  %v6984_v0 = vld [vmem:[#allocation3 + $0x6c] sm:$0xe] }
 0x5fc   : > { %v7926_v32 = vpop.permute.xlu0 %7925  ;;  %v7369_v23 = vpop.permute.xlu2 %7368  ;;  %v7706_v3 = vsel %vm9518_vm11, %v7701_v53, %v7705_v34  ;;  %v7714_v37 = vor.u32 %v7713_v24, %v7710_v57  ;;  %v7515_v53 = vld [vmem:[#allocation3 + $0x78] sm:$0xf] }
 0x5fd   : > { %v7732_v24 = vshrl.u32 %v7515_v53, 16 }
 0x5fe   : > { %8280 = vrot.lane.b32.xlu1 %v8186_v12, %s9422_s23  ;;  %v7717_v12 = vshll.u32 %v7513_v58, 16 }
 0x600   : > { %v7365_v13 = vpop.permute.xlu1 %7364  ;;  %v7719_v63 = vrot.slane %v7717_v12, 5 }
 0x601   : > { %7460 = vst.msk [vmem:[#allocation5 + $0x4] sm:$0xf] %vm7458_vm13, %v7365_v13 }
 0x602   : > { %8021 = vst.msk [vmem:[#allocation5 + $0x4] sm:$0xf] %vm8019_vm14, %v7926_v32  ;;  %7388 = vrot.lane.b32.xlu0 %v7311_v43, %s9420_s22  ;;  %8282 = vrot.lane.b32.xlu2 %v8189_v21, %s9422_s23  ;;  %v8074_v43 = vld [vmem:[#allocation3 + $0x70] sm:$0xf]  ;;  %v7715_v21 = vrot.slane %v7714_v37, 4  ;;  %v7724_v62 = vor.u32 %v7723_v18, %v7719_v63 }
 0x603   : > { %8358 = vst.msk [vmem:[#allocation5 + $0x4] sm:$0xf] %vm8356_vm15, %v8263_v45  ;;  %v8199_v10 = vrot.slane %v8074_v43, 5  ;;  %v7516_v37 = vld [vmem:[#allocation3 + $0x7c] sm:$0xf] }
 0x604   : > { %v7175_v2 = vpop.permute.xlu0 %7174  ;;  %v8265_v7 = vpop.permute.xlu2 %8264  ;;  %v7720_v5 = vsel %vm9518_vm11, %v7715_v21, %v7719_v63  ;;  %v7315_v43 = vld [vmem:[#allocation3 + $0x7c] sm:$0xf]  ;;  %v7741_v6 = vshll.u32 %v7516_v37, 16 }
 0x605   : > { %7268 = vst.msk [vmem:[#allocation5 + $0xc] sm:$0xf] %vm7264_vm10, %v7175_v2  ;;  %v8201_v16 = vrot.slane %v8199_v10, 4  ;;  %v8200_v34 = vsel %vm9964_vm1, %v9199_v22, %v8199_v10 }
 0x606   : > { %7462 = vst.msk [vmem:[#allocation5 + $0xc] sm:$0xf] %vm7458_vm13, %v7369_v23  ;;  %7194 = vrot.lane.b32.xlu1 %v7104_v17, %s9419_s16  ;;  %v8072_v23 = vld [vmem:[#allocation3 + $0x68] sm:$0x1]  ;;  %v7514_v17 = vld [vmem:[#allocation3 + $0x74] sm:$0x1] }
 0x607   : > { %v8195_v15 = vrot.slane %v8072_v23, 5  ;;  %v7727_v30 = vshll.u32 %v7514_v17, 16  ;;  %v8203_v4 = vsel %vm9964_vm1, %v8201_v16, %v8202_v52  ;;  %v7743_v44 = vrot.slane %v7741_v6, 5  ;;  %v7529_v52 = vld [vmem:[#allocation3 + $0xb0] sm:$0x1] }
 0x608   : > { %v8261_v40 = vpop.permute.xlu1 %8260  ;;  %v7745_v17 = vshrl.u32 %v7516_v37, 16  ;;  %v7847_v19 = vshll.u32 %v7529_v52, 16 }
 0x609   : > { %8357 = vst.msk [vmem:[#allocation5] sm:$0xf] %vm8356_vm15, %v8261_v40  ;;  %v8196_v13 = vsel %vm9964_vm1, %v8194_v59, %v8195_v15  ;;  %v7729_v61 = vrot.slane %v7727_v30, 5  ;;  %v6998_v59 = vld [vmem:[#allocation3 + $0xa4] sm:$0x1] }
 0x60a   : > { %8284 = vrot.lane.b32.xlu0 %v8193_v36, %s9422_s23  ;;  %7386 = vrot.lane.b32.xlu2 %v7310_v38, %s9420_s22  ;;  %v7725_v38 = vrot.slane %v7724_v62, 4  ;;  %v7145_v21 = vrot.slane %v6998_v59, 5  ;;  %v7527_v30 = vld [vmem:[#allocation3 + $0xa8] sm:$0xf] }
 0x60b   : > { %9010 = vmatmul.msk.bf16.gmra.mxu0 %vm420_vm4, %v9310_v25 }
 0x60c   : > { %v7928_v45 = vpop.permute.xlu0 %7927  ;;  %v7179_v56 = vpop.permute.xlu2 %7178 }
 0x60d   : > { %7270 = vst.msk [vmem:[#allocation5 + $0x14] sm:$0xf] %vm7264_vm10, %v7179_v56  ;;  %v9188_v56 = vrot.slane %v6996_v35, 9 }
 0x60e   : > { %7947 = vrot.lane.b32.xlu1 %v7696_v51, %s9421_s18  ;;  %v6985_v51 = vld [vmem:[#allocation3 + $0x70] sm:$0xf] }
 0x60f   : > { %v7143_v9 = vsel %vm9964_vm1, %v9188_v56, %v7142_v49  ;;  %v7114_v57 = vrot.slane %v6985_v51, 5  ;;  %v7322_v51 = vld [vmem:[#allocation3 + $0xa8] sm:$0xf] }
 0x610   : > { %v7367_v47 = vpop.permute.xlu1 %7366  ;;  %v9342_v32 = vld [vmem:[#allocation5] sm:$0xff] }
 0x611   : > { %7461 = vst.msk [vmem:[#allocation5 + $0x8] sm:$0xf] %vm7458_vm13, %v7367_v47  ;;  %9288 = vmatmul.msk.bf16.vlgmr.msra.gmra.mxu2 %vm8537_vm3, %v9342_v32  ;;  %v7735_v47 = vshll.u32 %v7515_v53, 16  ;;  %v9184_v32 = vrot.slane %v6984_v0, 9  ;;  %v7116_v15 = vrot.slane %v7114_v57, 4  ;;  %v7849_v53 = vrot.slane %v7847_v19, 5 }
 0x612   : > { %8022 = vst.msk [vmem:[#allocation5 + $0x8] sm:$0xf] %vm8019_vm14, %v7928_v45  ;;  %7198 = vrot.lane.b32.xlu0 %v7111_v31, %s9419_s16  ;;  %7949 = vrot.lane.b32.xlu2 %v7706_v3, %s9421_s18  ;;  %v7730_v45 = vsel %vm9518_vm11, %v7725_v38, %v7729_v61  ;;  %v6986_v3 = vld [vmem:[#allocation3 + $0x74] sm:$0x1]  ;;  %v7747_v38 = vrot.slane %v7745_v17, 4  ;;  %v7828_v61 = vshrl.u32 %v7527_v30, 16 }
 0x613   : > { %8359 = vst.msk [vmem:[#allocation5 + $0x8] sm:$0xf] %vm8356_vm15, %v8265_v7  ;;  %v7115_v12 = vsel %vm9964_vm1, %v9184_v32, %v7114_v57  ;;  %v7737_v60 = vrot.slane %v7735_v47, 5  ;;  %v7117_v63 = vrot.slane %v6986_v3, 5  ;;  %v6987_v19 = vld [vmem:[#allocation3 + $0x78] sm:$0xe] }
 0x614   : > { %v8267_v42 = vpop.permute.xlu0 %8266  ;;  %v7932_v55 = vpop.permute.xlu2 %7931  ;;  %v7748_v56 = vor.u32 %v7747_v38, %v7743_v44 }
 0x616   : > { %8286 = vrot.lane.b32.xlu1 %v8196_v13, %s9422_s23  ;;  %v7528_v13 = vld [vmem:[#allocation3 + $0xac] sm:$0xf]  ;;  %v7749_v47 = vrot.slane %v7748_v56, 4 }
 0x617   : > { %v7841_v10 = vshrl.u32 %v7528_v13, 16 }
 0x618   : > { %v7930_v41 = vpop.permute.xlu1 %7929 }
 0x619   : > { %8023 = vst.msk [vmem:[#allocation5 + $0xc] sm:$0xf] %vm8019_vm14, %v7930_v41  ;;  %v7118_v41 = vsel %vm9964_vm1, %v7116_v15, %v7117_v63  ;;  %v7843_v16 = vrot.slane %v7841_v10, 4 }
 0x61a   : > { %8360 = vst.msk [vmem:[#allocation5 + $0xc] sm:$0xf] %vm8356_vm15, %v8267_v42  ;;  %7951 = vrot.lane.b32.xlu0 %v7720_v5, %s9421_s18  ;;  %7196 = vrot.lane.b32.xlu2 %v7108_v48, %s9419_s16  ;;  %v9311_v42 = vld [vmem:[%s9504_s10 + $0x18] sm:$0xff]  ;;  %v7144_v5 = vrot.slane %v7142_v49, 4  ;;  %v7837_v48 = vshll.u32 %v7528_v13, 16  ;;  %v9312_v49 = vld [vmem:[%s9504_s10 + $0x20] sm:$0xff] }
 0x61b   : > { %9011 = vmatmul.msk.bf16.gmra.mxu0 %vm420_vm4, %v9311_v42  ;;  %v6988_v13 = vld [vmem:[#allocation3 + $0x7c] sm:$0xf] }
 0x61c   : > { %v7371_v2 = vpop.permute.xlu0 %7370  ;;  %v8271_v7 = vpop.permute.xlu2 %8270  ;;  %v7146_v25 = vsel %vm9964_vm1, %v7144_v5, %v7145_v21 }
 0x61e   : > { %7390 = vrot.lane.b32.xlu1 %v7312_v50, %s9420_s22  ;;  %v12264_v50 = vrot.slane %v7837_v48, 5 }
 0x620   : > { %v7177_v40 = vpop.permute.xlu1 %7176  ;;  %v7844_v35 = vor.u32 %v7843_v16, %v12264_v50 }
 0x621   : > { %7269 = vst.msk [vmem:[#allocation5 + $0x10] sm:$0xf] %vm7264_vm10, %v7177_v40  ;;  %v9343_v36 = vld [vmem:[#allocation5 + $0x8] sm:$0xff] }
 0x622   : > { %7463 = vst.msk [vmem:[#allocation5 + $0x10] sm:$0xf] %vm7458_vm13, %v7371_v2  ;;  %8290 = vrot.lane.b32.xlu0 %v8203_v4, %s9422_s23  ;;  %7392 = vrot.lane.b32.xlu2 %v7313_v14, %s9420_s22  ;;  %v7314_v14 = vld [vmem:[#allocation3 + $0x78] sm:$0xf]  ;;  %v7845_v22 = vrot.slane %v7844_v35, 4 }
 0x623   : > { %8024 = vst.msk [vmem:[#allocation5 + $0x10] sm:$0xf] %vm8019_vm14, %v7932_v55  ;;  %9289 = vmatmul.msk.bf16.gmra.mxu2 %vm8537_vm3, %v9343_v36  ;;  %v7734_v55 = vrot.slane %v7732_v24, 4  ;;  %v7323_v24 = vld [vmem:[#allocation3 + $0xac] sm:$0xf] }
 0x624   : > { %v7934_v11 = vpop.permute.xlu0 %7933  ;;  %v7375_v8 = vpop.permute.xlu2 %7374  ;;  %v7850_v57 = vsel %vm9518_vm11, %v7845_v22, %v7849_v53  ;;  %v7316_v22 = vld [vmem:[#allocation3 + $0x84] sm:$0xf] }
 0x625   : > { %v7738_v18 = vor.u32 %v7737_v60, %v7734_v55  ;;  %v8077_v60 = vld [vmem:[#allocation3 + $0x7c] sm:$0xf] }
 0x626   : > { %7953 = vrot.lane.b32.xlu1 %v7730_v45, %s9421_s18  ;;  %v7517_v45 = vld [vmem:[#allocation3 + $0x80] sm:$0x1]  ;;  %v8206_v6 = vrot.slane %v8077_v60, 5 }
 0x627   : > { %v7739_v62 = vrot.slane %v7738_v18, 4  ;;  %v6989_v18 = vld [vmem:[#allocation3 + $0x80] sm:$0x1] }
 0x628   : > { %v7373_v58 = vpop.permute.xlu1 %7372  ;;  %v8208_v17 = vrot.slane %v8206_v6, 4  ;;  %v7124_v16 = vrot.slane %v6989_v18, 5  ;;  %v7317_v18 = vld [vmem:[#allocation3 + $0x88] sm:$0xf] }
 0x629   : > { %7464 = vst.msk [vmem:[#allocation5 + $0x14] sm:$0xf] %vm7458_vm13, %v7373_v58  ;;  %v7744_v4 = vsel %vm9518_vm11, %v7739_v62, %v7743_v44  ;;  %v7830_v58 = vrot.slane %v7828_v61, 4 }
 0x62a   : > { %8025 = vst.msk [vmem:[#allocation5 + $0x14] sm:$0xf] %vm8019_vm14, %v7934_v11  ;;  %7216 = vrot.lane.b32.xlu0 %v7143_v9, %s9419_s16  ;;  %8288 = vrot.lane.b32.xlu2 %v8200_v34, %s9422_s23  ;;  %v7831_v11 = vshll.u32 %v7527_v30, 16  ;;  %v7751_v9 = vshll.u32 %v7517_v45, 16  ;;  %v9185_v45 = vrot.slane %v6987_v19, 9 }
 0x62b   : > { %8362 = vst.msk [vmem:[#allocation5 + $0x14] sm:$0xf] %vm8356_vm15, %v8271_v7  ;;  %9012 = vmatmul.msk.bf16.gmra.mxu0 %vm420_vm4, %v9312_v49 }
 0x62c   : > { %v7181_v23 = vpop.permute.xlu0 %7180  ;;  %v7938_v31 = vpop.permute.xlu2 %7937  ;;  %v7833_v0 = vrot.slane %v7831_v11, 5  ;;  %v7753_v3 = vrot.slane %v7751_v9, 5  ;;  %v6999_v11 = vld [vmem:[#allocation3 + $0xa8] sm:$0xe]  ;;  %v7001_v9 = vld [vmem:[#allocation3 + $0xb0] sm:$0x1] }
 0x62d   : > { %7271 = vst.msk [vmem:[#allocation5 + $0x18] sm:$0xf] %vm7264_vm10, %v7181_v23  ;;  %v8088_v23 = vld [vmem:[#allocation3 + $0xa8] sm:$0xe]  ;;  %v9189_v49 = vrot.slane %v6999_v11, 9 }
 0x62e   : > { %7465 = vst.msk [vmem:[#allocation5 + $0x18] sm:$0xf] %vm7458_vm13, %v7375_v8  ;;  %7200 = vrot.lane.b32.xlu1 %v7115_v12, %s9419_s16  ;;  %v7834_v32 = vor.u32 %v7833_v0, %v7830_v58  ;;  %v7754_v15 = vsel %vm9518_vm11, %v7749_v47, %v7753_v3  ;;  %v9204_v37 = vrot.slane %v8088_v23, 9  ;;  %v7518_v47 = vld [vmem:[#allocation3 + $0x84] sm:$0xf] }
 0x630   : > { %v8269_v29 = vpop.permute.xlu1 %8268  ;;  %v7835_v55 = vrot.slane %v7834_v32, 4  ;;  %v9314_v32 = vld [vmem:[%s9504_s10 + $0x30] sm:$0xff] }
 0x631   : > { %8361 = vst.msk [vmem:[#allocation5 + $0x10] sm:$0xf] %vm8356_vm15, %v8269_v29  ;;  %v8076_v29 = vld [vmem:[#allocation3 + $0x78] sm:$0xe] }
 0x632   : > { %7396 = vrot.lane.b32.xlu0 %v7315_v43, %s9420_s22  ;;  %7202 = vrot.lane.b32.xlu2 %v7118_v41, %s9419_s16  ;;  %v7840_v21 = vsel %vm9518_vm11, %v7835_v55, %v12264_v50  ;;  %v7121_v41 = vrot.slane %v6988_v13, 5  ;;  %v9200_v5 = vrot.slane %v8076_v29, 9  ;;  %v9313_v50 = vld [vmem:[%s9504_s10 + $0x28] sm:$0xff]  ;;  %v7531_v55 = vld [vmem:[#allocation3 + $0xb8] sm:$0xf] }
 0x633   : > { %v7325_v13 = vld [vmem:[#allocation3 + $0xb8] sm:$0xf] }
 0x634   : > { %v7377_v2 = vpop.permute.xlu0 %7376  ;;  %v7185_v7 = vpop.permute.xlu2 %7184  ;;  %v7123_v44 = vrot.slane %v7121_v41, 4  ;;  %v7122_v53 = vsel %vm9964_vm1, %v9185_v45, %v7121_v41 }
 0x635   : > { %7273 = vst.msk [vmem:[#allocation5 + $0x20] sm:$0xf] %vm7264_vm10, %v7185_v7  ;;  %v8207_v7 = vsel %vm9964_vm1, %v9200_v5, %v8206_v6  ;;  %v7861_v6 = vshll.u32 %v7531_v55, 16 }
 0x636   : > { %7218 = vrot.lane.b32.xlu1 %v7146_v25, %s9419_s16  ;;  %v8090_v25 = vld [vmem:[#allocation3 + $0xb0] sm:$0x1] }
 0x638   : > { %v7183_v40 = vpop.permute.xlu1 %7182  ;;  %v9344_v36 = vld [vmem:[#allocation5 + $0x10] sm:$0xff] }
 0x639   : > { %7272 = vst.msk [vmem:[#allocation5 + $0x1c] sm:$0xf] %vm7264_vm10, %v7183_v40  ;;  %9290 = vmatmul.msk.bf16.gmra.mxu2 %vm8537_vm3, %v9344_v36  ;;  %v7125_v40 = vsel %vm9964_vm1, %v7123_v44, %v7124_v16  ;;  %v8237_v36 = vrot.slane %v8090_v25, 5 }
 0x63a   : > { %7466 = vst.msk [vmem:[#allocation5 + $0x1c] sm:$0xf] %vm7458_vm13, %v7377_v2  ;;  %7955 = vrot.lane.b32.xlu0 %v7744_v4, %s9421_s18  ;;  %7394 = vrot.lane.b32.xlu2 %v7314_v14, %s9420_s22  ;;  %v8078_v2 = vld [vmem:[#allocation3 + $0x80] sm:$0x1] }
 0x63b   : > { %8027 = vst.msk [vmem:[#allocation5 + $0x1c] sm:$0xf] %vm8019_vm14, %v7938_v31  ;;  %v8089_v31 = vld [vmem:[#allocation3 + $0xac] sm:$0xf]  ;;  %v8209_v62 = vrot.slane %v8078_v2, 5  ;;  %9013 = vmatmul.msk.bf16.gmra.mxu0 %vm420_vm4, %v9313_v50  ;;  %v7863_v50 = vrot.slane %v7861_v6, 5 }
 0x63c   : > { %v8273_v8 = vpop.permute.xlu0 %8272  ;;  %v7381_v54 = vpop.permute.xlu2 %7380  ;;  %v8234_v42 = vrot.slane %v8089_v31, 5  ;;  %v7152_v31 = vrot.slane %v7001_v9, 5 }
 0x63d   : > { %v8210_v4 = vsel %vm9964_vm1, %v8208_v17, %v8209_v62  ;;  %v12336_v17 = vld [vmem:[#allocation3 + $0x88] sm:$0xf] }
 0x63e   : > { %7410 = vrot.lane.b32.xlu1 %v7322_v51, %s9420_s22  ;;  %v8235_v43 = vsel %vm9964_vm1, %v9204_v37, %v8234_v42  ;;  %v8236_v14 = vrot.slane %v8234_v42, 4  ;;  %v7759_v37 = vshll.u32 %v7518_v47, 16 }
 0x640   : > { %v7936_v34 = vpop.permute.xlu1 %7935  ;;  %v8238_v61 = vsel %vm9964_vm1, %v8236_v14, %v8237_v36  ;;  %v7761_v5 = vrot.slane %v7759_v37, 5  ;;  %v8092_v37 = vld [vmem:[#allocation3 + $0xb8] sm:$0xf] }
 0x641   : > { %8026 = vst.msk [vmem:[#allocation5 + $0x18] sm:$0xf] %vm8019_vm14, %v7936_v34 }
 0x642   : > { %8363 = vst.msk [vmem:[#allocation5 + $0x18] sm:$0xf] %vm8356_vm15, %v8273_v8  ;;  %7973 = vrot.lane.b32.xlu0 %v7850_v57, %s9421_s18  ;;  %7412 = vrot.lane.b32.xlu2 %v7323_v24, %s9420_s22  ;;  %v7000_v8 = vld [vmem:[#allocation3 + $0xac] sm:$0xf] }
 0x643   : > { %v7149_v51 = vrot.slane %v7000_v8, 5  ;;  %v8081_v8 = vld [vmem:[#allocation3 + $0x8c] sm:$0x1] }
 0x644   : > { %v7187_v59 = vpop.permute.xlu0 %7186  ;;  %v8277_v12 = vpop.permute.xlu2 %8276 }
 0x645   : > { %7274 = vst.msk [vmem:[#allocation5 + $0x24] sm:$0xf] %vm7264_vm10, %v7187_v59  ;;  %v7150_v24 = vsel %vm9964_vm1, %v9189_v49, %v7149_v51  ;;  %v7151_v23 = vrot.slane %v7149_v51, 4 }
 0x646   : > { %7468 = vst.msk [vmem:[#allocation5 + $0x24] sm:$0xf] %vm7458_vm13, %v7381_v54  ;;  %7957 = vrot.lane.b32.xlu1 %v7754_v15, %s9421_s18  ;;  %v7530_v54 = vld [vmem:[#allocation3 + $0xb4] sm:$0xf]  ;;  %v7756_v15 = vshrl.u32 %v7518_v47, 16 }
 0x647   : > { %v7852_v58 = vshrl.u32 %v7530_v54, 16  ;;  %v7855_v0 = vshll.u32 %v7530_v54, 16  ;;  %v6991_v47 = vld [vmem:[#allocation3 + $0x88] sm:$0xf] }
 0x648   : > { %v8275_v63 = vpop.permute.xlu1 %8274  ;;  %v7758_v41 = vrot.slane %v7756_v15, 4  ;;  %v8091_v15 = vld [vmem:[#allocation3 + $0xb4] sm:$0xe] }
 0x649   : > { %8364 = vst.msk [vmem:[#allocation5 + $0x1c] sm:$0xf] %vm8356_vm15, %v8275_v63  ;;  %v7854_v3 = vrot.slane %v7852_v58, 4  ;;  %v7857_v59 = vrot.slane %v7855_v0, 5  ;;  %v7153_v63 = vsel %vm9964_vm1, %v7151_v23, %v7152_v31  ;;  %v6990_v31 = vld [vmem:[#allocation3 + $0x84] sm:$0xe] }
 0x64a   : > { %8308 = vrot.lane.b32.xlu0 %v8235_v43, %s9422_s23  ;;  %7971 = vrot.lane.b32.xlu2 %v7840_v21, %s9421_s18  ;;  %v7762_v16 = vor.u32 %v7761_v5, %v7758_v41  ;;  %v7004_v5 = vld [vmem:[#allocation3 + $0xbc] sm:$0x1] }
 0x64b   : > { %9014 = vmatmul.msk.bf16.gmra.mxu0 %vm420_vm4, %v9314_v32  ;;  %v7858_v43 = vor.u32 %v7857_v59, %v7854_v3  ;;  %v7128_v3 = vrot.slane %v6991_v47, 5  ;;  %v8079_v59 = vld [vmem:[#allocation3 + $0x84] sm:$0xe] }
 0x64c   : > { %v7940_v48 = vpop.permute.xlu0 %7939  ;;  %v7191_v10 = vpop.permute.xlu2 %7190 }
 0x64d   : > { %7276 = vst.msk [vmem:[#allocation5 + $0x2c] sm:$0xf] %vm7264_vm10, %v7191_v10  ;;  %v7859_v2 = vrot.slane %v7858_v43, 4  ;;  %v8241_v43 = vrot.slane %v8092_v37, 5 }
 0x64e   : > { %8292 = vrot.lane.b32.xlu1 %v8207_v7, %s9422_s23  ;;  %v7865_v7 = vshrl.u32 %v7531_v55, 16  ;;  %v9186_v55 = vrot.slane %v6990_v31, 9 }
 0x650   : > { %v7379_v52 = vpop.permute.xlu1 %7378  ;;  %v9345_v30 = vld [vmem:[#allocation5 + $0x18] sm:$0xff]  ;;  %v7867_v36 = vrot.slane %v7865_v7, 4 }
 0x651   : > { %7467 = vst.msk [vmem:[#allocation5 + $0x20] sm:$0xf] %vm7458_vm13, %v7379_v52  ;;  %9291 = vmatmul.msk.bf16.gmra.mxu2 %vm8537_vm3, %v9345_v30  ;;  %v8213_v52 = vrot.slane %v12336_v17, 5  ;;  %v7520_v30 = vld [vmem:[#allocation3 + $0x8c] sm:$0x1]  ;;  %v7159_v17 = vrot.slane %v7004_v5, 5 }
 0x652   : > { %8028 = vst.msk [vmem:[#allocation5 + $0x20] sm:$0xf] %vm8019_vm14, %v7940_v48  ;;  %7206 = vrot.lane.b32.xlu0 %v7125_v40, %s9419_s16  ;;  %8294 = vrot.lane.b32.xlu2 %v8210_v4, %s9422_s23  ;;  %v7864_v40 = vsel %vm9518_vm11, %v7859_v2, %v7863_v50  ;;  %v7324_v4 = vld [vmem:[#allocation3 + $0xb4] sm:$0xf]  ;;  %v7775_v19 = vshll.u32 %v7520_v30, 16  ;;  %v7868_v49 = vor.u32 %v7867_v36, %v7863_v50  ;;  %v7130_v30 = vrot.slane %v7128_v3, 4 }
 0x653   : > { %8365 = vst.msk [vmem:[#allocation5 + $0x20] sm:$0xf] %vm8356_vm15, %v8277_v12  ;;  %v7519_v12 = vld [vmem:[#allocation3 + $0x88] sm:$0xf]  ;;  %v8215_v54 = vrot.slane %v8213_v52, 4 }
 0x654   : > { %v8279_v38 = vpop.permute.xlu0 %8278  ;;  %v7944_v35 = vpop.permute.xlu2 %7943  ;;  %v7765_v60 = vshll.u32 %v7519_v12, 16  ;;  %v7769_v21 = vshrl.u32 %v7519_v12, 16  ;;  %v7777_v58 = vrot.slane %v7775_v19, 5 }
 0x656   : > { %8310 = vrot.lane.b32.xlu1 %v8238_v61, %s9422_s23  ;;  %v7767_v44 = vrot.slane %v7765_v60, 5  ;;  %v7771_v25 = vrot.slane %v7769_v21, 4  ;;  %v9201_v60 = vrot.slane %v8079_v59, 9  ;;  %v7129_v21 = vsel %vm9964_vm1, %v9186_v55, %v7128_v3  ;;  %v7318_v3 = vld [vmem:[#allocation3 + $0x90] sm:$0xf] }
 0x657   : > { %v7534_v55 = vld [vmem:[#allocation3 + $0xc4] sm:$0xf] }
 0x658   : > { %v7942_v56 = vpop.permute.xlu1 %7941  ;;  %v7772_v14 = vor.u32 %v7771_v25, %v7767_v44  ;;  %v8214_v6 = vsel %vm9964_vm1, %v9201_v60, %v8213_v52  ;;  %v8243_v25 = vrot.slane %v8241_v43, 4  ;;  %v6992_v52 = vld [vmem:[#allocation3 + $0x8c] sm:$0x1]  ;;  %v7885_v5 = vshll.u32 %v7534_v55, 16 }
 0x659   : > { %8029 = vst.msk [vmem:[#allocation5 + $0x24] sm:$0xf] %vm8019_vm14, %v7942_v56  ;;  %v7131_v19 = vrot.slane %v6992_v52, 5 }
 0x65a   : > { %8366 = vst.msk [vmem:[#allocation5 + $0x24] sm:$0xf] %vm8356_vm15, %v8279_v38  ;;  %7398 = vrot.lane.b32.xlu0 %v7316_v22, %s9420_s22  ;;  %7204 = vrot.lane.b32.xlu2 %v7122_v53, %s9419_s16  ;;  %v7532_v38 = vld [vmem:[#allocation3 + $0xbc] sm:$0x1]  ;;  %v7773_v56 = vrot.slane %v7772_v14, 4  ;;  %v9315_v22 = vld [vmem:[%s9504_s10 + $0x38] sm:$0xff] }
 0x65b   : > { %v7871_v51 = vshll.u32 %v7532_v38, 16  ;;  %v8216_v53 = vrot.slane %v8081_v8, 5  ;;  %9015 = vmatmul.msk.bf16.gmra.mxu0 %vm420_vm4, %v9315_v22  ;;  %v9316_v38 = vld [vmem:[%s9504_s10 + $0x40] sm:$0xff] }
 0x65c   : > { %v7383_v34 = vpop.permute.xlu0 %7382  ;;  %v8283_v57 = vpop.permute.xlu2 %8282 }
 0x65d   : > { %v8217_v9 = vsel %vm9964_vm1, %v8215_v54, %v8216_v53  ;;  %v7132_v54 = vsel %vm9964_vm1, %v7130_v30, %v7131_v19  ;;  %v7523_v53 = vld [vmem:[#allocation3 + $0x98] sm:$0x1]  ;;  %v7887_v30 = vrot.slane %v7885_v5, 5  ;;  %v7535_v19 = vld [vmem:[#allocation3 + $0xc8] sm:$0x1] }
 0x65e   : > { %7220 = vrot.lane.b32.xlu1 %v7150_v24, %s9419_s16  ;;  %v7873_v24 = vrot.slane %v7871_v51, 5  ;;  %v7521_v51 = vld [vmem:[#allocation3 + $0x90] sm:$0xf]  ;;  %v7799_v47 = vshll.u32 %v7523_v53, 16  ;;  %v8096_v53 = vld [vmem:[#allocation3 + $0xc8] sm:$0x1] }
 0x660   : > { %v7189_v42 = vpop.permute.xlu1 %7188  ;;  %v7801_v60 = vrot.slane %v7799_v47, 5 }
 0x661   : > { %7275 = vst.msk [vmem:[#allocation5 + $0x28] sm:$0xf] %vm7264_vm10, %v7189_v42  ;;  %v9346_v29 = vld [vmem:[#allocation5 + $0x20] sm:$0xff] }
 0x662   : > { %7469 = vst.msk [vmem:[#allocation5 + $0x28] sm:$0xf] %vm7458_vm13, %v7383_v34  ;;  %7416 = vrot.lane.b32.xlu0 %v7325_v13, %s9420_s22  ;;  %7222 = vrot.lane.b32.xlu2 %v7153_v63, %s9419_s16  ;;  %v7778_v34 = vsel %vm9518_vm11, %v7773_v56, %v7777_v58  ;;  %v7003_v42 = vld [vmem:[#allocation3 + $0xb8] sm:$0xf]  ;;  %v7326_v58 = vld [vmem:[#allocation3 + $0xc0] sm:$0xf] }
 0x663   : > { %8030 = vst.msk [vmem:[#allocation5 + $0x28] sm:$0xf] %vm8019_vm14, %v7944_v35  ;;  %9292 = vmatmul.msk.bf16.gmra.mxu2 %vm8537_vm3, %v9346_v29  ;;  %v7763_v35 = vrot.slane %v7762_v16, 4  ;;  %v9205_v29 = vrot.slane %v8091_v15, 9  ;;  %v7156_v41 = vrot.slane %v7003_v42, 5 }
 0x664   : > { %v7946_v48 = vpop.permute.xlu0 %7945  ;;  %v7387_v10 = vpop.permute.xlu2 %7386  ;;  %v7522_v16 = vld [vmem:[#allocation3 + $0x94] sm:$0xf] }
 0x665   : > { %v7768_v45 = vsel %vm9518_vm11, %v7763_v35, %v7767_v44  ;;  %v8242_v7 = vsel %vm9964_vm1, %v9205_v29, %v8241_v43  ;;  %v7158_v44 = vrot.slane %v7156_v41, 4  ;;  %v7789_v14 = vshll.u32 %v7522_v16, 16  ;;  %v7002_v35 = vld [vmem:[#allocation3 + $0xb4] sm:$0xe] }
 0x666   : > { %7400 = vrot.lane.b32.xlu1 %v7317_v18, %s9420_s22  ;;  %v7793_v36 = vshrl.u32 %v7522_v16, 16  ;;  %v12409_v43 = vld [vmem:[#allocation3 + $0x94] sm:$0xf] }
 0x667   : > { %v12395_v56 = vrot.slane %v7789_v14, 5  ;;  %v8220_v16 = vrot.slane %v12409_v43, 5 }
 0x668   : > { %v7385_v62 = vpop.permute.xlu1 %7384 }
 0x669   : > { %7470 = vst.msk [vmem:[#allocation5 + $0x2c] sm:$0xf] %vm7458_vm13, %v7385_v62  ;;  %v8222_v43 = vrot.slane %v8220_v16, 4 }
 0x66a   : > { %8031 = vst.msk [vmem:[#allocation5 + $0x2c] sm:$0xf] %vm8019_vm14, %v7946_v48  ;;  %7975 = vrot.lane.b32.xlu0 %v7864_v40, %s9421_s18  ;;  %7414 = vrot.lane.b32.xlu2 %v7324_v4, %s9420_s22  ;;  %v8093_v48 = vld [vmem:[#allocation3 + $0xbc] sm:$0x1]  ;;  %v7160_v40 = vsel %vm9964_vm1, %v7158_v44, %v7159_v17  ;;  %v8082_v44 = vld [vmem:[#allocation3 + $0x90] sm:$0xe] }
 0x66b   : > { %8368 = vst.msk [vmem:[#allocation5 + $0x2c] sm:$0xf] %vm8356_vm15, %v8283_v57  ;;  %v7869_v57 = vrot.slane %v7868_v49, 4  ;;  %v8244_v50 = vrot.slane %v8093_v48, 5  ;;  %9016 = vmatmul.msk.bf16.gmra.mxu0 %vm420_vm4, %v9316_v38  ;;  %v7795_v49 = vrot.slane %v7793_v36, 4  ;;  %v7889_v48 = vshrl.u32 %v7534_v55, 16 }
 0x66c   : > { %v7193_v61 = vpop.permute.xlu0 %7192  ;;  %v7950_v11 = vpop.permute.xlu2 %7949  ;;  %v9202_v38 = vrot.slane %v8082_v44, 9  ;;  %v8084_v55 = vld [vmem:[#allocation3 + $0x98] sm:$0x1] }
 0x66d   : > { %7277 = vst.msk [vmem:[#allocation5 + $0x30] sm:$0xf] %vm7264_vm10, %v7193_v61  ;;  %v7874_v12 = vsel %vm9518_vm11, %v7869_v57, %v7873_v24  ;;  %v8245_v4 = vsel %vm9964_vm1, %v8243_v25, %v8244_v50  ;;  %v7780_v57 = vshrl.u32 %v7521_v51, 16  ;;  %v7783_v24 = vshll.u32 %v7521_v51, 16  ;;  %v7327_v50 = vld [vmem:[#allocation3 + $0xc4] sm:$0xf] }
 0x66e   : > { %7471 = vst.msk [vmem:[#allocation5 + $0x30] sm:$0xf] %vm7458_vm13, %v7387_v10  ;;  %7959 = vrot.lane.b32.xlu1 %v7768_v45, %s9421_s18  ;;  %v12375_v10 = vpop.f32.mrf.mxu0  ;;  %v9190_v45 = vrot.slane %v7002_v35, 9 }
 0x66f   : > { %v7782_v37 = vrot.slane %v7780_v57, 4  ;;  %v7785_v42 = vrot.slane %v7783_v24, 5  ;;  %v8251_v24 = vrot.slane %v8096_v53, 5 }
 0x670   : > { %v8281_v0 = vpop.permute.xlu1 %8280 }
 0x671   : > { %8367 = vst.msk [vmem:[#allocation5 + $0x28] sm:$0xf] %vm8356_vm15, %v8281_v0  ;;  %v7157_v0 = vsel %vm9964_vm1, %v9190_v45, %v7156_v41 }
 0x672   : > { %8298 = vrot.lane.b32.xlu0 %v8217_v9, %s9422_s23  ;;  %7961 = vrot.lane.b32.xlu2 %v7778_v34, %s9421_s18  ;;  %v7796_v9 = vor.u32 %v7795_v49, %v12395_v56  ;;  %v7533_v34 = vld [vmem:[#allocation3 + $0xc0] sm:$0xf] }
 0x673   : > { %v7876_v31 = vshrl.u32 %v7533_v34, 16 }
 0x674   : > { %v7389_v32 = vpop.permute.xlu0 %7388  ;;  %v7197_v23 = vpop.permute.xlu2 %7196  ;;  %v7797_v59 = vrot.slane %v7796_v9, 4 }
 0x675   : > { %7279 = vst.msk [vmem:[#allocation5 + $0x38] sm:$0xf] %vm7264_vm10, %v7197_v23 }
 0x676   : > { %7977 = vrot.lane.b32.xlu1 %v7874_v12, %s9421_s18  ;;  %v12390_v61 = vpop.f32.mrf.mxu0  ;;  %v7879_v12 = vshll.u32 %v7533_v34, 16 }
 0x678   : > { %v7195_v13 = vpop.permute.xlu1 %7194  ;;  %v9347_v63 = vld [vmem:[#allocation5 + $0x28] sm:$0xff]  ;;  %v7881_v41 = vrot.slane %v7879_v12, 5 }
 0x679   : > { %7278 = vst.msk [vmem:[#allocation5 + $0x34] sm:$0xf] %vm7264_vm10, %v7195_v13  ;;  %9293 = vmatmul.msk.bf16.gmra.mxu2 %vm8537_vm3, %v9347_v63  ;;  %v7319_v63 = vld [vmem:[#allocation3 + $0x94] sm:$0xf] }
 0x67a   : > { %7472 = vst.msk [vmem:[#allocation5 + $0x34] sm:$0xf] %vm7458_vm13, %v7389_v32  ;;  %7208 = vrot.lane.b32.xlu0 %v7129_v21, %s9419_s16  ;;  %8296 = vrot.lane.b32.xlu2 %v8214_v6, %s9422_s23  ;;  %v7878_v21 = vrot.slane %v7876_v31, 4  ;;  %v7802_v6 = vsel %vm9518_vm11, %v7797_v59, %v7801_v60 }
 0x67b   : > { %8033 = vst.msk [vmem:[#allocation5 + $0x34] sm:$0xf] %vm8019_vm14, %v7950_v11 }
 0x67c   : > { %v8285_v18 = vpop.permute.xlu0 %8284  ;;  %v7393_v2 = vpop.permute.xlu2 %7392  ;;  %v7882_v52 = vor.u32 %v7881_v41, %v7878_v21  ;;  %v7005_v21 = vld [vmem:[#allocation3 + $0xc0] sm:$0xe] }
 0x67d   : > { %v8094_v41 = vld [vmem:[#allocation3 + $0xc0] sm:$0xe]  ;;  %v9191_v44 = vrot.slane %v7005_v21, 9 }
 0x67e   : > { %8312 = vrot.lane.b32.xlu1 %v8242_v7, %s9422_s23  ;;  %v12406_v15 = vpop.f32.mrf.mxu0  ;;  %v12423_v7 = vld [vmem:[%s12803_s6] ss:$0 sm:$0xff] }
 0x680   : > { %v7948_v62 = vpop.permute.xlu1 %7947 }
 0x681   : > { %8032 = vst.msk [vmem:[#allocation5 + $0x30] sm:$0xf] %vm8019_vm14, %v7948_v62  ;;  %v12430_v62 = vld [vmem:[%s12804_s7] ss:$0 sm:$0xff] }
 0x682   : > { %8369 = vst.msk [vmem:[#allocation5 + $0x30] sm:$0xf] %vm8356_vm15, %v8285_v18  ;;  %7226 = vrot.lane.b32.xlu0 %v7160_v40, %s9419_s16  ;;  %8314 = vrot.lane.b32.xlu2 %v8245_v4, %s9422_s23  ;;  %v9317_v18 = vld [vmem:[%s9504_s10 + $0x48] sm:$0xff]  ;;  %v12432_v40 = vld [vmem:[#allocation3 + $0xc4] sm:$0xf]  ;;  %v7891_v4 = vrot.slane %v7889_v48, 4 }
 0x683   : > { %9017 = vmatmul.msk.bf16.gmra.mxu0 %vm420_vm4, %v9317_v18  ;;  %v8248_v49 = vrot.slane %v12432_v40, 5  ;;  %v8223_v48 = vrot.slane %v8084_v55, 5 }
 0x684   : > { %v7199_v11 = vpop.permute.xlu0 %7198  ;;  %v8289_v8 = vpop.permute.xlu2 %8288 }
 0x685   : > { %7280 = vst.msk [vmem:[#allocation5 + $0x3c] sm:$0xf] %vm7264_vm10, %v7199_v11  ;;  %v8250_v57 = vrot.slane %v8248_v49, 4 }
 0x686   : > { %7474 = vst.msk [vmem:[#allocation5 + $0x3c] sm:$0xf] %vm7458_vm13, %v7393_v2  ;;  %7210 = vrot.lane.b32.xlu1 %v7132_v54, %s9419_s16  ;;  %v7786_v2 = vor.u32 %v7785_v42, %v7782_v37  ;;  %v12434_v14 = vpop.f32.mrf.mxu0  ;;  %v8221_v54 = vsel %vm9964_vm1, %v9202_v38, %v8220_v16  ;;  %v9318_v37 = vld [vmem:[%s9504_s10 + $0x50] sm:$0xff] }
 0x688   : > { %v8287_v22 = vpop.permute.xlu1 %8286  ;;  %v7787_v35 = vrot.slane %v7786_v2, 4 }
 0x689   : > { %8370 = vst.msk [vmem:[#allocation5 + $0x34] sm:$0xf] %vm8356_vm15, %v8287_v22  ;;  %v7883_v22 = vrot.slane %v7882_v52, 4  ;;  %v8224_v52 = vsel %vm9964_vm1, %v8222_v43, %v8223_v48  ;;  %v9319_v43 = vld [vmem:[%s9504_s10 + $0x58] sm:$0xff]  ;;  %v7536_v48 = vld [vmem:[#allocation3 + $0xcc] sm:$0xf] }
 0x68a   : > { %7418 = vrot.lane.b32.xlu0 %v7326_v58, %s9420_s22  ;;  %7224 = vrot.lane.b32.xlu2 %v7157_v0, %s9419_s16  ;;  %v7792_v45 = vsel %vm9518_vm11, %v7787_v35, %v12395_v56  ;;  %v7892_v58 = vor.u32 %v7891_v4, %v7887_v30  ;;  %v7895_v0 = vshll.u32 %v7535_v19, 16  ;;  %v6993_v35 = vld [vmem:[#allocation3 + $0x90] sm:$0xe] }
 0x68c   : > { %v7952_v32 = vpop.permute.xlu0 %7951  ;;  %v7203_v23 = vpop.permute.xlu2 %7202  ;;  %v7897_v31 = vrot.slane %v7895_v0, 5  ;;  %v6995_v0 = vld [vmem:[#allocation3 + $0x98] sm:$0x1] }
 0x68d   : > { %7282 = vst.msk [vmem:[#allocation5 + $0x44] sm:$0xf] %vm7264_vm10, %v7203_v23  ;;  %v7893_v23 = vrot.slane %v7892_v58, 4  ;;  %v9187_v58 = vrot.slane %v6993_v35, 9 }
 0x68e   : > { %7402 = vrot.lane.b32.xlu1 %v7318_v3, %s9420_s22  ;;  %v12463_v12 = vpop.f32.mrf.mxu0 }
 0x690   : > { %v7391_v13 = vpop.permute.xlu1 %7390  ;;  %v9348_v29 = vld [vmem:[#allocation5 + $0x30] sm:$0xff] }
 0x691   : > { %7473 = vst.msk [vmem:[#allocation5 + $0x38] sm:$0xf] %vm7458_vm13, %v7391_v13  ;;  %9294 = vmatmul.msk.bf16.gmra.mxu2 %vm8537_vm3, %v9348_v29  ;;  %v8252_v13 = vsel %vm9964_vm1, %v8250_v57, %v8251_v24 }
 0x692   : > { %8034 = vst.msk [vmem:[#allocation5 + $0x38] sm:$0xf] %vm8019_vm14, %v7952_v32  ;;  %7965 = vrot.lane.b32.xlu0 %v7802_v6, %s9421_s18  ;;  %7404 = vrot.lane.b32.xlu2 %v7319_v63, %s9420_s22  ;;  %v7888_v32 = vsel %vm9518_vm11, %v7883_v22, %v7887_v30  ;;  %v7898_v63 = vsel %vm9518_vm11, %v7893_v23, %v7897_v31  ;;  %v7006_v6 = vld [vmem:[#allocation3 + $0xc4] sm:$0xf]  ;;  %v9206_v30 = vrot.slane %v8094_v41, 9 }
 0x693   : > { %8371 = vst.msk [vmem:[#allocation5 + $0x38] sm:$0xf] %vm8356_vm15, %v8289_v8  ;;  %9018 = vmatmul.msk.bf16.gmra.mxu0 %vm420_vm4, %v9318_v37 }
 0x694   : > { %v8291_v17 = vpop.permute.xlu0 %8290  ;;  %v7395_v25 = vpop.permute.xlu2 %7394 }
 0x695   : > { %v8599_v36 = vpop.f32.mrf.mxu2 }
 0x696   : > { %7420 = vrot.lane.b32.xlu1 %v7327_v50, %s9420_s22  ;;  %v8683_v11 = vmul.f32 %v12423_v7, %v8599_v36  ;;  %v7524_v50 = vld [vmem:[#allocation3 + $0x9c] sm:$0xf]  ;;  %v12494_v22 = vpop.f32.mrf.mxu0 }
 0x698   : > { %v7954_v8 = vpop.permute.xlu1 %7953  ;;  %v8719_v51 = vadd.f32 %v12430_v62, %v8683_v11  ;;  %v7804_v11 = vshrl.u32 %v7524_v50, 16 }
 0x699   : > { %8035 = vst.msk [vmem:[#allocation5 + $0x3c] sm:$0xf] %vm8019_vm14, %v7954_v8 }
 0x69a   : > { %8372 = vst.msk [vmem:[#allocation5 + $0x3c] sm:$0xf] %vm8356_vm15, %v8291_v17  ;;  %8300 = vrot.lane.b32.xlu0 %v8221_v54, %s9422_s23  ;;  %7963 = vrot.lane.b32.xlu2 %v7792_v45, %s9421_s18  ;;  %v8751_v9 = vadd.f32 %v8719_v51, %v12375_v10  ;;  %v6994_v17 = vld [vmem:[#allocation3 + $0x94] sm:$0xf]  ;;  %v8249_v45 = vsel %vm9964_vm1, %v9206_v30, %v8248_v49  ;;  %v7807_v51 = vshll.u32 %v7524_v50, 16  ;;  %v7806_v24 = vrot.slane %v7804_v11, 4 }
 0x69b   : > { %v7135_v19 = vrot.slane %v6994_v17, 5  ;;  %v7538_v50 = vld [vmem:[#allocation3 + $0xd4] sm:$0x1] }
 0x69c   : > { %v7217_v56 = vpop.permute.xlu0 %7216  ;;  %v7413_v34 = vpop.permute.xlu2 %7412  ;;  %v8783_v47 = vmul.f32 0.2, %v8751_v9  ;;  %v7919_v35 = vshll.u32 %v7538_v50, 16 }
 0x69d   : > { %7289 = vst.msk [vmem:[#allocation5 + $0x60] sm:$0xf] %vm7264_vm10, %v7217_v56  ;;  %v8601_v10 = vpop.f32.mrf.mxu2  ;;  %v7137_v56 = vrot.slane %v7135_v19, 4  ;;  %v7136_v57 = vsel %vm9964_vm1, %v9187_v58, %v7135_v19 }
 0x69e   : > { %7979 = vrot.lane.b32.xlu1 %v7888_v32, %s9421_s18  ;;  %v8815_v3 = vmax.f32 %v8751_v9, %v8783_v47  ;;  %v8684_v59 = vmul.f32 %v12423_v7, %v8601_v10  ;;  %v7809_v47 = vrot.slane %v7807_v51, 5  ;;  %v7007_v32 = vld [vmem:[#allocation3 + $0xc8] sm:$0x1]  ;;  %v7525_v10 = vld [vmem:[#allocation3 + $0xa0] sm:$0xf] }
 0x69f   : > { %v7813_v21 = vshll.u32 %v7525_v10, 16 }
 0x6a0   : > { %v7201_v42 = vpop.permute.xlu1 %7200  ;;  %8848 = vst.msk [vmem:[%s12459_s28] sm:$0xff] %vm8847_vm0, %v8815_v3  ;;  %v8720_v60 = vadd.f32 %v12430_v62, %v8684_v59  ;;  %v7321_v59 = vld [vmem:[#allocation3 + $0xa0] sm:$0xf] }
 0x6a1   : > { %v9349_v29 = vld [vmem:[#allocation5 + $0x38] sm:$0xff]  ;;  %7281 = vst.msk [vmem:[#allocation5 + $0x40] sm:$0xf] %vm7264_vm10, %v7201_v42 }
 0x6a2   : > { %8318 = vrot.lane.b32.xlu0 %v8252_v13, %s9422_s23  ;;  %7981 = vrot.lane.b32.xlu2 %v7898_v63, %s9421_s18  ;;  %7475 = vst.msk [vmem:[#allocation5 + $0x40] sm:$0xf] %vm7458_vm13, %v7395_v25  ;;  %v8752_v5 = vadd.f32 %v8720_v60, %v12390_v61  ;;  %v7163_v25 = vrot.slane %v7006_v6, 5  ;;  %v7166_v60 = vrot.slane %v7007_v32, 5  ;;  %v7810_v13 = vor.u32 %v7809_v47, %v7806_v24  ;;  %v12513_v63 = vpop.f32.mrf.mxu0  ;;  %v7329_v32 = vld [vmem:[#allocation3 + $0xd0] sm:$0xf] }
 0x6a3   : > { %9295 = vmatmul.msk.bf16.gmra.mxu2 %vm8537_vm3, %v9349_v29  ;;  %v7537_v29 = vld [vmem:[#allocation3 + $0xd0] sm:$0xf]  ;;  %9019 = vmatmul.msk.bf16.gmra.mxu0 %vm420_vm4, %v9319_v43 }
 0x6a4   : > { %v7397_v18 = vpop.permute.xlu0 %7396  ;;  %v7972_v2 = vpop.permute.xlu2 %7971  ;;  %v8784_v16 = vmul.f32 0.2, %v8752_v5  ;;  %v7164_v54 = vsel %vm9964_vm1, %v9191_v44, %v7163_v25  ;;  %v7165_v55 = vrot.slane %v7163_v25, 4  ;;  %v7909_v6 = vshll.u32 %v7537_v29, 16 }
 0x6a5   : > { %7476 = vst.msk [vmem:[#allocation5 + $0x44] sm:$0xf] %vm7458_vm13, %v7397_v18  ;;  %v7913_v41 = vshrl.u32 %v7537_v29, 16  ;;  %v7811_v30 = vrot.slane %v7810_v13, 4  ;;  %v8098_v29 = vld [vmem:[#allocation3 + $0xd0] sm:$0xf] }
 0x6a6   : > { %8302 = vrot.lane.b32.xlu1 %v8224_v52, %s9422_s23  ;;  %v8604_v61 = vpop.f32.mrf.mxu2  ;;  %v8816_v4 = vmax.f32 %v8752_v5, %v8784_v16  ;;  %v12522_v17 = vrot.slane %v7909_v6, 5  ;;  %v7167_v25 = vsel %vm9964_vm1, %v7165_v55, %v7166_v60  ;;  %v9320_v55 = vld [vmem:[%s9504_s10 + $0x60] sm:$0xff] }
 0x6a7   : > { %v8685_v36 = vmul.f32 %v12423_v7, %v8604_v61  ;;  %v7915_v16 = vrot.slane %v7913_v41, 4  ;;  %v7900_v61 = vshrl.u32 %v7536_v48, 16 }
 0x6a8   : > { %v7219_v38 = vpop.permute.xlu1 %7218  ;;  %8849 = vst.msk [vmem:[%s12459_s28 + $0x8] sm:$0xff] %vm8847_vm0, %v8816_v4 }
 0x6a9   : > { %v8721_v8 = vadd.f32 %v12430_v62, %v8685_v36  ;;  %7290 = vst.msk [vmem:[#allocation5 + $0x64] sm:$0xf] %vm7264_vm10, %v7219_v38  ;;  %v7903_v36 = vshll.u32 %v7536_v48, 16  ;;  %v7916_v38 = vor.u32 %v7915_v16, %v12522_v17  ;;  %v7902_v58 = vrot.slane %v7900_v61, 4 }
 0x6aa   : > { %7228 = vrot.lane.b32.xlu0 %v7164_v54, %s9419_s16  ;;  %8316 = vrot.lane.b32.xlu2 %v8249_v45, %s9422_s23  ;;  %7484 = vst.msk [vmem:[#allocation5 + $0x64] sm:$0xf] %vm7458_vm13, %v7413_v34  ;;  %v7526_v54 = vld [vmem:[#allocation3 + $0xa4] sm:$0x1]  ;;  %v12534_v51 = vpop.f32.mrf.mxu0 }
 0x6ab   : > { %v8753_v53 = vadd.f32 %v8721_v8, %v12406_v15  ;;  %v7138_v15 = vrot.slane %v6995_v0, 5  ;;  %v7320_v8 = vld [vmem:[#allocation3 + $0x9c] sm:$0xf]  ;;  %v7905_v0 = vrot.slane %v7903_v36, 5  ;;  %v7823_v24 = vshll.u32 %v7526_v54, 16 }
 0x6ac   : > { %v7956_v9 = vpop.permute.xlu0 %7955  ;;  %v12501_v40 = vpop.permute.xlu2 %8294 }
 0x6ad   : > { %v8785_v49 = vmul.f32 0.2, %v8753_v53  ;;  %8036 = vst.msk [vmem:[#allocation5 + $0x40] sm:$0xf] %vm8019_vm14, %v7956_v9  ;;  %v7139_v37 = vsel %vm9964_vm1, %v7137_v56, %v7138_v15  ;;  %v7917_v9 = vrot.slane %v7916_v38, 4  ;;  %v7921_v56 = vrot.slane %v7919_v35, 5 }
 0x6ae   : > { %7212 = vrot.lane.b32.xlu1 %v7136_v57, %s9419_s16  ;;  %v8606_v34 = vpop.f32.mrf.mxu2 }
 0x6af   : > { %v8817_v23 = vmax.f32 %v8753_v53, %v8785_v49  ;;  %v8686_v31 = vmul.f32 %v12423_v7, %v8606_v34  ;;  %v7328_v53 = vld [vmem:[#allocation3 + $0xcc] sm:$0xf] }
 0x6b0   : > { %v7411_v3 = vpop.permute.xlu1 %7410 }
 0x6b1   : > { %8850 = vst.msk [vmem:[%s12459_s28 + $0x10] sm:$0xff] %vm8847_vm0, %v8817_v23  ;;  %v8722_v42 = vadd.f32 %v12430_v62, %v8686_v31  ;;  %v7922_v23 = vsel %vm9518_vm11, %v7917_v9, %v7921_v56 }
 0x6b2   : > { %7483 = vst.msk [vmem:[#allocation5 + $0x60] sm:$0xf] %vm7458_vm13, %v7411_v3  ;;  %7408 = vrot.lane.b32.xlu0 %v7321_v59, %s9420_s22  ;;  %7214 = vrot.lane.b32.xlu2 %v7139_v37, %s9419_s16  ;;  %v8097_v37 = vld [vmem:[#allocation3 + $0xcc] sm:$0xe] }
 0x6b3   : > { %8044 = vst.msk [vmem:[#allocation5 + $0x60] sm:$0xf] %vm8019_vm14, %v7972_v2  ;;  %v8754_v5 = vadd.f32 %v8722_v42, %v12434_v14  ;;  %v7817_v2 = vshrl.u32 %v7525_v10, 16  ;;  %v7815_v14 = vrot.slane %v7813_v21, 5  ;;  %v7825_v10 = vrot.slane %v7823_v24, 5  ;;  %v12549_v42 = vpop.f32.mrf.mxu0  ;;  %9020 = vmatmul.msk.bf16.gmra.mxu0 %vm420_vm4, %v9320_v55 }
 0x6b4   : > { %v7974_v18 = vpop.permute.xlu0 %7973  ;;  %v7205_v44 = vpop.permute.xlu2 %7204  ;;  %v9207_v6 = vrot.slane %v8097_v37, 9 }
 0x6b5   : > { %v8786_v52 = vmul.f32 0.2, %v8754_v5  ;;  %8045 = vst.msk [vmem:[#allocation5 + $0x64] sm:$0xf] %vm8019_vm14, %v7974_v18  ;;  %v7816_v11 = vsel %vm9518_vm11, %v7811_v30, %v7815_v14  ;;  %v7819_v45 = vrot.slane %v7817_v2, 4 }
 0x6b6   : > { %7283 = vst.msk [vmem:[#allocation5 + $0x48] sm:$0xf] %vm7264_vm10, %v7205_v44  ;;  %7230 = vrot.lane.b32.xlu1 %v7167_v25, %s9419_s16  ;;  %v8085_v18 = vld [vmem:[#allocation3 + $0x9c] sm:$0xe]  ;;  %v8086_v44 = vld [vmem:[#allocation3 + $0xa0] sm:$0xf] }
 0x6b7   : > { %v8818_v4 = vmax.f32 %v8754_v5, %v8786_v52  ;;  %v7820_v47 = vor.u32 %v7819_v45, %v7815_v14  ;;  %v9203_v61 = vrot.slane %v8085_v18, 9  ;;  %v8230_v45 = vrot.slane %v8087_v27, 5 }
 0x6b8   : > { %v7958_v19 = vpop.permute.xlu1 %7957 }
 0x6b9   : > { %8851 = vst.msk [vmem:[%s12459_s28 + $0x18] sm:$0xff] %vm8847_vm0, %v8818_v4  ;;  %v7821_v59 = vrot.slane %v7820_v47, 4  ;;  %v8227_v4 = vrot.slane %v8086_v44, 5 }
 0x6ba   : > { %8037 = vst.msk [vmem:[#allocation5 + $0x44] sm:$0xf] %vm8019_vm14, %v7958_v19  ;;  %7967 = vrot.lane.b32.xlu0 %v7816_v11, %s9421_s18  ;;  %7406 = vrot.lane.b32.xlu2 %v7320_v8, %s9420_s22  ;;  %v8099_v19 = vld [vmem:[#allocation3 + $0xd4] sm:$0x1] }
 0x6bb   : > { %8374 = vst.msk [vmem:[#allocation5 + $0x44] sm:$0xf] %vm8356_vm15, %v12501_v40  ;;  %v7906_v40 = vor.u32 %v7905_v0, %v7902_v58  ;;  %v7826_v5 = vsel %vm9518_vm11, %v7821_v59, %v7825_v10  ;;  %v12569_v36 = vpop.f32.mrf.mxu0  ;;  %v8228_v8 = vsel %vm9964_vm1, %v9203_v61, %v8227_v4  ;;  %v8229_v54 = vrot.slane %v8227_v4, 4 }
 0x6bc   : > { %v8309_v49 = vpop.permute.xlu0 %8308  ;;  %v7223_v57 = vpop.permute.xlu2 %7222  ;;  %v8258_v0 = vrot.slane %v8099_v19, 5 }
 0x6bd   : > { %8381 = vst.msk [vmem:[#allocation5 + $0x60] sm:$0xf] %vm8356_vm15, %v8309_v49  ;;  %v8609_v34 = vpop.f32.mrf.mxu2  ;;  %v7907_v13 = vrot.slane %v7906_v40, 4 }
 0x6be   : > { %7292 = vst.msk [vmem:[#allocation5 + $0x6c] sm:$0xf] %vm7264_vm10, %v7223_v57  ;;  %7422 = vrot.lane.b32.xlu1 %v7328_v53, %s9420_s22  ;;  %v8687_v15 = vmul.f32 %v12423_v7, %v8609_v34 }
 0x6bf   : > { %v7912_v52 = vsel %vm9518_vm11, %v7907_v13, %v12522_v17 }
 0x6c0   : > { %v8293_v31 = vpop.permute.xlu1 %8292  ;;  %v8723_v3 = vadd.f32 %v12430_v62, %v8687_v15 }
 0x6c1   : > { %8373 = vst.msk [vmem:[#allocation5 + $0x40] sm:$0xf] %vm8356_vm15, %v8293_v31 }
 0x6c2   : > { %7424 = vrot.lane.b32.xlu2 %v7329_v32, %s9420_s22  ;;  %7985 = vrot.lane.b32.xlu0 %v7922_v23, %s9421_s18  ;;  %v8755_v60 = vadd.f32 %v8723_v3, %v12463_v12  ;;  %v8255_v12 = vrot.slane %v8098_v29, 5 }
 0x6c3   : > { %v12584_v49 = vpop.f32.mrf.mxu0 }
 0x6c4   : > { %v7207_v43 = vpop.permute.xlu0 %7206  ;;  %v7415_v21 = vpop.permute.xlu2 %7414  ;;  %v8787_v41 = vmul.f32 0.2, %v8755_v60  ;;  %v8256_v2 = vsel %vm9964_vm1, %v9207_v6, %v8255_v12  ;;  %v8257_v58 = vrot.slane %v8255_v12, 4 }
 0x6c5   : > { %7284 = vst.msk [vmem:[#allocation5 + $0x4c] sm:$0xf] %vm7264_vm10, %v7207_v43  ;;  %v8611_v48 = vpop.f32.mrf.mxu2 }
 0x6c6   : > { %7969 = vrot.lane.b32.xlu1 %v7826_v5, %s9421_s18  ;;  %v8819_v50 = vmax.f32 %v8755_v60, %v8787_v41  ;;  %v8688_v16 = vmul.f32 %v12423_v7, %v8611_v48  ;;  %v8259_v57 = vsel %vm9964_vm1, %v8257_v58, %v8258_v0 }
 0x6c8   : > { %v8311_v25 = vpop.permute.xlu1 %8310  ;;  %v9350_v30 = vld [vmem:[#allocation5 + $0x40] sm:$0xff]  ;;  %8852 = vst.msk [vmem:[%s12459_s28 + $0x20] sm:$0xff] %vm8847_vm0, %v8819_v50  ;;  %v8724_v14 = vadd.f32 %v12430_v62, %v8688_v16 }
 0x6c9   : > { %8382 = vst.msk [vmem:[#allocation5 + $0x64] sm:$0xf] %vm8356_vm15, %v8311_v25  ;;  %9296 = vmatmul.msk.bf16.gmra.mxu2 %vm8537_vm3, %v9350_v30 }
 0x6ca   : > { %7983 = vrot.lane.b32.xlu2 %v7912_v52, %s9421_s18  ;;  %v8756_v17 = vadd.f32 %v8724_v14, %v12494_v22  ;;  %8320 = vrot.lane.b32.xlu0 %v8256_v2, %s9422_s23  ;;  %v8231_v22 = vsel %vm9964_vm1, %v8229_v54, %v8230_v45 }
 0x6cb   : > { %v12597_v23 = vpop.f32.mrf.mxu0 }
 0x6cc   : > { %v7399_v38 = vpop.permute.xlu0 %7398  ;;  %v7962_v35 = vpop.permute.xlu2 %7961  ;;  %v8788_v11 = vmul.f32 0.2, %v8756_v17 }
 0x6cd   : > { %7477 = vst.msk [vmem:[#allocation5 + $0x48] sm:$0xf] %vm7458_vm13, %v7399_v38 }
 0x6ce   : > { %8304 = vrot.lane.b32.xlu1 %v8228_v8, %s9422_s23  ;;  %v8820_v53 = vmax.f32 %v8756_v17, %v8788_v11 }
 0x6d0   : > { %v7221_v9 = vpop.permute.xlu1 %7220  ;;  %8853 = vst.msk [vmem:[%s12459_s28 + $0x28] sm:$0xff] %vm8847_vm0, %v8820_v53  ;;  %v9354_v56 = vld [vmem:[#allocation5 + $0x60] sm:$0xff] }
 0x6d1   : > { %7291 = vst.msk [vmem:[#allocation5 + $0x68] sm:$0xf] %vm7264_vm10, %v7221_v9  ;;  %9300 = vmatmul.msk.bf16.vlgmr.msra.gmra.mxu3 %vm8537_vm3, %v9354_v56 }
 0x6d2   : > { %8306 = vrot.lane.b32.xlu2 %v8231_v22, %s9422_s23  ;;  %7485 = vst.msk [vmem:[#allocation5 + $0x68] sm:$0xf] %vm7458_vm13, %v7415_v21 }
 0x6d3   : > { %v12606_v29 = vpop.f32.mrf.mxu0 }
 0x6d4   : > { %v7417_v24 = vpop.permute.xlu0 %7416  ;;  %v8297_v47 = vpop.permute.xlu2 %8296 }
 0x6d5   : > { %7486 = vst.msk [vmem:[#allocation5 + $0x6c] sm:$0xf] %vm7458_vm13, %v7417_v24  ;;  %v8614_v34 = vpop.f32.mrf.mxu2 }
 0x6d6   : > { %8322 = vrot.lane.b32.xlu1 %v8259_v57, %s9422_s23  ;;  %v8689_v15 = vmul.f32 %v12423_v7, %v8614_v34 }
 0x6d8   : > { %v7401_v32 = vpop.permute.xlu1 %7400  ;;  %v8725_v40 = vadd.f32 %v12430_v62, %v8689_v15 }
 0x6d9   : > { %7478 = vst.msk [vmem:[#allocation5 + $0x4c] sm:$0xf] %vm7458_vm13, %v7401_v32 }
 0x6da   : > { %8039 = vst.msk [vmem:[#allocation5 + $0x4c] sm:$0xf] %vm8019_vm14, %v7962_v35  ;;  %v8757_v46 = vadd.f32 %v8725_v40, %v12513_v63 }
 0x6dc   : > { %v7976_v31 = vpop.permute.xlu0 %7975  ;;  %v8315_v10 = vpop.permute.xlu2 %8314  ;;  %v8789_v3 = vmul.f32 0.2, %v8757_v46 }
 0x6dd   : > { %8046 = vst.msk [vmem:[#allocation5 + $0x68] sm:$0xf] %vm8019_vm14, %v7976_v31  ;;  %v8616_v59 = vpop.f32.mrf.mxu2 }
 0x6de   : > { %v8821_v37 = vmax.f32 %v8757_v46, %v8789_v3  ;;  %v8690_v55 = vmul.f32 %v12423_v7, %v8616_v59 }
 0x6e0   : > { %v7960_v60 = vpop.permute.xlu1 %7959  ;;  %8854 = vst.msk [vmem:[%s12459_s28 + $0x30] sm:$0xff] %vm8847_vm0, %v8821_v37  ;;  %v8726_v13 = vadd.f32 %v12430_v62, %v8690_v55 }
 0x6e1   : > { %8038 = vst.msk [vmem:[#allocation5 + $0x48] sm:$0xf] %vm8019_vm14, %v7960_v60 }
 0x6e2   : > { %v8758_v63 = vadd.f32 %v8726_v13, %v12534_v51  ;;  %8375 = vst.msk [vmem:[#allocation5 + $0x48] sm:$0xf] %vm8356_vm15, %v8297_v47  ;;  %v12617_v51 = vpop.f32.mrf.mxu0 }
 0x6e4   : > { %v8299_v43 = vpop.permute.xlu0 %8298  ;;  %v7225_v21 = vpop.permute.xlu2 %7224  ;;  %v8790_v6 = vmul.f32 0.2, %v8758_v63 }
 0x6e5   : > { %8376 = vst.msk [vmem:[#allocation5 + $0x4c] sm:$0xf] %vm8356_vm15, %v8299_v43 }
 0x6e6   : > { %7293 = vst.msk [vmem:[#allocation5 + $0x70] sm:$0xf] %vm7264_vm10, %v7225_v21  ;;  %v8619_v41 = vpop.f32.mrf.mxu2  ;;  %v8822_v5 = vmax.f32 %v8758_v63, %v8790_v6 }
 0x6e7   : > { %v8691_v48 = vmul.f32 %v12423_v7, %v8619_v41 }
 0x6e8   : > { %v7978_v18 = vpop.permute.xlu1 %7977  ;;  %8855 = vst.msk [vmem:[%s12459_s28 + $0x38] sm:$0xff] %vm8847_vm0, %v8822_v5 }
 0x6e9   : > { %v8727_v44 = vadd.f32 %v12430_v62, %v8691_v48  ;;  %8047 = vst.msk [vmem:[#allocation5 + $0x6c] sm:$0xf] %vm8019_vm14, %v7978_v18 }
 0x6ea   : > { %8384 = vst.msk [vmem:[#allocation5 + $0x6c] sm:$0xf] %vm8356_vm15, %v8315_v10  ;;  %v12628_v4 = vpop.f32.mrf.mxu0 }
 0x6eb   : > { %v8759_v12 = vadd.f32 %v8727_v44, %v12549_v42 }
 0x6ec   : > { %v7209_v50 = vpop.permute.xlu0 %7208  ;;  %v7405_v16 = vpop.permute.xlu2 %7404  ;;  %v9351_v52 = vld [vmem:[#allocation5 + $0x48] sm:$0xff] }
 0x6ed   : > { %v8791_v25 = vmul.f32 0.2, %v8759_v12  ;;  %7285 = vst.msk [vmem:[#allocation5 + $0x50] sm:$0xf] %vm7264_vm10, %v7209_v50  ;;  %9297 = vmatmul.msk.bf16.gmra.mxu2 %vm8537_vm3, %v9351_v52 }
 0x6ee   : > { %v8621_v30 = vpop.f32.mrf.mxu2 }
 0x6ef   : > { %v8823_v2 = vmax.f32 %v8759_v12, %v8791_v25  ;;  %v8692_v14 = vmul.f32 %v12423_v7, %v8621_v30 }
 0x6f0   : > { %v8313_v61 = vpop.permute.xlu1 %8312 }
 0x6f1   : > { %8856 = vst.msk [vmem:[%s12459_s28 + $0x40] sm:$0xff] %vm8847_vm0, %v8823_v2  ;;  %v8728_v42 = vadd.f32 %v12430_v62, %v8692_v14 }
 0x6f2   : > { %8383 = vst.msk [vmem:[#allocation5 + $0x68] sm:$0xf] %vm8356_vm15, %v8313_v61  ;;  %v12638_v54 = vpop.f32.mrf.mxu0 }
 0x6f3   : > { %v8760_v27 = vadd.f32 %v8728_v42, %v12569_v36 }
 0x6f4   : > { %v7227_v17 = vpop.permute.xlu0 %7226  ;;  %v7964_v38 = vpop.permute.xlu2 %7963 }
 0x6f5   : > { %v8792_v35 = vmul.f32 0.2, %v8760_v27  ;;  %7294 = vst.msk [vmem:[#allocation5 + $0x74] sm:$0xf] %vm7264_vm10, %v7227_v17 }
 0x6f7   : > { %v8824_v19 = vmax.f32 %v8760_v27, %v8792_v35 }
 0x6f8   : > { %v7211_v11 = vpop.permute.xlu1 %7210 }
 0x6f9   : > { %8857 = vst.msk [vmem:[%s12459_s28 + $0x48] sm:$0xff] %vm8847_vm0, %v8824_v19  ;;  %v9355_v8 = vld [vmem:[#allocation5 + $0x68] sm:$0xff] }
 0x6fa   : > { %7286 = vst.msk [vmem:[#allocation5 + $0x54] sm:$0xf] %vm7264_vm10, %v7211_v11  ;;  %9301 = vmatmul.msk.bf16.gmra.mxu3 %vm8537_vm3, %v9355_v8  ;;  %v12647_v34 = vpop.f32.mrf.mxu0 }
 0x6fb   : > { %7480 = vst.msk [vmem:[#allocation5 + $0x54] sm:$0xf] %vm7458_vm13, %v7405_v16 }
 0x6fc   : > { %v7419_v45 = vpop.permute.xlu0 %7418  ;;  %v7982_v36 = vpop.permute.xlu2 %7981 }
 0x6fd   : > { %7487 = vst.msk [vmem:[#allocation5 + $0x70] sm:$0xf] %vm7458_vm13, %v7419_v45  ;;  %v8624_v53 = vpop.f32.mrf.mxu2 }
 0x6fe   : > { %v8693_v58 = vmul.f32 %v12423_v7, %v8624_v53 }
 0x700   : > { %v7403_v0 = vpop.permute.xlu1 %7402  ;;  %v8729_v9 = vadd.f32 %v12430_v62, %v8693_v58 }
 0x701   : > { %7479 = vst.msk [vmem:[#allocation5 + $0x50] sm:$0xf] %vm7458_vm13, %v7403_v0 }
 0x702   : > { %8040 = vst.msk [vmem:[#allocation5 + $0x50] sm:$0xf] %vm8019_vm14, %v7964_v38  ;;  %v8761_v22 = vadd.f32 %v8729_v9, %v12584_v49  ;;  %v12658_v55 = vpop.f32.mrf.mxu0 }
 0x704   : > { %v7966_v56 = vpop.permute.xlu0 %7965  ;;  %v8317_v57 = vpop.permute.xlu2 %8316  ;;  %v8793_v24 = vmul.f32 0.2, %v8761_v22 }
 0x705   : > { %8041 = vst.msk [vmem:[#allocation5 + $0x54] sm:$0xf] %vm8019_vm14, %v7966_v56  ;;  %v8626_v47 = vpop.f32.mrf.mxu2 }
 0x706   : > { %v8825_v15 = vmax.f32 %v8761_v22, %v8793_v24  ;;  %v8694_v32 = vmul.f32 %v12423_v7, %v8626_v47 }
 0x708   : > { %v7421_v40 = vpop.permute.xlu1 %7420  ;;  %8858 = vst.msk [vmem:[%s12459_s28 + $0x50] sm:$0xff] %vm8847_vm0, %v8825_v15  ;;  %v8730_v46 = vadd.f32 %v12430_v62, %v8694_v32 }
 0x709   : > { %7488 = vst.msk [vmem:[#allocation5 + $0x74] sm:$0xf] %vm7458_vm13, %v7421_v40 }
 0x70a   : > { %v8762_v49 = vadd.f32 %v8730_v46, %v12597_v23  ;;  %8049 = vst.msk [vmem:[#allocation5 + $0x74] sm:$0xf] %vm8019_vm14, %v7982_v36  ;;  %v12668_v21 = vpop.f32.mrf.mxu0 }
 0x70c   : > { %v8301_v31 = vpop.permute.xlu0 %8300  ;;  %v7215_v10 = vpop.permute.xlu2 %7214  ;;  %v8794_v3 = vmul.f32 0.2, %v8762_v49 }
 0x70d   : > { %8377 = vst.msk [vmem:[#allocation5 + $0x50] sm:$0xf] %vm8356_vm15, %v8301_v31 }
 0x70e   : > { %7288 = vst.msk [vmem:[#allocation5 + $0x5c] sm:$0xf] %vm7264_vm10, %v7215_v10  ;;  %v8826_v59 = vmax.f32 %v8762_v49, %v8794_v3 }
 0x710   : > { %v7980_v37 = vpop.permute.xlu1 %7979  ;;  %8859 = vst.msk [vmem:[%s12459_s28 + $0x58] sm:$0xff] %vm8847_vm0, %v8826_v59 }
 0x711   : > { %8048 = vst.msk [vmem:[#allocation5 + $0x70] sm:$0xf] %vm8019_vm14, %v7980_v37 }
 0x712   : > { %8385 = vst.msk [vmem:[#allocation5 + $0x70] sm:$0xf] %vm8356_vm15, %v8317_v57  ;;  %v12681_v2 = vpop.f32.mrf.mxu0 }
 0x714   : > { %v8319_v23 = vpop.permute.xlu0 %8318  ;;  %v8629_v60 = vpop.f32.mrf.mxu2 }
 0x715   : > { %8386 = vst.msk [vmem:[#allocation5 + $0x74] sm:$0xf] %vm8356_vm15, %v8319_v23  ;;  %v8695_v13 = vmul.f32 %v12423_v7, %v8629_v60  ;;  %v7407_v41 = vpop.permute.xlu2 %7406 }
 0x717   : > { %v8731_v43 = vadd.f32 %v12430_v62, %v8695_v13 }
 0x718   : > { %v8303_v63 = vpop.permute.xlu1 %8302 }
 0x719   : > { %8378 = vst.msk [vmem:[#allocation5 + $0x54] sm:$0xf] %vm8356_vm15, %v8303_v63  ;;  %v8763_v6 = vadd.f32 %v8731_v43, %v12606_v29 }
 0x71a   : > { %v12692_v45 = vpop.f32.mrf.mxu0 }
 0x71b   : > { %v8795_v18 = vmul.f32 0.2, %v8763_v6 }
 0x71c   : > { %v7229_v5 = vpop.permute.xlu0 %7228  ;;  %v9356_v48 = vld [vmem:[#allocation5 + $0x70] sm:$0xff]  ;;  %v8631_v44 = vpop.f32.mrf.mxu2 }
 0x71d   : > { %7295 = vst.msk [vmem:[#allocation5 + $0x78] sm:$0xf] %vm7264_vm10, %v7229_v5  ;;  %9302 = vmatmul.msk.bf16.gmra.mxu3 %vm8537_vm3, %v9356_v48  ;;  %v8827_v12 = vmax.f32 %v8763_v6, %v8795_v18  ;;  %v8696_v50 = vmul.f32 %v12423_v7, %v8631_v44  ;;  %v7425_v61 = vpop.permute.xlu2 %7424 }
 0x71f   : > { %8860 = vst.msk [vmem:[%s12459_s28 + $0x60] sm:$0xff] %vm8847_vm0, %v8827_v12  ;;  %v8732_v25 = vadd.f32 %v12430_v62, %v8696_v50 }
 0x720   : > { %v7213_v16 = vpop.permute.xlu1 %7212  ;;  %v9352_v52 = vld [vmem:[#allocation5 + $0x50] sm:$0xff] }
 0x721   : > { %7287 = vst.msk [vmem:[#allocation5 + $0x58] sm:$0xf] %vm7264_vm10, %v7213_v16  ;;  %9298 = vmatmul.msk.bf16.gmra.mxu2 %vm8537_vm3, %v9352_v52  ;;  %v8764_v29 = vadd.f32 %v8732_v25, %v12617_v51 }
 0x722   : > { %7481 = vst.msk [vmem:[#allocation5 + $0x58] sm:$0xf] %vm7458_vm13, %v7407_v41  ;;  %v12702_v47 = vpop.f32.mrf.mxu0 }
 0x723   : > { %v8796_v14 = vmul.f32 0.2, %v8764_v29 }
 0x724   : > { %v7409_v30 = vpop.permute.xlu0 %7408 }
 0x725   : > { %7482 = vst.msk [vmem:[#allocation5 + $0x5c] sm:$0xf] %vm7458_vm13, %v7409_v30  ;;  %v8828_v27 = vmax.f32 %v8764_v29, %v8796_v14  ;;  %v7984_v58 = vpop.permute.xlu2 %7983 }
 0x726   : > { %v8634_v42 = vpop.f32.mrf.mxu2 }
 0x727   : > { %v8697_v17 = vmul.f32 %v12423_v7, %v8634_v42  ;;  %8861 = vst.msk [vmem:[%s12459_s28 + $0x68] sm:$0xff] %vm8847_vm0, %v8828_v27 }
 0x728   : > { %v7231_v38 = vpop.permute.xlu1 %7230 }
 0x729   : > { %v8733_v35 = vadd.f32 %v12430_v62, %v8697_v17  ;;  %7296 = vst.msk [vmem:[#allocation5 + $0x7c] sm:$0xf] %vm7264_vm10, %v7231_v38 }
 0x72a   : > { %7490 = vst.msk [vmem:[#allocation5 + $0x7c] sm:$0xf] %vm7458_vm13, %v7425_v61  ;;  %v12710_v40 = vpop.f32.mrf.mxu0 }
 0x72b   : > { %v8765_v51 = vadd.f32 %v8733_v35, %v12628_v4 }
 0x72c   : > { %v7968_v19 = vpop.permute.xlu0 %7967 }
 0x72d   : > { %v8797_v11 = vmul.f32 0.2, %v8765_v51  ;;  %8042 = vst.msk [vmem:[#allocation5 + $0x58] sm:$0xf] %vm8019_vm14, %v7968_v19  ;;  %v8307_v15 = vpop.permute.xlu2 %8306 }
 0x72e   : > { %v8636_v8 = vpop.f32.mrf.mxu2 }
 0x72f   : > { %v8829_v36 = vmax.f32 %v8765_v51, %v8797_v11  ;;  %v8698_v53 = vmul.f32 %v12423_v7, %v8636_v8 }
 0x730   : > { %v7423_v0 = vpop.permute.xlu1 %7422 }
 0x731   : > { %8862 = vst.msk [vmem:[%s12459_s28 + $0x70] sm:$0xff] %vm8847_vm0, %v8829_v36  ;;  %v8734_v9 = vadd.f32 %v12430_v62, %v8698_v53 }
 0x732   : > { %7489 = vst.msk [vmem:[#allocation5 + $0x78] sm:$0xf] %vm7458_vm13, %v7423_v0  ;;  %v12714_v31 = vpop.f32.mrf.mxu0 }
 0x733   : > { %v8766_v4 = vadd.f32 %v8734_v9, %v12638_v54  ;;  %8050 = vst.msk [vmem:[#allocation5 + $0x78] sm:$0xf] %vm8019_vm14, %v7984_v58 }
 0x734   : > { %v7986_v22 = vpop.permute.xlu0 %7985 }
 0x735   : > { %v8798_v56 = vmul.f32 0.2, %v8766_v4  ;;  %8051 = vst.msk [vmem:[#allocation5 + $0x7c] sm:$0xf] %vm8019_vm14, %v7986_v22 }
 0x737   : > { %v8830_v57 = vmax.f32 %v8766_v4, %v8798_v56 }
 0x738   : > { %v7970_v24 = vpop.permute.xlu1 %7969 }
 0x739   : > { %8863 = vst.msk [vmem:[%s12459_s28 + $0x78] sm:$0xff] %vm8847_vm0, %v8830_v57 }
 0x73a   : > { %8043 = vst.msk [vmem:[#allocation5 + $0x5c] sm:$0xf] %vm8019_vm14, %v7970_v24  ;;  %v542_v41 = vpop.f32.mrf.mxu0 }
 0x73b   : > { %8380 = vst.msk [vmem:[#allocation5 + $0x5c] sm:$0xf] %vm8356_vm15, %v8307_v15 }
 0x73c   : > { %v8321_v32 = vpop.permute.xlu0 %8320 }
 0x73d   : > { %8387 = vst.msk [vmem:[#allocation5 + $0x78] sm:$0xf] %vm8356_vm15, %v8321_v32 }
 0x740   : > { %v8305_v54 = vpop.permute.xlu1 %8304 }
 0x741   : > { %8379 = vst.msk [vmem:[#allocation5 + $0x58] sm:$0xf] %vm8356_vm15, %v8305_v54 }
 0x742   : > { %v544_v30 = vpop.f32.mrf.mxu0 }
 0x748   : > { %v8323_v46 = vpop.permute.xlu1 %8322  ;;  %v9353_v49 = vld [vmem:[#allocation5 + $0x58] sm:$0xff] }
 0x749   : > { %8388 = vst.msk [vmem:[#allocation5 + $0x7c] sm:$0xf] %vm8356_vm15, %v8323_v46  ;;  %9299 = vmatmul.msk.bf16.gmra.mxu2 %vm8537_vm3, %v9353_v49 }
 0x74c   : > { %v8639_v10 = vpop.f32.mrf.mxu2 }
 0x74d   : > { %v8699_v3 = vmul.f32 %v12423_v7, %v8639_v10 }
 0x74f   : > { %v8735_v59 = vadd.f32 %v12430_v62, %v8699_v3 }
 0x750   : > { %v9357_v37 = vld [vmem:[#allocation5 + $0x78] sm:$0xff] }
 0x751   : > { %v8767_v23 = vadd.f32 %v8735_v59, %v12647_v34  ;;  %9303 = vmatmul.msk.bf16.gmra.mxu3 %vm8537_vm3, %v9357_v37 }
 0x753   : > { %v8799_v60 = vmul.f32 0.2, %v8767_v23 }
 0x754   : > { %v8641_v13 = vpop.f32.mrf.mxu2  ;;  %v8659_v6 = vpop.f32.mrf.mxu3 }
 0x755   : > { %v8831_v63 = vmax.f32 %v8767_v23, %v8799_v60  ;;  %v8700_v43 = vmul.f32 %v12423_v7, %v8641_v13  ;;  %v8707_v5 = vmul.f32 %v12423_v7, %v8659_v6 }
 0x757   : > { %8864 = vst.msk [vmem:[%s12459_s28 + $0x80] sm:$0xff] %vm8847_vm0, %v8831_v63  ;;  %v8736_v48 = vadd.f32 %v12430_v62, %v8700_v43  ;;  %v8743_v18 = vadd.f32 %v12430_v62, %v8707_v5 }
 0x759   : > { %v8768_v34 = vadd.f32 %v8736_v48, %v12658_v55  ;;  %v8775_v44 = vadd.f32 %v8743_v18, %v542_v41 }
 0x75b   : > { %v8800_v12 = vmul.f32 0.2, %v8768_v34  ;;  %v8807_v50 = vmul.f32 0.2, %v8775_v44 }
 0x75c   : > { %v8661_v52 = vpop.f32.mrf.mxu3 }
 0x75d   : > { %v8832_v16 = vmax.f32 %v8768_v34, %v8800_v12  ;;  %v8839_v25 = vmax.f32 %v8775_v44, %v8807_v50  ;;  %v8708_v29 = vmul.f32 %v12423_v7, %v8661_v52 }
 0x75f   : > { %8865 = vst.msk [vmem:[%s12459_s28 + $0x88] sm:$0xff] %vm8847_vm0, %v8832_v16  ;;  %v8744_v14 = vadd.f32 %v12430_v62, %v8708_v29 }
 0x760   : > { %8872 = vst.msk [vmem:[%s12459_s28 + $0xc0] sm:$0xff] %vm8847_vm0, %v8839_v25 }
 0x761   : > { %v8776_v61 = vadd.f32 %v8744_v14, %v544_v30 }
 0x763   : > { %v8808_v42 = vmul.f32 0.2, %v8776_v61 }
 0x765   : > { %v8840_v27 = vmax.f32 %v8776_v61, %v8808_v42 }
 0x767   : > { %8873 = vst.msk [vmem:[%s12459_s28 + $0xc8] sm:$0xff] %vm8847_vm0, %v8840_v27 }
 0x770   : > { %v8644_v55 = vpop.f32.mrf.mxu2 }
 0x771   : > { %v8701_v17 = vmul.f32 %v12423_v7, %v8644_v55  ;;  %v9401_v55 = vld [vmem:[%s12804_s7] ss:$0 sm:$0xff] }
 0x773   : > { %v8737_v38 = vadd.f32 %v12430_v62, %v8701_v17 }
 0x775   : > { %v8769_v35 = vadd.f32 %v8737_v38, %v12668_v21 }
 0x777   : > { %v8801_v51 = vmul.f32 0.2, %v8769_v35 }
 0x778   : > { %v8646_v19 = vpop.f32.mrf.mxu2 }
 0x779   : > { %v8833_v11 = vmax.f32 %v8769_v35, %v8801_v51  ;;  %v8702_v8 = vmul.f32 %v12423_v7, %v8646_v19 }
 0x77b   : > { %8866 = vst.msk [vmem:[%s12459_s28 + $0x90] sm:$0xff] %vm8847_vm0, %v8833_v11  ;;  %v8738_v36 = vadd.f32 %v12430_v62, %v8702_v8 }
 0x77d   : > { %v8770_v53 = vadd.f32 %v8738_v36, %v12681_v2  ;;  %v8664_v58 = vpop.f32.mrf.mxu3 }
 0x77e   : > { %v8709_v0 = vmul.f32 %v12423_v7, %v8664_v58 }
 0x77f   : > { %v8802_v9 = vmul.f32 0.2, %v8770_v53 }
 0x780   : > { %v8745_v4 = vadd.f32 %v12430_v62, %v8709_v0 }
 0x781   : > { %v8834_v21 = vmax.f32 %v8770_v53, %v8802_v9 }
 0x782   : > { %v8777_v22 = vadd.f32 %v8745_v4, %v11319_v20 }
 0x783   : > { %8867 = vst.msk [vmem:[%s12459_s28 + $0x98] sm:$0xff] %vm8847_vm0, %v8834_v21 }
 0x784   : > { %v8809_v56 = vmul.f32 0.2, %v8777_v22 }
 0x785   : > { %v8666_v57 = vpop.f32.mrf.mxu3 }
 0x786   : > { %v8841_v24 = vmax.f32 %v8777_v22, %v8809_v56  ;;  %v8710_v15 = vmul.f32 %v12423_v7, %v8666_v57 }
 0x788   : > { %8874 = vst.msk [vmem:[%s12459_s28 + $0xd0] sm:$0xff] %vm8847_vm0, %v8841_v24  ;;  %v8746_v2 = vadd.f32 %v12430_v62, %v8710_v15 }
 0x78a   : > { %v8778_v32 = vadd.f32 %v8746_v2, %v11337_v28 }
 0x78c   : > { %v8810_v54 = vmul.f32 0.2, %v8778_v32 }
 0x78e   : > { %v8842_v46 = vmax.f32 %v8778_v32, %v8810_v54 }
 0x790   : > { %8875 = vst.msk [vmem:[%s12459_s28 + $0xd8] sm:$0xff] %vm8847_vm0, %v8842_v46 }
 0x7a0   : > { %v8669_v49 = vpop.f32.mrf.mxu3 }
 0x7a1   : > { %v8711_v20 = vmul.f32 %v12423_v7, %v8669_v49 }
 0x7a3   : > { %v8747_v10 = vadd.f32 %v12430_v62, %v8711_v20 }
 0x7a4   : > { %v8649_v3 = vpop.f32.mrf.mxu2 }
 0x7a5   : > { %v8779_v59 = vadd.f32 %v8747_v10, %v11346_v33  ;;  %v8703_v37 = vmul.f32 %v12423_v7, %v8649_v3 }
 0x7a7   : > { %v8811_v23 = vmul.f32 0.2, %v8779_v59  ;;  %v8739_v60 = vadd.f32 %v12430_v62, %v8703_v37 }
 0x7a8   : > { %v8671_v28 = vpop.f32.mrf.mxu3 }
 0x7a9   : > { %v8843_v13 = vmax.f32 %v8779_v59, %v8811_v23  ;;  %v8771_v63 = vadd.f32 %v8739_v60, %v12692_v45  ;;  %v8712_v43 = vmul.f32 %v12423_v7, %v8671_v28 }
 0x7ab   : > { %8876 = vst.msk [vmem:[%s12459_s28 + $0xe0] sm:$0xff] %vm8847_vm0, %v8843_v13  ;;  %v8803_v6 = vmul.f32 0.2, %v8771_v63  ;;  %v8748_v41 = vadd.f32 %v12430_v62, %v8712_v43 }
 0x7ac   : > { %v8651_v5 = vpop.f32.mrf.mxu2 }
 0x7ad   : > { %v8835_v33 = vmax.f32 %v8771_v63, %v8803_v6  ;;  %v8780_v48 = vadd.f32 %v8748_v41, %v11364_v39  ;;  %v8704_v18 = vmul.f32 %v12423_v7, %v8651_v5  ;;  %v9400_v39 = vld [vmem:[%s12803_s6] ss:$0 sm:$0xff] }
 0x7af   : > { %8868 = vst.msk [vmem:[%s12459_s28 + $0xa0] sm:$0xff] %vm8847_vm0, %v8835_v33  ;;  %v8812_v34 = vmul.f32 0.2, %v8780_v48  ;;  %v8740_v44 = vadd.f32 %v12430_v62, %v8704_v18 }
 0x7b1   : > { %v8844_v45 = vmax.f32 %v8780_v48, %v8812_v34  ;;  %v8772_v12 = vadd.f32 %v8740_v44, %v12702_v47 }
 0x7b3   : > { %8877 = vst.msk [vmem:[%s12459_s28 + $0xe8] sm:$0xff] %vm8847_vm0, %v8844_v45  ;;  %v8804_v50 = vmul.f32 0.2, %v8772_v12 }
 0x7b5   : > { %v8836_v16 = vmax.f32 %v8772_v12, %v8804_v50 }
 0x7b7   : > { %8869 = vst.msk [vmem:[%s12459_s28 + $0xa8] sm:$0xff] %vm8847_vm0, %v8836_v16 }
 0x7cc   : > { %v8654_v52 = vpop.f32.mrf.mxu2 }
 0x7cd   : > { %v8705_v7 = vmul.f32 %v9400_v39, %v8654_v52 }
 0x7cf   : > { %v8741_v25 = vadd.f32 %v12430_v62, %v8705_v7 }
 0x7d1   : > { %v8773_v29 = vadd.f32 %v8741_v25, %v12710_v40 }
 0x7d3   : > { %v8805_v30 = vmul.f32 0.2, %v8773_v29 }
 0x7d4   : > { %v8656_v14 = vpop.f32.mrf.mxu2  ;;  %v8674_v47 = vpop.f32.mrf.mxu3 }
 0x7d5   : > { %v8837_v61 = vmax.f32 %v8773_v29, %v8805_v30  ;;  %v8706_v42 = vmul.f32 %v9400_v39, %v8656_v14  ;;  %v8713_v27 = vmul.f32 %v9400_v39, %v8674_v47 }
 0x7d7   : > { %8870 = vst.msk [vmem:[%s12459_s28 + $0xb0] sm:$0xff] %vm8847_vm0, %v8837_v61  ;;  %v8742_v17 = vadd.f32 %v9401_v55, %v8706_v42  ;;  %v8749_v38 = vadd.f32 %v9401_v55, %v8713_v27 }
 0x7d9   : > { %v8774_v62 = vadd.f32 %v8742_v17, %v12714_v31  ;;  %v8781_v40 = vadd.f32 %v8749_v38, %v11373_v1 }
 0x7db   : > { %v8806_v35 = vmul.f32 0.2, %v8774_v62  ;;  %v8813_v51 = vmul.f32 0.2, %v8781_v40 }
 0x7dc   : > { %v8676_v19 = vpop.f32.mrf.mxu3 }
 0x7dd   : > { %v8838_v11 = vmax.f32 %v8774_v62, %v8806_v35  ;;  %v8845_v8 = vmax.f32 %v8781_v40, %v8813_v51  ;;  %v8714_v36 = vmul.f32 %v9400_v39, %v8676_v19 }
 0x7df   : > { %8871 = vst.msk [vmem:[%s12459_s28 + $0xb8] sm:$0xff] %vm8847_vm0, %v8838_v11  ;;  %v8750_v53 = vadd.f32 %v9401_v55, %v8714_v36 }
 0x7e0   : > { %8878 = vst.msk [vmem:[%s12459_s28 + $0xf0] sm:$0xff] %vm8847_vm0, %v8845_v8 }
 0x7e1   : > { %v8782_v58 = vadd.f32 %v8750_v53, %v11392_v26 }
 0x7e3   : > { %v8814_v0 = vmul.f32 0.2, %v8782_v58 }
 0x7e5   : > { %v8846_v9 = vmax.f32 %v8782_v58, %v8814_v0 }
 0x7e7   : > { %8879 = vst.msk [vmem:[%s12459_s28 + $0xf8] sm:$0xff] %vm8847_vm0, %v8846_v9 }
 0x7e8 PF: > { %s18_s27 = sadd.s32 1, %s9408_s27  }
 0x7e9   : > { %p15_p4 = scmp.ge.s32.totalorder %s18_s27, 4  }
 0x7eb   :  { %17 = sbr.rel (!%p15_p4) target bundleno = 1 (0x1), region = 88 }

</bundles_post_ra>
